<compile_context>
chip_gen: v5e
topology: v5e:2x2
jax: 0.10.0
libtpu: 0.0.40
codegen_flags: <defaults>
</compile_context>

<pallas_src>
import functools

import jax
import jax.numpy as jnp
from jax.experimental import pallas as pl
from jax.experimental.pallas import tpu as pltpu


# ---------------------------------------------------------------------------
# Small helpers
# ---------------------------------------------------------------------------
def _round_up(x, m):
    return (x + m - 1) // m * m


def _choose_tk(K, cap=2048):
    """Largest K tile <= cap that divides K (K itself if already small)."""
    if K <= cap:
        return K
    for t in (2048, 1024, 512, 256, 128):
        if K % t == 0:
            return t
    return K


@functools.lru_cache(maxsize=1)
def _vmem_limit_bytes():
    """3/4 of physical VMEM, capped at 96 MiB; None if query unavailable."""
    try:
        cap = int(pltpu.get_tpu_info().vmem_capacity_bytes)
        return min((cap * 3) // 4, 96 * 1024 * 1024)
    except Exception:
        return None


def _compiler_params(dimension_semantics):
    kwargs = dict(dimension_semantics=dimension_semantics)
    limit = _vmem_limit_bytes()
    if limit is not None:
        kwargs["vmem_limit_bytes"] = limit
    return pltpu.CompilerParams(**kwargs)


# ---------------------------------------------------------------------------
# Kernel 1: row-tiled conv-as-matmul (+bias, optional LeakyReLU).  No IN.
#   grid = (row_tiles, k_tiles); f32 accumulator scratch across k.
# ---------------------------------------------------------------------------
def _make_rows_kernel(use_lrelu, slope=0.2):
    def kernel(p_ref, w_ref, b_ref, o_ref, acc_ref):
        kk = pl.program_id(1)

        @pl.when(kk == 0)
        def _init():
            acc_ref[...] = jnp.zeros_like(acc_ref)

        acc_ref[...] += jnp.dot(p_ref[...], w_ref[...],
                                preferred_element_type=jnp.float32)

        @pl.when(kk == pl.num_programs(1) - 1)
        def _epilogue():
            acc = acc_ref[...] + b_ref[...]
            if use_lrelu:
                acc = jnp.where(acc > 0, acc, slope * acc)
            o_ref[...] = acc.astype(o_ref.dtype)

    return kernel


def conv_rows_block(rows, wmat, bias, *, use_lrelu, out_dtype, tm_max=512):
    """rows: (R, K) bf16; wmat: (K, Cp) bf16; bias: (1, Cp) f32 -> (R_pad, Cp)."""
    R, K = rows.shape
    Cp = wmat.shape[1]
    tm = min(tm_max, _round_up(R, 8))
    R_pad = _round_up(R, tm)
    if R_pad != R:
        rows = jnp.pad(rows, ((0, R_pad - R), (0, 0)))
    tk = _choose_tk(K)
    grid = (R_pad // tm, K // tk)

    return pl.pallas_call(
        _make_rows_kernel(use_lrelu),
        out_shape=jax.ShapeDtypeStruct((R_pad, Cp), out_dtype),
        grid=grid,
        in_specs=[
            pl.BlockSpec((tm, tk), lambda r, k: (r, k)),
            pl.BlockSpec((tk, Cp), lambda r, k: (k, 0)),
            pl.BlockSpec((1, Cp), lambda r, k: (0, 0)),
        ],
        out_specs=pl.BlockSpec((tm, Cp), lambda r, k: (r, 0)),
        scratch_shapes=[pltpu.VMEM((tm, Cp), jnp.float32)],
        compiler_params=_compiler_params(("parallel", "arbitrary")),
    )(rows, wmat, bias)


# ---------------------------------------------------------------------------
# Kernel 2: per-batch-element conv + bias + InstanceNorm + LeakyReLU (fused).
#   grid = (N, k_tiles); stats over the full spatial extent, one pass
#   (sum + sum-of-squares), rsqrt on the EUP.
# ---------------------------------------------------------------------------
def _make_in_kernel(eps=1e-5, slope=0.2):
    def kernel(p_ref, w_ref, b_ref, g_ref, bt_ref, o_ref, acc_ref):
        kk = pl.program_id(1)

        @pl.when(kk == 0)
        def _init():
            acc_ref[...] = jnp.zeros_like(acc_ref)

        acc_ref[...] += jnp.dot(p_ref[0], w_ref[...],
                                preferred_element_type=jnp.float32)

        @pl.when(kk == pl.num_programs(1) - 1)
        def _epilogue():
            acc = acc_ref[...] + b_ref[...]              # (M, Cp) f32
            inv_m = 1.0 / acc.shape[0]
            s1 = jnp.sum(acc, axis=0, keepdims=True)
            s2 = jnp.sum(acc * acc, axis=0, keepdims=True)
            mean = s1 * inv_m
            var = jnp.maximum(s2 * inv_m - mean * mean, 0.0)
            y = (acc - mean) * jax.lax.rsqrt(var + eps)
            y = y * g_ref[...] + bt_ref[...]
            y = jnp.where(y > 0, y, slope * y)
            o_ref[0] = y.astype(o_ref.dtype)

    return kernel


def conv_in_block(patches, wmat, bias, gamma, beta, *, out_dtype):
    """patches: (N, M, K) bf16; wmat: (K, Cp) bf16 -> (N, M, Cp)."""
    N, M, K = patches.shape
    Cp = wmat.shape[1]
    tk = _choose_tk(K)
    grid = (N, K // tk)

    return pl.pallas_call(
        _make_in_kernel(),
        out_shape=jax.ShapeDtypeStruct((N, M, Cp), out_dtype),
        grid=grid,
        in_specs=[
            pl.BlockSpec((1, M, tk), lambda n, k: (n, 0, k)),
            pl.BlockSpec((tk, Cp), lambda n, k: (k, 0)),
            pl.BlockSpec((1, Cp), lambda n, k: (0, 0)),
            pl.BlockSpec((1, Cp), lambda n, k: (0, 0)),
            pl.BlockSpec((1, Cp), lambda n, k: (0, 0)),
        ],
        out_specs=pl.BlockSpec((1, M, Cp), lambda n, k: (n, 0, 0)),
        scratch_shapes=[pltpu.VMEM((M, Cp), jnp.float32)],
        compiler_params=_compiler_params(("parallel", "arbitrary")),
    )(patches, wmat, bias, gamma, beta)


# ---------------------------------------------------------------------------
# Glue: NHWC im2col, spectral norm, parameter construction
# ---------------------------------------------------------------------------
def im2col_nhwc(x, cin, k, stride, pad):
    """x: (N, H, W, C>=cin) -> patches (N, Ho*Wo, k*k*cin), Ho, Wo.

    Only the first `cin` channels are used (drops zero-padded lane columns
    produced by the previous layer for free).
    """
    N, H, W, C = x.shape
    if C != cin:
        x = x[..., :cin]
    xp = jnp.pad(x, ((0, 0), (pad, pad), (pad, pad), (0, 0)))
    Ho = (H + 2 * pad - k) // stride + 1
    Wo = (W + 2 * pad - k) // stride + 1
    cols = []
    for i in range(k):
        for j in range(k):
            cols.append(xp[:, i:i + stride * Ho:stride,
                           j:j + stride * Wo:stride, :])     # (N, Ho, Wo, cin)
    p = jnp.concatenate(cols, axis=-1)                        # (N, Ho, Wo, k*k*cin)
    return p.reshape(N, Ho * Wo, k * k * cin), Ho, Wo


def spectral_normalize(w, n_iter=30):
    """Divide conv weight (Cout, Cin, k, k) by its spectral norm (power iter)."""
    wm = w.reshape(w.shape[0], -1)
    u = jnp.ones((wm.shape[0],), jnp.float32) / jnp.sqrt(float(wm.shape[0]))
    v = None
    for _ in range(n_iter):
        v = wm.T @ u
        v = v / (jnp.linalg.norm(v) + 1e-12)
        u = wm @ v
        u = u / (jnp.linalg.norm(u) + 1e-12)
    sigma = u @ (wm @ v)
    return w / sigma


# (kernel, stride, pad, use_instance_norm, use_leaky_relu, spectral_norm)
_LAYER_CFG = [
    (4, 2, 1, False, True,  True),   # 3   -> 64
    (4, 2, 1, True,  True,  True),   # 64  -> 128
    (4, 2, 1, True,  True,  True),   # 128 -> 256
    (4, 2, 1, True,  True,  True),   # 256 -> 512
    (4, 1, 1, False, False, False),  # 512 -> 1   (plain conv, no SN)
]
_CHANNELS = [3, 64, 128, 256, 512, 1]


def init_params(key):
    params = []
    for li, (k, s, p, use_in, use_lrelu, use_sn) in enumerate(_LAYER_CFG):
        cin, cout = _CHANNELS[li], _CHANNELS[li + 1]
        key, kw, kb = jax.random.split(key, 3)
        w = jax.random.normal(kw, (cout, cin, k, k), jnp.float32) * 0.05
        b = jax.random.normal(kb, (cout,), jnp.float32) * 0.01
        if use_sn:
            w = spectral_normalize(w)
        gamma = jnp.ones((cout,), jnp.float32)   # InstanceNorm affine init
        beta = jnp.zeros((cout,), jnp.float32)
        params.append((w, b, gamma, beta))
    return params


# ---------------------------------------------------------------------------
# Full forward pass (Pallas) and a pure-JAX reference (same bf16 casting)
# ---------------------------------------------------------------------------
@jax.jit
def discriminator_forward_pallas(x, params):
    """x: (N, C, H, W) f32 -> (N, 1, Hf, Wf) f32 (PatchGAN logit map)."""
    N = x.shape[0]
    n_layers = len(_LAYER_CFG)
    # One NCHW -> NHWC transpose of the input; channels-last from here on.
    h = jnp.transpose(x, (0, 2, 3, 1)).astype(jnp.bfloat16)

    for li, ((w, b, gamma, beta), (k, s, p, use_in, use_lrelu, _)) in enumerate(
            zip(params, _LAYER_CFG)):
        last = li == n_layers - 1
        cout, cin = w.shape[0], w.shape[1]
        cp = _round_up(cout, 128)                       # lane-dense output width

        patches, Ho, Wo = im2col_nhwc(h, cin, k, s, p)  # (N, M, k*k*cin) bf16
        K = patches.shape[-1]

        # Weight rows ordered (ki, kj, c) to match the patch layout; pad Cout.
        wmat = jnp.transpose(w, (2, 3, 1, 0)).reshape(K, cout).astype(jnp.bfloat16)
        wmat = jnp.pad(wmat, ((0, 0), (0, cp - cout)))
        bvec = jnp.pad(b, (0, cp - cout)).reshape(1, cp).astype(jnp.float32)

        out_dtype = jnp.float32 if last else jnp.bfloat16

        if use_in:
            gvec = jnp.pad(gamma, (0, cp - cout),
                           constant_values=1.0).reshape(1, cp).astype(jnp.float32)
            btvec = jnp.pad(beta, (0, cp - cout)).reshape(1, cp).astype(jnp.float32)
            out = conv_in_block(patches, wmat, bvec, gvec, btvec,
                                out_dtype=out_dtype)            # (N, M, cp)
            h = out.reshape(N, Ho, Wo, cp)
        else:
            M = patches.shape[1]
            rows = patches.reshape(N * M, K)
            out = conv_rows_block(rows, wmat, bvec,
                                  use_lrelu=use_lrelu,
                                  out_dtype=out_dtype)          # (R_pad, cp)
            h = out[: N * M].reshape(N, Ho, Wo, cp)

    # Final layer has cout=1 (padded to 128): keep channel 0, back to NCHW.
    out = h[..., :1]
    return jnp.transpose(out, (0, 3, 1, 2))


@jax.jit
def discriminator_forward_ref(x, params):
    """Pure-JAX reference mirroring the kernel's bf16 conv-input casting."""
    n_layers = len(_LAYER_CFG)
    h = x.astype(jnp.bfloat16)
    for li, ((w, b, gamma, beta), (k, s, p, use_in, use_lrelu, _)) in enumerate(
            zip(params, _LAYER_CFG)):
        y = jax.lax.conv_general_dilated(
            h, w.astype(jnp.bfloat16),
            window_strides=(s, s), padding=((p, p), (p, p)),
            dimension_numbers=("NCHW", "OIHW", "NCHW"),
            preferred_element_type=jnp.float32)
        y = y + b.reshape(1, -1, 1, 1)
        if use_in:
            mean = jnp.mean(y, axis=(2, 3), keepdims=True)
            var = jnp.mean((y - mean) ** 2, axis=(2, 3), keepdims=True)
            y = (y - mean) * jax.lax.rsqrt(var + 1e-5)
            y = y * gamma.reshape(1, -1, 1, 1) + beta.reshape(1, -1, 1, 1)
        if use_lrelu:
            y = jnp.where(y > 0, y, 0.2 * y)
        h = y if li == n_layers - 1 else y.astype(jnp.bfloat16)
    return h


if __name__ == "__main__":
    key = jax.random.PRNGKey(0)
    key, kx = jax.random.split(key)
    # Small input consistent with the module: NCHW, in_ch=3.
    # Spatial 32 so the final 4x4/s1/p1 conv produces a 1x1 patch map.
    x = jax.random.normal(kx, (2, 3, 32, 32), jnp.float32)

    params = init_params(key)

    out = jax.block_until_ready(discriminator_forward_pallas(x, params))
    assert out.shape == (2, 1, 1, 1), out.shape

    ref = jax.block_until_ready(discriminator_forward_ref(x, params))
    max_diff = float(jnp.max(jnp.abs(out - ref)))
    assert jnp.allclose(out, ref, rtol=3e-2, atol=3e-2), (
        "max abs diff %e" % max_diff)

    print("KERNEL_OK")
</pallas_src>

<mosaic_0001>
module attributes {stable_mosaic.version = 11 : i64} {
  func.func @kernel(%arg0: i32, %arg1: i32, %arg2: memref<512x48xbf16, #tpu.memory_space<vmem>>, %arg3: memref<48x128xbf16, #tpu.memory_space<vmem>>, %arg4: memref<1x128xf32, #tpu.memory_space<vmem>>, %arg5: memref<512x128xbf16, #tpu.memory_space<vmem>>, %arg6: memref<512x128xf32, #tpu.memory_space<vmem>>) attributes {dimension_semantics = [#tpu.dimension_semantics<parallel>, #tpu.dimension_semantics<arbitrary>], iteration_bounds = array<i64: 1, 1>, scalar_prefetch = 0 : i64, scratch_operands = 1 : i64, tpu.core_type = #tpu.core_type<tc>, window_params = [{transform_indices = @transform_0, window_bounds = array<i64: 512, 48>}, {transform_indices = @transform_1, window_bounds = array<i64: 48, 128>}, {pipeline_mode = #tpu.pipeline_mode<synchronous>, transform_indices = @transform_2, window_bounds = array<i64: 1, 128>}, {transform_indices = @transform_3, window_bounds = array<i64: 512, 128>}]} {
    %c0_i32 = arith.constant 0 : i32
    %0 = arith.cmpi eq, %arg1, %c0_i32 : i32
    %1 = arith.extui %0 : i1 to i32
    %c0_i32_0 = arith.constant 0 : i32
    %2 = arith.cmpi ne, %1, %c0_i32_0 : i32
    scf.if %2 {
      %cst_10 = arith.constant 0.000000e+00 : f32
      %12 = vector.broadcast %cst_10 : f32 to vector<512x128xf32>
      %c0_11 = arith.constant 0 : index
      %c0_12 = arith.constant 0 : index
      %13 = vector.load %arg6[%c0_11, %c0_12] : memref<512x128xf32, #tpu.memory_space<vmem>>, vector<512x128xf32>
      tpu.vector_store %arg6[%c0_11, %c0_12], %12 {strides = array<i32>} : memref<512x128xf32, #tpu.memory_space<vmem>>, vector<512x128xf32>,
    } else {
    }
    %c0 = arith.constant 0 : index
    %c0_1 = arith.constant 0 : index
    %3 = vector.load %arg6[%c0, %c0_1] : memref<512x128xf32, #tpu.memory_space<vmem>>, vector<512x128xf32>
    %c0_2 = arith.constant 0 : index
    %c0_3 = arith.constant 0 : index
    %4 = vector.load %arg2[%c0_2, %c0_3] : memref<512x48xbf16, #tpu.memory_space<vmem>>, vector<512x48xbf16>
    %c0_4 = arith.constant 0 : index
    %c0_5 = arith.constant 0 : index
    %5 = vector.load %arg3[%c0_4, %c0_5] : memref<48x128xbf16, #tpu.memory_space<vmem>>, vector<48x128xbf16>
    %cst = arith.constant dense<0.000000e+00> : vector<512x128xf32>
    %6 = tpu.matmul %4, %5, %cst {dimension_numbers = #tpu.dot_dimension_numbers<[1], [0], [0], [1], [0, 0, 1, 1], [], []>} : vector<512x48xbf16>, vector<48x128xbf16>, vector<512x128xf32> -> vector<512x128xf32>
    %7 = arith.addf %3, %6 : vector<512x128xf32>
    %c0_6 = arith.constant 0 : index
    %c0_7 = arith.constant 0 : index
    %8 = vector.load %arg6[%c0_6, %c0_7] : memref<512x128xf32, #tpu.memory_space<vmem>>, vector<512x128xf32>
    tpu.vector_store %arg6[%c0_6, %c0_7], %7 {strides = array<i32>} : memref<512x128xf32, #tpu.memory_space<vmem>>, vector<512x128xf32>,
    %c0_i32_8 = arith.constant 0 : i32
    %9 = arith.cmpi eq, %arg1, %c0_i32_8 : i32
    %10 = arith.extui %9 : i1 to i32
    %c0_i32_9 = arith.constant 0 : i32
    %11 = arith.cmpi ne, %10, %c0_i32_9 : i32
    scf.if %11 {
      %c0_10 = arith.constant 0 : index
      %c0_11 = arith.constant 0 : index
      %12 = vector.load %arg6[%c0_10, %c0_11] : memref<512x128xf32, #tpu.memory_space<vmem>>, vector<512x128xf32>
      %c0_12 = arith.constant 0 : index
      %c0_13 = arith.constant 0 : index
      %13 = vector.load %arg4[%c0_12, %c0_13] : memref<1x128xf32, #tpu.memory_space<vmem>>, vector<1x128xf32>
      %14 = vector.broadcast %13 : vector<1x128xf32> to vector<512x128xf32>
      %15 = arith.addf %12, %14 : vector<512x128xf32>
      %cst_14 = arith.constant 0.000000e+00 : f32
      %16 = vector.broadcast %cst_14 : f32 to vector<512x128xf32>
      %17 = arith.cmpf ogt, %15, %16 : vector<512x128xf32>
      %cst_15 = arith.constant 2.000000e-01 : f32
      %18 = vector.broadcast %cst_15 : f32 to vector<512x128xf32>
      %19 = arith.mulf %18, %15 : vector<512x128xf32>
      %20 = arith.select %17, %15, %19 : vector<512x128xi1>, vector<512x128xf32>
      %21 = arith.truncf %20 : vector<512x128xf32> to vector<512x128xbf16>
      %c0_16 = arith.constant 0 : index
      %c0_17 = arith.constant 0 : index
      %22 = vector.load %arg5[%c0_16, %c0_17] : memref<512x128xbf16, #tpu.memory_space<vmem>>, vector<512x128xbf16>
      tpu.vector_store %arg5[%c0_16, %c0_17], %21 {strides = array<i32>} : memref<512x128xbf16, #tpu.memory_space<vmem>>, vector<512x128xbf16>,
    } else {
    }
    return
  }
  func.func @transform_0(%arg0: i32, %arg1: i32) -> (i32, i32) {
    %c0_i32 = arith.constant 0 : i32
    return %arg0, %arg1 : i32, i32
  }
  func.func @transform_1(%arg0: i32, %arg1: i32) -> (i32, i32) {
    %c0_i32 = arith.constant 0 : i32
    %c0_i32_0 = arith.constant 0 : i32
    return %arg1, %c0_i32 : i32, i32
  }
  func.func @transform_2(%arg0: i32, %arg1: i32) -> (i32, i32) {
    %c0_i32 = arith.constant 0 : i32
    %c0_i32_0 = arith.constant 0 : i32
    %c0_i32_1 = arith.constant 0 : i32
    return %c0_i32, %c0_i32_0 : i32, i32
  }
  func.func @transform_3(%arg0: i32, %arg1: i32) -> (i32, i32) {
    %c0_i32 = arith.constant 0 : i32
    %c0_i32_0 = arith.constant 0 : i32
    return %arg0, %c0_i32 : i32, i32
  }
}

module attributes {stable_mosaic.version = 11 : i64} {
  func.func @kernel(%arg0: i32, %arg1: i32, %arg2: memref<1x64x1024xbf16, #tpu.memory_space<vmem>>, %arg3: memref<1024x128xbf16, #tpu.memory_space<vmem>>, %arg4: memref<1x128xf32, #tpu.memory_space<vmem>>, %arg5: memref<1x128xf32, #tpu.memory_space<vmem>>, %arg6: memref<1x128xf32, #tpu.memory_space<vmem>>, %arg7: memref<1x64x128xbf16, #tpu.memory_space<vmem>>, %arg8: memref<64x128xf32, #tpu.memory_space<vmem>>) attributes {dimension_semantics = [#tpu.dimension_semantics<parallel>, #tpu.dimension_semantics<arbitrary>], iteration_bounds = array<i64: 2, 1>, scalar_prefetch = 0 : i64, scratch_operands = 1 : i64, tpu.core_type = #tpu.core_type<tc>, window_params = [{transform_indices = @transform_0, window_bounds = array<i64: 1, 64, 1024>}, {transform_indices = @transform_1, window_bounds = array<i64: 1024, 128>}, {pipeline_mode = #tpu.pipeline_mode<synchronous>, transform_indices = @transform_2, window_bounds = array<i64: 1, 128>}, {pipeline_mode = #tpu.pipeline_mode<synchronous>, transform_indices = @transform_3, window_bounds = array<i64: 1, 128>}, {pipeline_mode = #tpu.pipeline_mode<synchronous>, transform_indices = @transform_4, window_bounds = array<i64: 1, 128>}, {transform_indices = @transform_5, window_bounds = array<i64: 1, 64, 128>}]} {
    %c0_i32 = arith.constant 0 : i32
    %0 = arith.cmpi eq, %arg1, %c0_i32 : i32
    %1 = arith.extui %0 : i1 to i32
    %c0_i32_0 = arith.constant 0 : i32
    %2 = arith.cmpi ne, %1, %c0_i32_0 : i32
    scf.if %2 {
      %cst_11 = arith.constant 0.000000e+00 : f32
      %13 = vector.broadcast %cst_11 : f32 to vector<64x128xf32>
      %c0_12 = arith.constant 0 : index
      %c0_13 = arith.constant 0 : index
      %14 = vector.load %arg8[%c0_12, %c0_13] : memref<64x128xf32, #tpu.memory_space<vmem>>, vector<64x128xf32>
      tpu.vector_store %arg8[%c0_12, %c0_13], %13 {strides = array<i32>} : memref<64x128xf32, #tpu.memory_space<vmem>>, vector<64x128xf32>,
    } else {
    }
    %c0 = arith.constant 0 : index
    %c0_1 = arith.constant 0 : index
    %3 = vector.load %arg8[%c0, %c0_1] : memref<64x128xf32, #tpu.memory_space<vmem>>, vector<64x128xf32>
    %c0_2 = arith.constant 0 : index
    %c0_3 = arith.constant 0 : index
    %c0_4 = arith.constant 0 : index
    %4 = vector.load %arg2[%c0_2, %c0_3, %c0_4] : memref<1x64x1024xbf16, #tpu.memory_space<vmem>>, vector<1x64x1024xbf16>
    %5 = vector.shape_cast %4 : vector<1x64x1024xbf16> to vector<64x1024xbf16>
    %c0_5 = arith.constant 0 : index
    %c0_6 = arith.constant 0 : index
    %6 = vector.load %arg3[%c0_5, %c0_6] : memref<1024x128xbf16, #tpu.memory_space<vmem>>, vector<1024x128xbf16>
    %cst = arith.constant dense<0.000000e+00> : vector<64x128xf32>
    %7 = tpu.matmul %5, %6, %cst {dimension_numbers = #tpu.dot_dimension_numbers<[1], [0], [0], [1], [0, 0, 1, 1], [], []>} : vector<64x1024xbf16>, vector<1024x128xbf16>, vector<64x128xf32> -> vector<64x128xf32>
    %8 = arith.addf %3, %7 : vector<64x128xf32>
    %c0_7 = arith.constant 0 : index
    %c0_8 = arith.constant 0 : index
    %9 = vector.load %arg8[%c0_7, %c0_8] : memref<64x128xf32, #tpu.memory_space<vmem>>, vector<64x128xf32>
    tpu.vector_store %arg8[%c0_7, %c0_8], %8 {strides = array<i32>} : memref<64x128xf32, #tpu.memory_space<vmem>>, vector<64x128xf32>,
    %c0_i32_9 = arith.constant 0 : i32
    %10 = arith.cmpi eq, %arg1, %c0_i32_9 : i32
    %11 = arith.extui %10 : i1 to i32
    %c0_i32_10 = arith.constant 0 : i32
    %12 = arith.cmpi ne, %11, %c0_i32_10 : i32
    scf.if %12 {
      %c0_11 = arith.constant 0 : index
      %c0_12 = arith.constant 0 : index
      %13 = vector.load %arg8[%c0_11, %c0_12] : memref<64x128xf32, #tpu.memory_space<vmem>>, vector<64x128xf32>
      %c0_13 = arith.constant 0 : index
      %c0_14 = arith.constant 0 : index
      %14 = vector.load %arg4[%c0_13, %c0_14] : memref<1x128xf32, #tpu.memory_space<vmem>>, vector<1x128xf32>
      %15 = vector.broadcast %14 : vector<1x128xf32> to vector<64x128xf32>
      %16 = arith.addf %13, %15 : vector<64x128xf32>
      %cst_15 = arith.constant dense<0.000000e+00> : vector<128xf32>
      %17 = vector.multi_reduction <add>, %16, %cst_15 [0] : vector<64x128xf32> to vector<128xf32>
      %18 = vector.shape_cast %17 : vector<128xf32> to vector<1x128xf32>
      %19 = arith.mulf %16, %16 : vector<64x128xf32>
      %cst_16 = arith.constant dense<0.000000e+00> : vector<128xf32>
      %20 = vector.multi_reduction <add>, %19, %cst_16 [0] : vector<64x128xf32> to vector<128xf32>
      %21 = vector.shape_cast %20 : vector<128xf32> to vector<1x128xf32>
      %cst_17 = arith.constant 1.562500e-02 : f32
      %22 = vector.broadcast %cst_17 : f32 to vector<1x128xf32>
      %23 = arith.mulf %18, %22 : vector<1x128xf32>
      %cst_18 = arith.constant 1.562500e-02 : f32
      %24 = vector.broadcast %cst_18 : f32 to vector<1x128xf32>
      %25 = arith.mulf %21, %24 : vector<1x128xf32>
      %26 = arith.mulf %23, %23 : vector<1x128xf32>
      %27 = arith.subf %25, %26 : vector<1x128xf32>
      %cst_19 = arith.constant 0.000000e+00 : f32
      %28 = vector.broadcast %cst_19 : f32 to vector<1x128xf32>
      %29 = arith.maximumf %27, %28 : vector<1x128xf32>
      %30 = vector.broadcast %23 : vector<1x128xf32> to vector<64x128xf32>
      %31 = arith.subf %16, %30 : vector<64x128xf32>
      %cst_20 = arith.constant 9.99999974E-6 : f32
      %32 = vector.broadcast %cst_20 : f32 to vector<1x128xf32>
      %33 = arith.addf %29, %32 : vector<1x128xf32>
      %34 = math.rsqrt %33 : vector<1x128xf32>
      %35 = vector.broadcast %34 : vector<1x128xf32> to vector<64x128xf32>
      %36 = arith.mulf %31, %35 : vector<64x128xf32>
      %c0_21 = arith.constant 0 : index
      %c0_22 = arith.constant 0 : index
      %37 = vector.load %arg5[%c0_21, %c0_22] : memref<1x128xf32, #tpu.memory_space<vmem>>, vector<1x128xf32>
      %38 = vector.broadcast %37 : vector<1x128xf32> to vector<64x128xf32>
      %39 = arith.mulf %36, %38 : vector<64x128xf32>
      %c0_23 = arith.constant 0 : index
      %c0_24 = arith.constant 0 : index
      %40 = vector.load %arg6[%c0_23, %c0_24] : memref<1x128xf32, #tpu.memory_space<vmem>>, vector<1x128xf32>
      %41 = vector.broadcast %40 : vector<1x128xf32> to vector<64x128xf32>
      %42 = arith.addf %39, %41 : vector<64x128xf32>
      %cst_25 = arith.constant 0.000000e+00 : f32
      %43 = vector.broadcast %cst_25 : f32 to vector<64x128xf32>
      %44 = arith.cmpf ogt, %42, %43 : vector<64x128xf32>
      %cst_26 = arith.constant 2.000000e-01 : f32
      %45 = vector.broadcast %cst_26 : f32 to vector<64x128xf32>
      %46 = arith.mulf %45, %42 : vector<64x128xf32>
      %47 = arith.select %44, %42, %46 : vector<64x128xi1>, vector<64x128xf32>
      %48 = arith.truncf %47 : vector<64x128xf32> to vector<64x128xbf16>
      %c0_27 = arith.constant 0 : index
      %c0_28 = arith.constant 0 : index
      %c0_29 = arith.constant 0 : index
      %49 = vector.load %arg7[%c0_27, %c0_28, %c0_29] : memref<1x64x128xbf16, #tpu.memory_space<vmem>>, vector<1x64x128xbf16>
      %50 = vector.shape_cast %49 : vector<1x64x128xbf16> to vector<64x128xbf16>
      %51 = vector.shape_cast %48 : vector<64x128xbf16> to vector<1x64x128xbf16>
      tpu.vector_store %arg7[%c0_27, %c0_28, %c0_29], %51 {strides = array<i32>} : memref<1x64x128xbf16, #tpu.memory_space<vmem>>, vector<1x64x128xbf16>,
    } else {
    }
    return
  }
  func.func @transform_0(%arg0: i32, %arg1: i32) -> (i32, i32, i32) {
    %c0_i32 = arith.constant 0 : i32
    %c0_i32_0 = arith.constant 0 : i32
    return %arg0, %c0_i32, %arg1 : i32, i32, i32
  }
  func.func @transform_1(%arg0: i32, %arg1: i32) -> (i32, i32) {
    %c0_i32 = arith.constant 0 : i32
    %c0_i32_0 = arith.constant 0 : i32
    return %arg1, %c0_i32 : i32, i32
  }
  func.func @transform_2(%arg0: i32, %arg1: i32) -> (i32, i32) {
    %c0_i32 = arith.constant 0 : i32
    %c0_i32_0 = arith.constant 0 : i32
    %c0_i32_1 = arith.constant 0 : i32
    return %c0_i32, %c0_i32_0 : i32, i32
  }
  func.func @transform_3(%arg0: i32, %arg1: i32) -> (i32, i32) {
    %c0_i32 = arith.constant 0 : i32
    %c0_i32_0 = arith.constant 0 : i32
    %c0_i32_1 = arith.constant 0 : i32
    return %c0_i32, %c0_i32_0 : i32, i32
  }
  func.func @transform_4(%arg0: i32, %arg1: i32) -> (i32, i32) {
    %c0_i32 = arith.constant 0 : i32
    %c0_i32_0 = arith.constant 0 : i32
    %c0_i32_1 = arith.constant 0 : i32
    return %c0_i32, %c0_i32_0 : i32, i32
  }
  func.func @transform_5(%arg0: i32, %arg1: i32) -> (i32, i32, i32) {
    %c0_i32 = arith.constant 0 : i32
    %c0_i32_0 = arith.constant 0 : i32
    %c0_i32_1 = arith.constant 0 : i32
    return %arg0, %c0_i32, %c0_i32_0 : i32, i32, i32
  }
}

module attributes {stable_mosaic.version = 11 : i64} {
  func.func @kernel(%arg0: i32, %arg1: i32, %arg2: memref<1x16x2048xbf16, #tpu.memory_space<vmem>>, %arg3: memref<2048x256xbf16, #tpu.memory_space<vmem>>, %arg4: memref<1x256xf32, #tpu.memory_space<vmem>>, %arg5: memref<1x256xf32, #tpu.memory_space<vmem>>, %arg6: memref<1x256xf32, #tpu.memory_space<vmem>>, %arg7: memref<1x16x256xbf16, #tpu.memory_space<vmem>>, %arg8: memref<16x256xf32, #tpu.memory_space<vmem>>) attributes {dimension_semantics = [#tpu.dimension_semantics<parallel>, #tpu.dimension_semantics<arbitrary>], iteration_bounds = array<i64: 2, 1>, scalar_prefetch = 0 : i64, scratch_operands = 1 : i64, tpu.core_type = #tpu.core_type<tc>, window_params = [{transform_indices = @transform_0, window_bounds = array<i64: 1, 16, 2048>}, {transform_indices = @transform_1, window_bounds = array<i64: 2048, 256>}, {pipeline_mode = #tpu.pipeline_mode<synchronous>, transform_indices = @transform_2, window_bounds = array<i64: 1, 256>}, {pipeline_mode = #tpu.pipeline_mode<synchronous>, transform_indices = @transform_3, window_bounds = array<i64: 1, 256>}, {pipeline_mode = #tpu.pipeline_mode<synchronous>, transform_indices = @transform_4, window_bounds = array<i64: 1, 256>}, {transform_indices = @transform_5, window_bounds = array<i64: 1, 16, 256>}]} {
    %c0_i32 = arith.constant 0 : i32
    %0 = arith.cmpi eq, %arg1, %c0_i32 : i32
    %1 = arith.extui %0 : i1 to i32
    %c0_i32_0 = arith.constant 0 : i32
    %2 = arith.cmpi ne, %1, %c0_i32_0 : i32
    scf.if %2 {
      %cst_11 = arith.constant 0.000000e+00 : f32
      %13 = vector.broadcast %cst_11 : f32 to vector<16x256xf32>
      %c0_12 = arith.constant 0 : index
      %c0_13 = arith.constant 0 : index
      %14 = vector.load %arg8[%c0_12, %c0_13] : memref<16x256xf32, #tpu.memory_space<vmem>>, vector<16x256xf32>
      tpu.vector_store %arg8[%c0_12, %c0_13], %13 {strides = array<i32>} : memref<16x256xf32, #tpu.memory_space<vmem>>, vector<16x256xf32>,
    } else {
    }
    %c0 = arith.constant 0 : index
    %c0_1 = arith.constant 0 : index
    %3 = vector.load %arg8[%c0, %c0_1] : memref<16x256xf32, #tpu.memory_space<vmem>>, vector<16x256xf32>
    %c0_2 = arith.constant 0 : index
    %c0_3 = arith.constant 0 : index
    %c0_4 = arith.constant 0 : index
    %4 = vector.load %arg2[%c0_2, %c0_3, %c0_4] : memref<1x16x2048xbf16, #tpu.memory_space<vmem>>, vector<1x16x2048xbf16>
    %5 = vector.shape_cast %4 : vector<1x16x2048xbf16> to vector<16x2048xbf16>
    %c0_5 = arith.constant 0 : index
    %c0_6 = arith.constant 0 : index
    %6 = vector.load %arg3[%c0_5, %c0_6] : memref<2048x256xbf16, #tpu.memory_space<vmem>>, vector<2048x256xbf16>
    %cst = arith.constant dense<0.000000e+00> : vector<16x256xf32>
    %7 = tpu.matmul %5, %6, %cst {dimension_numbers = #tpu.dot_dimension_numbers<[1], [0], [0], [1], [0, 0, 1, 1], [], []>} : vector<16x2048xbf16>, vector<2048x256xbf16>, vector<16x256xf32> -> vector<16x256xf32>
    %8 = arith.addf %3, %7 : vector<16x256xf32>
    %c0_7 = arith.constant 0 : index
    %c0_8 = arith.constant 0 : index
    %9 = vector.load %arg8[%c0_7, %c0_8] : memref<16x256xf32, #tpu.memory_space<vmem>>, vector<16x256xf32>
    tpu.vector_store %arg8[%c0_7, %c0_8], %8 {strides = array<i32>} : memref<16x256xf32, #tpu.memory_space<vmem>>, vector<16x256xf32>,
    %c0_i32_9 = arith.constant 0 : i32
    %10 = arith.cmpi eq, %arg1, %c0_i32_9 : i32
    %11 = arith.extui %10 : i1 to i32
    %c0_i32_10 = arith.constant 0 : i32
    %12 = arith.cmpi ne, %11, %c0_i32_10 : i32
    scf.if %12 {
      %c0_11 = arith.constant 0 : index
      %c0_12 = arith.constant 0 : index
      %13 = vector.load %arg8[%c0_11, %c0_12] : memref<16x256xf32, #tpu.memory_space<vmem>>, vector<16x256xf32>
      %c0_13 = arith.constant 0 : index
      %c0_14 = arith.constant 0 : index
      %14 = vector.load %arg4[%c0_13, %c0_14] : memref<1x256xf32, #tpu.memory_space<vmem>>, vector<1x256xf32>
      %15 = vector.broadcast %14 : vector<1x256xf32> to vector<16x256xf32>
      %16 = arith.addf %13, %15 : vector<16x256xf32>
      %cst_15 = arith.constant dense<0.000000e+00> : vector<256xf32>
      %17 = vector.multi_reduction <add>, %16, %cst_15 [0] : vector<16x256xf32> to vector<256xf32>
      %18 = vector.shape_cast %17 : vector<256xf32> to vector<1x256xf32>
      %19 = arith.mulf %16, %16 : vector<16x256xf32>
      %cst_16 = arith.constant dense<0.000000e+00> : vector<256xf32>
      %20 = vector.multi_reduction <add>, %19, %cst_16 [0] : vector<16x256xf32> to vector<256xf32>
      %21 = vector.shape_cast %20 : vector<256xf32> to vector<1x256xf32>
      %cst_17 = arith.constant 6.250000e-02 : f32
      %22 = vector.broadcast %cst_17 : f32 to vector<1x256xf32>
      %23 = arith.mulf %18, %22 : vector<1x256xf32>
      %cst_18 = arith.constant 6.250000e-02 : f32
      %24 = vector.broadcast %cst_18 : f32 to vector<1x256xf32>
      %25 = arith.mulf %21, %24 : vector<1x256xf32>
      %26 = arith.mulf %23, %23 : vector<1x256xf32>
      %27 = arith.subf %25, %26 : vector<1x256xf32>
      %cst_19 = arith.constant 0.000000e+00 : f32
      %28 = vector.broadcast %cst_19 : f32 to vector<1x256xf32>
      %29 = arith.maximumf %27, %28 : vector<1x256xf32>
      %30 = vector.broadcast %23 : vector<1x256xf32> to vector<16x256xf32>
      %31 = arith.subf %16, %30 : vector<16x256xf32>
      %cst_20 = arith.constant 9.99999974E-6 : f32
      %32 = vector.broadcast %cst_20 : f32 to vector<1x256xf32>
      %33 = arith.addf %29, %32 : vector<1x256xf32>
      %34 = math.rsqrt %33 : vector<1x256xf32>
      %35 = vector.broadcast %34 : vector<1x256xf32> to vector<16x256xf32>
      %36 = arith.mulf %31, %35 : vector<16x256xf32>
      %c0_21 = arith.constant 0 : index
      %c0_22 = arith.constant 0 : index
      %37 = vector.load %arg5[%c0_21, %c0_22] : memref<1x256xf32, #tpu.memory_space<vmem>>, vector<1x256xf32>
      %38 = vector.broadcast %37 : vector<1x256xf32> to vector<16x256xf32>
      %39 = arith.mulf %36, %38 : vector<16x256xf32>
      %c0_23 = arith.constant 0 : index
      %c0_24 = arith.constant 0 : index
      %40 = vector.load %arg6[%c0_23, %c0_24] : memref<1x256xf32, #tpu.memory_space<vmem>>, vector<1x256xf32>
      %41 = vector.broadcast %40 : vector<1x256xf32> to vector<16x256xf32>
      %42 = arith.addf %39, %41 : vector<16x256xf32>
      %cst_25 = arith.constant 0.000000e+00 : f32
      %43 = vector.broadcast %cst_25 : f32 to vector<16x256xf32>
      %44 = arith.cmpf ogt, %42, %43 : vector<16x256xf32>
      %cst_26 = arith.constant 2.000000e-01 : f32
      %45 = vector.broadcast %cst_26 : f32 to vector<16x256xf32>
      %46 = arith.mulf %45, %42 : vector<16x256xf32>
      %47 = arith.select %44, %42, %46 : vector<16x256xi1>, vector<16x256xf32>
      %48 = arith.truncf %47 : vector<16x256xf32> to vector<16x256xbf16>
      %c0_27 = arith.constant 0 : index
      %c0_28 = arith.constant 0 : index
      %c0_29 = arith.constant 0 : index
      %49 = vector.load %arg7[%c0_27, %c0_28, %c0_29] : memref<1x16x256xbf16, #tpu.memory_space<vmem>>, vector<1x16x256xbf16>
      %50 = vector.shape_cast %49 : vector<1x16x256xbf16> to vector<16x256xbf16>
      %51 = vector.shape_cast %48 : vector<16x256xbf16> to vector<1x16x256xbf16>
      tpu.vector_store %arg7[%c0_27, %c0_28, %c0_29], %51 {strides = array<i32>} : memref<1x16x256xbf16, #tpu.memory_space<vmem>>, vector<1x16x256xbf16>,
    } else {
    }
    return
  }
  func.func @transform_0(%arg0: i32, %arg1: i32) -> (i32, i32, i32) {
    %c0_i32 = arith.constant 0 : i32
    %c0_i32_0 = arith.constant 0 : i32
    return %arg0, %c0_i32, %arg1 : i32, i32, i32
  }
  func.func @transform_1(%arg0: i32, %arg1: i32) -> (i32, i32) {
    %c0_i32 = arith.constant 0 : i32
    %c0_i32_0 = arith.constant 0 : i32
    return %arg1, %c0_i32 : i32, i32
  }
  func.func @transform_2(%arg0: i32, %arg1: i32) -> (i32, i32) {
    %c0_i32 = arith.constant 0 : i32
    %c0_i32_0 = arith.constant 0 : i32
    %c0_i32_1 = arith.constant 0 : i32
    return %c0_i32, %c0_i32_0 : i32, i32
  }
  func.func @transform_3(%arg0: i32, %arg1: i32) -> (i32, i32) {
    %c0_i32 = arith.constant 0 : i32
    %c0_i32_0 = arith.constant 0 : i32
    %c0_i32_1 = arith.constant 0 : i32
    return %c0_i32, %c0_i32_0 : i32, i32
  }
  func.func @transform_4(%arg0: i32, %arg1: i32) -> (i32, i32) {
    %c0_i32 = arith.constant 0 : i32
    %c0_i32_0 = arith.constant 0 : i32
    %c0_i32_1 = arith.constant 0 : i32
    return %c0_i32, %c0_i32_0 : i32, i32
  }
  func.func @transform_5(%arg0: i32, %arg1: i32) -> (i32, i32, i32) {
    %c0_i32 = arith.constant 0 : i32
    %c0_i32_0 = arith.constant 0 : i32
    %c0_i32_1 = arith.constant 0 : i32
    return %arg0, %c0_i32, %c0_i32_0 : i32, i32, i32
  }
}

module attributes {stable_mosaic.version = 11 : i64} {
  func.func @kernel(%arg0: i32, %arg1: i32, %arg2: memref<1x4x2048xbf16, #tpu.memory_space<vmem>>, %arg3: memref<2048x512xbf16, #tpu.memory_space<vmem>>, %arg4: memref<1x512xf32, #tpu.memory_space<vmem>>, %arg5: memref<1x512xf32, #tpu.memory_space<vmem>>, %arg6: memref<1x512xf32, #tpu.memory_space<vmem>>, %arg7: memref<1x4x512xbf16, #tpu.memory_space<vmem>>, %arg8: memref<4x512xf32, #tpu.memory_space<vmem>>) attributes {dimension_semantics = [#tpu.dimension_semantics<parallel>, #tpu.dimension_semantics<arbitrary>], iteration_bounds = array<i64: 2, 2>, scalar_prefetch = 0 : i64, scratch_operands = 1 : i64, tpu.core_type = #tpu.core_type<tc>, window_params = [{transform_indices = @transform_0, window_bounds = array<i64: 1, 4, 2048>}, {transform_indices = @transform_1, window_bounds = array<i64: 2048, 512>}, {pipeline_mode = #tpu.pipeline_mode<synchronous>, transform_indices = @transform_2, window_bounds = array<i64: 1, 512>}, {pipeline_mode = #tpu.pipeline_mode<synchronous>, transform_indices = @transform_3, window_bounds = array<i64: 1, 512>}, {pipeline_mode = #tpu.pipeline_mode<synchronous>, transform_indices = @transform_4, window_bounds = array<i64: 1, 512>}, {transform_indices = @transform_5, window_bounds = array<i64: 1, 4, 512>}]} {
    %c0_i32 = arith.constant 0 : i32
    %0 = arith.cmpi eq, %arg1, %c0_i32 : i32
    %1 = arith.extui %0 : i1 to i32
    %c0_i32_0 = arith.constant 0 : i32
    %2 = arith.cmpi ne, %1, %c0_i32_0 : i32
    scf.if %2 {
      %cst_10 = arith.constant 0.000000e+00 : f32
      %13 = vector.broadcast %cst_10 : f32 to vector<4x512xf32>
      %c0_11 = arith.constant 0 : index
      %c0_12 = arith.constant 0 : index
      %14 = vector.load %arg8[%c0_11, %c0_12] : memref<4x512xf32, #tpu.memory_space<vmem>>, vector<4x512xf32>
      tpu.vector_store %arg8[%c0_11, %c0_12], %13 {strides = array<i32>} : memref<4x512xf32, #tpu.memory_space<vmem>>, vector<4x512xf32>,
    } else {
    }
    %c0 = arith.constant 0 : index
    %c0_1 = arith.constant 0 : index
    %3 = vector.load %arg8[%c0, %c0_1] : memref<4x512xf32, #tpu.memory_space<vmem>>, vector<4x512xf32>
    %c0_2 = arith.constant 0 : index
    %c0_3 = arith.constant 0 : index
    %c0_4 = arith.constant 0 : index
    %4 = vector.load %arg2[%c0_2, %c0_3, %c0_4] : memref<1x4x2048xbf16, #tpu.memory_space<vmem>>, vector<1x4x2048xbf16>
    %5 = vector.shape_cast %4 : vector<1x4x2048xbf16> to vector<4x2048xbf16>
    %c0_5 = arith.constant 0 : index
    %c0_6 = arith.constant 0 : index
    %6 = vector.load %arg3[%c0_5, %c0_6] : memref<2048x512xbf16, #tpu.memory_space<vmem>>, vector<2048x512xbf16>
    %cst = arith.constant dense<0.000000e+00> : vector<4x512xf32>
    %7 = tpu.matmul %5, %6, %cst {dimension_numbers = #tpu.dot_dimension_numbers<[1], [0], [0], [1], [0, 0, 1, 1], [], []>} : vector<4x2048xbf16>, vector<2048x512xbf16>, vector<4x512xf32> -> vector<4x512xf32>
    %8 = arith.addf %3, %7 : vector<4x512xf32>
    %c0_7 = arith.constant 0 : index
    %c0_8 = arith.constant 0 : index
    %9 = vector.load %arg8[%c0_7, %c0_8] : memref<4x512xf32, #tpu.memory_space<vmem>>, vector<4x512xf32>
    tpu.vector_store %arg8[%c0_7, %c0_8], %8 {strides = array<i32>} : memref<4x512xf32, #tpu.memory_space<vmem>>, vector<4x512xf32>,
    %c1_i32 = arith.constant 1 : i32
    %10 = arith.cmpi eq, %arg1, %c1_i32 : i32
    %11 = arith.extui %10 : i1 to i32
    %c0_i32_9 = arith.constant 0 : i32
    %12 = arith.cmpi ne, %11, %c0_i32_9 : i32
    scf.if %12 {
      %c0_10 = arith.constant 0 : index
      %c0_11 = arith.constant 0 : index
      %13 = vector.load %arg8[%c0_10, %c0_11] : memref<4x512xf32, #tpu.memory_space<vmem>>, vector<4x512xf32>
      %c0_12 = arith.constant 0 : index
      %c0_13 = arith.constant 0 : index
      %14 = vector.load %arg4[%c0_12, %c0_13] : memref<1x512xf32, #tpu.memory_space<vmem>>, vector<1x512xf32>
      %15 = vector.broadcast %14 : vector<1x512xf32> to vector<4x512xf32>
      %16 = arith.addf %13, %15 : vector<4x512xf32>
      %cst_14 = arith.constant dense<0.000000e+00> : vector<512xf32>
      %17 = vector.multi_reduction <add>, %16, %cst_14 [0] : vector<4x512xf32> to vector<512xf32>
      %18 = vector.shape_cast %17 : vector<512xf32> to vector<1x512xf32>
      %19 = arith.mulf %16, %16 : vector<4x512xf32>
      %cst_15 = arith.constant dense<0.000000e+00> : vector<512xf32>
      %20 = vector.multi_reduction <add>, %19, %cst_15 [0] : vector<4x512xf32> to vector<512xf32>
      %21 = vector.shape_cast %20 : vector<512xf32> to vector<1x512xf32>
      %cst_16 = arith.constant 2.500000e-01 : f32
      %22 = vector.broadcast %cst_16 : f32 to vector<1x512xf32>
      %23 = arith.mulf %18, %22 : vector<1x512xf32>
      %cst_17 = arith.constant 2.500000e-01 : f32
      %24 = vector.broadcast %cst_17 : f32 to vector<1x512xf32>
      %25 = arith.mulf %21, %24 : vector<1x512xf32>
      %26 = arith.mulf %23, %23 : vector<1x512xf32>
      %27 = arith.subf %25, %26 : vector<1x512xf32>
      %cst_18 = arith.constant 0.000000e+00 : f32
      %28 = vector.broadcast %cst_18 : f32 to vector<1x512xf32>
      %29 = arith.maximumf %27, %28 : vector<1x512xf32>
      %30 = vector.broadcast %23 : vector<1x512xf32> to vector<4x512xf32>
      %31 = arith.subf %16, %30 : vector<4x512xf32>
      %cst_19 = arith.constant 9.99999974E-6 : f32
      %32 = vector.broadcast %cst_19 : f32 to vector<1x512xf32>
      %33 = arith.addf %29, %32 : vector<1x512xf32>
      %34 = math.rsqrt %33 : vector<1x512xf32>
      %35 = vector.broadcast %34 : vector<1x512xf32> to vector<4x512xf32>
      %36 = arith.mulf %31, %35 : vector<4x512xf32>
      %c0_20 = arith.constant 0 : index
      %c0_21 = arith.constant 0 : index
      %37 = vector.load %arg5[%c0_20, %c0_21] : memref<1x512xf32, #tpu.memory_space<vmem>>, vector<1x512xf32>
      %38 = vector.broadcast %37 : vector<1x512xf32> to vector<4x512xf32>
      %39 = arith.mulf %36, %38 : vector<4x512xf32>
      %c0_22 = arith.constant 0 : index
      %c0_23 = arith.constant 0 : index
      %40 = vector.load %arg6[%c0_22, %c0_23] : memref<1x512xf32, #tpu.memory_space<vmem>>, vector<1x512xf32>
      %41 = vector.broadcast %40 : vector<1x512xf32> to vector<4x512xf32>
      %42 = arith.addf %39, %41 : vector<4x512xf32>
      %cst_24 = arith.constant 0.000000e+00 : f32
      %43 = vector.broadcast %cst_24 : f32 to vector<4x512xf32>
      %44 = arith.cmpf ogt, %42, %43 : vector<4x512xf32>
      %cst_25 = arith.constant 2.000000e-01 : f32
      %45 = vector.broadcast %cst_25 : f32 to vector<4x512xf32>
      %46 = arith.mulf %45, %42 : vector<4x512xf32>
      %47 = arith.select %44, %42, %46 : vector<4x512xi1>, vector<4x512xf32>
      %48 = arith.truncf %47 : vector<4x512xf32> to vector<4x512xbf16>
      %c0_26 = arith.constant 0 : index
      %c0_27 = arith.constant 0 : index
      %c0_28 = arith.constant 0 : index
      %49 = vector.load %arg7[%c0_26, %c0_27, %c0_28] : memref<1x4x512xbf16, #tpu.memory_space<vmem>>, vector<1x4x512xbf16>
      %50 = vector.shape_cast %49 : vector<1x4x512xbf16> to vector<4x512xbf16>
      %51 = vector.shape_cast %48 : vector<4x512xbf16> to vector<1x4x512xbf16>
      tpu.vector_store %arg7[%c0_26, %c0_27, %c0_28], %51 {strides = array<i32>} : memref<1x4x512xbf16, #tpu.memory_space<vmem>>, vector<1x4x512xbf16>,
    } else {
    }
    return
  }
  func.func @transform_0(%arg0: i32, %arg1: i32) -> (i32, i32, i32) {
    %c0_i32 = arith.constant 0 : i32
    %c0_i32_0 = arith.constant 0 : i32
    return %arg0, %c0_i32, %arg1 : i32, i32, i32
  }
  func.func @transform_1(%arg0: i32, %arg1: i32) -> (i32, i32) {
    %c0_i32 = arith.constant 0 : i32
    %c0_i32_0 = arith.constant 0 : i32
    return %arg1, %c0_i32 : i32, i32
  }
  func.func @transform_2(%arg0: i32, %arg1: i32) -> (i32, i32) {
    %c0_i32 = arith.constant 0 : i32
    %c0_i32_0 = arith.constant 0 : i32
    %c0_i32_1 = arith.constant 0 : i32
    return %c0_i32, %c0_i32_0 : i32, i32
  }
  func.func @transform_3(%arg0: i32, %arg1: i32) -> (i32, i32) {
    %c0_i32 = arith.constant 0 : i32
    %c0_i32_0 = arith.constant 0 : i32
    %c0_i32_1 = arith.constant 0 : i32
    return %c0_i32, %c0_i32_0 : i32, i32
  }
  func.func @transform_4(%arg0: i32, %arg1: i32) -> (i32, i32) {
    %c0_i32 = arith.constant 0 : i32
    %c0_i32_0 = arith.constant 0 : i32
    %c0_i32_1 = arith.constant 0 : i32
    return %c0_i32, %c0_i32_0 : i32, i32
  }
  func.func @transform_5(%arg0: i32, %arg1: i32) -> (i32, i32, i32) {
    %c0_i32 = arith.constant 0 : i32
    %c0_i32_0 = arith.constant 0 : i32
    %c0_i32_1 = arith.constant 0 : i32
    return %arg0, %c0_i32, %c0_i32_0 : i32, i32, i32
  }
}

module attributes {stable_mosaic.version = 11 : i64} {
  func.func @kernel(%arg0: i32, %arg1: i32, %arg2: memref<8x2048xbf16, #tpu.memory_space<vmem>>, %arg3: memref<2048x128xbf16, #tpu.memory_space<vmem>>, %arg4: memref<1x128xf32, #tpu.memory_space<vmem>>, %arg5: memref<8x128xf32, #tpu.memory_space<vmem>>, %arg6: memref<8x128xf32, #tpu.memory_space<vmem>>) attributes {dimension_semantics = [#tpu.dimension_semantics<parallel>, #tpu.dimension_semantics<arbitrary>], iteration_bounds = array<i64: 1, 4>, scalar_prefetch = 0 : i64, scratch_operands = 1 : i64, tpu.core_type = #tpu.core_type<tc>, window_params = [{transform_indices = @transform_0, window_bounds = array<i64: 8, 2048>}, {transform_indices = @transform_1, window_bounds = array<i64: 2048, 128>}, {pipeline_mode = #tpu.pipeline_mode<synchronous>, transform_indices = @transform_2, window_bounds = array<i64: 1, 128>}, {transform_indices = @transform_3, window_bounds = array<i64: 8, 128>}]} {
    %c0_i32 = arith.constant 0 : i32
    %0 = arith.cmpi eq, %arg1, %c0_i32 : i32
    %1 = arith.extui %0 : i1 to i32
    %c0_i32_0 = arith.constant 0 : i32
    %2 = arith.cmpi ne, %1, %c0_i32_0 : i32
    scf.if %2 {
      %cst_9 = arith.constant 0.000000e+00 : f32
      %12 = vector.broadcast %cst_9 : f32 to vector<8x128xf32>
      %c0_10 = arith.constant 0 : index
      %c0_11 = arith.constant 0 : index
      %13 = vector.load %arg6[%c0_10, %c0_11] : memref<8x128xf32, #tpu.memory_space<vmem>>, vector<8x128xf32>
      tpu.vector_store %arg6[%c0_10, %c0_11], %12 {strides = array<i32>} : memref<8x128xf32, #tpu.memory_space<vmem>>, vector<8x128xf32>,
    } else {
    }
    %c0 = arith.constant 0 : index
    %c0_1 = arith.constant 0 : index
    %3 = vector.load %arg6[%c0, %c0_1] : memref<8x128xf32, #tpu.memory_space<vmem>>, vector<8x128xf32>
    %c0_2 = arith.constant 0 : index
    %c0_3 = arith.constant 0 : index
    %4 = vector.load %arg2[%c0_2, %c0_3] : memref<8x2048xbf16, #tpu.memory_space<vmem>>, vector<8x2048xbf16>
    %c0_4 = arith.constant 0 : index
    %c0_5 = arith.constant 0 : index
    %5 = vector.load %arg3[%c0_4, %c0_5] : memref<2048x128xbf16, #tpu.memory_space<vmem>>, vector<2048x128xbf16>
    %cst = arith.constant dense<0.000000e+00> : vector<8x128xf32>
    %6 = tpu.matmul %4, %5, %cst {dimension_numbers = #tpu.dot_dimension_numbers<[1], [0], [0], [1], [0, 0, 1, 1], [], []>} : vector<8x2048xbf16>, vector<2048x128xbf16>, vector<8x128xf32> -> vector<8x128xf32>
    %7 = arith.addf %3, %6 : vector<8x128xf32>
    %c0_6 = arith.constant 0 : index
    %c0_7 = arith.constant 0 : index
    %8 = vector.load %arg6[%c0_6, %c0_7] : memref<8x128xf32, #tpu.memory_space<vmem>>, vector<8x128xf32>
    tpu.vector_store %arg6[%c0_6, %c0_7], %7 {strides = array<i32>} : memref<8x128xf32, #tpu.memory_space<vmem>>, vector<8x128xf32>,
    %c3_i32 = arith.constant 3 : i32
    %9 = arith.cmpi eq, %arg1, %c3_i32 : i32
    %10 = arith.extui %9 : i1 to i32
    %c0_i32_8 = arith.constant 0 : i32
    %11 = arith.cmpi ne, %10, %c0_i32_8 : i32
    scf.if %11 {
      %c0_9 = arith.constant 0 : index
      %c0_10 = arith.constant 0 : index
      %12 = vector.load %arg6[%c0_9, %c0_10] : memref<8x128xf32, #tpu.memory_space<vmem>>, vector<8x128xf32>
      %c0_11 = arith.constant 0 : index
      %c0_12 = arith.constant 0 : index
      %13 = vector.load %arg4[%c0_11, %c0_12] : memref<1x128xf32, #tpu.memory_space<vmem>>, vector<1x128xf32>
      %14 = vector.broadcast %13 : vector<1x128xf32> to vector<8x128xf32>
      %15 = arith.addf %12, %14 : vector<8x128xf32>
      %c0_13 = arith.constant 0 : index
      %c0_14 = arith.constant 0 : index
      %16 = vector.load %arg5[%c0_13, %c0_14] : memref<8x128xf32, #tpu.memory_space<vmem>>, vector<8x128xf32>
      tpu.vector_store %arg5[%c0_13, %c0_14], %15 {strides = array<i32>} : memref<8x128xf32, #tpu.memory_space<vmem>>, vector<8x128xf32>,
    } else {
    }
    return
  }
  func.func @transform_0(%arg0: i32, %arg1: i32) -> (i32, i32) {
    %c0_i32 = arith.constant 0 : i32
    return %arg0, %arg1 : i32, i32
  }
  func.func @transform_1(%arg0: i32, %arg1: i32) -> (i32, i32) {
    %c0_i32 = arith.constant 0 : i32
    %c0_i32_0 = arith.constant 0 : i32
    return %arg1, %c0_i32 : i32, i32
  }
  func.func @transform_2(%arg0: i32, %arg1: i32) -> (i32, i32) {
    %c0_i32 = arith.constant 0 : i32
    %c0_i32_0 = arith.constant 0 : i32
    %c0_i32_1 = arith.constant 0 : i32
    return %c0_i32, %c0_i32_0 : i32, i32
  }
  func.func @transform_3(%arg0: i32, %arg1: i32) -> (i32, i32) {
    %c0_i32 = arith.constant 0 : i32
    %c0_i32_0 = arith.constant 0 : i32
    return %arg0, %c0_i32 : i32, i32
  }
}

</mosaic_0001>

<bundles_post_ra>
// kernel: discriminator_forward_pallas.5
= control target key start
LH: loop header
LB: loop body
LE: loop exit
PB: predicated region body
PF: predicated region fallthrough
CT: control target
= control target key end

     0   :  { %vm395_vm0 = vcmask 392192   ;;  %s1978_s1 = inlined_call_operand.vmem [shape: bf16[48,128], index: 1, kind: input, shape index: {}]   ;;  %s1979_s2 = inlined_call_operand.vmem [shape: f32[1,128], index: 2, kind: input, shape index: {}]   ;;  %s1980_s0 = inlined_call_operand.vmem [shape: bf16[512,48], index: 0, kind: input, shape index: {}]   ;;  %s1981_s3 = inlined_call_operand.vmem [shape: bf16[512,128], index: 3, kind: output, shape index: {}]  }
   0x1   :  { %v1454_v0 = vld [vmem:[%s1978_s1 + $0x10] sm:$0xff]  ;;  %v1453_v1 = vld [vmem:[%s1978_s1 + $0x8] sm:$0xff]  ;;  %v1452_v2 = vld [vmem:[%s1978_s1] sm:$0xff] }
   0x2   :  { %497 = vmatpush.bf16.msra.mxu0 %v1454_v0  ;;  %1646 = vmatpush.bf16.msra.mxu1 %v1454_v0  ;;  %v1420_v3 = vld [vmem:[%s1980_s0] sm:$0xff]  ;;  %v1421_v7 = vld [vmem:[%s1980_s0 + $0x8] sm:$0xff]  ;;  %v1422_v11 = vld [vmem:[%s1980_s0 + $0x10] sm:$0xff] }
   0x3   :  { %1647 = vmatpush.bf16.msra.mxu2 %v1454_v0  ;;  %1648 = vmatpush.bf16.msra.mxu3 %v1454_v0  ;;  %v1428_v4 = vld [vmem:[%s1980_s0 + $0x40] sm:$0xff]  ;;  %v1429_v8 = vld [vmem:[%s1980_s0 + $0x48] sm:$0xff]  ;;  %v1430_v12 = vld [vmem:[%s1980_s0 + $0x50] sm:$0xff] }
   0x4   :  { %v1436_v5 = vld [vmem:[%s1980_s0 + $0x80] sm:$0xff]  ;;  %v1437_v9 = vld [vmem:[%s1980_s0 + $0x88] sm:$0xff]  ;;  %v1438_v13 = vld [vmem:[%s1980_s0 + $0x90] sm:$0xff] }
   0x5   :  { %v1444_v6 = vld [vmem:[%s1980_s0 + $0xc0] sm:$0xff]  ;;  %v1445_v10 = vld [vmem:[%s1980_s0 + $0xc8] sm:$0xff]  ;;  %v1446_v14 = vld [vmem:[%s1980_s0 + $0xd0] sm:$0xff] }
   0x6   :  { %498 = vmatpush.bf16.msra.mxu0 %v1453_v1  ;;  %1649 = vmatpush.bf16.msra.mxu1 %v1453_v1  ;;  %v1423_v15 = vld [vmem:[%s1980_s0 + $0x18] sm:$0xff]  ;;  %v1424_v19 = vld [vmem:[%s1980_s0 + $0x20] sm:$0xff]  ;;  %v1425_v23 = vld [vmem:[%s1980_s0 + $0x28] sm:$0xff] }
   0x7   :  { %1650 = vmatpush.bf16.msra.mxu2 %v1453_v1  ;;  %1651 = vmatpush.bf16.msra.mxu3 %v1453_v1  ;;  %v1431_v16 = vld [vmem:[%s1980_s0 + $0x58] sm:$0xff]  ;;  %v1432_v20 = vld [vmem:[%s1980_s0 + $0x60] sm:$0xff]  ;;  %v1433_v24 = vld [vmem:[%s1980_s0 + $0x68] sm:$0xff] }
   0x8   :  { %v1439_v17 = vld [vmem:[%s1980_s0 + $0x98] sm:$0xff]  ;;  %v1440_v21 = vld [vmem:[%s1980_s0 + $0xa0] sm:$0xff]  ;;  %v1441_v25 = vld [vmem:[%s1980_s0 + $0xa8] sm:$0xff] }
   0x9   :  { %v1447_v18 = vld [vmem:[%s1980_s0 + $0xd8] sm:$0xff]  ;;  %v1448_v22 = vld [vmem:[%s1980_s0 + $0xe0] sm:$0xff]  ;;  %v1449_v26 = vld [vmem:[%s1980_s0 + $0xe8] sm:$0xff] }
   0xa   :  { %499 = vmatpush.bf16.msra.mxu0 %v1452_v2  ;;  %1652 = vmatpush.bf16.msra.mxu1 %v1452_v2  ;;  %v1426_v27 = vld [vmem:[%s1980_s0 + $0x30] sm:$0xff]  ;;  %v1427_v31 = vld [vmem:[%s1980_s0 + $0x38] sm:$0xff]  ;;  %v1816_v37 = vld [vmem:[%s1979_s2] ss:$0 sm:$0xff] }
   0xb   :  { %1653 = vmatpush.bf16.msra.mxu2 %v1452_v2  ;;  %1654 = vmatpush.bf16.msra.mxu3 %v1452_v2  ;;  %v1434_v28 = vld [vmem:[%s1980_s0 + $0x70] sm:$0xff]  ;;  %v1435_v32 = vld [vmem:[%s1980_s0 + $0x78] sm:$0xff] }
   0xc   :  { %v1442_v29 = vld [vmem:[%s1980_s0 + $0xb0] sm:$0xff]  ;;  %v1443_v33 = vld [vmem:[%s1980_s0 + $0xb8] sm:$0xff] }
   0xd   :  { %1388 = vmatmul.msk.bf16.vlgmr.msra.gmra.mxu0 %vm395_vm0, %v1420_v3  ;;  %1396 = vmatmul.msk.bf16.vlgmr.msra.gmra.mxu1 %vm395_vm0, %v1428_v4  ;;  %v1450_v30 = vld [vmem:[%s1980_s0 + $0xf0] sm:$0xff]  ;;  %v1451_v34 = vld [vmem:[%s1980_s0 + $0xf8] sm:$0xff] }
   0xe   :  { %1404 = vmatmul.msk.bf16.vlgmr.msra.gmra.mxu2 %vm395_vm0, %v1436_v5  ;;  %1412 = vmatmul.msk.bf16.vlgmr.msra.gmra.mxu3 %vm395_vm0, %v1444_v6 }
  0x1d   :  { %1389 = vmatmul.msk.bf16.gmra.mxu0 %vm395_vm0, %v1421_v7  ;;  %1397 = vmatmul.msk.bf16.gmra.mxu1 %vm395_vm0, %v1429_v8 }
  0x1e   :  { %1405 = vmatmul.msk.bf16.gmra.mxu2 %vm395_vm0, %v1437_v9  ;;  %1413 = vmatmul.msk.bf16.gmra.mxu3 %vm395_vm0, %v1445_v10 }
  0x2d   :  { %1390 = vmatmul.msk.bf16.gmra.mxu0 %vm395_vm0, %v1422_v11  ;;  %1398 = vmatmul.msk.bf16.gmra.mxu1 %vm395_vm0, %v1430_v12 }
  0x2e   :  { %1406 = vmatmul.msk.bf16.gmra.mxu2 %vm395_vm0, %v1438_v13  ;;  %1414 = vmatmul.msk.bf16.gmra.mxu3 %vm395_vm0, %v1446_v14 }
  0x3d   :  { %1391 = vmatmul.msk.bf16.gmra.mxu0 %vm395_vm0, %v1423_v15  ;;  %1399 = vmatmul.msk.bf16.gmra.mxu1 %vm395_vm0, %v1431_v16 }
  0x3e   :  { %1407 = vmatmul.msk.bf16.gmra.mxu2 %vm395_vm0, %v1439_v17  ;;  %1415 = vmatmul.msk.bf16.gmra.mxu3 %vm395_vm0, %v1447_v18 }
  0x4d   :  { %1392 = vmatmul.msk.bf16.gmra.mxu0 %vm395_vm0, %v1424_v19  ;;  %1400 = vmatmul.msk.bf16.gmra.mxu1 %vm395_vm0, %v1432_v20 }
  0x4e   :  { %1408 = vmatmul.msk.bf16.gmra.mxu2 %vm395_vm0, %v1440_v21  ;;  %1416 = vmatmul.msk.bf16.gmra.mxu3 %vm395_vm0, %v1448_v22 }
  0x5d   :  { %1393 = vmatmul.msk.bf16.gmra.mxu0 %vm395_vm0, %v1425_v23  ;;  %1401 = vmatmul.msk.bf16.gmra.mxu1 %vm395_vm0, %v1433_v24 }
  0x5e   :  { %1409 = vmatmul.msk.bf16.gmra.mxu2 %vm395_vm0, %v1441_v25  ;;  %1417 = vmatmul.msk.bf16.gmra.mxu3 %vm395_vm0, %v1449_v26 }
  0x6d   :  { %1394 = vmatmul.msk.bf16.gmra.mxu0 %vm395_vm0, %v1426_v27  ;;  %1402 = vmatmul.msk.bf16.gmra.mxu1 %vm395_vm0, %v1434_v28 }
  0x6e   :  { %1410 = vmatmul.msk.bf16.gmra.mxu2 %vm395_vm0, %v1442_v29  ;;  %1418 = vmatmul.msk.bf16.gmra.mxu3 %vm395_vm0, %v1450_v30 }
  0x7d   :  { %1395 = vmatmul.msk.bf16.gmra.mxu0 %vm395_vm0, %v1427_v31  ;;  %1403 = vmatmul.msk.bf16.gmra.mxu1 %vm395_vm0, %v1435_v32 }
  0x7e   :  { %1411 = vmatmul.msk.bf16.gmra.mxu2 %vm395_vm0, %v1443_v33  ;;  %1419 = vmatmul.msk.bf16.gmra.mxu3 %vm395_vm0, %v1451_v34 }
  0x8a   :  { %v501_v35 = vpop.f32.mrf.mxu0  ;;  %v541_v36 = vpop.f32.mrf.mxu1 }
  0x8b   :  { %v860_v38 = vadd.f32 %v1816_v37, %v501_v35  ;;  %v876_v39 = vadd.f32 %v1816_v37, %v541_v36 }
  0x8d   :  { %v988_v44 = vmul.f32 0.2, %v860_v38  ;;  %v1004_v45 = vmul.f32 0.2, %v876_v39  ;;  %vm924_vm1 = vcmp.gt.f32.partialorder %v860_v38, 0.0  ;;  %vm940_vm2 = vcmp.gt.f32.partialorder %v876_v39, 0.0 }
  0x8f   :  { %v1052_v52 = vsel %vm924_vm1, %v860_v38, %v988_v44  ;;  %v1068_v53 = vsel %vm940_vm2, %v876_v39, %v1004_v45 }
  0x91   :  { %v581_v40 = vpop.f32.mrf.mxu2  ;;  %v621_v41 = vpop.f32.mrf.mxu3 }
  0x92   :  { %v503_v42 = vpop.f32.mrf.mxu0  ;;  %v543_v43 = vpop.f32.mrf.mxu1  ;;  %v892_v50 = vadd.f32 %v1816_v37, %v581_v40  ;;  %v908_v51 = vadd.f32 %v1816_v37, %v621_v41 }
  0x93   :  { %v861_v46 = vadd.f32 %v1816_v37, %v503_v42  ;;  %v877_v47 = vadd.f32 %v1816_v37, %v543_v43 }
  0x94   :  { %v1020_v60 = vmul.f32 0.2, %v892_v50  ;;  %v1036_v61 = vmul.f32 0.2, %v908_v51  ;;  %vm956_vm5 = vcmp.gt.f32.partialorder %v892_v50, 0.0  ;;  %vm972_vm6 = vcmp.gt.f32.partialorder %v908_v51, 0.0 }
  0x95   :  { %vm925_vm3 = vcmp.gt.f32.partialorder %v861_v46, 0.0  ;;  %v989_v48 = vmul.f32 0.2, %v861_v46  ;;  %vm941_vm4 = vcmp.gt.f32.partialorder %v877_v47, 0.0  ;;  %v1005_v49 = vmul.f32 0.2, %v877_v47 }
  0x96   :  { %v1084_v4 = vsel %vm956_vm5, %v892_v50, %v1020_v60  ;;  %v1100_v5 = vsel %vm972_vm6, %v908_v51, %v1036_v61 }
  0x97   :  { %v1053_v54 = vsel %vm925_vm3, %v861_v46, %v989_v48  ;;  %v1069_v55 = vsel %vm941_vm4, %v877_v47, %v1005_v49 }
  0x98   :  { %v1458_v56 = vpack.c.bf16 %v1053_v54, %v1052_v52  ;;  %v1498_v57 = vpack.c.bf16 %v1069_v55, %v1068_v53 }
  0x99   :  { %v583_v58 = vpop.f32.mrf.mxu2  ;;  %v623_v59 = vpop.f32.mrf.mxu3 }
  0x9a   :  { %1459 = vst [vmem:[%s1981_s3] sm:$0xff] %v1458_v56   ;;  %v893_v62 = vadd.f32 %v1816_v37, %v583_v58  ;;  %v909_v63 = vadd.f32 %v1816_v37, %v623_v59  ;;  %v506_v0 = vpop.f32.mrf.mxu0  ;;  %v546_v1 = vpop.f32.mrf.mxu1 }
  0x9b   :  { %1622 = vst [vmem:[%s1981_s3 + $0x40] sm:$0xff] %v1498_v57   ;;  %v862_v10 = vadd.f32 %v1816_v37, %v506_v0  ;;  %v878_v11 = vadd.f32 %v1816_v37, %v546_v1 }
  0x9c   :  { %vm957_vm7 = vcmp.gt.f32.partialorder %v893_v62, 0.0  ;;  %v1021_v2 = vmul.f32 0.2, %v893_v62  ;;  %vm973_vm8 = vcmp.gt.f32.partialorder %v909_v63, 0.0  ;;  %v1037_v3 = vmul.f32 0.2, %v909_v63 }
  0x9d   :  { %v990_v16 = vmul.f32 0.2, %v862_v10  ;;  %v1006_v17 = vmul.f32 0.2, %v878_v11  ;;  %vm926_vm9 = vcmp.gt.f32.partialorder %v862_v10, 0.0  ;;  %vm942_vm10 = vcmp.gt.f32.partialorder %v878_v11, 0.0 }
  0x9e   :  { %v1085_v6 = vsel %vm957_vm7, %v893_v62, %v1021_v2  ;;  %v1101_v7 = vsel %vm973_vm8, %v909_v63, %v1037_v3 }
  0x9f   :  { %v1538_v8 = vpack.c.bf16 %v1085_v6, %v1084_v4  ;;  %v1578_v9 = vpack.c.bf16 %v1101_v7, %v1100_v5  ;;  %v1054_v24 = vsel %vm926_vm9, %v862_v10, %v990_v16  ;;  %v1070_v25 = vsel %vm942_vm10, %v878_v11, %v1006_v17 }
  0xa1   :  { %1630 = vst [vmem:[%s1981_s3 + $0x80] sm:$0xff] %v1538_v8   ;;  %v586_v12 = vpop.f32.mrf.mxu2  ;;  %v626_v13 = vpop.f32.mrf.mxu3 }
  0xa2   :  { %1638 = vst [vmem:[%s1981_s3 + $0xc0] sm:$0xff] %v1578_v9   ;;  %v508_v14 = vpop.f32.mrf.mxu0  ;;  %v548_v15 = vpop.f32.mrf.mxu1  ;;  %v894_v22 = vadd.f32 %v1816_v37, %v586_v12  ;;  %v910_v23 = vadd.f32 %v1816_v37, %v626_v13 }
  0xa3   :  { %v863_v18 = vadd.f32 %v1816_v37, %v508_v14  ;;  %v879_v19 = vadd.f32 %v1816_v37, %v548_v15 }
  0xa4   :  { %v1022_v32 = vmul.f32 0.2, %v894_v22  ;;  %v1038_v33 = vmul.f32 0.2, %v910_v23  ;;  %vm958_vm13 = vcmp.gt.f32.partialorder %v894_v22, 0.0  ;;  %vm974_vm14 = vcmp.gt.f32.partialorder %v910_v23, 0.0 }
  0xa5   :  { %vm927_vm11 = vcmp.gt.f32.partialorder %v863_v18, 0.0  ;;  %v991_v20 = vmul.f32 0.2, %v863_v18  ;;  %vm943_vm12 = vcmp.gt.f32.partialorder %v879_v19, 0.0  ;;  %v1007_v21 = vmul.f32 0.2, %v879_v19 }
  0xa6   :  { %v1086_v41 = vsel %vm958_vm13, %v894_v22, %v1022_v32  ;;  %v1102_v42 = vsel %vm974_vm14, %v910_v23, %v1038_v33 }
  0xa7   :  { %v1055_v26 = vsel %vm927_vm11, %v863_v18, %v991_v20  ;;  %v1071_v27 = vsel %vm943_vm12, %v879_v19, %v1007_v21 }
  0xa8   :  { %v1463_v28 = vpack.c.bf16 %v1055_v26, %v1054_v24  ;;  %v1503_v29 = vpack.c.bf16 %v1071_v27, %v1070_v25 }
  0xa9   :  { %v588_v30 = vpop.f32.mrf.mxu2  ;;  %v628_v31 = vpop.f32.mrf.mxu3 }
  0xaa   :  { %1615 = vst [vmem:[%s1981_s3 + $0x8] sm:$0xff] %v1463_v28   ;;  %v895_v34 = vadd.f32 %v1816_v37, %v588_v30  ;;  %v911_v35 = vadd.f32 %v1816_v37, %v628_v31  ;;  %v511_v36 = vpop.f32.mrf.mxu0  ;;  %v551_v38 = vpop.f32.mrf.mxu1 }
  0xab   :  { %1623 = vst [vmem:[%s1981_s3 + $0x48] sm:$0xff] %v1503_v29   ;;  %v864_v47 = vadd.f32 %v1816_v37, %v511_v36  ;;  %v880_v48 = vadd.f32 %v1816_v37, %v551_v38 }
  0xac   :  { %vm959_vm15 = vcmp.gt.f32.partialorder %v895_v34, 0.0  ;;  %v1023_v39 = vmul.f32 0.2, %v895_v34  ;;  %vm975_vm0 = vcmp.gt.f32.partialorder %v911_v35, 0.0  ;;  %v1039_v40 = vmul.f32 0.2, %v911_v35 }
  0xad   :  { %v992_v53 = vmul.f32 0.2, %v864_v47  ;;  %v1008_v54 = vmul.f32 0.2, %v880_v48  ;;  %vm928_vm1 = vcmp.gt.f32.partialorder %v864_v47, 0.0  ;;  %vm944_vm2 = vcmp.gt.f32.partialorder %v880_v48, 0.0 }
  0xae   :  { %v1087_v43 = vsel %vm959_vm15, %v895_v34, %v1023_v39  ;;  %v1103_v44 = vsel %vm975_vm0, %v911_v35, %v1039_v40 }
  0xaf   :  { %v1543_v45 = vpack.c.bf16 %v1087_v43, %v1086_v41  ;;  %v1583_v46 = vpack.c.bf16 %v1103_v44, %v1102_v42  ;;  %v1056_v61 = vsel %vm928_vm1, %v864_v47, %v992_v53  ;;  %v1072_v62 = vsel %vm944_vm2, %v880_v48, %v1008_v54 }
  0xb1   :  { %1631 = vst [vmem:[%s1981_s3 + $0x88] sm:$0xff] %v1543_v45   ;;  %v591_v49 = vpop.f32.mrf.mxu2  ;;  %v631_v50 = vpop.f32.mrf.mxu3 }
  0xb2   :  { %1639 = vst [vmem:[%s1981_s3 + $0xc8] sm:$0xff] %v1583_v46   ;;  %v513_v51 = vpop.f32.mrf.mxu0  ;;  %v553_v52 = vpop.f32.mrf.mxu1  ;;  %v896_v59 = vadd.f32 %v1816_v37, %v591_v49  ;;  %v912_v60 = vadd.f32 %v1816_v37, %v631_v50 }
  0xb3   :  { %v865_v55 = vadd.f32 %v1816_v37, %v513_v51  ;;  %v881_v56 = vadd.f32 %v1816_v37, %v553_v52 }
  0xb4   :  { %v1024_v5 = vmul.f32 0.2, %v896_v59  ;;  %v1040_v6 = vmul.f32 0.2, %v912_v60  ;;  %vm960_vm5 = vcmp.gt.f32.partialorder %v896_v59, 0.0  ;;  %vm976_vm6 = vcmp.gt.f32.partialorder %v912_v60, 0.0 }
  0xb5   :  { %vm929_vm3 = vcmp.gt.f32.partialorder %v865_v55, 0.0  ;;  %v993_v57 = vmul.f32 0.2, %v865_v55  ;;  %vm945_vm4 = vcmp.gt.f32.partialorder %v881_v56, 0.0  ;;  %v1009_v58 = vmul.f32 0.2, %v881_v56 }
  0xb6   :  { %v1088_v13 = vsel %vm960_vm5, %v896_v59, %v1024_v5  ;;  %v1104_v14 = vsel %vm976_vm6, %v912_v60, %v1040_v6 }
  0xb7   :  { %v1057_v63 = vsel %vm929_vm3, %v865_v55, %v993_v57  ;;  %v1073_v0 = vsel %vm945_vm4, %v881_v56, %v1009_v58 }
  0xb8   :  { %v1468_v1 = vpack.c.bf16 %v1057_v63, %v1056_v61  ;;  %v1508_v2 = vpack.c.bf16 %v1073_v0, %v1072_v62 }
  0xb9   :  { %v593_v3 = vpop.f32.mrf.mxu2  ;;  %v633_v4 = vpop.f32.mrf.mxu3 }
  0xba   :  { %1616 = vst [vmem:[%s1981_s3 + $0x10] sm:$0xff] %v1468_v1   ;;  %v897_v7 = vadd.f32 %v1816_v37, %v593_v3  ;;  %v913_v8 = vadd.f32 %v1816_v37, %v633_v4  ;;  %v516_v9 = vpop.f32.mrf.mxu0  ;;  %v556_v10 = vpop.f32.mrf.mxu1 }
  0xbb   :  { %1624 = vst [vmem:[%s1981_s3 + $0x50] sm:$0xff] %v1508_v2   ;;  %v866_v19 = vadd.f32 %v1816_v37, %v516_v9  ;;  %v882_v20 = vadd.f32 %v1816_v37, %v556_v10 }
  0xbc   :  { %vm961_vm7 = vcmp.gt.f32.partialorder %v897_v7, 0.0  ;;  %v1025_v11 = vmul.f32 0.2, %v897_v7  ;;  %vm977_vm8 = vcmp.gt.f32.partialorder %v913_v8, 0.0  ;;  %v1041_v12 = vmul.f32 0.2, %v913_v8 }
  0xbd   :  { %v994_v25 = vmul.f32 0.2, %v866_v19  ;;  %v1010_v26 = vmul.f32 0.2, %v882_v20  ;;  %vm930_vm9 = vcmp.gt.f32.partialorder %v866_v19, 0.0  ;;  %vm946_vm10 = vcmp.gt.f32.partialorder %v882_v20, 0.0 }
  0xbe   :  { %v1089_v15 = vsel %vm961_vm7, %v897_v7, %v1025_v11  ;;  %v1105_v16 = vsel %vm977_vm8, %v913_v8, %v1041_v12 }
  0xbf   :  { %v1548_v17 = vpack.c.bf16 %v1089_v15, %v1088_v13  ;;  %v1588_v18 = vpack.c.bf16 %v1105_v16, %v1104_v14  ;;  %v1058_v33 = vsel %vm930_vm9, %v866_v19, %v994_v25  ;;  %v1074_v34 = vsel %vm946_vm10, %v882_v20, %v1010_v26 }
  0xc1   :  { %1632 = vst [vmem:[%s1981_s3 + $0x90] sm:$0xff] %v1548_v17   ;;  %v596_v21 = vpop.f32.mrf.mxu2  ;;  %v636_v22 = vpop.f32.mrf.mxu3 }
  0xc2   :  { %1640 = vst [vmem:[%s1981_s3 + $0xd0] sm:$0xff] %v1588_v18   ;;  %v518_v23 = vpop.f32.mrf.mxu0  ;;  %v558_v24 = vpop.f32.mrf.mxu1  ;;  %v898_v31 = vadd.f32 %v1816_v37, %v596_v21  ;;  %v914_v32 = vadd.f32 %v1816_v37, %v636_v22 }
  0xc3   :  { %v867_v27 = vadd.f32 %v1816_v37, %v518_v23  ;;  %v883_v28 = vadd.f32 %v1816_v37, %v558_v24 }
  0xc4   :  { %v1026_v42 = vmul.f32 0.2, %v898_v31  ;;  %v1042_v43 = vmul.f32 0.2, %v914_v32  ;;  %vm962_vm13 = vcmp.gt.f32.partialorder %v898_v31, 0.0  ;;  %vm978_vm14 = vcmp.gt.f32.partialorder %v914_v32, 0.0 }
  0xc5   :  { %vm931_vm11 = vcmp.gt.f32.partialorder %v867_v27, 0.0  ;;  %v995_v29 = vmul.f32 0.2, %v867_v27  ;;  %vm947_vm12 = vcmp.gt.f32.partialorder %v883_v28, 0.0  ;;  %v1011_v30 = vmul.f32 0.2, %v883_v28 }
  0xc6   :  { %v1090_v50 = vsel %vm962_vm13, %v898_v31, %v1026_v42  ;;  %v1106_v51 = vsel %vm978_vm14, %v914_v32, %v1042_v43 }
  0xc7   :  { %v1059_v35 = vsel %vm931_vm11, %v867_v27, %v995_v29  ;;  %v1075_v36 = vsel %vm947_vm12, %v883_v28, %v1011_v30 }
  0xc8   :  { %v1473_v38 = vpack.c.bf16 %v1059_v35, %v1058_v33  ;;  %v1513_v39 = vpack.c.bf16 %v1075_v36, %v1074_v34 }
  0xc9   :  { %v598_v40 = vpop.f32.mrf.mxu2  ;;  %v638_v41 = vpop.f32.mrf.mxu3 }
  0xca   :  { %1617 = vst [vmem:[%s1981_s3 + $0x18] sm:$0xff] %v1473_v38   ;;  %v899_v44 = vadd.f32 %v1816_v37, %v598_v40  ;;  %v915_v45 = vadd.f32 %v1816_v37, %v638_v41  ;;  %v521_v46 = vpop.f32.mrf.mxu0  ;;  %v561_v47 = vpop.f32.mrf.mxu1 }
  0xcb   :  { %1625 = vst [vmem:[%s1981_s3 + $0x58] sm:$0xff] %v1513_v39   ;;  %v868_v56 = vadd.f32 %v1816_v37, %v521_v46  ;;  %v884_v57 = vadd.f32 %v1816_v37, %v561_v47 }
  0xcc   :  { %vm963_vm15 = vcmp.gt.f32.partialorder %v899_v44, 0.0  ;;  %v1027_v48 = vmul.f32 0.2, %v899_v44  ;;  %vm979_vm0 = vcmp.gt.f32.partialorder %v915_v45, 0.0  ;;  %v1043_v49 = vmul.f32 0.2, %v915_v45 }
  0xcd   :  { %v996_v62 = vmul.f32 0.2, %v868_v56  ;;  %v1012_v63 = vmul.f32 0.2, %v884_v57  ;;  %vm932_vm1 = vcmp.gt.f32.partialorder %v868_v56, 0.0  ;;  %vm948_vm2 = vcmp.gt.f32.partialorder %v884_v57, 0.0 }
  0xce   :  { %v1091_v52 = vsel %vm963_vm15, %v899_v44, %v1027_v48  ;;  %v1107_v53 = vsel %vm979_vm0, %v915_v45, %v1043_v49 }
  0xcf   :  { %v1553_v54 = vpack.c.bf16 %v1091_v52, %v1090_v50  ;;  %v1593_v55 = vpack.c.bf16 %v1107_v53, %v1106_v51  ;;  %v1060_v6 = vsel %vm932_vm1, %v868_v56, %v996_v62  ;;  %v1076_v7 = vsel %vm948_vm2, %v884_v57, %v1012_v63 }
  0xd1   :  { %1633 = vst [vmem:[%s1981_s3 + $0x98] sm:$0xff] %v1553_v54   ;;  %v601_v58 = vpop.f32.mrf.mxu2  ;;  %v641_v59 = vpop.f32.mrf.mxu3 }
  0xd2   :  { %1641 = vst [vmem:[%s1981_s3 + $0xd8] sm:$0xff] %v1593_v55   ;;  %v523_v60 = vpop.f32.mrf.mxu0  ;;  %v563_v61 = vpop.f32.mrf.mxu1  ;;  %v900_v4 = vadd.f32 %v1816_v37, %v601_v58  ;;  %v916_v5 = vadd.f32 %v1816_v37, %v641_v59 }
  0xd3   :  { %v869_v0 = vadd.f32 %v1816_v37, %v523_v60  ;;  %v885_v1 = vadd.f32 %v1816_v37, %v563_v61 }
  0xd4   :  { %v1028_v14 = vmul.f32 0.2, %v900_v4  ;;  %v1044_v15 = vmul.f32 0.2, %v916_v5  ;;  %vm964_vm5 = vcmp.gt.f32.partialorder %v900_v4, 0.0  ;;  %vm980_vm6 = vcmp.gt.f32.partialorder %v916_v5, 0.0 }
  0xd5   :  { %vm933_vm3 = vcmp.gt.f32.partialorder %v869_v0, 0.0  ;;  %v997_v2 = vmul.f32 0.2, %v869_v0  ;;  %vm949_vm4 = vcmp.gt.f32.partialorder %v885_v1, 0.0  ;;  %v1013_v3 = vmul.f32 0.2, %v885_v1 }
  0xd6   :  { %v1092_v22 = vsel %vm964_vm5, %v900_v4, %v1028_v14  ;;  %v1108_v23 = vsel %vm980_vm6, %v916_v5, %v1044_v15 }
  0xd7   :  { %v1061_v8 = vsel %vm933_vm3, %v869_v0, %v997_v2  ;;  %v1077_v9 = vsel %vm949_vm4, %v885_v1, %v1013_v3 }
  0xd8   :  { %v1478_v10 = vpack.c.bf16 %v1061_v8, %v1060_v6  ;;  %v1518_v11 = vpack.c.bf16 %v1077_v9, %v1076_v7 }
  0xd9   :  { %v603_v12 = vpop.f32.mrf.mxu2  ;;  %v643_v13 = vpop.f32.mrf.mxu3 }
  0xda   :  { %1618 = vst [vmem:[%s1981_s3 + $0x20] sm:$0xff] %v1478_v10   ;;  %v901_v16 = vadd.f32 %v1816_v37, %v603_v12  ;;  %v917_v17 = vadd.f32 %v1816_v37, %v643_v13  ;;  %v526_v18 = vpop.f32.mrf.mxu0  ;;  %v566_v19 = vpop.f32.mrf.mxu1 }
  0xdb   :  { %1626 = vst [vmem:[%s1981_s3 + $0x60] sm:$0xff] %v1518_v11   ;;  %v870_v28 = vadd.f32 %v1816_v37, %v526_v18  ;;  %v886_v29 = vadd.f32 %v1816_v37, %v566_v19 }
  0xdc   :  { %vm965_vm7 = vcmp.gt.f32.partialorder %v901_v16, 0.0  ;;  %v1029_v20 = vmul.f32 0.2, %v901_v16  ;;  %vm981_vm8 = vcmp.gt.f32.partialorder %v917_v17, 0.0  ;;  %v1045_v21 = vmul.f32 0.2, %v917_v17 }
  0xdd   :  { %v998_v34 = vmul.f32 0.2, %v870_v28  ;;  %v1014_v35 = vmul.f32 0.2, %v886_v29  ;;  %vm934_vm9 = vcmp.gt.f32.partialorder %v870_v28, 0.0  ;;  %vm950_vm10 = vcmp.gt.f32.partialorder %v886_v29, 0.0 }
  0xde   :  { %v1093_v24 = vsel %vm965_vm7, %v901_v16, %v1029_v20  ;;  %v1109_v25 = vsel %vm981_vm8, %v917_v17, %v1045_v21 }
  0xdf   :  { %v1558_v26 = vpack.c.bf16 %v1093_v24, %v1092_v22  ;;  %v1598_v27 = vpack.c.bf16 %v1109_v25, %v1108_v23  ;;  %v1062_v43 = vsel %vm934_vm9, %v870_v28, %v998_v34  ;;  %v1078_v44 = vsel %vm950_vm10, %v886_v29, %v1014_v35 }
  0xe1   :  { %1634 = vst [vmem:[%s1981_s3 + $0xa0] sm:$0xff] %v1558_v26   ;;  %v606_v30 = vpop.f32.mrf.mxu2  ;;  %v646_v31 = vpop.f32.mrf.mxu3 }
  0xe2   :  { %1642 = vst [vmem:[%s1981_s3 + $0xe0] sm:$0xff] %v1598_v27   ;;  %v528_v32 = vpop.f32.mrf.mxu0  ;;  %v568_v33 = vpop.f32.mrf.mxu1  ;;  %v902_v41 = vadd.f32 %v1816_v37, %v606_v30  ;;  %v918_v42 = vadd.f32 %v1816_v37, %v646_v31 }
  0xe3   :  { %v871_v36 = vadd.f32 %v1816_v37, %v528_v32  ;;  %v887_v38 = vadd.f32 %v1816_v37, %v568_v33 }
  0xe4   :  { %v1030_v51 = vmul.f32 0.2, %v902_v41  ;;  %v1046_v52 = vmul.f32 0.2, %v918_v42  ;;  %vm966_vm13 = vcmp.gt.f32.partialorder %v902_v41, 0.0  ;;  %vm982_vm14 = vcmp.gt.f32.partialorder %v918_v42, 0.0 }
  0xe5   :  { %vm935_vm11 = vcmp.gt.f32.partialorder %v871_v36, 0.0  ;;  %v999_v39 = vmul.f32 0.2, %v871_v36  ;;  %vm951_vm12 = vcmp.gt.f32.partialorder %v887_v38, 0.0  ;;  %v1015_v40 = vmul.f32 0.2, %v887_v38 }
  0xe6   :  { %v1094_v59 = vsel %vm966_vm13, %v902_v41, %v1030_v51  ;;  %v1110_v60 = vsel %vm982_vm14, %v918_v42, %v1046_v52 }
  0xe7   :  { %v1063_v45 = vsel %vm935_vm11, %v871_v36, %v999_v39  ;;  %v1079_v46 = vsel %vm951_vm12, %v887_v38, %v1015_v40 }
  0xe8   :  { %v1483_v47 = vpack.c.bf16 %v1063_v45, %v1062_v43  ;;  %v1523_v48 = vpack.c.bf16 %v1079_v46, %v1078_v44 }
  0xe9   :  { %v608_v49 = vpop.f32.mrf.mxu2  ;;  %v648_v50 = vpop.f32.mrf.mxu3 }
  0xea   :  { %1619 = vst [vmem:[%s1981_s3 + $0x28] sm:$0xff] %v1483_v47   ;;  %v903_v53 = vadd.f32 %v1816_v37, %v608_v49  ;;  %v919_v54 = vadd.f32 %v1816_v37, %v648_v50  ;;  %v531_v55 = vpop.f32.mrf.mxu0  ;;  %v571_v56 = vpop.f32.mrf.mxu1 }
  0xeb   :  { %1627 = vst [vmem:[%s1981_s3 + $0x68] sm:$0xff] %v1523_v48   ;;  %v872_v1 = vadd.f32 %v1816_v37, %v531_v55  ;;  %v888_v2 = vadd.f32 %v1816_v37, %v571_v56 }
  0xec   :  { %vm967_vm15 = vcmp.gt.f32.partialorder %v903_v53, 0.0  ;;  %v1031_v57 = vmul.f32 0.2, %v903_v53  ;;  %vm983_vm0 = vcmp.gt.f32.partialorder %v919_v54, 0.0  ;;  %v1047_v58 = vmul.f32 0.2, %v919_v54 }
  0xed   :  { %v1000_v7 = vmul.f32 0.2, %v872_v1  ;;  %v1016_v8 = vmul.f32 0.2, %v888_v2  ;;  %vm936_vm1 = vcmp.gt.f32.partialorder %v872_v1, 0.0  ;;  %vm952_vm2 = vcmp.gt.f32.partialorder %v888_v2, 0.0 }
  0xee   :  { %v1095_v61 = vsel %vm967_vm15, %v903_v53, %v1031_v57  ;;  %v1111_v62 = vsel %vm983_vm0, %v919_v54, %v1047_v58 }
  0xef   :  { %v1563_v63 = vpack.c.bf16 %v1095_v61, %v1094_v59  ;;  %v1603_v0 = vpack.c.bf16 %v1111_v62, %v1110_v60  ;;  %v1064_v15 = vsel %vm936_vm1, %v872_v1, %v1000_v7  ;;  %v1080_v16 = vsel %vm952_vm2, %v888_v2, %v1016_v8 }
  0xf1   :  { %1635 = vst [vmem:[%s1981_s3 + $0xa8] sm:$0xff] %v1563_v63   ;;  %v611_v3 = vpop.f32.mrf.mxu2  ;;  %v651_v4 = vpop.f32.mrf.mxu3 }
  0xf2   :  { %1643 = vst [vmem:[%s1981_s3 + $0xe8] sm:$0xff] %v1603_v0   ;;  %v533_v5 = vpop.f32.mrf.mxu0  ;;  %v573_v6 = vpop.f32.mrf.mxu1  ;;  %v904_v13 = vadd.f32 %v1816_v37, %v611_v3  ;;  %v920_v14 = vadd.f32 %v1816_v37, %v651_v4 }
  0xf3   :  { %v873_v9 = vadd.f32 %v1816_v37, %v533_v5  ;;  %v889_v10 = vadd.f32 %v1816_v37, %v573_v6 }
  0xf4   :  { %v1032_v23 = vmul.f32 0.2, %v904_v13  ;;  %v1048_v24 = vmul.f32 0.2, %v920_v14  ;;  %vm968_vm5 = vcmp.gt.f32.partialorder %v904_v13, 0.0  ;;  %vm984_vm6 = vcmp.gt.f32.partialorder %v920_v14, 0.0 }
  0xf5   :  { %vm937_vm3 = vcmp.gt.f32.partialorder %v873_v9, 0.0  ;;  %v1001_v11 = vmul.f32 0.2, %v873_v9  ;;  %vm953_vm4 = vcmp.gt.f32.partialorder %v889_v10, 0.0  ;;  %v1017_v12 = vmul.f32 0.2, %v889_v10 }
  0xf6   :  { %v1096_v31 = vsel %vm968_vm5, %v904_v13, %v1032_v23  ;;  %v1112_v32 = vsel %vm984_vm6, %v920_v14, %v1048_v24 }
  0xf7   :  { %v1065_v17 = vsel %vm937_vm3, %v873_v9, %v1001_v11  ;;  %v1081_v18 = vsel %vm953_vm4, %v889_v10, %v1017_v12 }
  0xf8   :  { %v1488_v19 = vpack.c.bf16 %v1065_v17, %v1064_v15  ;;  %v1528_v20 = vpack.c.bf16 %v1081_v18, %v1080_v16 }
  0xf9   :  { %v613_v21 = vpop.f32.mrf.mxu2  ;;  %v653_v22 = vpop.f32.mrf.mxu3 }
  0xfa   :  { %1620 = vst [vmem:[%s1981_s3 + $0x30] sm:$0xff] %v1488_v19   ;;  %v905_v25 = vadd.f32 %v1816_v37, %v613_v21  ;;  %v921_v26 = vadd.f32 %v1816_v37, %v653_v22  ;;  %v536_v27 = vpop.f32.mrf.mxu0  ;;  %v576_v28 = vpop.f32.mrf.mxu1 }
  0xfb   :  { %1628 = vst [vmem:[%s1981_s3 + $0x70] sm:$0xff] %v1528_v20   ;;  %v874_v38 = vadd.f32 %v1816_v37, %v536_v27  ;;  %v890_v39 = vadd.f32 %v1816_v37, %v576_v28 }
  0xfc   :  { %vm969_vm7 = vcmp.gt.f32.partialorder %v905_v25, 0.0  ;;  %v1033_v29 = vmul.f32 0.2, %v905_v25  ;;  %vm985_vm8 = vcmp.gt.f32.partialorder %v921_v26, 0.0  ;;  %v1049_v30 = vmul.f32 0.2, %v921_v26 }
  0xfd   :  { %v1002_v44 = vmul.f32 0.2, %v874_v38  ;;  %v1018_v45 = vmul.f32 0.2, %v890_v39  ;;  %vm938_vm9 = vcmp.gt.f32.partialorder %v874_v38, 0.0  ;;  %vm954_vm10 = vcmp.gt.f32.partialorder %v890_v39, 0.0 }
  0xfe   :  { %v1097_v33 = vsel %vm969_vm7, %v905_v25, %v1033_v29  ;;  %v1113_v34 = vsel %vm985_vm8, %v921_v26, %v1049_v30 }
  0xff   :  { %v1568_v35 = vpack.c.bf16 %v1097_v33, %v1096_v31  ;;  %v1608_v36 = vpack.c.bf16 %v1113_v34, %v1112_v32  ;;  %v1066_v52 = vsel %vm938_vm9, %v874_v38, %v1002_v44  ;;  %v1082_v53 = vsel %vm954_vm10, %v890_v39, %v1018_v45 }
 0x101   :  { %1636 = vst [vmem:[%s1981_s3 + $0xb0] sm:$0xff] %v1568_v35   ;;  %v616_v40 = vpop.f32.mrf.mxu2  ;;  %v656_v41 = vpop.f32.mrf.mxu3 }
 0x102   :  { %1644 = vst [vmem:[%s1981_s3 + $0xf0] sm:$0xff] %v1608_v36   ;;  %v538_v42 = vpop.f32.mrf.mxu0  ;;  %v578_v43 = vpop.f32.mrf.mxu1  ;;  %v906_v50 = vadd.f32 %v1816_v37, %v616_v40  ;;  %v922_v51 = vadd.f32 %v1816_v37, %v656_v41 }
 0x103   :  { %v875_v46 = vadd.f32 %v1816_v37, %v538_v42  ;;  %v891_v47 = vadd.f32 %v1816_v37, %v578_v43 }
 0x104   :  { %v1034_v60 = vmul.f32 0.2, %v906_v50  ;;  %v1050_v61 = vmul.f32 0.2, %v922_v51  ;;  %vm970_vm13 = vcmp.gt.f32.partialorder %v906_v50, 0.0  ;;  %vm986_vm14 = vcmp.gt.f32.partialorder %v922_v51, 0.0 }
 0x105   :  { %vm939_vm11 = vcmp.gt.f32.partialorder %v875_v46, 0.0  ;;  %v1003_v48 = vmul.f32 0.2, %v875_v46  ;;  %vm955_vm12 = vcmp.gt.f32.partialorder %v891_v47, 0.0  ;;  %v1019_v49 = vmul.f32 0.2, %v891_v47 }
 0x106   :  { %v1098_v2 = vsel %vm970_vm13, %v906_v50, %v1034_v60  ;;  %v1114_v3 = vsel %vm986_vm14, %v922_v51, %v1050_v61 }
 0x107   :  { %v1067_v54 = vsel %vm939_vm11, %v875_v46, %v1003_v48  ;;  %v1083_v55 = vsel %vm955_vm12, %v891_v47, %v1019_v49 }
 0x108   :  { %v1493_v56 = vpack.c.bf16 %v1067_v54, %v1066_v52  ;;  %v1533_v57 = vpack.c.bf16 %v1083_v55, %v1082_v53 }
 0x109   :  { %v618_v58 = vpop.f32.mrf.mxu2  ;;  %v658_v59 = vpop.f32.mrf.mxu3 }
 0x10a   :  { %1621 = vst [vmem:[%s1981_s3 + $0x38] sm:$0xff] %v1493_v56   ;;  %v907_v62 = vadd.f32 %v1816_v37, %v618_v58  ;;  %v923_v63 = vadd.f32 %v1816_v37, %v658_v59 }
 0x10b   :  { %1629 = vst [vmem:[%s1981_s3 + $0x78] sm:$0xff] %v1533_v57  }
 0x10c   :  { %vm971_vm15 = vcmp.gt.f32.partialorder %v907_v62, 0.0  ;;  %v1035_v0 = vmul.f32 0.2, %v907_v62  ;;  %vm987_vm0 = vcmp.gt.f32.partialorder %v923_v63, 0.0  ;;  %v1051_v1 = vmul.f32 0.2, %v923_v63 }
 0x10e   :  { %v1099_v4 = vsel %vm971_vm15, %v907_v62, %v1035_v0  ;;  %v1115_v5 = vsel %vm987_vm0, %v923_v63, %v1051_v1 }
 0x10f   :  { %v1573_v6 = vpack.c.bf16 %v1099_v4, %v1098_v2  ;;  %v1613_v7 = vpack.c.bf16 %v1115_v5, %v1114_v3 }
 0x111   :  { %1637 = vst [vmem:[%s1981_s3 + $0xb8] sm:$0xff] %v1573_v6  }
 0x112   :  { %1645 = vst [vmem:[%s1981_s3 + $0xf8] sm:$0xff] %v1613_v7  }

// kernel: discriminator_forward_pallas.6
= control target key start
LH: loop header
LB: loop body
LE: loop exit
PB: predicated region body
PF: predicated region fallthrough
CT: control target
= control target key end

     0   :  { %s2085_s18 = smov 0   ;;  %s2087_s19 = smov 0   ;;  %s2474_s0 = inlined_call_operand.vmem [shape: bf16[2,64,1024], index: 0, kind: input, shape index: {}]   ;;  %s2475_s1 = inlined_call_operand.vmem [shape: bf16[1024,128], index: 1, kind: input, shape index: {}]   ;;  %s2476_s2 = inlined_call_operand.vmem [shape: f32[1,128], index: 2, kind: input, shape index: {}]   ;;  %s2477_s3 = inlined_call_operand.vmem [shape: f32[1,128], index: 3, kind: input, shape index: {}]   ;;  %s2478_s4 = inlined_call_operand.vmem [shape: f32[1,128], index: 4, kind: input, shape index: {}]   ;;  %s2479_s5 = inlined_call_operand.vmem [shape: bf16[2,64,128], index: 5, kind: output, shape index: {}]  }
   0x1   :  { %s2089_s20 = smov 0  }
   0x2 LB: > { %s27_s21 = sadd.s32 1, %s2049_s19  ;;  %p1490_p0 = scmp.ge.s32.totalorder %s2053_s20, 1  ;;  %s2053_s20 = sphi %s2089_s20, %s15_s20   ;;  %s2049_s19 = sphi %s2087_s19, %s2481_s19   ;;  %s2045_s18 = sphi %s2085_s18, %s2480_s18  }
   0x3   : > { %p29_p1 = scmp.ge.s32.totalorder %s27_s21, 2  ;;  %p217_p2 = scmp.lt.s32.totalorder %s2053_s20, 3 }
   0x5   : > { %s2483_s21 = smov (%p29_p1, %s27_s21), 0  ;;  %p218_p3 = pnand %p1490_p0, %p217_p2 }
   0x6   : > { %p255_p4 = scmp.lt.s32.totalorder (!%p218_p3), %s2045_s18, 1 }
   0x7   : > { %221 = sbr.rel (%p218_p3) target bundleno = 364 (0x16c), region = 40 }
   0xc   : > { %v1922_v0 = vld [vmem:[%s2475_s1 + $0x38] sm:$0xff]  ;;  %v1921_v4 = vld [vmem:[%s2475_s1 + $0x30] sm:$0xff]  ;;  %v1920_v8 = vld [vmem:[%s2475_s1 + $0x28] sm:$0xff]  ;;  %s2485_s18 = smov (!%p255_p4, %s2045_s18), 1 }
   0xd   : > { %v1930_v1 = vld [vmem:[%s2475_s1 + $0x78] sm:$0xff]  ;;  %999 = vmatpush.bf16.msra.mxu0 %v1922_v0  ;;  %v1929_v5 = vld [vmem:[%s2475_s1 + $0x70] sm:$0xff]  ;;  %v1928_v9 = vld [vmem:[%s2475_s1 + $0x68] sm:$0xff]  ;;  %s1881_s28 = sshll.u32 %s2485_s18, 8  ;;  %s1882_s12 = sshll.u32 %s2485_s18, 5 }
   0xe   : > { %v1938_v2 = vld [vmem:[%s2475_s1 + $0xb8] sm:$0xff]  ;;  %1028 = vmatpush.bf16.msra.mxu1 %v1930_v1  ;;  %v1937_v6 = vld [vmem:[%s2475_s1 + $0xb0] sm:$0xff]  ;;  %v1936_v10 = vld [vmem:[%s2475_s1 + $0xa8] sm:$0xff]  ;;  %s2191_s10 = scalar_lea.vmem %s2474_s0, %s1881_s28  ;;  %s274_s18 = scalar_lea.vmem %s2479_s5, %s1882_s12 }
   0xf   : > { %v1946_v3 = vld [vmem:[%s2475_s1 + $0xf8] sm:$0xff]  ;;  %1057 = vmatpush.bf16.msra.mxu2 %v1938_v2  ;;  %v1945_v7 = vld [vmem:[%s2475_s1 + $0xf0] sm:$0xff]  ;;  %v1944_v11 = vld [vmem:[%s2475_s1 + $0xe8] sm:$0xff] }
  0x10   : > { %1086 = vmatpush.bf16.msra.mxu3 %v1946_v3  ;;  %v1919_v12 = vld [vmem:[%s2475_s1 + $0x20] sm:$0xff]  ;;  %v1918_v16 = vld [vmem:[%s2475_s1 + $0x18] sm:$0xff]  ;;  %v1917_v20 = vld [vmem:[%s2475_s1 + $0x10] sm:$0xff] }
  0x11   : > { %1000 = vmatpush.bf16.msra.mxu0 %v1921_v4  ;;  %v1927_v13 = vld [vmem:[%s2475_s1 + $0x60] sm:$0xff]  ;;  %v1926_v17 = vld [vmem:[%s2475_s1 + $0x58] sm:$0xff]  ;;  %v1925_v21 = vld [vmem:[%s2475_s1 + $0x50] sm:$0xff] }
  0x12   : > { %1029 = vmatpush.bf16.msra.mxu1 %v1929_v5  ;;  %v1935_v14 = vld [vmem:[%s2475_s1 + $0xa0] sm:$0xff]  ;;  %v1934_v18 = vld [vmem:[%s2475_s1 + $0x98] sm:$0xff]  ;;  %v1933_v22 = vld [vmem:[%s2475_s1 + $0x90] sm:$0xff] }
  0x13   : > { %1058 = vmatpush.bf16.msra.mxu2 %v1937_v6  ;;  %v1943_v15 = vld [vmem:[%s2475_s1 + $0xe0] sm:$0xff]  ;;  %v1942_v19 = vld [vmem:[%s2475_s1 + $0xd8] sm:$0xff]  ;;  %v1941_v23 = vld [vmem:[%s2475_s1 + $0xd0] sm:$0xff] }
  0x14   : > { %1087 = vmatpush.bf16.msra.mxu3 %v1945_v7  ;;  %v1916_v24 = vld [vmem:[%s2475_s1 + $0x8] sm:$0xff]  ;;  %v1915_v28 = vld [vmem:[%s2475_s1] sm:$0xff]  ;;  %v1970_v40 = vld [vmem:[%s2475_s1 + $0x1b8] sm:$0xff] }
  0x15   : > { %1001 = vmatpush.bf16.msra.mxu0 %v1920_v8  ;;  %v1924_v25 = vld [vmem:[%s2475_s1 + $0x48] sm:$0xff]  ;;  %v1923_v29 = vld [vmem:[%s2475_s1 + $0x40] sm:$0xff]  ;;  %v1954_v41 = vld [vmem:[%s2475_s1 + $0x138] sm:$0xff] }
  0x16   : > { %1030 = vmatpush.bf16.msra.mxu1 %v1928_v9  ;;  %v1932_v26 = vld [vmem:[%s2475_s1 + $0x88] sm:$0xff]  ;;  %v1931_v30 = vld [vmem:[%s2475_s1 + $0x80] sm:$0xff]  ;;  %v1978_v46 = vld [vmem:[%s2475_s1 + $0x1f8] sm:$0xff] }
  0x17   : > { %1059 = vmatpush.bf16.msra.mxu2 %v1936_v10  ;;  %v1940_v27 = vld [vmem:[%s2475_s1 + $0xc8] sm:$0xff]  ;;  %v1939_v31 = vld [vmem:[%s2475_s1 + $0xc0] sm:$0xff]  ;;  %v1962_v47 = vld [vmem:[%s2475_s1 + $0x178] sm:$0xff] }
  0x18   : > { %1088 = vmatpush.bf16.msra.mxu3 %v1944_v11  ;;  %v1497_v32 = vld [vmem:[%s2191_s10] sm:$0xf]  ;;  %v1883_v34 = vld [vmem:[%s2191_s10 + $0x4] sm:$0xf]  ;;  %v1505_v36 = vld [vmem:[%s2191_s10 + $0x8] sm:$0xf] }
  0x19   : > { %1002 = vmatpush.bf16.msra.mxu0 %v1919_v12  ;;  %v1887_v33 = vld [vmem:[%s2191_s10 + $0x1c] sm:$0xf0]  ;;  %v1499_v35 = vld [vmem:[%s2191_s10 + $0x20] sm:$0xf0]  ;;  %v1888_v37 = vld [vmem:[%s2191_s10 + $0x24] sm:$0xf0] }
  0x1a   : > { %1031 = vmatpush.bf16.msra.mxu1 %v1927_v13  ;;  %v1884_v38 = vld [vmem:[%s2191_s10 + $0xc] sm:$0xf]  ;;  %v1498_v42 = vor.u32 %v1887_v33, %v1497_v32  ;;  %v1502_v43 = vor.u32 %v1883_v34, %v1499_v35  ;;  %v1506_v44 = vor.u32 %v1888_v37, %v1505_v36  ;;  %v1969_v48 = vld [vmem:[%s2475_s1 + $0x1b0] sm:$0xff]  ;;  %v1529_v56 = vld [vmem:[%s2191_s10 + $0x40] sm:$0xf] }
  0x1b   : > { %1060 = vmatpush.bf16.msra.mxu2 %v1935_v14  ;;  %v1507_v39 = vld [vmem:[%s2191_s10 + $0x28] sm:$0xf0]  ;;  %v1953_v49 = vld [vmem:[%s2475_s1 + $0x130] sm:$0xff]  ;;  %v1967_v57 = vld [vmem:[%s2475_s1 + $0x1a0] sm:$0xff] }
  0x1c   : > { %1089 = vmatpush.bf16.msra.mxu3 %v1943_v15  ;;  %v1510_v45 = vor.u32 %v1884_v38, %v1507_v39  ;;  %v1977_v50 = vld [vmem:[%s2475_s1 + $0x1f0] sm:$0xff]  ;;  %v1968_v52 = vld [vmem:[%s2475_s1 + $0x1a8] sm:$0xff]  ;;  %v1951_v58 = vld [vmem:[%s2475_s1 + $0x120] sm:$0xff] }
  0x1d   : > { %1003 = vmatpush.bf16.msra.mxu0 %v1918_v16  ;;  %v1961_v51 = vld [vmem:[%s2475_s1 + $0x170] sm:$0xff]  ;;  %v1952_v53 = vld [vmem:[%s2475_s1 + $0x128] sm:$0xff]  ;;  %v1895_v59 = vld [vmem:[%s2191_s10 + $0x5c] sm:$0xf0] }
  0x1e   : > { %1032 = vmatpush.bf16.msra.mxu1 %v1926_v17  ;;  %v1976_v54 = vld [vmem:[%s2475_s1 + $0x1e8] sm:$0xff]  ;;  %v1891_v60 = vld [vmem:[%s2191_s10 + $0x44] sm:$0xf]  ;;  %v1966_v4 = vld [vmem:[%s2475_s1 + $0x198] sm:$0xff]  ;;  %v1530_v6 = vor.u32 %v1895_v59, %v1529_v56 }
  0x1f   : > { %1061 = vmatpush.bf16.msra.mxu2 %v1934_v18  ;;  %v1960_v55 = vld [vmem:[%s2475_s1 + $0x168] sm:$0xff]  ;;  %v1531_v61 = vld [vmem:[%s2191_s10 + $0x60] sm:$0xf0]  ;;  %v1950_v5 = vld [vmem:[%s2475_s1 + $0x118] sm:$0xff] }
  0x20   : > { %1090 = vmatpush.bf16.msra.mxu3 %v1942_v19  ;;  %v1537_v62 = vld [vmem:[%s2191_s10 + $0x48] sm:$0xf]  ;;  %v1892_v0 = vld [vmem:[%s2191_s10 + $0x4c] sm:$0xf]  ;;  %v1975_v2 = vld [vmem:[%s2475_s1 + $0x1e0] sm:$0xff]  ;;  %v1534_v7 = vor.u32 %v1891_v60, %v1531_v61 }
  0x21   : > { %1004 = vmatpush.bf16.msra.mxu0 %v1917_v20  ;;  %v1896_v63 = vld [vmem:[%s2191_s10 + $0x64] sm:$0xf0]  ;;  %v1539_v1 = vld [vmem:[%s2191_s10 + $0x68] sm:$0xf0]  ;;  %v1959_v3 = vld [vmem:[%s2475_s1 + $0x160] sm:$0xff] }
  0x22   : > { %1033 = vmatpush.bf16.msra.mxu1 %v1925_v21  ;;  %v1538_v8 = vor.u32 %v1896_v63, %v1537_v62  ;;  %v1542_v9 = vor.u32 %v1892_v0, %v1539_v1  ;;  %v1974_v10 = vld [vmem:[%s2475_s1 + $0x1d8] sm:$0xff]  ;;  %v1965_v12 = vld [vmem:[%s2475_s1 + $0x190] sm:$0xff]  ;;  %v1964_v16 = vld [vmem:[%s2475_s1 + $0x188] sm:$0xff] }
  0x23   : > { %1062 = vmatpush.bf16.msra.mxu2 %v1933_v22  ;;  %v1958_v11 = vld [vmem:[%s2475_s1 + $0x158] sm:$0xff]  ;;  %v1949_v13 = vld [vmem:[%s2475_s1 + $0x110] sm:$0xff]  ;;  %v1948_v17 = vld [vmem:[%s2475_s1 + $0x108] sm:$0xff] }
  0x24   : > { %1091 = vmatpush.bf16.msra.mxu3 %v1941_v23  ;;  %v1973_v14 = vld [vmem:[%s2475_s1 + $0x1d0] sm:$0xff]  ;;  %v1972_v18 = vld [vmem:[%s2475_s1 + $0x1c8] sm:$0xff]  ;;  %v1561_v20 = vld [vmem:[%s2191_s10 + $0x80] sm:$0xf] }
  0x25   : > { %1005 = vmatpush.bf16.msra.mxu0 %v1916_v24  ;;  %v1957_v15 = vld [vmem:[%s2475_s1 + $0x150] sm:$0xff]  ;;  %v1956_v19 = vld [vmem:[%s2475_s1 + $0x148] sm:$0xff]  ;;  %v1963_v21 = vld [vmem:[%s2475_s1 + $0x180] sm:$0xff] }
  0x26   : > { %1034 = vmatpush.bf16.msra.mxu1 %v1924_v25  ;;  %v1947_v22 = vld [vmem:[%s2475_s1 + $0x100] sm:$0xff]  ;;  %v1545_v60 = vld [vmem:[%s2191_s10 + $0x50] sm:$0xf]  ;;  %v1893_v62 = vld [vmem:[%s2191_s10 + $0x54] sm:$0xf] }
  0x27   : > { %1063 = vmatpush.bf16.msra.mxu2 %v1932_v26  ;;  %v1903_v23 = vld [vmem:[%s2191_s10 + $0x9c] sm:$0xf0]  ;;  %v1899_v24 = vld [vmem:[%s2191_s10 + $0x84] sm:$0xf]  ;;  %v1569_v26 = vld [vmem:[%s2191_s10 + $0x88] sm:$0xf] }
  0x28   : > { %1092 = vmatpush.bf16.msra.mxu3 %v1940_v27  ;;  %v1563_v25 = vld [vmem:[%s2191_s10 + $0xa0] sm:$0xf0]  ;;  %v1904_v27 = vld [vmem:[%s2191_s10 + $0xa4] sm:$0xf0]  ;;  %v1562_v32 = vor.u32 %v1903_v23, %v1561_v20  ;;  %v1593_v36 = vld [vmem:[%s2191_s10 + $0xc0] sm:$0xf] }
  0x29   : > { %1006 = vmatpush.bf16.msra.mxu0 %v1915_v28  ;;  %v1900_v28 = vld [vmem:[%s2191_s10 + $0x8c] sm:$0xf]  ;;  %v1566_v33 = vor.u32 %v1899_v24, %v1563_v25  ;;  %v1570_v34 = vor.u32 %v1904_v27, %v1569_v26  ;;  %v1911_v37 = vld [vmem:[%s2191_s10 + $0xdc] sm:$0xf0]  ;;  %v1907_v38 = vld [vmem:[%s2191_s10 + $0xc4] sm:$0xf] }
  0x2a   : > { %1035 = vmatpush.bf16.msra.mxu1 %v1923_v29  ;;  %v1571_v29 = vld [vmem:[%s2191_s10 + $0xa8] sm:$0xf0]  ;;  %v1595_v39 = vld [vmem:[%s2191_s10 + $0xe0] sm:$0xf0]  ;;  %v1897_v61 = vld [vmem:[%s2191_s10 + $0x6c] sm:$0xf0] }
  0x2b   : > { %1064 = vmatpush.bf16.msra.mxu2 %v1931_v30  ;;  %v1971_v30 = vld [vmem:[%s2475_s1 + $0x1c0] sm:$0xff]  ;;  %v1574_v35 = vor.u32 %v1900_v28, %v1571_v29  ;;  %v1547_v63 = vld [vmem:[%s2191_s10 + $0x70] sm:$0xf0]  ;;  %v1553_v0 = vld [vmem:[%s2191_s10 + $0x58] sm:$0xf] }
  0x2c   : > { %1093 = vmatpush.bf16.msra.mxu3 %v1939_v31  ;;  %1007 = vmatmul.bf16.vlgmr.msra.gmra.mxu0 %v1498_v42  ;;  %v1955_v31 = vld [vmem:[%s2475_s1 + $0x140] sm:$0xff]  ;;  %v1908_v42 = vld [vmem:[%s2191_s10 + $0xcc] sm:$0xf]  ;;  %v1898_v1 = vld [vmem:[%s2191_s10 + $0x74] sm:$0xf0] }
  0x2d   : > { %1115 = vmatpush.bf16.msrb.mxu0 %v1954_v41  ;;  %1036 = vmatmul.bf16.vlgmr.msra.gmra.mxu1 %v1502_v43  ;;  %v1912_v41 = vld [vmem:[%s2191_s10 + $0xe4] sm:$0xf0]  ;;  %v1603_v43 = vld [vmem:[%s2191_s10 + $0xe8] sm:$0xf0]  ;;  %v1609_v20 = vld [vmem:[%s2191_s10 + $0xd0] sm:$0xf] }
  0x2e   : > { %1065 = vmatmul.bf16.vlgmr.msra.gmra.mxu2 %v1506_v44  ;;  %1144 = vmatpush.bf16.msrb.mxu1 %v1962_v47  ;;  %v1594_v44 = vor.u32 %v1911_v37, %v1593_v36  ;;  %v1606_v47 = vor.u32 %v1908_v42, %v1603_v43  ;;  %v1611_v23 = vld [vmem:[%s2191_s10 + $0xf0] sm:$0xf0]  ;;  %v1617_v24 = vld [vmem:[%s2191_s10 + $0xd8] sm:$0xf]  ;;  %v1910_v26 = vld [vmem:[%s2191_s10 + $0xdc] sm:$0xf] }
  0x2f   : > { %1173 = vmatpush.bf16.msrb.mxu2 %v1970_v40  ;;  %1094 = vmatmul.bf16.vlgmr.msra.gmra.mxu3 %v1510_v45  ;;  %v1601_v40 = vld [vmem:[%s2191_s10 + $0xc8] sm:$0xf]  ;;  %v1598_v45 = vor.u32 %v1907_v38, %v1595_v39  ;;  %v1914_v25 = vld [vmem:[%s2191_s10 + $0xf4] sm:$0xf0]  ;;  %v1619_v27 = vld [vmem:[%s2191_s10 + $0xf8] sm:$0xf0] }
  0x30   : > { %1202 = vmatpush.bf16.msrb.mxu3 %v1978_v46  ;;  %v1602_v46 = vor.u32 %v1912_v41, %v1601_v40 }
  0x31   : > { %1116 = vmatpush.bf16.msrb.mxu0 %v1953_v49  ;;  %v1889_v49 = vld [vmem:[%s2191_s10 + $0x2c] sm:$0xf0] }
  0x32   : > { %1145 = vmatpush.bf16.msrb.mxu1 %v1961_v51  ;;  %v1515_v51 = vld [vmem:[%s2191_s10 + $0x30] sm:$0xf0] }
  0x33   : > { %1174 = vmatpush.bf16.msrb.mxu2 %v1969_v48  ;;  %v1513_v48 = vld [vmem:[%s2191_s10 + $0x10] sm:$0xf] }
  0x34   : > { %1203 = vmatpush.bf16.msrb.mxu3 %v1977_v50  ;;  %v1885_v50 = vld [vmem:[%s2191_s10 + $0x14] sm:$0xf]  ;;  %v1514_v56 = vor.u32 %v1889_v49, %v1513_v48 }
  0x35   : > { %1117 = vmatpush.bf16.msrb.mxu0 %v1952_v53  ;;  %v1890_v53 = vld [vmem:[%s2191_s10 + $0x34] sm:$0xf0] }
  0x36   : > { %1146 = vmatpush.bf16.msrb.mxu1 %v1960_v55  ;;  %v1523_v55 = vld [vmem:[%s2191_s10 + $0x38] sm:$0xf0] }
  0x37   : > { %1175 = vmatpush.bf16.msrb.mxu2 %v1968_v52  ;;  %v1521_v52 = vld [vmem:[%s2191_s10 + $0x18] sm:$0xf] }
  0x38   : > { %1204 = vmatpush.bf16.msrb.mxu3 %v1976_v54  ;;  %v1886_v54 = vld [vmem:[%s2191_s10 + $0x1c] sm:$0xf] }
  0x39   : > { %1118 = vmatpush.bf16.msrb.mxu0 %v1951_v58  ;;  %v1522_v58 = vor.u32 %v1890_v53, %v1521_v52  ;;  %v1526_v59 = vor.u32 %v1886_v54, %v1523_v55 }
  0x3a   : > { %1147 = vmatpush.bf16.msrb.mxu1 %v1959_v3  ;;  %v1555_v3 = vld [vmem:[%s2191_s10 + $0x78] sm:$0xf0] }
  0x3b   : > { %1176 = vmatpush.bf16.msrb.mxu2 %v1967_v57  ;;  %v1518_v57 = vor.u32 %v1885_v50, %v1515_v51 }
  0x3c   : > { %1205 = vmatpush.bf16.msrb.mxu3 %v1975_v2  ;;  %1012 = vmatmul.bf16.gmra.mxu0 %v1530_v6  ;;  %v1894_v2 = vld [vmem:[%s2191_s10 + $0x5c] sm:$0xf]  ;;  %v1554_v6 = vor.u32 %v1898_v1, %v1553_v0 }
  0x3d   : > { %1119 = vmatpush.bf16.msrb.mxu0 %v1950_v5  ;;  %1041 = vmatmul.bf16.gmra.mxu1 %v1534_v7  ;;  %v1550_v5 = vor.u32 %v1893_v62, %v1547_v63  ;;  %v1558_v7 = vor.u32 %v1894_v2, %v1555_v3 }
  0x3e   : > { %1070 = vmatmul.bf16.gmra.mxu2 %v1538_v8  ;;  %1148 = vmatpush.bf16.msrb.mxu1 %v1958_v11  ;;  %v1577_v8 = vld [vmem:[%s2191_s10 + $0x90] sm:$0xf]  ;;  %v1579_v11 = vld [vmem:[%s2191_s10 + $0xb0] sm:$0xf0] }
  0x3f   : > { %1177 = vmatpush.bf16.msrb.mxu2 %v1966_v4  ;;  %1099 = vmatmul.bf16.gmra.mxu3 %v1542_v9  ;;  %v1546_v4 = vor.u32 %v1897_v61, %v1545_v60  ;;  %v1905_v9 = vld [vmem:[%s2191_s10 + $0xac] sm:$0xf0] }
  0x40   : > { %1206 = vmatpush.bf16.msrb.mxu3 %v1974_v10  ;;  %v1901_v10 = vld [vmem:[%s2191_s10 + $0x94] sm:$0xf] }
  0x41   : > { %1120 = vmatpush.bf16.msrb.mxu0 %v1949_v13  ;;  %v1906_v13 = vld [vmem:[%s2191_s10 + $0xb4] sm:$0xf0] }
  0x42   : > { %1149 = vmatpush.bf16.msrb.mxu1 %v1957_v15  ;;  %v1587_v15 = vld [vmem:[%s2191_s10 + $0xb8] sm:$0xf0] }
  0x43   : > { %1178 = vmatpush.bf16.msrb.mxu2 %v1965_v12  ;;  %v1585_v12 = vld [vmem:[%s2191_s10 + $0x98] sm:$0xf] }
  0x44   : > { %1207 = vmatpush.bf16.msrb.mxu3 %v1973_v14  ;;  %v1902_v14 = vld [vmem:[%s2191_s10 + $0x9c] sm:$0xf] }
  0x45   : > { %1121 = vmatpush.bf16.msrb.mxu0 %v1948_v17  ;;  %v1582_v17 = vor.u32 %v1901_v10, %v1579_v11 }
  0x46   : > { %1150 = vmatpush.bf16.msrb.mxu1 %v1956_v19  ;;  %v1590_v19 = vor.u32 %v1902_v14, %v1587_v15 }
  0x47   : > { %1179 = vmatpush.bf16.msrb.mxu2 %v1964_v16  ;;  %v1578_v16 = vor.u32 %v1905_v9, %v1577_v8 }
  0x48   : > { %1208 = vmatpush.bf16.msrb.mxu3 %v1972_v18  ;;  %v1586_v18 = vor.u32 %v1906_v13, %v1585_v12 }
  0x49   : > { %1122 = vmatpush.bf16.msrb.mxu0 %v1947_v22  ;;  %v1909_v22 = vld [vmem:[%s2191_s10 + $0xd4] sm:$0xf] }
  0x4a   : > { %1151 = vmatpush.bf16.msrb.mxu1 %v1955_v31  ;;  %v1614_v29 = vor.u32 %v1909_v22, %v1611_v23  ;;  %v1622_v31 = vor.u32 %v1910_v26, %v1619_v27 }
  0x4b   : > { %1180 = vmatpush.bf16.msrb.mxu2 %v1963_v21  ;;  %v1913_v21 = vld [vmem:[%s2191_s10 + $0xec] sm:$0xf0] }
  0x4c   : > { %1209 = vmatpush.bf16.msrb.mxu3 %v1971_v30  ;;  %1017 = vmatmul.bf16.gmra.mxu0 %v1562_v32  ;;  %v1610_v28 = vor.u32 %v1913_v21, %v1609_v20  ;;  %v1618_v30 = vor.u32 %v1914_v25, %v1617_v24 }
  0x4d   : > { %1046 = vmatmul.bf16.gmra.mxu1 %v1566_v33 }
  0x4e   : > { %1075 = vmatmul.bf16.gmra.mxu2 %v1570_v34 }
  0x4f   : > { %1104 = vmatmul.bf16.gmra.mxu3 %v1574_v35 }
  0x5c   : > { %1022 = vmatmul.bf16.gmra.mxu0 %v1594_v44 }
  0x5d   : > { %1051 = vmatmul.bf16.gmra.mxu1 %v1598_v45 }
  0x5e   : > { %1080 = vmatmul.bf16.gmra.mxu2 %v1602_v46 }
  0x5f   : > { %1109 = vmatmul.bf16.gmra.mxu3 %v1606_v47 }
  0x6c   : > { %1123 = vmatmul.bf16.vlgmr.msrb.gmra.mxu0 %v1514_v56 }
  0x6d   : > { %1152 = vmatmul.bf16.vlgmr.msrb.gmra.mxu1 %v1518_v57 }
  0x6e   : > { %1181 = vmatmul.bf16.vlgmr.msrb.gmra.mxu2 %v1522_v58 }
  0x6f   : > { %1210 = vmatmul.bf16.vlgmr.msrb.gmra.mxu3 %v1526_v59 }
  0x7c   : > { %1128 = vmatmul.bf16.gmra.mxu0 %v1546_v4 }
  0x7d   : > { %1157 = vmatmul.bf16.gmra.mxu1 %v1550_v5 }
  0x7e   : > { %1186 = vmatmul.bf16.gmra.mxu2 %v1554_v6 }
  0x7f   : > { %1215 = vmatmul.bf16.gmra.mxu3 %v1558_v7 }
  0x8c   : > { %1133 = vmatmul.bf16.gmra.mxu0 %v1578_v16 }
  0x8d   : > { %1162 = vmatmul.bf16.gmra.mxu1 %v1582_v17 }
  0x8e   : > { %1191 = vmatmul.bf16.gmra.mxu2 %v1586_v18 }
  0x8f   : > { %1220 = vmatmul.bf16.gmra.mxu3 %v1590_v19 }
  0x9c   : > { %1138 = vmatmul.bf16.gmra.mxu0 %v1610_v28 }
  0x9d   : > { %1167 = vmatmul.bf16.gmra.mxu1 %v1614_v29  ;;  %v2392_v29 = vld [vmem:[%s2476_s2] ss:$0 sm:$0xff] }
  0x9e   : > { %1196 = vmatmul.bf16.gmra.mxu2 %v1618_v30 }
  0x9f   : > { %1225 = vmatmul.bf16.gmra.mxu3 %v1622_v31 }
  0xa9   : > { %v1008_v32 = vpop.f32.mrf.mxu0 }
  0xaa   : > { %v1037_v33 = vpop.f32.mrf.mxu1 }
  0xab   : > { %v1038_v34 = vadd.f32 %v1037_v33, %v1008_v32 }
  0xb1   : > { %v1066_v35 = vpop.f32.mrf.mxu2  ;;  %v1010_v38 = vpop.f32.mrf.mxu0 }
  0xb2   : > { %v1095_v36 = vpop.f32.mrf.mxu3  ;;  %v1067_v37 = vadd.f32 %v1066_v35, %v1038_v34  ;;  %v1039_v39 = vpop.f32.mrf.mxu1 }
  0xb3   : > { %v1040_v40 = vadd.f32 %v1039_v39, %v1010_v38 }
  0xb4   : > { %v1096_v41 = vadd.f32 %v1095_v36, %v1067_v37 }
  0xb9   : > { %v1068_v42 = vpop.f32.mrf.mxu2  ;;  %v1013_v45 = vpop.f32.mrf.mxu0 }
  0xba   : > { %v1097_v43 = vpop.f32.mrf.mxu3  ;;  %v1069_v44 = vadd.f32 %v1068_v42, %v1040_v40  ;;  %v1042_v46 = vpop.f32.mrf.mxu1 }
  0xbb   : > { %v1043_v47 = vadd.f32 %v1042_v46, %v1013_v45 }
  0xbc   : > { %v1098_v48 = vadd.f32 %v1097_v43, %v1069_v44 }
  0xc1   : > { %v1071_v49 = vpop.f32.mrf.mxu2  ;;  %v1015_v52 = vpop.f32.mrf.mxu0 }
  0xc2   : > { %v1100_v50 = vpop.f32.mrf.mxu3  ;;  %v1072_v51 = vadd.f32 %v1071_v49, %v1043_v47  ;;  %v1044_v53 = vpop.f32.mrf.mxu1 }
  0xc3   : > { %v1045_v54 = vadd.f32 %v1044_v53, %v1015_v52 }
  0xc4   : > { %v1101_v55 = vadd.f32 %v1100_v50, %v1072_v51 }
  0xc9   : > { %v1073_v56 = vpop.f32.mrf.mxu2  ;;  %v1018_v59 = vpop.f32.mrf.mxu0 }
  0xca   : > { %v1102_v57 = vpop.f32.mrf.mxu3  ;;  %v1074_v58 = vadd.f32 %v1073_v56, %v1045_v54  ;;  %v1047_v60 = vpop.f32.mrf.mxu1 }
  0xcb   : > { %v1048_v61 = vadd.f32 %v1047_v60, %v1018_v59 }
  0xcc   : > { %v1103_v62 = vadd.f32 %v1102_v57, %v1074_v58 }
  0xd1   : > { %v1076_v63 = vpop.f32.mrf.mxu2  ;;  %v1020_v2 = vpop.f32.mrf.mxu0 }
  0xd2   : > { %v1105_v0 = vpop.f32.mrf.mxu3  ;;  %v1077_v1 = vadd.f32 %v1076_v63, %v1048_v61  ;;  %v1049_v3 = vpop.f32.mrf.mxu1 }
  0xd3   : > { %v1050_v4 = vadd.f32 %v1049_v3, %v1020_v2 }
  0xd4   : > { %v1106_v5 = vadd.f32 %v1105_v0, %v1077_v1 }
  0xd9   : > { %v1078_v6 = vpop.f32.mrf.mxu2  ;;  %v2371_v9 = vpop.f32.mrf.mxu0 }
  0xda   : > { %v1107_v7 = vpop.f32.mrf.mxu3  ;;  %v1079_v8 = vadd.f32 %v1078_v6, %v1050_v4  ;;  %v2373_v10 = vpop.f32.mrf.mxu1 }
  0xdc   : > { %v2375_v11 = vadd.f32 %v1107_v7, %v1079_v8 }
  0xe1   : > { %v2377_v12 = vpop.f32.mrf.mxu2  ;;  %v2381_v14 = vpop.f32.mrf.mxu0 }
  0xe2   : > { %v2379_v13 = vpop.f32.mrf.mxu3  ;;  %v2383_v15 = vpop.f32.mrf.mxu1 }
  0xe9   : > { %v2385_v16 = vpop.f32.mrf.mxu2  ;;  %v1124_v18 = vpop.f32.mrf.mxu0 }
  0xea   : > { %v2387_v17 = vpop.f32.mrf.mxu3  ;;  %v1153_v19 = vpop.f32.mrf.mxu1  ;;  %v1125_v20 = vadd.f32 %v1124_v18, %v1096_v41 }
  0xec   : > { %v1154_v23 = vadd.f32 %v1153_v19, %v1125_v20  ;;  %v1053_v20 = vadd.f32 %v2373_v10, %v2371_v9 }
  0xf1   : > { %v1182_v21 = vpop.f32.mrf.mxu2  ;;  %v1126_v24 = vpop.f32.mrf.mxu0 }
  0xf2   : > { %v1211_v22 = vpop.f32.mrf.mxu3  ;;  %v1155_v25 = vpop.f32.mrf.mxu1  ;;  %v1183_v26 = vadd.f32 %v1182_v21, %v1154_v23  ;;  %v1127_v27 = vadd.f32 %v1126_v24, %v1098_v48 }
  0xf4   : > { %v1212_v28 = vadd.f32 %v1211_v22, %v1183_v26  ;;  %v1156_v30 = vadd.f32 %v1155_v25, %v1127_v27  ;;  %v1082_v22 = vadd.f32 %v2377_v12, %v1053_v20 }
  0xf6   : > { %v2395_v36 = vadd.f32 %v2392_v29, %v1212_v28 }
  0xf8   : > { %v1283_v40 = vmul.f32 %v2395_v36, %v2395_v36 }
  0xf9   : > { %v1184_v31 = vpop.f32.mrf.mxu2  ;;  %v1129_v34 = vpop.f32.mrf.mxu0 }
  0xfa   : > { %v1213_v32 = vpop.f32.mrf.mxu3  ;;  %v1185_v33 = vadd.f32 %v1184_v31, %v1156_v30  ;;  %v1158_v35 = vpop.f32.mrf.mxu1  ;;  %v1130_v38 = vadd.f32 %v1129_v34, %v1101_v55  ;;  %v1111_v30 = vadd.f32 %v2379_v13, %v1082_v22 }
  0xfc   : > { %v1214_v37 = vadd.f32 %v1213_v32, %v1185_v33  ;;  %v1159_v43 = vadd.f32 %v1158_v35, %v1130_v38 }
  0xfe   : > { %v2398_v39 = vadd.f32 %v2392_v29, %v1214_v37 }
 0x100   : > { %v1270_v41 = vadd.f32 %v2398_v39, %v2395_v36  ;;  %v1284_v42 = vmul.f32 %v2398_v39, %v2398_v39 }
 0x101   : > { %v1187_v44 = vpop.f32.mrf.mxu2  ;;  %v1131_v48 = vpop.f32.mrf.mxu0 }
 0x102   : > { %v1216_v45 = vpop.f32.mrf.mxu3  ;;  %v1291_v46 = vadd.f32 %v1284_v42, %v1283_v40  ;;  %v1188_v47 = vadd.f32 %v1187_v44, %v1159_v43  ;;  %v1160_v49 = vpop.f32.mrf.mxu1  ;;  %v1132_v51 = vadd.f32 %v1131_v48, %v1103_v62 }
 0x104   : > { %v1217_v50 = vadd.f32 %v1216_v45, %v1188_v47  ;;  %v1161_v55 = vadd.f32 %v1160_v49, %v1132_v51 }
 0x106   : > { %v2407_v52 = vadd.f32 %v2392_v29, %v1217_v50 }
 0x108   : > { %v1271_v53 = vadd.f32 %v1270_v41, %v2407_v52  ;;  %v1285_v54 = vmul.f32 %v2407_v52, %v2407_v52 }
 0x109   : > { %v1189_v56 = vpop.f32.mrf.mxu2  ;;  %v1134_v60 = vpop.f32.mrf.mxu0 }
 0x10a   : > { %v1218_v57 = vpop.f32.mrf.mxu3  ;;  %v1292_v58 = vadd.f32 %v1291_v46, %v1285_v54  ;;  %v1190_v59 = vadd.f32 %v1189_v56, %v1161_v55  ;;  %v1163_v61 = vpop.f32.mrf.mxu1  ;;  %v1135_v0 = vadd.f32 %v1134_v60, %v1106_v5 }
 0x10c   : > { %v1219_v63 = vadd.f32 %v1218_v57, %v1190_v59  ;;  %v1164_v3 = vadd.f32 %v1163_v61, %v1135_v0 }
 0x10e   : > { %v2413_v1 = vadd.f32 %v2392_v29, %v1219_v63 }
 0x110   : > { %v1272_v62 = vadd.f32 %v1271_v53, %v2413_v1  ;;  %v1286_v2 = vmul.f32 %v2413_v1, %v2413_v1 }
 0x111   : > { %v1192_v4 = vpop.f32.mrf.mxu2  ;;  %v1136_v18 = vpop.f32.mrf.mxu0 }
 0x112   : > { %v1221_v6 = vpop.f32.mrf.mxu3  ;;  %v1293_v7 = vadd.f32 %v1292_v58, %v1286_v2  ;;  %v1193_v8 = vadd.f32 %v1192_v4, %v1164_v3  ;;  %v1165_v19 = vpop.f32.mrf.mxu1  ;;  %v1137_v5 = vadd.f32 %v1136_v18, %v2375_v11  ;;  %v1055_v11 = vadd.f32 %v2383_v15, %v2381_v14 }
 0x114   : > { %v1222_v21 = vadd.f32 %v1221_v6, %v1193_v8  ;;  %v1166_v26 = vadd.f32 %v1165_v19, %v1137_v5  ;;  %v1084_v34 = vadd.f32 %v2385_v16, %v1055_v11 }
 0x116   : > { %v2423_v23 = vadd.f32 %v2392_v29, %v1222_v21  ;;  %v1113_v42 = vadd.f32 %v2387_v17, %v1084_v34 }
 0x118   : > { %v1273_v24 = vadd.f32 %v1272_v62, %v2423_v23  ;;  %v1287_v25 = vmul.f32 %v2423_v23, %v2423_v23 }
 0x119   : > { %v1194_v27 = vpop.f32.mrf.mxu2  ;;  %v1139_v10 = vpop.f32.mrf.mxu0 }
 0x11a   : > { %v1223_v28 = vpop.f32.mrf.mxu3  ;;  %v1294_v31 = vadd.f32 %v1293_v7, %v1287_v25  ;;  %v1195_v9 = vadd.f32 %v1194_v27, %v1166_v26  ;;  %v1140_v32 = vadd.f32 %v1139_v10, %v1111_v30  ;;  %v1168_v33 = vpop.f32.mrf.mxu1 }
 0x11c   : > { %v1224_v12 = vadd.f32 %v1223_v28, %v1195_v9  ;;  %v1169_v13 = vadd.f32 %v1168_v33, %v1140_v32 }
 0x11e   : > { %v2433_v35 = vadd.f32 %v2392_v29, %v1224_v12 }
 0x120   : > { %v1274_v37 = vadd.f32 %v1273_v24, %v2433_v35  ;;  %v1288_v38 = vmul.f32 %v2433_v35, %v2433_v35 }
 0x121   : > { %v1197_v40 = vpop.f32.mrf.mxu2  ;;  %v1141_v15 = vpop.f32.mrf.mxu0 }
 0x122   : > { %v1226_v41 = vpop.f32.mrf.mxu3  ;;  %v1295_v43 = vadd.f32 %v1294_v31, %v1288_v38  ;;  %v1198_v14 = vadd.f32 %v1197_v40, %v1169_v13  ;;  %v1142_v45 = vadd.f32 %v1141_v15, %v1113_v42  ;;  %v1170_v46 = vpop.f32.mrf.mxu1 }
 0x124   : > { %v1227_v44 = vadd.f32 %v1226_v41, %v1198_v14  ;;  %v1171_v49 = vadd.f32 %v1170_v46, %v1142_v45 }
 0x126   : > { %v1268_v16 = vadd.f32 %v2392_v29, %v1227_v44 }
 0x128   : > { %v1275_v47 = vadd.f32 %v1274_v37, %v1268_v16  ;;  %v1289_v48 = vmul.f32 %v1268_v16, %v1268_v16 }
 0x129   : > { %v1199_v50 = vpop.f32.mrf.mxu2 }
 0x12a   : > { %v1296_v51 = vadd.f32 %v1295_v43, %v1289_v48  ;;  %v1200_v53 = vadd.f32 %v1199_v50, %v1171_v49  ;;  %v1228_v54 = vpop.f32.mrf.mxu3 }
 0x12c   : > { %v1229_v55 = vadd.f32 %v1228_v54, %v1200_v53 }
 0x12e   : > { %v1269_v56 = vadd.f32 %v2392_v29, %v1229_v55 }
 0x130   : > { %v1276_v57 = vadd.f32 %v1275_v47, %v1269_v56  ;;  %v1290_v17 = vmul.f32 %v1269_v56, %v1269_v56 }
 0x132   : > { %v1277_v58 = vrot.slane %v1276_v57, 4  ;;  %v1297_v59 = vadd.f32 %v1296_v51, %v1290_v17 }
 0x134   : > { %v1278_v60 = vadd.f32 %v1277_v58, %v1276_v57  ;;  %v1298_v61 = vrot.slane %v1297_v59, 4 }
 0x136   : > { %v1279_v63 = vrot.slane %v1278_v60, 2  ;;  %v1299_v0 = vadd.f32 %v1298_v61, %v1297_v59 }
 0x138   : > { %v1280_v62 = vadd.f32 %v1279_v63, %v1278_v60  ;;  %v1300_v2 = vrot.slane %v1299_v0, 2 }
 0x13a   : > { %v1281_v3 = vrot.slane %v1280_v62, 1  ;;  %v1301_v4 = vadd.f32 %v1300_v2, %v1299_v0 }
 0x13c   : > { %v1282_v6 = vadd.f32 %v1281_v3, %v1280_v62  ;;  %v1302_v7 = vrot.slane %v1301_v4, 1 }
 0x13e   : > { %v1303_v8 = vadd.f32 %v1302_v7, %v1301_v4  ;;  %v1304_v18 = vmul.f32 0.015625, %v1282_v6 }
 0x140   : > { %v1305_v19 = vmul.f32 0.015625, %v1303_v8  ;;  %v1306_v20 = vmul.f32 %v1304_v18, %v1304_v18  ;;  %v1309_v29 = vsub.f32 %v2395_v36, %v1304_v18  ;;  %v1310_v21 = vsub.f32 %v2398_v39, %v1304_v18 }
 0x141   : > { %v1311_v5 = vsub.f32 %v2407_v52, %v1304_v18  ;;  %v1312_v22 = vsub.f32 %v2413_v1, %v1304_v18  ;;  %v1313_v24 = vsub.f32 %v2423_v23, %v1304_v18  ;;  %v1314_v25 = vsub.f32 %v2433_v35, %v1304_v18  ;;  %v2027_v52 = vld [vmem:[%s2477_s3] ss:$0 sm:$0xff] }
 0x142   : > { %v1307_v26 = vsub.f32 %v1305_v19, %v1306_v20  ;;  %v1315_v27 = vsub.f32 %v1268_v16, %v1304_v18  ;;  %v1316_v1 = vsub.f32 %v1269_v56, %v1304_v18  ;;  %v2028_v35 = vld [vmem:[%s2478_s4] ss:$0 sm:$0xff] }
 0x144   : > { %v1308_v28 = vmax.f32 %v1307_v26, 0.0 }
 0x146   : > { %v1317_v30 = vadd.f32 1e-05, %v1308_v28 }
 0x148   : > { %2029 = vrsqrt.f32 %v1317_v30  ;;  %vm1324_vm1 = vweird.f32 %v1317_v30 }
 0x14e   : > { %v2030_v31 = vpop.eup %2029 }
 0x14f   : > { %v1319_v9 = vmul.f32 %v2030_v31, %v1317_v30  ;;  %vm1325_vm0 = vweird.f32 %v2030_v31 }
 0x150   : > { %vm1326_vm2 = vmor %vm1324_vm1, %vm1325_vm0 }
 0x151   : > { %v1320_v10 = vmul.f32 %v2030_v31, %v1319_v9 }
 0x153   : > { %v1321_v11 = vmul.f32 0.5, %v1320_v10 }
 0x155   : > { %v1322_v36 = vsub.f32 1.5, %v1321_v11 }
 0x157   : > { %v1323_v39 = vmul.f32 %v2030_v31, %v1322_v36 }
 0x159   : > { %v1327_v23 = vsel %vm1326_vm2, %v2030_v31, %v1323_v39 }
 0x15a   : > { %v1328_v12 = vmul.f32 %v1327_v23, %v1309_v29  ;;  %v1329_v32 = vmul.f32 %v1327_v23, %v1310_v21  ;;  %v1330_v33 = vmul.f32 %v1327_v23, %v1311_v5  ;;  %v1331_v34 = vmul.f32 %v1327_v23, %v1312_v22 }
 0x15b   : > { %v1332_v37 = vmul.f32 %v1327_v23, %v1313_v24  ;;  %v1333_v38 = vmul.f32 %v1327_v23, %v1314_v25  ;;  %v1334_v13 = vmul.f32 %v1327_v23, %v1315_v27  ;;  %v1335_v40 = vmul.f32 %v1327_v23, %v1316_v1 }
 0x15c   : > { %v1340_v41 = vmul.f32 %v2027_v52, %v1328_v12  ;;  %v1341_v42 = vmul.f32 %v2027_v52, %v1329_v32  ;;  %v1342_v43 = vmul.f32 %v2027_v52, %v1330_v33  ;;  %v1343_v14 = vmul.f32 %v2027_v52, %v1331_v34 }
 0x15d   : > { %v1344_v15 = vmul.f32 %v2027_v52, %v1332_v37  ;;  %v1345_v44 = vmul.f32 %v2027_v52, %v1333_v38  ;;  %v1346_v45 = vmul.f32 %v2027_v52, %v1334_v13  ;;  %v1347_v16 = vmul.f32 %v2027_v52, %v1335_v40 }
 0x15e   : > { %v1352_v46 = vadd.f32 %v2028_v35, %v1340_v41  ;;  %v1353_v47 = vadd.f32 %v2028_v35, %v1341_v42  ;;  %v1354_v48 = vadd.f32 %v2028_v35, %v1342_v43  ;;  %v1355_v49 = vadd.f32 %v2028_v35, %v1343_v14 }
 0x15f   : > { %v1356_v50 = vadd.f32 %v2028_v35, %v1344_v15  ;;  %v1357_v51 = vadd.f32 %v2028_v35, %v1345_v44  ;;  %v1358_v53 = vadd.f32 %v2028_v35, %v1346_v45  ;;  %v1359_v54 = vadd.f32 %v2028_v35, %v1347_v16 }
 0x160   : > { %vm1360_vm3 = vcmp.gt.f32.partialorder %v1352_v46, 0.0  ;;  %vm1361_vm4 = vcmp.gt.f32.partialorder %v1353_v47, 0.0  ;;  %vm1362_vm5 = vcmp.gt.f32.partialorder %v1354_v48, 0.0  ;;  %vm1363_vm6 = vcmp.gt.f32.partialorder %v1355_v49, 0.0 }
 0x161   : > { %vm1364_vm7 = vcmp.gt.f32.partialorder %v1356_v50, 0.0  ;;  %vm1365_vm8 = vcmp.gt.f32.partialorder %v1357_v51, 0.0  ;;  %vm1366_vm9 = vcmp.gt.f32.partialorder %v1358_v53, 0.0  ;;  %vm1367_vm10 = vcmp.gt.f32.partialorder %v1359_v54, 0.0 }
 0x162   : > { %v1368_v55 = vmul.f32 0.2, %v1352_v46  ;;  %v1369_v56 = vmul.f32 0.2, %v1353_v47  ;;  %v1370_v57 = vmul.f32 0.2, %v1354_v48 }
 0x163   : > { %v1371_v17 = vmul.f32 0.2, %v1355_v49  ;;  %v1372_v58 = vmul.f32 0.2, %v1356_v50  ;;  %v1373_v59 = vmul.f32 0.2, %v1357_v51 }
 0x164   : > { %v1374_v60 = vmul.f32 0.2, %v1358_v53  ;;  %v1375_v61 = vmul.f32 0.2, %v1359_v54  ;;  %v1376_v63 = vsel %vm1360_vm3, %v1352_v46, %v1368_v55  ;;  %v1377_v0 = vsel %vm1361_vm4, %v1353_v47, %v1369_v56 }
 0x165   : > { %v1378_v62 = vsel %vm1362_vm5, %v1354_v48, %v1370_v57  ;;  %v1379_v2 = vsel %vm1363_vm6, %v1355_v49, %v1371_v17  ;;  %v1380_v3 = vsel %vm1364_vm7, %v1356_v50, %v1372_v58  ;;  %v1381_v4 = vsel %vm1365_vm8, %v1357_v51, %v1373_v59 }
 0x166   : > { %v1382_v6 = vsel %vm1366_vm9, %v1358_v53, %v1374_v60  ;;  %v1383_v7 = vsel %vm1367_vm10, %v1359_v54, %v1375_v61  ;;  %v1982_v8 = vpack.c.bf16 %v1377_v0, %v1376_v63  ;;  %v1987_v18 = vpack.c.bf16 %v1379_v2, %v1378_v62 }
 0x167   : > { %v1992_v19 = vpack.c.bf16 %v1381_v4, %v1380_v3  ;;  %v1997_v20 = vpack.c.bf16 %v1383_v7, %v1382_v6 }
 0x168   : > { %1983 = vst [vmem:[%s274_s18] sm:$0xff] %v1982_v8  }
 0x169   : > { %1999 = vst [vmem:[%s274_s18 + $0x8] sm:$0xff] %v1987_v18  }
 0x16a   : > { %2000 = vst [vmem:[%s274_s18 + $0x10] sm:$0xff] %v1992_v19  }
 0x16b   : > { %2001 = vst [vmem:[%s274_s18 + $0x18] sm:$0xff] %v1997_v20  }
 0x16c PF: > { %s15_s20 = sadd.s32 1, %s2053_s20   ;;  %s2480_s18 = smov %s2049_s19 }
 0x16d   : > { %p12_p5 = scmp.ge.s32.totalorder %s15_s20, 4   ;;  %s2481_s19 = smov %s2483_s21 }
 0x16f   :  { %14 = sbr.rel (!%p12_p5) target bundleno = 2 (0x2), region = 81 }

// kernel: discriminator_forward_pallas.7
= control target key start
LH: loop header
LB: loop body
LE: loop exit
PB: predicated region body
PF: predicated region fallthrough
CT: control target
= control target key end

     0   :  { %s4044_s18 = smov 0   ;;  %s4046_s19 = smov 0   ;;  %s5744_s0 = inlined_call_operand.vmem [shape: bf16[2,16,2048], index: 0, kind: input, shape index: {}]   ;;  %s5745_s1 = inlined_call_operand.vmem [shape: bf16[2048,256], index: 1, kind: input, shape index: {}]   ;;  %s5746_s2 = inlined_call_operand.vmem [shape: f32[1,256], index: 2, kind: input, shape index: {}]   ;;  %s5747_s3 = inlined_call_operand.vmem [shape: f32[1,256], index: 3, kind: input, shape index: {}]   ;;  %s5748_s4 = inlined_call_operand.vmem [shape: f32[1,256], index: 4, kind: input, shape index: {}]   ;;  %s5749_s5 = inlined_call_operand.vmem [shape: bf16[2,16,256], index: 5, kind: output, shape index: {}]  }
   0x1   :  { %s4048_s20 = smov 0  }
   0x2 LB: > { %s27_s21 = sadd.s32 1, %s4008_s19  ;;  %p2593_p0 = scmp.ge.s32.totalorder %s4012_s20, 1  ;;  %s4012_s20 = sphi %s4048_s20, %s15_s20   ;;  %s4008_s19 = sphi %s4046_s19, %s5751_s19   ;;  %s4004_s18 = sphi %s4044_s18, %s5750_s18  }
   0x3   : > { %p29_p1 = scmp.ge.s32.totalorder %s27_s21, 2  ;;  %p218_p2 = scmp.lt.s32.totalorder %s4012_s20, 3 }
   0x5   : > { %s5753_s21 = smov (%p29_p1, %s27_s21), 0  ;;  %p219_p3 = pnand %p2593_p0, %p218_p2 }
   0x6   : > { %p257_p4 = scmp.lt.s32.totalorder (!%p219_p3), %s4004_s18, 1 }
   0x7   : > { %222 = sbr.rel (%p219_p3) target bundleno = 473 (0x1d9), region = 40 }
   0xc   : > { %v2720_v0 = vld [vmem:[%s5745_s1 + $0x70] sm:$0xf]  ;;  %v3721_v1 = vld [vmem:[%s5745_s1 + $0x74] sm:$0xf0]  ;;  %v2712_v11 = vld [vmem:[%s5745_s1 + $0x60] sm:$0xf] }
   0xd   : > { %v2784_v2 = vld [vmem:[%s5745_s1 + $0xf0] sm:$0xf]  ;;  %v2721_v3 = vor.u32 %v3721_v1, %v2720_v0  ;;  %v3737_v4 = vld [vmem:[%s5745_s1 + $0xf4] sm:$0xf0]  ;;  %v3719_v13 = vld [vmem:[%s5745_s1 + $0x64] sm:$0xf0] }
   0xe   : > { %v2848_v5 = vld [vmem:[%s5745_s1 + $0x170] sm:$0xf]  ;;  %v3753_v6 = vld [vmem:[%s5745_s1 + $0x174] sm:$0xf0]  ;;  %v2785_v7 = vor.u32 %v3737_v4, %v2784_v2  ;;  %v2776_v14 = vld [vmem:[%s5745_s1 + $0xe0] sm:$0xf]  ;;  %v2713_v16 = vor.u32 %v3719_v13, %v2712_v11 }
   0xf   : > { %v2849_v8 = vor.u32 %v3753_v6, %v2848_v5  ;;  %v2912_v9 = vld [vmem:[%s5745_s1 + $0x1f0] sm:$0xf]  ;;  %v3769_v10 = vld [vmem:[%s5745_s1 + $0x1f4] sm:$0xf0]  ;;  %1922 = vmatpush.bf16.msra.mxu0 %v2721_v3  ;;  %v3735_v15 = vld [vmem:[%s5745_s1 + $0xe4] sm:$0xf0] }
  0x10   : > { %v2913_v12 = vor.u32 %v3769_v10, %v2912_v9  ;;  %1936 = vmatpush.bf16.msra.mxu1 %v2785_v7  ;;  %v2777_v17 = vor.u32 %v3735_v15, %v2776_v14  ;;  %v2840_v18 = vld [vmem:[%s5745_s1 + $0x160] sm:$0xf]  ;;  %v3751_v19 = vld [vmem:[%s5745_s1 + $0x164] sm:$0xf0]  ;;  %v2704_v23 = vld [vmem:[%s5745_s1 + $0x50] sm:$0xf] }
  0x11   : > { %1950 = vmatpush.bf16.msra.mxu2 %v2849_v8  ;;  %v2904_v20 = vld [vmem:[%s5745_s1 + $0x1e0] sm:$0xf]  ;;  %v2841_v21 = vor.u32 %v3751_v19, %v2840_v18  ;;  %v3767_v22 = vld [vmem:[%s5745_s1 + $0x1e4] sm:$0xf0]  ;;  %v3717_v24 = vld [vmem:[%s5745_s1 + $0x54] sm:$0xf0] }
  0x12   : > { %1964 = vmatpush.bf16.msra.mxu3 %v2913_v12  ;;  %v2905_v25 = vor.u32 %v3767_v22, %v2904_v20  ;;  %v2768_v26 = vld [vmem:[%s5745_s1 + $0xd0] sm:$0xf]  ;;  %v3733_v27 = vld [vmem:[%s5745_s1 + $0xd4] sm:$0xf0]  ;;  %v2705_v29 = vor.u32 %v3717_v24, %v2704_v23  ;;  %v2696_v35 = vld [vmem:[%s5745_s1 + $0x40] sm:$0xf] }
  0x13   : > { %v2832_v28 = vld [vmem:[%s5745_s1 + $0x150] sm:$0xf]  ;;  %1923 = vmatpush.bf16.msra.mxu0 %v2713_v16  ;;  %v3749_v30 = vld [vmem:[%s5745_s1 + $0x154] sm:$0xf0]  ;;  %v2769_v33 = vor.u32 %v3733_v27, %v2768_v26  ;;  %v3715_v36 = vld [vmem:[%s5745_s1 + $0x44] sm:$0xf0] }
  0x14   : > { %v2896_v31 = vld [vmem:[%s5745_s1 + $0x1d0] sm:$0xf]  ;;  %v3765_v32 = vld [vmem:[%s5745_s1 + $0x1d4] sm:$0xf0]  ;;  %1937 = vmatpush.bf16.msra.mxu1 %v2777_v17  ;;  %v2833_v34 = vor.u32 %v3749_v30, %v2832_v28  ;;  %v2760_v37 = vld [vmem:[%s5745_s1 + $0xc0] sm:$0xf]  ;;  %v2697_v44 = vor.u32 %v3715_v36, %v2696_v35 }
  0x15   : > { %1951 = vmatpush.bf16.msra.mxu2 %v2841_v21  ;;  %v2897_v38 = vor.u32 %v3765_v32, %v2896_v31  ;;  %v3731_v39 = vld [vmem:[%s5745_s1 + $0xc4] sm:$0xf0]  ;;  %v2824_v40 = vld [vmem:[%s5745_s1 + $0x140] sm:$0xf]  ;;  %v2688_v47 = vld [vmem:[%s5745_s1 + $0x30] sm:$0xf] }
  0x16   : > { %1965 = vmatpush.bf16.msra.mxu3 %v2905_v25  ;;  %v3747_v41 = vld [vmem:[%s5745_s1 + $0x144] sm:$0xf0]  ;;  %v2888_v42 = vld [vmem:[%s5745_s1 + $0x1c0] sm:$0xf]  ;;  %v2761_v45 = vor.u32 %v3731_v39, %v2760_v37  ;;  %v3713_v48 = vld [vmem:[%s5745_s1 + $0x34] sm:$0xf0] }
  0x17   : > { %v3763_v43 = vld [vmem:[%s5745_s1 + $0x1c4] sm:$0xf0]  ;;  %1924 = vmatpush.bf16.msra.mxu0 %v2705_v29  ;;  %v2825_v46 = vor.u32 %v3747_v41, %v2824_v40  ;;  %v2752_v49 = vld [vmem:[%s5745_s1 + $0xb0] sm:$0xf]  ;;  %v3729_v51 = vld [vmem:[%s5745_s1 + $0xb4] sm:$0xf0]  ;;  %v2689_v56 = vor.u32 %v3713_v48, %v2688_v47 }
  0x18   : > { %1938 = vmatpush.bf16.msra.mxu1 %v2769_v33  ;;  %v2889_v50 = vor.u32 %v3763_v43, %v2888_v42  ;;  %v2816_v52 = vld [vmem:[%s5745_s1 + $0x130] sm:$0xf]  ;;  %v3745_v53 = vld [vmem:[%s5745_s1 + $0x134] sm:$0xf0]  ;;  %v2753_v57 = vor.u32 %v3729_v51, %v2752_v49  ;;  %v2680_v59 = vld [vmem:[%s5745_s1 + $0x20] sm:$0xf] }
  0x19   : > { %1952 = vmatpush.bf16.msra.mxu2 %v2833_v34  ;;  %v2880_v54 = vld [vmem:[%s5745_s1 + $0x1b0] sm:$0xf]  ;;  %v3761_v55 = vld [vmem:[%s5745_s1 + $0x1b4] sm:$0xf0]  ;;  %v2817_v58 = vor.u32 %v3745_v53, %v2816_v52  ;;  %v3711_v60 = vld [vmem:[%s5745_s1 + $0x24] sm:$0xf0] }
  0x1a   : > { %1966 = vmatpush.bf16.msra.mxu3 %v2897_v38  ;;  %v2744_v61 = vld [vmem:[%s5745_s1 + $0xa0] sm:$0xf]  ;;  %v2881_v62 = vor.u32 %v3761_v55, %v2880_v54  ;;  %v3727_v63 = vld [vmem:[%s5745_s1 + $0xa4] sm:$0xf0]  ;;  %v2681_v4 = vor.u32 %v3711_v60, %v2680_v59  ;;  %v2672_v7 = vld [vmem:[%s5745_s1 + $0x10] sm:$0xf] }
  0x1b   : > { %1925 = vmatpush.bf16.msra.mxu0 %v2697_v44  ;;  %v2808_v0 = vld [vmem:[%s5745_s1 + $0x120] sm:$0xf]  ;;  %v3743_v1 = vld [vmem:[%s5745_s1 + $0x124] sm:$0xf0]  ;;  %v2745_v5 = vor.u32 %v3727_v63, %v2744_v61  ;;  %v3709_v8 = vld [vmem:[%s5745_s1 + $0x14] sm:$0xf0] }
  0x1c   : > { %1939 = vmatpush.bf16.msra.mxu1 %v2761_v45  ;;  %v2872_v2 = vld [vmem:[%s5745_s1 + $0x1a0] sm:$0xf]  ;;  %v3759_v3 = vld [vmem:[%s5745_s1 + $0x1a4] sm:$0xf0]  ;;  %v2809_v6 = vor.u32 %v3743_v1, %v2808_v0  ;;  %v2736_v9 = vld [vmem:[%s5745_s1 + $0x90] sm:$0xf]  ;;  %v2673_v16 = vor.u32 %v3709_v8, %v2672_v7 }
  0x1d   : > { %1953 = vmatpush.bf16.msra.mxu2 %v2825_v46  ;;  %v2873_v10 = vor.u32 %v3759_v3, %v2872_v2  ;;  %v3725_v11 = vld [vmem:[%s5745_s1 + $0x94] sm:$0xf0]  ;;  %v2800_v12 = vld [vmem:[%s5745_s1 + $0x110] sm:$0xf]  ;;  %v2664_v17 = vld [vmem:[%s5745_s1] sm:$0xf] }
  0x1e   : > { %1967 = vmatpush.bf16.msra.mxu3 %v2889_v50  ;;  %v3741_v13 = vld [vmem:[%s5745_s1 + $0x114] sm:$0xf0]  ;;  %v2864_v14 = vld [vmem:[%s5745_s1 + $0x190] sm:$0xf]  ;;  %v3707_v18 = vld [vmem:[%s5745_s1 + $0x4] sm:$0xf0]  ;;  %v2737_v19 = vor.u32 %v3725_v11, %v2736_v9 }
  0x1f   : > { %1926 = vmatpush.bf16.msra.mxu0 %v2689_v56  ;;  %v3757_v15 = vld [vmem:[%s5745_s1 + $0x194] sm:$0xf0]  ;;  %v2801_v20 = vor.u32 %v3741_v13, %v2800_v12  ;;  %v2728_v21 = vld [vmem:[%s5745_s1 + $0x80] sm:$0xf]  ;;  %v3723_v22 = vld [vmem:[%s5745_s1 + $0x84] sm:$0xf0]  ;;  %v2665_v31 = vor.u32 %v3707_v18, %v2664_v17 }
  0x20   : > { %1940 = vmatpush.bf16.msra.mxu1 %v2753_v57  ;;  %v2792_v23 = vld [vmem:[%s5745_s1 + $0x100] sm:$0xf]  ;;  %v2865_v24 = vor.u32 %v3757_v15, %v2864_v14  ;;  %v3739_v25 = vld [vmem:[%s5745_s1 + $0x104] sm:$0xf0]  ;;  %v2976_v28 = vld [vmem:[%s5745_s1 + $0x270] sm:$0xf]  ;;  %v2729_v35 = vor.u32 %v3723_v22, %v2728_v21 }
  0x21   : > { %1954 = vmatpush.bf16.msra.mxu2 %v2817_v58  ;;  %v2856_v26 = vld [vmem:[%s5745_s1 + $0x180] sm:$0xf]  ;;  %v3755_v27 = vld [vmem:[%s5745_s1 + $0x184] sm:$0xf0]  ;;  %v3785_v29 = vld [vmem:[%s5745_s1 + $0x274] sm:$0xf0]  ;;  %v2793_v36 = vor.u32 %v3739_v25, %v2792_v23 }
  0x22   : > { %1968 = vmatpush.bf16.msra.mxu3 %v2881_v62  ;;  %v3040_v30 = vld [vmem:[%s5745_s1 + $0x2f0] sm:$0xf]  ;;  %v3801_v32 = vld [vmem:[%s5745_s1 + $0x2f4] sm:$0xf0]  ;;  %v2857_v39 = vor.u32 %v3755_v27, %v2856_v26  ;;  %v2977_v40 = vor.u32 %v3785_v29, %v2976_v28  ;;  %v2968_v43 = vld [vmem:[%s5745_s1 + $0x260] sm:$0xf] }
  0x23   : > { %1927 = vmatpush.bf16.msra.mxu0 %v2681_v4  ;;  %v3104_v33 = vld [vmem:[%s5745_s1 + $0x370] sm:$0xf]  ;;  %v3817_v34 = vld [vmem:[%s5745_s1 + $0x374] sm:$0xf0]  ;;  %v3041_v41 = vor.u32 %v3801_v32, %v3040_v30  ;;  %v3783_v44 = vld [vmem:[%s5745_s1 + $0x264] sm:$0xf0] }
  0x24   : > { %1941 = vmatpush.bf16.msra.mxu1 %v2745_v5  ;;  %v3168_v37 = vld [vmem:[%s5745_s1 + $0x3f0] sm:$0xf]  ;;  %v3833_v38 = vld [vmem:[%s5745_s1 + $0x3f4] sm:$0xf0]  ;;  %v3105_v42 = vor.u32 %v3817_v34, %v3104_v33  ;;  %v3032_v45 = vld [vmem:[%s5745_s1 + $0x2e0] sm:$0xf]  ;;  %v2969_v52 = vor.u32 %v3783_v44, %v2968_v43 }
  0x25   : > { %1955 = vmatpush.bf16.msra.mxu2 %v2809_v6  ;;  %v3169_v46 = vor.u32 %v3833_v38, %v3168_v37  ;;  %v3799_v47 = vld [vmem:[%s5745_s1 + $0x2e4] sm:$0xf0]  ;;  %v3096_v48 = vld [vmem:[%s5745_s1 + $0x360] sm:$0xf]  ;;  %v2960_v53 = vld [vmem:[%s5745_s1 + $0x250] sm:$0xf] }
  0x26   : > { %1969 = vmatpush.bf16.msra.mxu3 %v2873_v10  ;;  %v3815_v49 = vld [vmem:[%s5745_s1 + $0x364] sm:$0xf0]  ;;  %v3160_v50 = vld [vmem:[%s5745_s1 + $0x3e0] sm:$0xf]  ;;  %v3781_v54 = vld [vmem:[%s5745_s1 + $0x254] sm:$0xf0]  ;;  %v3033_v56 = vor.u32 %v3799_v47, %v3032_v45 }
  0x27   : > { %1928 = vmatpush.bf16.msra.mxu0 %v2673_v16  ;;  %v3831_v51 = vld [vmem:[%s5745_s1 + $0x3e4] sm:$0xf0]  ;;  %v3024_v55 = vld [vmem:[%s5745_s1 + $0x2d0] sm:$0xf]  ;;  %v3097_v57 = vor.u32 %v3815_v49, %v3096_v48  ;;  %v3797_v58 = vld [vmem:[%s5745_s1 + $0x2d4] sm:$0xf0]  ;;  %v2961_v2 = vor.u32 %v3781_v54, %v2960_v53 }
  0x28   : > { %1942 = vmatpush.bf16.msra.mxu1 %v2737_v19  ;;  %v3088_v59 = vld [vmem:[%s5745_s1 + $0x350] sm:$0xf]  ;;  %s5755_s18 = smov (!%p257_p4, %s4004_s18), 1  ;;  %v3161_v60 = vor.u32 %v3831_v51, %v3160_v50  ;;  %v3813_v61 = vld [vmem:[%s5745_s1 + $0x354] sm:$0xf0]  ;;  %v3025_v7 = vor.u32 %v3797_v58, %v3024_v55 }
  0x29   : > { %1956 = vmatpush.bf16.msra.mxu2 %v2801_v20  ;;  %v3152_v62 = vld [vmem:[%s5745_s1 + $0x3d0] sm:$0xf]  ;;  %v3829_v63 = vld [vmem:[%s5745_s1 + $0x3d4] sm:$0xf0]  ;;  %v2952_v0 = vld [vmem:[%s5745_s1 + $0x240] sm:$0xf]  ;;  %v3089_v8 = vor.u32 %v3813_v61, %v3088_v59 }
  0x2a   : > { %1970 = vmatpush.bf16.msra.mxu3 %v2865_v24  ;;  %v3779_v1 = vld [vmem:[%s5745_s1 + $0x244] sm:$0xf0]  ;;  %s3688_s9 = sshll.u32 %s5755_s18, 7  ;;  %v3016_v3 = vld [vmem:[%s5745_s1 + $0x2c0] sm:$0xf]  ;;  %v3153_v13 = vor.u32 %v3829_v63, %v3152_v62  ;;  %s3689_s22 = sshll.u32 %s5755_s18, 4 }
  0x2b   : > { %1929 = vmatpush.bf16.msra.mxu0 %v2665_v31  ;;  %v3795_v4 = vld [vmem:[%s5745_s1 + $0x2c4] sm:$0xf0]  ;;  %v3080_v5 = vld [vmem:[%s5745_s1 + $0x340] sm:$0xf]  ;;  %s4354_s24 = scalar_lea.vmem %s5744_s0, %s3688_s9  ;;  %v2953_v23 = vor.u32 %v3779_v1, %v2952_v0  ;;  %v2944_v27 = vld [vmem:[%s5745_s1 + $0x230] sm:$0xf]  ;;  %s277_s26 = scalar_lea.vmem %s5749_s5, %s3689_s22 }
  0x2c   : > { %1943 = vmatpush.bf16.msra.mxu1 %v2729_v35  ;;  %v3811_v6 = vld [vmem:[%s5745_s1 + $0x344] sm:$0xf0]  ;;  %v3144_v9 = vld [vmem:[%s5745_s1 + $0x3c0] sm:$0xf]  ;;  %v3690_v16 = vld [vmem:[%s4354_s24 + $0x4] sm:$0xf]  ;;  %v3017_v25 = vor.u32 %v3795_v4, %v3016_v3 }
  0x2d   : > { %1957 = vmatpush.bf16.msra.mxu2 %v2793_v36  ;;  %v2600_v10 = vld [vmem:[%s4354_s24] sm:$0xf]  ;;  %v2608_v12 = vld [vmem:[%s4354_s24 + $0x8] sm:$0xf]  ;;  %v2602_v17 = vld [vmem:[%s4354_s24 + $0x40] sm:$0xf0]  ;;  %v3081_v26 = vor.u32 %v3811_v6, %v3080_v5 }
  0x2e   : > { %1971 = vmatpush.bf16.msra.mxu3 %v2857_v39  ;;  %v3698_v11 = vld [vmem:[%s4354_s24 + $0x3c] sm:$0xf0]  ;;  %v3699_v15 = vld [vmem:[%s4354_s24 + $0x44] sm:$0xf0]  ;;  %v4372_v20 = vor.u32 %v3690_v16, %v2602_v17  ;;  %v3691_v21 = vld [vmem:[%s4354_s24 + $0xc] sm:$0xf] }
  0x2f   : > { %1978 = vmatpush.bf16.msrb.mxu0 %v2977_v40  ;;  %v4362_v14 = vor.u32 %v3698_v11, %v2600_v10  ;;  %v3827_v18 = vld [vmem:[%s5745_s1 + $0x3c4] sm:$0xf0]  ;;  %v4370_v19 = vor.u32 %v3699_v15, %v2608_v12  ;;  %v2610_v22 = vld [vmem:[%s4354_s24 + $0x48] sm:$0xf0]  ;;  %v3777_v28 = vld [vmem:[%s5745_s1 + $0x234] sm:$0xf0] }
  0x30   : > { %1992 = vmatpush.bf16.msrb.mxu1 %v3041_v41  ;;  %v4376_v24 = vor.u32 %v3691_v21, %v2610_v22  ;;  %v3008_v29 = vld [vmem:[%s5745_s1 + $0x2b0] sm:$0xf]  ;;  %v3145_v30 = vor.u32 %v3827_v18, %v3144_v9  ;;  %v3793_v31 = vld [vmem:[%s5745_s1 + $0x2b4] sm:$0xf0]  ;;  %v2945_v36 = vor.u32 %v3777_v28, %v2944_v27  ;;  %v2936_v39 = vld [vmem:[%s5745_s1 + $0x220] sm:$0xf] }
  0x31   : > { %2006 = vmatpush.bf16.msrb.mxu2 %v3105_v42  ;;  %1930 = vmatmul.bf16.vlgmr.msra.gmra.mxu0 %v4362_v14  ;;  %v3072_v32 = vld [vmem:[%s5745_s1 + $0x330] sm:$0xf]  ;;  %v3809_v33 = vld [vmem:[%s5745_s1 + $0x334] sm:$0xf0]  ;;  %v3009_v37 = vor.u32 %v3793_v31, %v3008_v29  ;;  %v3775_v40 = vld [vmem:[%s5745_s1 + $0x224] sm:$0xf0] }
  0x32   : > { %2020 = vmatpush.bf16.msrb.mxu3 %v3169_v46  ;;  %1958 = vmatmul.bf16.vlgmr.msra.gmra.mxu2 %v4370_v19  ;;  %v3136_v34 = vld [vmem:[%s5745_s1 + $0x3b0] sm:$0xf]  ;;  %v3825_v35 = vld [vmem:[%s5745_s1 + $0x3b4] sm:$0xf0]  ;;  %v3073_v38 = vor.u32 %v3809_v33, %v3072_v32  ;;  %v3000_v41 = vld [vmem:[%s5745_s1 + $0x2a0] sm:$0xf]  ;;  %v2937_v48 = vor.u32 %v3775_v40, %v2936_v39 }
  0x33   : > { %1979 = vmatpush.bf16.msrb.mxu0 %v2969_v52  ;;  %1944 = vmatmul.bf16.vlgmr.msra.gmra.mxu1 %v4372_v20  ;;  %v3137_v42 = vor.u32 %v3825_v35, %v3136_v34  ;;  %v3791_v43 = vld [vmem:[%s5745_s1 + $0x2a4] sm:$0xf0]  ;;  %v3064_v44 = vld [vmem:[%s5745_s1 + $0x320] sm:$0xf]  ;;  %v2928_v49 = vld [vmem:[%s5745_s1 + $0x210] sm:$0xf] }
  0x34   : > { %1993 = vmatpush.bf16.msrb.mxu1 %v3033_v56  ;;  %1972 = vmatmul.bf16.vlgmr.msra.gmra.mxu3 %v4376_v24  ;;  %v3807_v45 = vld [vmem:[%s5745_s1 + $0x324] sm:$0xf0]  ;;  %v3128_v46 = vld [vmem:[%s5745_s1 + $0x3a0] sm:$0xf]  ;;  %v3001_v50 = vor.u32 %v3791_v43, %v3000_v41  ;;  %v3773_v52 = vld [vmem:[%s5745_s1 + $0x214] sm:$0xf0] }
  0x35   : > { %2007 = vmatpush.bf16.msrb.mxu2 %v3097_v57  ;;  %v3823_v47 = vld [vmem:[%s5745_s1 + $0x3a4] sm:$0xf0]  ;;  %v3065_v51 = vor.u32 %v3807_v45, %v3064_v44  ;;  %v2992_v53 = vld [vmem:[%s5745_s1 + $0x290] sm:$0xf]  ;;  %v3789_v54 = vld [vmem:[%s5745_s1 + $0x294] sm:$0xf0]  ;;  %v2929_v62 = vor.u32 %v3773_v52, %v2928_v49 }
  0x36   : > { %2021 = vmatpush.bf16.msrb.mxu3 %v3161_v60  ;;  %v3129_v55 = vor.u32 %v3823_v47, %v3128_v46  ;;  %v3056_v56 = vld [vmem:[%s5745_s1 + $0x310] sm:$0xf]  ;;  %v3805_v57 = vld [vmem:[%s5745_s1 + $0x314] sm:$0xf0]  ;;  %v2920_v60 = vld [vmem:[%s5745_s1 + $0x200] sm:$0xf]  ;;  %v2993_v3 = vor.u32 %v3789_v54, %v2992_v53 }
  0x37   : > { %1980 = vmatpush.bf16.msrb.mxu0 %v2961_v2  ;;  %v3120_v58 = vld [vmem:[%s5745_s1 + $0x390] sm:$0xf]  ;;  %v3821_v59 = vld [vmem:[%s5745_s1 + $0x394] sm:$0xf0]  ;;  %v3771_v61 = vld [vmem:[%s5745_s1 + $0x204] sm:$0xf0]  ;;  %v3057_v4 = vor.u32 %v3805_v57, %v3056_v56 }
  0x38   : > { %1994 = vmatpush.bf16.msrb.mxu1 %v3025_v7  ;;  %v2984_v63 = vld [vmem:[%s5745_s1 + $0x280] sm:$0xf]  ;;  %v3787_v0 = vld [vmem:[%s5745_s1 + $0x284] sm:$0xf0]  ;;  %v3232_v7 = vld [vmem:[%s5745_s1 + $0x470] sm:$0xf]  ;;  %v2921_v16 = vor.u32 %v3771_v61, %v2920_v60 }
  0x39   : > { %2008 = vmatpush.bf16.msrb.mxu2 %v3089_v8  ;;  %v3048_v1 = vld [vmem:[%s5745_s1 + $0x300] sm:$0xf]  ;;  %v3803_v2 = vld [vmem:[%s5745_s1 + $0x304] sm:$0xf0]  ;;  %v3121_v8 = vor.u32 %v3821_v59, %v3120_v58  ;;  %v3849_v9 = vld [vmem:[%s5745_s1 + $0x474] sm:$0xf0]  ;;  %v2985_v22 = vor.u32 %v3787_v0, %v2984_v63 }
  0x3a   : > { %2022 = vmatpush.bf16.msrb.mxu3 %v3153_v13  ;;  %v3112_v5 = vld [vmem:[%s5745_s1 + $0x380] sm:$0xf]  ;;  %v3819_v6 = vld [vmem:[%s5745_s1 + $0x384] sm:$0xf0]  ;;  %v3296_v10 = vld [vmem:[%s5745_s1 + $0x4f0] sm:$0xf]  ;;  %v3233_v29 = vor.u32 %v3849_v9, %v3232_v7 }
  0x3b   : > { %1981 = vmatpush.bf16.msrb.mxu0 %v2953_v23  ;;  %v3865_v11 = vld [vmem:[%s5745_s1 + $0x4f4] sm:$0xf0]  ;;  %v3360_v12 = vld [vmem:[%s5745_s1 + $0x570] sm:$0xf]  ;;  %v3049_v23 = vor.u32 %v3803_v2, %v3048_v1  ;;  %v3692_v27 = vld [vmem:[%s4354_s24 + $0x14] sm:$0xf]  ;;  %v3113_v28 = vor.u32 %v3819_v6, %v3112_v5 }
  0x3c   : > { %1995 = vmatpush.bf16.msrb.mxu1 %v3017_v25  ;;  %v3881_v13 = vld [vmem:[%s5745_s1 + $0x574] sm:$0xf0]  ;;  %v3424_v15 = vld [vmem:[%s5745_s1 + $0x5f0] sm:$0xf]  ;;  %v3693_v31 = vld [vmem:[%s4354_s24 + $0x1c] sm:$0xf]  ;;  %v3297_v33 = vor.u32 %v3865_v11, %v3296_v10 }
  0x3d   : > { %2009 = vmatpush.bf16.msrb.mxu2 %v3081_v26  ;;  %v3897_v17 = vld [vmem:[%s5745_s1 + $0x5f4] sm:$0xf0]  ;;  %v2616_v18 = vld [vmem:[%s4354_s24 + $0x10] sm:$0xf]  ;;  %v2626_v32 = vld [vmem:[%s4354_s24 + $0x58] sm:$0xf0]  ;;  %v3361_v34 = vor.u32 %v3881_v13, %v3360_v12 }
  0x3e   : > { %2023 = vmatpush.bf16.msrb.mxu3 %v3145_v30  ;;  %v3700_v21 = vld [vmem:[%s4354_s24 + $0x4c] sm:$0xf0]  ;;  %v2624_v25 = vld [vmem:[%s4354_s24 + $0x18] sm:$0xf]  ;;  %v2618_v30 = vld [vmem:[%s4354_s24 + $0x50] sm:$0xf0]  ;;  %v4540_v47 = vor.u32 %v3693_v31, %v2626_v32 }
  0x3f   : > { %1982 = vmatpush.bf16.msrb.mxu0 %v2945_v36  ;;  %v3701_v26 = vld [vmem:[%s4354_s24 + $0x54] sm:$0xf0]  ;;  %v3224_v35 = vld [vmem:[%s5745_s1 + $0x460] sm:$0xf]  ;;  %v3847_v36 = vld [vmem:[%s5745_s1 + $0x464] sm:$0xf0]  ;;  %v4519_v39 = vor.u32 %v3700_v21, %v2616_v18  ;;  %v4532_v44 = vor.u32 %v3692_v27, %v2618_v30 }
  0x40   : > { %1996 = vmatpush.bf16.msrb.mxu1 %v3009_v37  ;;  %v3288_v37 = vld [vmem:[%s5745_s1 + $0x4e0] sm:$0xf]  ;;  %v3863_v40 = vld [vmem:[%s5745_s1 + $0x4e4] sm:$0xf0]  ;;  %v4530_v43 = vor.u32 %v3701_v26, %v2624_v25  ;;  %v3845_v52 = vld [vmem:[%s5745_s1 + $0x454] sm:$0xf0] }
  0x41   : > { %2010 = vmatpush.bf16.msrb.mxu2 %v3073_v38  ;;  %v3425_v38 = vor.u32 %v3897_v17, %v3424_v15  ;;  %v3352_v41 = vld [vmem:[%s5745_s1 + $0x560] sm:$0xf]  ;;  %v3895_v46 = vld [vmem:[%s5745_s1 + $0x5e4] sm:$0xf0]  ;;  %v3289_v49 = vor.u32 %v3863_v40, %v3288_v37  ;;  %v3280_v53 = vld [vmem:[%s5745_s1 + $0x4d0] sm:$0xf] }
  0x42   : > { %2024 = vmatpush.bf16.msrb.mxu3 %v3137_v42  ;;  %v3879_v42 = vld [vmem:[%s5745_s1 + $0x564] sm:$0xf0]  ;;  %v3416_v45 = vld [vmem:[%s5745_s1 + $0x5e0] sm:$0xf]  ;;  %v3344_v56 = vld [vmem:[%s5745_s1 + $0x550] sm:$0xf] }
  0x43   : > { %1983 = vmatpush.bf16.msrb.mxu0 %v2937_v48  ;;  %v3225_v48 = vor.u32 %v3847_v36, %v3224_v35  ;;  %v3417_v54 = vor.u32 %v3895_v46, %v3416_v45  ;;  %v3877_v57 = vld [vmem:[%s5745_s1 + $0x554] sm:$0xf0]  ;;  %v3408_v58 = vld [vmem:[%s5745_s1 + $0x5d0] sm:$0xf]  ;;  %v3208_v63 = vld [vmem:[%s5745_s1 + $0x440] sm:$0xf] }
  0x44   : > { %1997 = vmatpush.bf16.msrb.mxu1 %v3001_v50  ;;  %v3353_v50 = vor.u32 %v3879_v42, %v3352_v41  ;;  %v3893_v59 = vld [vmem:[%s5745_s1 + $0x5d4] sm:$0xf0]  ;;  %v3843_v0 = vld [vmem:[%s5745_s1 + $0x444] sm:$0xf0]  ;;  %v3272_v1 = vld [vmem:[%s5745_s1 + $0x4c0] sm:$0xf] }
  0x45   : > { %2011 = vmatpush.bf16.msrb.mxu2 %v3065_v51  ;;  %v3216_v51 = vld [vmem:[%s5745_s1 + $0x450] sm:$0xf]  ;;  %v3409_v2 = vor.u32 %v3893_v59, %v3408_v58  ;;  %v3875_v5 = vld [vmem:[%s5745_s1 + $0x544] sm:$0xf0]  ;;  %v3400_v6 = vld [vmem:[%s5745_s1 + $0x5c0] sm:$0xf] }
  0x46   : > { %2025 = vmatpush.bf16.msrb.mxu3 %v3129_v55  ;;  %v3861_v55 = vld [vmem:[%s5745_s1 + $0x4d4] sm:$0xf0]  ;;  %v3217_v60 = vor.u32 %v3845_v52, %v3216_v51  ;;  %v3891_v7 = vld [vmem:[%s5745_s1 + $0x5c4] sm:$0xf0]  ;;  %v3200_v11 = vld [vmem:[%s5745_s1 + $0x430] sm:$0xf] }
  0x47   : > { %1984 = vmatpush.bf16.msrb.mxu0 %v2929_v62  ;;  %v3281_v61 = vor.u32 %v3861_v55, %v3280_v53  ;;  %v3345_v62 = vor.u32 %v3877_v57, %v3344_v56  ;;  %v3841_v12 = vld [vmem:[%s5745_s1 + $0x434] sm:$0xf0]  ;;  %v3264_v13 = vld [vmem:[%s5745_s1 + $0x4b0] sm:$0xf]  ;;  %v3401_v15 = vor.u32 %v3891_v7, %v3400_v6  ;;  %v3192_v27 = vld [vmem:[%s5745_s1 + $0x420] sm:$0xf] }
  0x48   : > { %1998 = vmatpush.bf16.msrb.mxu1 %v2993_v3  ;;  %v3859_v3 = vld [vmem:[%s5745_s1 + $0x4c4] sm:$0xf0]  ;;  %v3328_v17 = vld [vmem:[%s5745_s1 + $0x530] sm:$0xf]  ;;  %v3873_v18 = vld [vmem:[%s5745_s1 + $0x534] sm:$0xf0] }
  0x49   : > { %2012 = vmatpush.bf16.msrb.mxu2 %v3057_v4  ;;  %v3336_v4 = vld [vmem:[%s5745_s1 + $0x540] sm:$0xf]  ;;  %v3273_v9 = vor.u32 %v3859_v3, %v3272_v1  ;;  %v3392_v21 = vld [vmem:[%s5745_s1 + $0x5b0] sm:$0xf]  ;;  %v3329_v26 = vor.u32 %v3873_v18, %v3328_v17  ;;  %v3855_v31 = vld [vmem:[%s5745_s1 + $0x4a4] sm:$0xf0] }
  0x4a   : > { %2026 = vmatpush.bf16.msrb.mxu3 %v3121_v8  ;;  %v3209_v8 = vor.u32 %v3843_v0, %v3208_v63  ;;  %v3337_v10 = vor.u32 %v3875_v5, %v3336_v4  ;;  %v3320_v32 = vld [vmem:[%s5745_s1 + $0x520] sm:$0xf]  ;;  %v3887_v35 = vld [vmem:[%s5745_s1 + $0x5a4] sm:$0xf0]  ;;  %v3184_v37 = vld [vmem:[%s5745_s1 + $0x410] sm:$0xf] }
  0x4b   : > { %1985 = vmatpush.bf16.msrb.mxu0 %v2921_v16  ;;  %v3857_v16 = vld [vmem:[%s5745_s1 + $0x4b4] sm:$0xf0]  ;;  %v3248_v42 = vld [vmem:[%s5745_s1 + $0x490] sm:$0xf]  ;;  %v3176_v52 = vld [vmem:[%s5745_s1 + $0x400] sm:$0xf] }
  0x4c   : > { %1999 = vmatpush.bf16.msrb.mxu1 %v2985_v22  ;;  %v3889_v22 = vld [vmem:[%s5745_s1 + $0x5b4] sm:$0xf0]  ;;  %v3265_v25 = vor.u32 %v3857_v16, %v3264_v13  ;;  %v3835_v53 = vld [vmem:[%s5745_s1 + $0x404] sm:$0xf0]  ;;  %v3240_v55 = vld [vmem:[%s5745_s1 + $0x480] sm:$0xf] }
  0x4d   : > { %2013 = vmatpush.bf16.msrb.mxu2 %v3049_v23  ;;  %v3201_v23 = vor.u32 %v3841_v12, %v3200_v11  ;;  %v3393_v30 = vor.u32 %v3889_v22, %v3392_v21  ;;  %v3837_v41 = vld [vmem:[%s5745_s1 + $0x414] sm:$0xf0]  ;;  %v3851_v56 = vld [vmem:[%s5745_s1 + $0x484] sm:$0xf0]  ;;  %v3304_v57 = vld [vmem:[%s5745_s1 + $0x500] sm:$0xf]  ;;  %v3177_v7 = vor.u32 %v3835_v53, %v3176_v52 }
  0x4e   : > { %2027 = vmatpush.bf16.msrb.mxu3 %v3113_v28  ;;  %1986 = vmatmul.bf16.vlgmr.msrb.gmra.mxu0 %v4519_v39  ;;  %v3839_v28 = vld [vmem:[%s5745_s1 + $0x424] sm:$0xf0]  ;;  %v3853_v45 = vld [vmem:[%s5745_s1 + $0x494] sm:$0xf0]  ;;  %v3488_v63 = vld [vmem:[%s5745_s1 + $0x670] sm:$0xf]  ;;  %v3241_v11 = vor.u32 %v3851_v56, %v3240_v55 }
  0x4f   : > { %2034 = vmatpush.bf16.msra.mxu0 %v3233_v29  ;;  %2000 = vmatmul.bf16.vlgmr.msrb.gmra.mxu1 %v4532_v44  ;;  %v3256_v29 = vld [vmem:[%s5745_s1 + $0x4a0] sm:$0xf]  ;;  %v3193_v36 = vor.u32 %v3839_v28, %v3192_v27  ;;  %v3885_v51 = vld [vmem:[%s5745_s1 + $0x594] sm:$0xf0]  ;;  %v3867_v58 = vld [vmem:[%s5745_s1 + $0x504] sm:$0xf0]  ;;  %v3249_v59 = vor.u32 %v3853_v45, %v3248_v42 }
  0x50   : > { %2048 = vmatpush.bf16.msra.mxu1 %v3297_v33  ;;  %2014 = vmatmul.bf16.vlgmr.msrb.gmra.mxu2 %v4530_v43  ;;  %v3871_v33 = vld [vmem:[%s5745_s1 + $0x524] sm:$0xf0]  ;;  %v3913_v1 = vld [vmem:[%s5745_s1 + $0x674] sm:$0xf0]  ;;  %v3616_v4 = vld [vmem:[%s5745_s1 + $0x770] sm:$0xf]  ;;  %v3305_v12 = vor.u32 %v3867_v58, %v3304_v57 }
  0x51   : > { %2062 = vmatpush.bf16.msra.mxu2 %v3361_v34  ;;  %2028 = vmatmul.bf16.vlgmr.msrb.gmra.mxu3 %v4540_v47  ;;  %v3384_v34 = vld [vmem:[%s5745_s1 + $0x5a0] sm:$0xf]  ;;  %v3321_v40 = vor.u32 %v3871_v33, %v3320_v32  ;;  %v3929_v3 = vld [vmem:[%s5745_s1 + $0x6f4] sm:$0xf0]  ;;  %v3680_v6 = vld [vmem:[%s5745_s1 + $0x7f0] sm:$0xf]  ;;  %v3489_v18 = vor.u32 %v3913_v1, %v3488_v63 }
  0x52   : > { %2076 = vmatpush.bf16.msra.mxu3 %v3425_v38  ;;  %v3257_v38 = vor.u32 %v3855_v31, %v3256_v29  ;;  %v3385_v46 = vor.u32 %v3887_v35, %v3384_v34  ;;  %v3945_v5 = vld [vmem:[%s5745_s1 + $0x774] sm:$0xf0]  ;;  %v2640_v13 = vld [vmem:[%s4354_s24 + $0x28] sm:$0xf]  ;;  %v3694_v16 = vld [vmem:[%s4354_s24 + $0x24] sm:$0xf] }
  0x53   : > { %2035 = vmatpush.bf16.msra.mxu0 %v3225_v48  ;;  %v3312_v48 = vld [vmem:[%s5745_s1 + $0x510] sm:$0xf]  ;;  %v2634_v21 = vld [vmem:[%s4354_s24 + $0x60] sm:$0xf0]  ;;  %v3695_v22 = vld [vmem:[%s4354_s24 + $0x2c] sm:$0xf] }
  0x54   : > { %2049 = vmatpush.bf16.msra.mxu1 %v3289_v49  ;;  %v3869_v49 = vld [vmem:[%s5745_s1 + $0x514] sm:$0xf0]  ;;  %v3480_v27 = vld [vmem:[%s5745_s1 + $0x660] sm:$0xf]  ;;  %v3911_v28 = vld [vmem:[%s5745_s1 + $0x664] sm:$0xf0] }
  0x55   : > { %2063 = vmatpush.bf16.msra.mxu2 %v3353_v50  ;;  %v3376_v50 = vld [vmem:[%s5745_s1 + $0x590] sm:$0xf]  ;;  %v3544_v29 = vld [vmem:[%s5745_s1 + $0x6e0] sm:$0xf]  ;;  %v3927_v32 = vld [vmem:[%s5745_s1 + $0x6e4] sm:$0xf0] }
  0x56   : > { %2077 = vmatpush.bf16.msra.mxu3 %v3417_v54  ;;  %v3185_v54 = vor.u32 %v3837_v41, %v3184_v37  ;;  %v3377_v0 = vor.u32 %v3885_v51, %v3376_v50  ;;  %v3608_v33 = vld [vmem:[%s5745_s1 + $0x760] sm:$0xf]  ;;  %v3943_v34 = vld [vmem:[%s5745_s1 + $0x764] sm:$0xf0]  ;;  %v3481_v41 = vor.u32 %v3911_v28, %v3480_v27  ;;  %v3545_v42 = vor.u32 %v3927_v32, %v3544_v29  ;;  %v3925_v51 = vld [vmem:[%s5745_s1 + $0x6d4] sm:$0xf0] }
  0x57   : > { %2036 = vmatpush.bf16.msra.mxu0 %v3217_v60  ;;  %v3313_v60 = vor.u32 %v3869_v49, %v3312_v48  ;;  %v3672_v37 = vld [vmem:[%s5745_s1 + $0x7e0] sm:$0xf]  ;;  %v3609_v45 = vor.u32 %v3943_v34, %v3608_v33  ;;  %v3909_v48 = vld [vmem:[%s5745_s1 + $0x654] sm:$0xf0]  ;;  %v3536_v49 = vld [vmem:[%s5745_s1 + $0x6d0] sm:$0xf] }
  0x58   : > { %2050 = vmatpush.bf16.msra.mxu1 %v3281_v61  ;;  %v3368_v61 = vld [vmem:[%s5745_s1 + $0x580] sm:$0xf]  ;;  %v3600_v52 = vld [vmem:[%s5745_s1 + $0x750] sm:$0xf]  ;;  %v3941_v53 = vld [vmem:[%s5745_s1 + $0x754] sm:$0xf0]  ;;  %v3537_v57 = vor.u32 %v3925_v51, %v3536_v49 }
  0x59   : > { %2064 = vmatpush.bf16.msra.mxu2 %v3345_v62  ;;  %v3883_v62 = vld [vmem:[%s5745_s1 + $0x584] sm:$0xf0]  ;;  %v3957_v55 = vld [vmem:[%s5745_s1 + $0x7d4] sm:$0xf0]  ;;  %v3601_v58 = vor.u32 %v3941_v53, %v3600_v52  ;;  %v3576_v28 = vld [vmem:[%s5745_s1 + $0x720] sm:$0xf] }
  0x5a   : > { %2078 = vmatpush.bf16.msra.mxu3 %v3409_v2  ;;  %v3552_v2 = vld [vmem:[%s5745_s1 + $0x6f0] sm:$0xf]  ;;  %v3369_v17 = vor.u32 %v3883_v62, %v3368_v61  ;;  %v3528_v61 = vld [vmem:[%s5745_s1 + $0x6c0] sm:$0xf]  ;;  %v3923_v63 = vld [vmem:[%s5745_s1 + $0x6c4] sm:$0xf0] }
  0x5b   : > { %2037 = vmatpush.bf16.msra.mxu0 %v3209_v8  ;;  %v3961_v8 = vld [vmem:[%s5745_s1 + $0x7f4] sm:$0xf0]  ;;  %v3939_v1 = vld [vmem:[%s5745_s1 + $0x744] sm:$0xf0]  ;;  %v3440_v34 = vld [vmem:[%s5745_s1 + $0x610] sm:$0xf] }
  0x5c   : > { %2051 = vmatpush.bf16.msra.mxu1 %v3273_v9  ;;  %v2632_v9 = vld [vmem:[%s4354_s24 + $0x20] sm:$0xf]  ;;  %v3919_v27 = vld [vmem:[%s5745_s1 + $0x6a4] sm:$0xf0]  ;;  %v3933_v49 = vld [vmem:[%s5745_s1 + $0x714] sm:$0xf0] }
  0x5d   : > { %2065 = vmatpush.bf16.msra.mxu2 %v3337_v10  ;;  %v3702_v10 = vld [vmem:[%s4354_s24 + $0x5c] sm:$0xf0]  ;;  %v3935_v29 = vld [vmem:[%s5745_s1 + $0x724] sm:$0xf0]  ;;  %v3949_v51 = vld [vmem:[%s5745_s1 + $0x794] sm:$0xf0] }
  0x5e   : > { %2079 = vmatpush.bf16.msra.mxu3 %v3401_v15  ;;  %v3703_v15 = vld [vmem:[%s4354_s24 + $0x64] sm:$0xf0]  ;;  %v4731_v31 = vor.u32 %v3702_v10, %v2632_v9  ;;  %v3520_v9 = vld [vmem:[%s5745_s1 + $0x6b0] sm:$0xf]  ;;  %v3432_v52 = vld [vmem:[%s5745_s1 + $0x600] sm:$0xf] }
  0x5f   : > { %2038 = vmatpush.bf16.msra.mxu0 %v3201_v23  ;;  %v2642_v23 = vld [vmem:[%s4354_s24 + $0x68] sm:$0xf0]  ;;  %v4742_v35 = vor.u32 %v3703_v15, %v2640_v13  ;;  %v3937_v13 = vld [vmem:[%s5745_s1 + $0x734] sm:$0xf0]  ;;  %v3648_v15 = vld [vmem:[%s5745_s1 + $0x7b0] sm:$0xf] }
  0x60   : > { %2052 = vmatpush.bf16.msra.mxu1 %v3265_v25  ;;  %v3553_v25 = vor.u32 %v3929_v3, %v3552_v2  ;;  %v3656_v2 = vld [vmem:[%s5745_s1 + $0x7c0] sm:$0xf]  ;;  %v3955_v3 = vld [vmem:[%s5745_s1 + $0x7c4] sm:$0xf0] }
  0x61   : > { %2066 = vmatpush.bf16.msra.mxu2 %v3329_v26  ;;  %v3617_v26 = vor.u32 %v3945_v5, %v3616_v4  ;;  %v3529_v5 = vor.u32 %v3923_v63, %v3528_v61  ;;  %v3657_v10 = vor.u32 %v3955_v3, %v3656_v2  ;;  %v3951_v32 = vld [vmem:[%s5745_s1 + $0x7a4] sm:$0xf0]  ;;  %v3624_v61 = vld [vmem:[%s5745_s1 + $0x780] sm:$0xf]  ;;  %v3720_v63 = vld [vmem:[%s5745_s1 + $0x74] sm:$0xf] }
  0x62   : > { %2080 = vmatpush.bf16.msra.mxu3 %v3393_v30  ;;  %v3681_v30 = vor.u32 %v3961_v8, %v3680_v6  ;;  %v3905_v8 = vld [vmem:[%s5745_s1 + $0x634] sm:$0xf0]  ;;  %v3899_v53 = vld [vmem:[%s5745_s1 + $0x604] sm:$0xf0]  ;;  %v3736_v2 = vld [vmem:[%s5745_s1 + $0xf4] sm:$0xf] }
  0x63   : > { %2039 = vmatpush.bf16.msra.mxu0 %v3193_v36  ;;  %v4744_v36 = vor.u32 %v3694_v16, %v2634_v21  ;;  %v3953_v16 = vld [vmem:[%s5745_s1 + $0x7b4] sm:$0xf0]  ;;  %v2786_v3 = vld [vmem:[%s5745_s1 + $0xf8] sm:$0xf0] }
  0x64   : > { %2053 = vmatpush.bf16.msra.mxu1 %v3257_v38  ;;  %v3959_v38 = vld [vmem:[%s5745_s1 + $0x7e4] sm:$0xf0] }
  0x65   : > { %2067 = vmatpush.bf16.msra.mxu2 %v3321_v40  ;;  %v4752_v40 = vor.u32 %v3695_v22, %v2642_v23  ;;  %v3673_v50 = vor.u32 %v3959_v38, %v3672_v37  ;;  %v3448_v22 = vld [vmem:[%s5745_s1 + $0x620] sm:$0xf]  ;;  %v3903_v23 = vld [vmem:[%s5745_s1 + $0x624] sm:$0xf0]  ;;  %v3577_v38 = vor.u32 %v3935_v29, %v3576_v28  ;;  %v2714_v28 = vld [vmem:[%s5745_s1 + $0x68] sm:$0xf0] }
  0x66   : > { %2081 = vmatpush.bf16.msra.mxu3 %v3385_v46  ;;  %v3472_v46 = vld [vmem:[%s5745_s1 + $0x650] sm:$0xf]  ;;  %v3449_v33 = vor.u32 %v3903_v23, %v3448_v22  ;;  %v3697_v22 = vld [vmem:[%s4354_s24 + $0x3c] sm:$0xf]  ;;  %v3734_v29 = vld [vmem:[%s5745_s1 + $0xe4] sm:$0xf] }
  0x67   : > { %2040 = vmatpush.bf16.msra.mxu0 %v3185_v54  ;;  %v3664_v54 = vld [vmem:[%s5745_s1 + $0x7d0] sm:$0xf]  ;;  %v3473_v56 = vor.u32 %v3909_v48, %v3472_v46  ;;  %v2658_v23 = vld [vmem:[%s4354_s24 + $0x78] sm:$0xf0] }
  0x68   : > { %2054 = vmatpush.bf16.msra.mxu1 %v3249_v59  ;;  %v3464_v59 = vld [vmem:[%s5745_s1 + $0x640] sm:$0xf]  ;;  %v3665_v62 = vor.u32 %v3957_v55, %v3664_v54  ;;  %v3568_v48 = vld [vmem:[%s5745_s1 + $0x710] sm:$0xf] }
  0x69   : > { %2068 = vmatpush.bf16.msra.mxu2 %v3313_v60  ;;  %v3907_v60 = vld [vmem:[%s5745_s1 + $0x644] sm:$0xf0]  ;;  %v3496_v55 = vld [vmem:[%s5745_s1 + $0x680] sm:$0xf] }
  0x6a   : > { %2082 = vmatpush.bf16.msra.mxu3 %v3377_v0  ;;  %v3592_v0 = vld [vmem:[%s5745_s1 + $0x740] sm:$0xf]  ;;  %v3465_v4 = vor.u32 %v3907_v60, %v3464_v59  ;;  %v3569_v60 = vor.u32 %v3933_v49, %v3568_v48 }
  0x6b   : > { %2041 = vmatpush.bf16.msra.mxu0 %v3177_v7  ;;  %v3593_v6 = vor.u32 %v3939_v1, %v3592_v0  ;;  %v3456_v7 = vld [vmem:[%s5745_s1 + $0x630] sm:$0xf]  ;;  %v2722_v1 = vld [vmem:[%s5745_s1 + $0x78] sm:$0xf0] }
  0x6c   : > { %2055 = vmatpush.bf16.msra.mxu1 %v3241_v11  ;;  %v3921_v11 = vld [vmem:[%s5745_s1 + $0x6b4] sm:$0xf0] }
  0x6d   : > { %2069 = vmatpush.bf16.msra.mxu2 %v3305_v12  ;;  %v3584_v12 = vld [vmem:[%s5745_s1 + $0x730] sm:$0xf] }
  0x6e   : > { %2083 = vmatpush.bf16.msra.mxu3 %v3369_v17  ;;  %2042 = vmatmul.bf16.vlgmr.msra.gmra.mxu0 %v4731_v31  ;;  %v3457_v17 = vor.u32 %v3905_v8, %v3456_v7  ;;  %v3585_v21 = vor.u32 %v3937_v13, %v3584_v12  ;;  %v3433_v7 = vor.u32 %v3899_v53, %v3432_v52  ;;  %v2914_v8 = vld [vmem:[%s5745_s1 + $0x1f8] sm:$0xf0]  ;;  %v2656_v13 = vld [vmem:[%s4354_s24 + $0x38] sm:$0xf]  ;;  %v3732_v53 = vld [vmem:[%s5745_s1 + $0xd4] sm:$0xf] }
  0x6f   : > { %2090 = vmatpush.bf16.msrb.mxu0 %v3489_v18  ;;  %2056 = vmatmul.bf16.vlgmr.msra.gmra.mxu1 %v4744_v36  ;;  %v3521_v18 = vor.u32 %v3921_v11, %v3520_v9  ;;  %v2648_v9 = vld [vmem:[%s4354_s24 + $0x30] sm:$0xf]  ;;  %v2706_v52 = vld [vmem:[%s5745_s1 + $0x58] sm:$0xf0] }
  0x70   : > { %2104 = vmatpush.bf16.msrb.mxu1 %v3553_v25  ;;  %2070 = vmatmul.bf16.vlgmr.msra.gmra.mxu2 %v4742_v35  ;;  %v3512_v25 = vld [vmem:[%s5745_s1 + $0x6a0] sm:$0xf] }
  0x71   : > { %2118 = vmatpush.bf16.msrb.mxu2 %v3617_v26  ;;  %2084 = vmatmul.bf16.vlgmr.msra.gmra.mxu3 %v4752_v40  ;;  %v3649_v26 = vor.u32 %v3953_v16, %v3648_v15  ;;  %v3513_v37 = vor.u32 %v3919_v27, %v3512_v25  ;;  %v3705_v15 = vld [vmem:[%s4354_s24 + $0x74] sm:$0xf0]  ;;  %v3696_v16 = vld [vmem:[%s4354_s24 + $0x34] sm:$0xf]  ;;  %v2789_v25 = vor.u32 %v3736_v2, %v2786_v3  ;;  %v3718_v27 = vld [vmem:[%s5745_s1 + $0x64] sm:$0xf] }
  0x72   : > { %2132 = vmatpush.bf16.msrb.mxu3 %v3681_v30  ;;  %v3640_v30 = vld [vmem:[%s5745_s1 + $0x7a0] sm:$0xf]  ;;  %v2717_v48 = vor.u32 %v3718_v27, %v2714_v28  ;;  %v2762_v3 = vld [vmem:[%s5745_s1 + $0xc8] sm:$0xf0]  ;;  %v3710_v27 = vld [vmem:[%s5745_s1 + $0x24] sm:$0xf] }
  0x73   : > { %2091 = vmatpush.bf16.msrb.mxu0 %v3481_v41  ;;  %v3901_v41 = vld [vmem:[%s5745_s1 + $0x614] sm:$0xf0]  ;;  %v3641_v46 = vor.u32 %v3951_v32, %v3640_v30  ;;  %v2682_v28 = vld [vmem:[%s5745_s1 + $0x28] sm:$0xf0] }
  0x74   : > { %2105 = vmatpush.bf16.msrb.mxu1 %v3545_v42  ;;  %v3504_v42 = vld [vmem:[%s5745_s1 + $0x690] sm:$0xf]  ;;  %v3441_v54 = vor.u32 %v3901_v41, %v3440_v34  ;;  %v3750_v34 = vld [vmem:[%s5745_s1 + $0x164] sm:$0xf] }
  0x75   : > { %2119 = vmatpush.bf16.msrb.mxu2 %v3609_v45  ;;  %v3917_v45 = vld [vmem:[%s5745_s1 + $0x694] sm:$0xf0] }
  0x76   : > { %2133 = vmatpush.bf16.msrb.mxu3 %v3673_v50  ;;  %v3632_v50 = vld [vmem:[%s5745_s1 + $0x790] sm:$0xf]  ;;  %v3505_v59 = vor.u32 %v3917_v45, %v3504_v42  ;;  %v3766_v42 = vld [vmem:[%s5745_s1 + $0x1e4] sm:$0xf]  ;;  %v2906_v45 = vld [vmem:[%s5745_s1 + $0x1e8] sm:$0xf0] }
  0x77   : > { %2092 = vmatpush.bf16.msrb.mxu0 %v3473_v56  ;;  %v3915_v56 = vld [vmem:[%s5745_s1 + $0x684] sm:$0xf0]  ;;  %v3633_v0 = vor.u32 %v3949_v51, %v3632_v50  ;;  %v3716_v51 = vld [vmem:[%s5745_s1 + $0x54] sm:$0xf] }
  0x78   : > { %2106 = vmatpush.bf16.msrb.mxu1 %v3537_v57  ;;  %v3560_v57 = vld [vmem:[%s5745_s1 + $0x700] sm:$0xf]  ;;  %v3497_v11 = vor.u32 %v3915_v56, %v3496_v55  ;;  %v2770_v55 = vld [vmem:[%s5745_s1 + $0xd8] sm:$0xf0]  ;;  %v3748_v56 = vld [vmem:[%s5745_s1 + $0x154] sm:$0xf] }
  0x79   : > { %2120 = vmatpush.bf16.msrb.mxu2 %v3601_v58  ;;  %v3931_v58 = vld [vmem:[%s5745_s1 + $0x704] sm:$0xf0] }
  0x7a   : > { %2134 = vmatpush.bf16.msrb.mxu3 %v3665_v62  ;;  %v3947_v62 = vld [vmem:[%s5745_s1 + $0x784] sm:$0xf0]  ;;  %v3561_v12 = vor.u32 %v3931_v58, %v3560_v57  ;;  %v2834_v57 = vld [vmem:[%s5745_s1 + $0x158] sm:$0xf0]  ;;  %v3764_v58 = vld [vmem:[%s5745_s1 + $0x1d4] sm:$0xf] }
  0x7b   : > { %2093 = vmatpush.bf16.msrb.mxu0 %v3465_v4  ;;  %v3752_v4 = vld [vmem:[%s5745_s1 + $0x174] sm:$0xf] }
  0x7c   : > { %2107 = vmatpush.bf16.msrb.mxu1 %v3529_v5  ;;  %v2850_v5 = vld [vmem:[%s5745_s1 + $0x178] sm:$0xf0] }
  0x7d   : > { %2121 = vmatpush.bf16.msrb.mxu2 %v3593_v6  ;;  %v3768_v6 = vld [vmem:[%s5745_s1 + $0x1f4] sm:$0xf] }
  0x7e   : > { %2135 = vmatpush.bf16.msrb.mxu3 %v3657_v10  ;;  %v3704_v10 = vld [vmem:[%s4354_s24 + $0x6c] sm:$0xf0]  ;;  %v2917_v30 = vor.u32 %v3768_v6, %v2914_v8  ;;  %v3762_v6 = vld [vmem:[%s5745_s1 + $0x1c4] sm:$0xf] }
  0x7f   : > { %2094 = vmatpush.bf16.msrb.mxu0 %v3457_v17  ;;  %v3625_v17 = vor.u32 %v3947_v62, %v3624_v61  ;;  %v4943_v32 = vor.u32 %v3704_v10, %v2648_v9  ;;  %v2773_v61 = vor.u32 %v3732_v53, %v2770_v55  ;;  %v2837_v62 = vor.u32 %v3748_v56, %v2834_v57  ;;  %v3724_v53 = vld [vmem:[%s5745_s1 + $0x94] sm:$0xf]  ;;  %v2738_v55 = vld [vmem:[%s5745_s1 + $0x98] sm:$0xf0] }
  0x80   : > { %2108 = vmatpush.bf16.msrb.mxu1 %v3521_v18  ;;  %v2725_v18 = vor.u32 %v3720_v63, %v2722_v1  ;;  %v3714_v63 = vld [vmem:[%s5745_s1 + $0x44] sm:$0xf]  ;;  %v3740_v56 = vld [vmem:[%s5745_s1 + $0x114] sm:$0xf]  ;;  %v2802_v57 = vld [vmem:[%s5745_s1 + $0x118] sm:$0xf0] }
  0x81   : > { %2122 = vmatpush.bf16.msrb.mxu2 %v3585_v21  ;;  %v2650_v21 = vld [vmem:[%s4354_s24 + $0x70] sm:$0xf0]  ;;  %v3730_v1 = vld [vmem:[%s5745_s1 + $0xc4] sm:$0xf] }
  0x82   : > { %2136 = vmatpush.bf16.msrb.mxu3 %v3649_v26  ;;  %v2853_v26 = vor.u32 %v3752_v4, %v2850_v5  ;;  %v4956_v41 = vor.u32 %v3696_v16, %v2650_v21  ;;  %v3746_v4 = vld [vmem:[%s5745_s1 + $0x144] sm:$0xf]  ;;  %v2826_v5 = vld [vmem:[%s5745_s1 + $0x148] sm:$0xf0]  ;;  %v2765_v9 = vor.u32 %v3730_v1, %v2762_v3  ;;  %v2754_v16 = vld [vmem:[%s5745_s1 + $0xb8] sm:$0xf0] }
  0x83   : > { %2095 = vmatpush.bf16.msrb.mxu0 %v3449_v33  ;;  %v2778_v33 = vld [vmem:[%s5745_s1 + $0xe8] sm:$0xf0]  ;;  %v2829_v10 = vor.u32 %v3746_v4, %v2826_v5  ;;  %v3760_v21 = vld [vmem:[%s5745_s1 + $0x1b4] sm:$0xf]  ;;  %v3722_v1 = vld [vmem:[%s5745_s1 + $0x84] sm:$0xf] }
  0x84   : > { %2109 = vmatpush.bf16.msrb.mxu1 %v3513_v37  ;;  %v2842_v37 = vld [vmem:[%s5745_s1 + $0x168] sm:$0xf0]  ;;  %v2781_v49 = vor.u32 %v3734_v29, %v2778_v33  ;;  %v3726_v29 = vld [vmem:[%s5745_s1 + $0xa4] sm:$0xf] }
  0x85   : > { %2123 = vmatpush.bf16.msrb.mxu2 %v3577_v38  ;;  %v4954_v38 = vor.u32 %v3705_v15, %v2656_v13  ;;  %v2845_v50 = vor.u32 %v3750_v34, %v2842_v37  ;;  %v3728_v13 = vld [vmem:[%s5745_s1 + $0xb4] sm:$0xf]  ;;  %v2746_v33 = vld [vmem:[%s5745_s1 + $0xa8] sm:$0xf0]  ;;  %v3742_v34 = vld [vmem:[%s5745_s1 + $0x124] sm:$0xf] }
  0x86   : > { %2137 = vmatpush.bf16.msrb.mxu3 %v3641_v46  ;;  %v4964_v46 = vor.u32 %v3697_v22, %v2658_v23  ;;  %v2882_v22 = vld [vmem:[%s5745_s1 + $0x1b8] sm:$0xf0]  ;;  %v2810_v37 = vld [vmem:[%s5745_s1 + $0x128] sm:$0xf0]  ;;  %v3738_v3 = vld [vmem:[%s5745_s1 + $0x104] sm:$0xf] }
  0x87   : > { %2096 = vmatpush.bf16.msrb.mxu0 %v3441_v54  ;;  %v2909_v54 = vor.u32 %v3766_v42, %v2906_v45  ;;  %v3758_v42 = vld [vmem:[%s5745_s1 + $0x1a4] sm:$0xf]  ;;  %v2874_v45 = vld [vmem:[%s5745_s1 + $0x1a8] sm:$0xf0] }
  0x88   : > { %2110 = vmatpush.bf16.msrb.mxu1 %v3505_v59  ;;  %v2898_v59 = vld [vmem:[%s5745_s1 + $0x1d8] sm:$0xf0]  ;;  %v2794_v5 = vld [vmem:[%s5745_s1 + $0x108] sm:$0xf0] }
  0x89   : > { %2124 = vmatpush.bf16.msrb.mxu2 %v3569_v60  ;;  %v2709_v60 = vor.u32 %v3716_v51, %v2706_v52  ;;  %v2901_v2 = vor.u32 %v3764_v58, %v2898_v59  ;;  %v3708_v51 = vld [vmem:[%s5745_s1 + $0x14] sm:$0xf]  ;;  %v2674_v52 = vld [vmem:[%s5745_s1 + $0x18] sm:$0xf0] }
  0x8a   : > { %2138 = vmatpush.bf16.msrb.mxu3 %v3633_v0  ;;  %v2698_v0 = vld [vmem:[%s5745_s1 + $0x48] sm:$0xf0]  ;;  %v3756_v58 = vld [vmem:[%s5745_s1 + $0x194] sm:$0xf]  ;;  %v2866_v59 = vld [vmem:[%s5745_s1 + $0x198] sm:$0xf0] }
  0x8b   : > { %2097 = vmatpush.bf16.msrb.mxu0 %v3433_v7  ;;  %v2890_v7 = vld [vmem:[%s5745_s1 + $0x1c8] sm:$0xf0]  ;;  %v2701_v8 = vor.u32 %v3714_v63, %v2698_v0  ;;  %v2741_v63 = vor.u32 %v3724_v53, %v2738_v55  ;;  %v2805_v0 = vor.u32 %v3740_v56, %v2802_v57  ;;  %v2869_v4 = vor.u32 %v3756_v58, %v2866_v59  ;;  %v3796_v53 = vld [vmem:[%s5745_s1 + $0x2d4] sm:$0xf]  ;;  %v3026_v55 = vld [vmem:[%s5745_s1 + $0x2d8] sm:$0xf0] }
  0x8c   : > { %2111 = vmatpush.bf16.msrb.mxu1 %v3497_v11  ;;  %v3712_v11 = vld [vmem:[%s5745_s1 + $0x34] sm:$0xf]  ;;  %v2893_v15 = vor.u32 %v3762_v6, %v2890_v7  ;;  %v3754_v6 = vld [vmem:[%s5745_s1 + $0x184] sm:$0xf]  ;;  %v2858_v7 = vld [vmem:[%s5745_s1 + $0x188] sm:$0xf0] }
  0x8d   : > { %2125 = vmatpush.bf16.msrb.mxu2 %v3561_v12  ;;  %v2690_v12 = vld [vmem:[%s5745_s1 + $0x38] sm:$0xf0]  ;;  %v3812_v56 = vld [vmem:[%s5745_s1 + $0x354] sm:$0xf] }
  0x8e   : > { %2139 = vmatpush.bf16.msrb.mxu3 %v3625_v17  ;;  %2098 = vmatmul.bf16.vlgmr.msrb.gmra.mxu0 %v4943_v32  ;;  %v3744_v17 = vld [vmem:[%s5745_s1 + $0x134] sm:$0xf]  ;;  %v2693_v23 = vor.u32 %v3712_v11, %v2690_v12  ;;  %v3042_v12 = vld [vmem:[%s5745_s1 + $0x2f8] sm:$0xf0] }
  0x8f   : > { %2146 = vmatpush.bf16.msra.mxu0 %v2725_v18  ;;  %2112 = vmatmul.bf16.vlgmr.msrb.gmra.mxu1 %v4956_v41  ;;  %v2818_v18 = vld [vmem:[%s5745_s1 + $0x138] sm:$0xf0]  ;;  %v3828_v58 = vld [vmem:[%s5745_s1 + $0x3d4] sm:$0xf] }
  0x90   : > { %2160 = vmatpush.bf16.msra.mxu1 %v2789_v25  ;;  %2126 = vmatmul.bf16.vlgmr.msrb.gmra.mxu2 %v4954_v38  ;;  %v2757_v25 = vor.u32 %v3728_v13, %v2754_v16  ;;  %v3816_v13 = vld [vmem:[%s5745_s1 + $0x374] sm:$0xf]  ;;  %v3090_v57 = vld [vmem:[%s5745_s1 + $0x358] sm:$0xf0] }
  0x91   : > { %2174 = vmatpush.bf16.msra.mxu2 %v2853_v26  ;;  %2140 = vmatmul.bf16.vlgmr.msrb.gmra.mxu3 %v4964_v46  ;;  %v2821_v26 = vor.u32 %v3744_v17, %v2818_v18  ;;  %v2797_v17 = vor.u32 %v3738_v3, %v2794_v5  ;;  %v3832_v18 = vld [vmem:[%s5745_s1 + $0x3f4] sm:$0xf]  ;;  %v3154_v59 = vld [vmem:[%s5745_s1 + $0x3d8] sm:$0xf0]  ;;  %v3146_v3 = vld [vmem:[%s5745_s1 + $0x3c8] sm:$0xf0] }
  0x92   : > { %2188 = vmatpush.bf16.msra.mxu3 %v2917_v30  ;;  %v2885_v30 = vor.u32 %v3760_v21, %v2882_v22  ;;  %v3170_v21 = vld [vmem:[%s5745_s1 + $0x3f8] sm:$0xf0]  ;;  %v2861_v22 = vor.u32 %v3754_v6, %v2858_v7  ;;  %v3776_v7 = vld [vmem:[%s5745_s1 + $0x234] sm:$0xf] }
  0x93   : > { %2147 = vmatpush.bf16.msra.mxu0 %v2717_v48  ;;  %v2685_v48 = vor.u32 %v3710_v27, %v2682_v28  ;;  %v3782_v27 = vld [vmem:[%s5745_s1 + $0x264] sm:$0xf]  ;;  %v2970_v28 = vld [vmem:[%s5745_s1 + $0x268] sm:$0xf0] }
  0x94   : > { %2161 = vmatpush.bf16.msra.mxu1 %v2781_v49  ;;  %v2749_v49 = vor.u32 %v3726_v29, %v2746_v33  ;;  %v3798_v29 = vld [vmem:[%s5745_s1 + $0x2e4] sm:$0xf]  ;;  %v3034_v33 = vld [vmem:[%s5745_s1 + $0x2e8] sm:$0xf0] }
  0x95   : > { %2175 = vmatpush.bf16.msra.mxu2 %v2845_v50  ;;  %v2813_v50 = vor.u32 %v3742_v34, %v2810_v37  ;;  %v3814_v34 = vld [vmem:[%s5745_s1 + $0x364] sm:$0xf]  ;;  %v3098_v37 = vld [vmem:[%s5745_s1 + $0x368] sm:$0xf0] }
  0x96   : > { %2189 = vmatpush.bf16.msra.mxu3 %v2909_v54  ;;  %v2877_v54 = vor.u32 %v3758_v42, %v2874_v45  ;;  %v3830_v42 = vld [vmem:[%s5745_s1 + $0x3e4] sm:$0xf]  ;;  %v3162_v45 = vld [vmem:[%s5745_s1 + $0x3e8] sm:$0xf0] }
  0x97   : > { %2148 = vmatpush.bf16.msra.mxu0 %v2709_v60  ;;  %v2677_v60 = vor.u32 %v3708_v51, %v2674_v52  ;;  %v3780_v51 = vld [vmem:[%s5745_s1 + $0x254] sm:$0xf]  ;;  %v2962_v52 = vld [vmem:[%s5745_s1 + $0x258] sm:$0xf0] }
  0x98   : > { %2162 = vmatpush.bf16.msra.mxu1 %v2773_v61  ;;  %v3706_v61 = vld [vmem:[%s5745_s1 + $0x4] sm:$0xf] }
  0x99   : > { %2176 = vmatpush.bf16.msra.mxu2 %v2837_v62  ;;  %v2666_v62 = vld [vmem:[%s5745_s1 + $0x8] sm:$0xf0] }
  0x9a   : > { %2190 = vmatpush.bf16.msra.mxu3 %v2901_v2  ;;  %v2730_v2 = vld [vmem:[%s5745_s1 + $0x88] sm:$0xf0]  ;;  %v2669_v11 = vor.u32 %v3706_v61, %v2666_v62  ;;  %v3029_v61 = vor.u32 %v3796_v53, %v3026_v55  ;;  %v3778_v62 = vld [vmem:[%s5745_s1 + $0x244] sm:$0xf]  ;;  %v3804_v55 = vld [vmem:[%s5745_s1 + $0x314] sm:$0xf] }
  0x9b   : > { %2149 = vmatpush.bf16.msra.mxu0 %v2701_v8  ;;  %v3784_v8 = vld [vmem:[%s5745_s1 + $0x274] sm:$0xf]  ;;  %v2733_v16 = vor.u32 %v3722_v1, %v2730_v2  ;;  %v3082_v1 = vld [vmem:[%s5745_s1 + $0x348] sm:$0xf0]  ;;  %v3826_v2 = vld [vmem:[%s5745_s1 + $0x3c4] sm:$0xf] }
  0x9c   : > { %2163 = vmatpush.bf16.msra.mxu1 %v2765_v9  ;;  %v2978_v9 = vld [vmem:[%s5745_s1 + $0x278] sm:$0xf0] }
  0x9d   : > { %2177 = vmatpush.bf16.msra.mxu2 %v2829_v10  ;;  %v3800_v10 = vld [vmem:[%s5745_s1 + $0x2f4] sm:$0xf] }
  0x9e   : > { %2191 = vmatpush.bf16.msra.mxu3 %v2893_v15  ;;  %v3106_v15 = vld [vmem:[%s5745_s1 + $0x378] sm:$0xf0] }
  0x9f   : > { %2150 = vmatpush.bf16.msra.mxu0 %v2693_v23  ;;  %v2981_v23 = vor.u32 %v3784_v8, %v2978_v9  ;;  %v2946_v8 = vld [vmem:[%s5745_s1 + $0x238] sm:$0xf0]  ;;  %v3792_v9 = vld [vmem:[%s5745_s1 + $0x2b4] sm:$0xf] }
  0xa0   : > { %2164 = vmatpush.bf16.msra.mxu1 %v2757_v25  ;;  %v3045_v25 = vor.u32 %v3800_v10, %v3042_v12  ;;  %v3149_v10 = vor.u32 %v3826_v2, %v3146_v3  ;;  %v3808_v12 = vld [vmem:[%s5745_s1 + $0x334] sm:$0xf]  ;;  %v3114_v2 = vld [vmem:[%s5745_s1 + $0x388] sm:$0xf0] }
  0xa1   : > { %2178 = vmatpush.bf16.msra.mxu2 %v2821_v26  ;;  %v3109_v26 = vor.u32 %v3816_v13, %v3106_v15  ;;  %v3074_v13 = vld [vmem:[%s5745_s1 + $0x338] sm:$0xf0]  ;;  %v3824_v15 = vld [vmem:[%s5745_s1 + $0x3b4] sm:$0xf] }
  0xa2   : > { %2192 = vmatpush.bf16.msra.mxu3 %v2885_v30  ;;  %v3173_v30 = vor.u32 %v3832_v18, %v3170_v21  ;;  %v3077_v21 = vor.u32 %v3808_v12, %v3074_v13  ;;  %v3880_v12 = vld [vmem:[%s5745_s1 + $0x574] sm:$0xf]  ;;  %v3362_v13 = vld [vmem:[%s5745_s1 + $0x578] sm:$0xf0] }
  0xa3   : > { %2151 = vmatpush.bf16.msra.mxu0 %v2685_v48  ;;  %v2973_v48 = vor.u32 %v3782_v27, %v2970_v28  ;;  %v3002_v27 = vld [vmem:[%s5745_s1 + $0x2a8] sm:$0xf0]  ;;  %v3806_v28 = vld [vmem:[%s5745_s1 + $0x324] sm:$0xf] }
  0xa4   : > { %2165 = vmatpush.bf16.msra.mxu1 %v2749_v49  ;;  %v3037_v49 = vor.u32 %v3798_v29, %v3034_v33  ;;  %v3066_v29 = vld [vmem:[%s5745_s1 + $0x328] sm:$0xf0] }
  0xa5   : > { %2179 = vmatpush.bf16.msra.mxu2 %v2813_v50  ;;  %v3101_v50 = vor.u32 %v3814_v34, %v3098_v37  ;;  %v3130_v33 = vld [vmem:[%s5745_s1 + $0x3a8] sm:$0xf0] }
  0xa6   : > { %2193 = vmatpush.bf16.msra.mxu3 %v2877_v54  ;;  %v3165_v54 = vor.u32 %v3830_v42, %v3162_v45 }
  0xa7   : > { %2152 = vmatpush.bf16.msra.mxu0 %v2677_v60  ;;  %v2965_v60 = vor.u32 %v3780_v51, %v2962_v52  ;;  %v3788_v51 = vld [vmem:[%s5745_s1 + $0x294] sm:$0xf] }
  0xa8   : > { %2166 = vmatpush.bf16.msra.mxu1 %v2741_v63  ;;  %v2954_v63 = vld [vmem:[%s5745_s1 + $0x248] sm:$0xf0] }
  0xa9   : > { %2180 = vmatpush.bf16.msra.mxu2 %v2805_v0  ;;  %v3810_v0 = vld [vmem:[%s5745_s1 + $0x344] sm:$0xf] }
  0xaa   : > { %2194 = vmatpush.bf16.msra.mxu3 %v2869_v4  ;;  %v2957_v4 = vor.u32 %v3778_v62, %v2954_v63  ;;  %v3085_v6 = vor.u32 %v3810_v0, %v3082_v1  ;;  %v3786_v63 = vld [vmem:[%s5745_s1 + $0x284] sm:$0xf]  ;;  %v3050_v0 = vld [vmem:[%s5745_s1 + $0x308] sm:$0xf0] }
  0xab   : > { %2153 = vmatpush.bf16.msra.mxu0 %v2669_v11  ;;  %v3010_v11 = vld [vmem:[%s5745_s1 + $0x2b8] sm:$0xf0]  ;;  %v3818_v1 = vld [vmem:[%s5745_s1 + $0x384] sm:$0xf] }
  0xac   : > { %2167 = vmatpush.bf16.msra.mxu1 %v2733_v16  ;;  %v3138_v16 = vld [vmem:[%s5745_s1 + $0x3b8] sm:$0xf0]  ;;  %v3013_v18 = vor.u32 %v3792_v9, %v3010_v11 }
  0xad   : > { %2181 = vmatpush.bf16.msra.mxu2 %v2797_v17  ;;  %v2949_v17 = vor.u32 %v3776_v7, %v2946_v8  ;;  %v3298_v11 = vld [vmem:[%s5745_s1 + $0x4f8] sm:$0xf0] }
  0xae   : > { %2195 = vmatpush.bf16.msra.mxu3 %v2861_v22  ;;  %2154 = vmatmul.bf16.vlgmr.msra.gmra.mxu0 %v4362_v14  ;;  %v3093_v14 = vor.u32 %v3812_v56, %v3090_v57  ;;  %v3774_v22 = vld [vmem:[%s5745_s1 + $0x224] sm:$0xf]  ;;  %v1931_v34 = vpop.f32.mrf.mxu0  ;;  %v3058_v56 = vld [vmem:[%s5745_s1 + $0x318] sm:$0xf0]  ;;  %v3820_v57 = vld [vmem:[%s5745_s1 + $0x394] sm:$0xf] }
  0xaf   : > { %2202 = vmatpush.bf16.msrb.mxu0 %v2981_v23  ;;  %2168 = vmatmul.bf16.vlgmr.msra.gmra.mxu1 %v4372_v20  ;;  %v3157_v20 = vor.u32 %v3828_v58, %v3154_v59  ;;  %v2938_v23 = vld [vmem:[%s5745_s1 + $0x228] sm:$0xf0]  ;;  %v3122_v58 = vld [vmem:[%s5745_s1 + $0x398] sm:$0xf0]  ;;  %v3061_v62 = vor.u32 %v3804_v55, %v3058_v56  ;;  %v3860_v56 = vld [vmem:[%s5745_s1 + $0x4d4] sm:$0xf] }
  0xb0   : > { %2216 = vmatpush.bf16.msrb.mxu1 %v3045_v25  ;;  %2182 = vmatmul.bf16.vlgmr.msra.gmra.mxu2 %v4370_v19  ;;  %v3794_v19 = vld [vmem:[%s5745_s1 + $0x2c4] sm:$0xf]  ;;  %v2941_v37 = vor.u32 %v3774_v22, %v2938_v23  ;;  %v1945_v42 = vpop.f32.mrf.mxu1  ;;  %v3218_v55 = vld [vmem:[%s5745_s1 + $0x458] sm:$0xf0] }
  0xb1   : > { %2230 = vmatpush.bf16.msrb.mxu2 %v3109_v26  ;;  %2196 = vmatmul.bf16.vlgmr.msra.gmra.mxu3 %v4376_v24  ;;  %v3018_v24 = vld [vmem:[%s5745_s1 + $0x2c8] sm:$0xf0]  ;;  %v3790_v25 = vld [vmem:[%s5745_s1 + $0x2a4] sm:$0xf]  ;;  %v3141_v26 = vor.u32 %v3824_v15, %v3138_v16  ;;  %v1946_v52 = vadd.f32 %v1945_v42, %v1931_v34 }
  0xb2   : > { %2244 = vmatpush.bf16.msrb.mxu3 %v3173_v30  ;;  %v3021_v5 = vor.u32 %v3794_v19, %v3018_v24  ;;  %v3822_v30 = vld [vmem:[%s5745_s1 + $0x3a4] sm:$0xf]  ;;  %v3005_v45 = vor.u32 %v3790_v25, %v3002_v27  ;;  %v2986_v19 = vld [vmem:[%s5745_s1 + $0x288] sm:$0xf0]  ;;  %v3125_v24 = vor.u32 %v3820_v57, %v3122_v58  ;;  %v3117_v25 = vor.u32 %v3818_v1, %v3114_v2 }
  0xb3   : > { %2203 = vmatpush.bf16.msrb.mxu0 %v2973_v48  ;;  %v3069_v48 = vor.u32 %v3806_v28, %v3066_v29  ;;  %v3133_v53 = vor.u32 %v3822_v30, %v3130_v33  ;;  %v3365_v28 = vor.u32 %v3880_v12, %v3362_v13  ;;  %v3846_v29 = vld [vmem:[%s5745_s1 + $0x464] sm:$0xf]  ;;  %v3226_v30 = vld [vmem:[%s5745_s1 + $0x468] sm:$0xf0]  ;;  %v3840_v12 = vld [vmem:[%s5745_s1 + $0x434] sm:$0xf] }
  0xb4   : > { %2217 = vmatpush.bf16.msrb.mxu1 %v3037_v49  ;;  %v3772_v49 = vld [vmem:[%s5745_s1 + $0x214] sm:$0xf]  ;;  %v3862_v33 = vld [vmem:[%s5745_s1 + $0x4e4] sm:$0xf]  ;;  %v3274_v1 = vld [vmem:[%s5745_s1 + $0x4c8] sm:$0xf0] }
  0xb5   : > { %2231 = vmatpush.bf16.msrb.mxu2 %v3101_v50  ;;  %v2930_v50 = vld [vmem:[%s5745_s1 + $0x218] sm:$0xf0]  ;;  %v1959_v3 = vpop.f32.mrf.mxu2  ;;  %v3878_v42 = vld [vmem:[%s5745_s1 + $0x564] sm:$0xf] }
  0xb6   : > { %2245 = vmatpush.bf16.msrb.mxu3 %v3165_v54  ;;  %v2994_v54 = vld [vmem:[%s5745_s1 + $0x298] sm:$0xf0]  ;;  %v2933_v59 = vor.u32 %v3772_v49, %v2930_v50  ;;  %v1960_v7 = vadd.f32 %v1959_v3, %v1946_v52  ;;  %v1933_v15 = vpop.f32.mrf.mxu0  ;;  %v3418_v49 = vld [vmem:[%s5745_s1 + $0x5e8] sm:$0xf0]  ;;  %v3229_v50 = vor.u32 %v3846_v29, %v3226_v30  ;;  %v3874_v2 = vld [vmem:[%s5745_s1 + $0x544] sm:$0xf] }
  0xb7   : > { %2204 = vmatpush.bf16.msrb.mxu0 %v2965_v60  ;;  %v3770_v60 = vld [vmem:[%s5745_s1 + $0x204] sm:$0xf]  ;;  %v1973_v8 = vpop.f32.mrf.mxu3  ;;  %v3338_v3 = vld [vmem:[%s5745_s1 + $0x548] sm:$0xf0]  ;;  %v3202_v13 = vld [vmem:[%s5745_s1 + $0x438] sm:$0xf0] }
  0xb8   : > { %2218 = vmatpush.bf16.msrb.mxu1 %v3029_v61  ;;  %v2922_v61 = vld [vmem:[%s5745_s1 + $0x208] sm:$0xf0]  ;;  %v1947_v16 = vpop.f32.mrf.mxu1  ;;  %v1974_v22 = vadd.f32 %v1973_v8, %v1960_v7  ;;  %v3838_v29 = vld [vmem:[%s5745_s1 + $0x424] sm:$0xf] }
  0xb9   : > { %2232 = vmatpush.bf16.msrb.mxu2 %v3093_v14  ;;  %v2997_v14 = vor.u32 %v3788_v51, %v2994_v54  ;;  %v2925_v9 = vor.u32 %v3770_v60, %v2922_v61  ;;  %v1948_v23 = vadd.f32 %v1947_v16, %v1933_v15  ;;  %v3844_v54 = vld [vmem:[%s5745_s1 + $0x454] sm:$0xf]  ;;  %v3346_v61 = vld [vmem:[%s5745_s1 + $0x558] sm:$0xf0]  ;;  %v3194_v30 = vld [vmem:[%s5745_s1 + $0x428] sm:$0xf0] }
  0xba   : > { %2246 = vmatpush.bf16.msrb.mxu3 %v3157_v20  ;;  %v3802_v20 = vld [vmem:[%s5745_s1 + $0x304] sm:$0xf]  ;;  %v3876_v60 = vld [vmem:[%s5745_s1 + $0x554] sm:$0xf] }
  0xbb   : > { %2205 = vmatpush.bf16.msrb.mxu0 %v2957_v4  ;;  %v3848_v4 = vld [vmem:[%s5745_s1 + $0x474] sm:$0xf] }
  0xbc   : > { %2219 = vmatpush.bf16.msrb.mxu1 %v3021_v5  ;;  %v3234_v5 = vld [vmem:[%s5745_s1 + $0x478] sm:$0xf0]  ;;  %v3856_v15 = vld [vmem:[%s5745_s1 + $0x4b4] sm:$0xf] }
  0xbd   : > { %2233 = vmatpush.bf16.msrb.mxu2 %v3085_v6  ;;  %v3864_v6 = vld [vmem:[%s5745_s1 + $0x4f4] sm:$0xf]  ;;  %v1961_v51 = vpop.f32.mrf.mxu2 }
  0xbe   : > { %2247 = vmatpush.bf16.msrb.mxu3 %v3149_v10  ;;  %v2989_v10 = vor.u32 %v3786_v63, %v2986_v19  ;;  %v3301_v27 = vor.u32 %v3864_v6, %v3298_v11  ;;  %v1962_v57 = vadd.f32 %v1961_v51, %v1948_v23  ;;  %v3221_v19 = vor.u32 %v3844_v54, %v3218_v55  ;;  %v3402_v6 = vld [vmem:[%s5745_s1 + $0x5c8] sm:$0xf0]  ;;  %v3888_v23 = vld [vmem:[%s5745_s1 + $0x5b4] sm:$0xf] }
  0xbf   : > { %2206 = vmatpush.bf16.msrb.mxu0 %v2949_v17  ;;  %v3053_v17 = vor.u32 %v3802_v20, %v3050_v0  ;;  %v3858_v0 = vld [vmem:[%s5745_s1 + $0x4c4] sm:$0xf]  ;;  %v3341_v11 = vor.u32 %v3874_v2, %v3338_v3  ;;  %v3197_v55 = vor.u32 %v3838_v29, %v3194_v30 }
  0xc0   : > { %2220 = vmatpush.bf16.msrb.mxu1 %v3013_v18  ;;  %v3896_v18 = vld [vmem:[%s5745_s1 + $0x5f4] sm:$0xf]  ;;  %v3850_v3 = vld [vmem:[%s5745_s1 + $0x484] sm:$0xf] }
  0xc1   : > { %2234 = vmatpush.bf16.msrb.mxu2 %v3077_v21  ;;  %v3426_v21 = vld [vmem:[%s5745_s1 + $0x5f8] sm:$0xf0] }
  0xc2   : > { %2248 = vmatpush.bf16.msrb.mxu3 %v3141_v26  ;;  %v3237_v26 = vor.u32 %v3848_v4, %v3234_v5  ;;  %v3429_v34 = vor.u32 %v3896_v18, %v3426_v21  ;;  %v3890_v5 = vld [vmem:[%s5745_s1 + $0x5c4] sm:$0xf]  ;;  %v3266_v18 = vld [vmem:[%s5745_s1 + $0x4b8] sm:$0xf0]  ;;  %v3872_v21 = vld [vmem:[%s5745_s1 + $0x534] sm:$0xf] }
  0xc3   : > { %2207 = vmatpush.bf16.msrb.mxu0 %v2941_v37  ;;  %v3290_v37 = vld [vmem:[%s5745_s1 + $0x4e8] sm:$0xf0]  ;;  %v3405_v16 = vor.u32 %v3890_v5, %v3402_v6  ;;  %v3866_v5 = vld [vmem:[%s5745_s1 + $0x504] sm:$0xf] }
  0xc4   : > { %2221 = vmatpush.bf16.msrb.mxu1 %v3005_v45  ;;  %v3354_v45 = vld [vmem:[%s5745_s1 + $0x568] sm:$0xf0]  ;;  %v3293_v52 = vor.u32 %v3862_v33, %v3290_v37  ;;  %v3854_v33 = vld [vmem:[%s5745_s1 + $0x4a4] sm:$0xf] }
  0xc5   : > { %2235 = vmatpush.bf16.msrb.mxu2 %v3069_v48  ;;  %v3894_v48 = vld [vmem:[%s5745_s1 + $0x5e4] sm:$0xf] }
  0xc6   : > { %2249 = vmatpush.bf16.msrb.mxu3 %v3133_v53  ;;  %v3357_v53 = vor.u32 %v3878_v42, %v3354_v45  ;;  %v3421_v58 = vor.u32 %v3894_v48, %v3418_v49  ;;  %v3258_v42 = vld [vmem:[%s5745_s1 + $0x4a8] sm:$0xf0]  ;;  %v3870_v45 = vld [vmem:[%s5745_s1 + $0x524] sm:$0xf] }
  0xc7   : > { %2208 = vmatpush.bf16.msrb.mxu0 %v2933_v59  ;;  %v3282_v59 = vld [vmem:[%s5745_s1 + $0x4d8] sm:$0xf0]  ;;  %v3322_v48 = vld [vmem:[%s5745_s1 + $0x528] sm:$0xf0] }
  0xc8   : > { %2222 = vmatpush.bf16.msrb.mxu1 %v2997_v14  ;;  %v1975_v14 = vpop.f32.mrf.mxu3  ;;  %v3285_v20 = vor.u32 %v3860_v56, %v3282_v59  ;;  %v3325_v59 = vor.u32 %v3870_v45, %v3322_v48  ;;  %v3926_v45 = vld [vmem:[%s5745_s1 + $0x6e4] sm:$0xf] }
  0xc9   : > { %2236 = vmatpush.bf16.msrb.mxu2 %v3061_v62  ;;  %v3410_v62 = vld [vmem:[%s5745_s1 + $0x5d8] sm:$0xf0]  ;;  %v1976_v63 = vadd.f32 %v1975_v14, %v1962_v57  ;;  %v3852_v14 = vld [vmem:[%s5745_s1 + $0x494] sm:$0xf] }
  0xca   : > { %2250 = vmatpush.bf16.msrb.mxu3 %v3125_v24  ;;  %v3349_v24 = vor.u32 %v3876_v60, %v3346_v61  ;;  %v3836_v60 = vld [vmem:[%s5745_s1 + $0x414] sm:$0xf]  ;;  %v3186_v61 = vld [vmem:[%s5745_s1 + $0x418] sm:$0xf0] }
  0xcb   : > { %2209 = vmatpush.bf16.msrb.mxu0 %v2925_v9  ;;  %v1987_v4 = vpop.f32.mrf.mxu0 }
  0xcc   : > { %2223 = vmatpush.bf16.msrb.mxu1 %v2989_v10  ;;  %v1988_v7 = vadd.f32 %v1987_v4, %v1974_v22  ;;  %v2001_v9 = vpop.f32.mrf.mxu1  ;;  %v3277_v10 = vor.u32 %v3858_v0, %v3274_v1  ;;  %v3330_v22 = vld [vmem:[%s5745_s1 + $0x538] sm:$0xf0]  ;;  %v3834_v0 = vld [vmem:[%s5745_s1 + $0x404] sm:$0xf]  ;;  %v3242_v4 = vld [vmem:[%s5745_s1 + $0x488] sm:$0xf0] }
  0xcd   : > { %2237 = vmatpush.bf16.msrb.mxu2 %v3053_v17 }
  0xce   : > { %2251 = vmatpush.bf16.msrb.mxu3 %v3117_v25  ;;  %2210 = vmatmul.bf16.vlgmr.msrb.gmra.mxu0 %v4519_v39  ;;  %v3892_v39 = vld [vmem:[%s5745_s1 + $0x5d4] sm:$0xf]  ;;  %v2002_v17 = vadd.f32 %v2001_v9, %v1988_v7  ;;  %v3394_v25 = vld [vmem:[%s5745_s1 + $0x5b8] sm:$0xf0]  ;;  %v3882_v9 = vld [vmem:[%s5745_s1 + $0x584] sm:$0xf] }
  0xcf   : > { %2258 = vmatpush.bf16.msra.mxu0 %v3237_v26  ;;  %2224 = vmatmul.bf16.vlgmr.msrb.gmra.mxu1 %v4532_v44  ;;  %v3210_v44 = vld [vmem:[%s5745_s1 + $0x448] sm:$0xf0]  ;;  %v3205_v26 = vor.u32 %v3840_v12, %v3202_v13  ;;  %v3912_v13 = vld [vmem:[%s5745_s1 + $0x674] sm:$0xf] }
  0xd0   : > { %2272 = vmatpush.bf16.msra.mxu1 %v3301_v27  ;;  %2238 = vmatmul.bf16.vlgmr.msrb.gmra.mxu2 %v4530_v43  ;;  %v3842_v43 = vld [vmem:[%s5745_s1 + $0x444] sm:$0xf]  ;;  %v3269_v27 = vor.u32 %v3856_v15, %v3266_v18  ;;  %v3490_v15 = vld [vmem:[%s5745_s1 + $0x678] sm:$0xf0] }
  0xd1   : > { %2286 = vmatpush.bf16.msra.mxu2 %v3365_v28  ;;  %2252 = vmatmul.bf16.vlgmr.msrb.gmra.mxu3 %v4540_v47  ;;  %v3413_v47 = vor.u32 %v3892_v39, %v3410_v62  ;;  %v3213_v8 = vor.u32 %v3842_v43, %v3210_v44  ;;  %v3333_v28 = vor.u32 %v3872_v21, %v3330_v22  ;;  %v3378_v43 = vld [vmem:[%s5745_s1 + $0x598] sm:$0xf0]  ;;  %v3944_v21 = vld [vmem:[%s5745_s1 + $0x774] sm:$0xf] }
  0xd2   : > { %2300 = vmatpush.bf16.msra.mxu3 %v3429_v34  ;;  %v3397_v34 = vor.u32 %v3888_v23, %v3394_v25  ;;  %v3189_v44 = vor.u32 %v3836_v60, %v3186_v61  ;;  %v3554_v18 = vld [vmem:[%s5745_s1 + $0x6f8] sm:$0xf0]  ;;  %v3245_v25 = vor.u32 %v3850_v3, %v3242_v4  ;;  %v3493_v30 = vor.u32 %v3912_v13, %v3490_v15  ;;  %v3924_v60 = vld [vmem:[%s5745_s1 + $0x6d4] sm:$0xf]  ;;  %v3658_v3 = vld [vmem:[%s5745_s1 + $0x7c8] sm:$0xf0] }
  0xd3   : > { %2259 = vmatpush.bf16.msra.mxu0 %v3229_v50  ;;  %v2015_v37 = vpop.f32.mrf.mxu2  ;;  %v1989_v50 = vpop.f32.mrf.mxu0  ;;  %v3618_v22 = vld [vmem:[%s5745_s1 + $0x778] sm:$0xf0]  ;;  %v3936_v15 = vld [vmem:[%s5745_s1 + $0x734] sm:$0xf] }
  0xd4   : > { %2273 = vmatpush.bf16.msra.mxu1 %v3293_v52  ;;  %v2016_v49 = vadd.f32 %v2015_v37, %v2002_v17  ;;  %v2029_v51 = vpop.f32.mrf.mxu3  ;;  %v3886_v52 = vld [vmem:[%s5745_s1 + $0x5a4] sm:$0xf]  ;;  %v1990_v54 = vadd.f32 %v1989_v50, %v1976_v63  ;;  %v2003_v56 = vpop.f32.mrf.mxu1  ;;  %v3250_v63 = vld [vmem:[%s5745_s1 + $0x498] sm:$0xf0] }
  0xd5   : > { %2287 = vmatpush.bf16.msra.mxu2 %v3357_v53  ;;  %v3386_v53 = vld [vmem:[%s5745_s1 + $0x5a8] sm:$0xf0]  ;;  %v3253_v1 = vor.u32 %v3852_v14, %v3250_v63  ;;  %v3910_v37 = vld [vmem:[%s5745_s1 + $0x664] sm:$0xf]  ;;  %v3538_v14 = vld [vmem:[%s5745_s1 + $0x6d8] sm:$0xf0] }
  0xd6   : > { %2301 = vmatpush.bf16.msra.mxu3 %v3421_v58  ;;  %v5458_v57 = vadd.f32 %v2029_v51, %v2016_v49  ;;  %v3261_v58 = vor.u32 %v3854_v33, %v3258_v42  ;;  %v3389_v39 = vor.u32 %v3886_v52, %v3386_v53  ;;  %v2004_v62 = vadd.f32 %v2003_v56, %v1990_v54  ;;  %v3482_v42 = vld [vmem:[%s5745_s1 + $0x668] sm:$0xf0]  ;;  %v3942_v50 = vld [vmem:[%s5745_s1 + $0x764] sm:$0xf]  ;;  %v3666_v63 = vld [vmem:[%s5745_s1 + $0x7d8] sm:$0xf0] }
  0xd7   : > { %2260 = vmatpush.bf16.msra.mxu0 %v3221_v19  ;;  %v3868_v19 = vld [vmem:[%s5745_s1 + $0x514] sm:$0xf]  ;;  %v3546_v49 = vld [vmem:[%s5745_s1 + $0x6e8] sm:$0xf0]  ;;  %v3958_v52 = vld [vmem:[%s5745_s1 + $0x7e4] sm:$0xf]  ;;  %v3485_v54 = vor.u32 %v3910_v37, %v3482_v42 }
  0xd8   : > { %2274 = vmatpush.bf16.msra.mxu1 %v3285_v20  ;;  %v3314_v20 = vld [vmem:[%s5745_s1 + $0x518] sm:$0xf0]  ;;  %v3610_v51 = vld [vmem:[%s5745_s1 + $0x768] sm:$0xf0] }
  0xd9   : > { %2288 = vmatpush.bf16.msra.mxu2 %v3349_v24  ;;  %v3884_v24 = vld [vmem:[%s5745_s1 + $0x594] sm:$0xf]  ;;  %v3317_v2 = vor.u32 %v3868_v19, %v3314_v20  ;;  %v3674_v53 = vld [vmem:[%s5745_s1 + $0x7e8] sm:$0xf0]  ;;  %v3613_v56 = vor.u32 %v3942_v50, %v3610_v51  ;;  %v3541_v20 = vor.u32 %v3924_v60, %v3538_v14  ;;  %v3522_v13 = vld [vmem:[%s5745_s1 + $0x6b8] sm:$0xf0] }
  0xda   : > { %2302 = vmatpush.bf16.msra.mxu3 %v3413_v47  ;;  %v3178_v47 = vld [vmem:[%s5745_s1 + $0x408] sm:$0xf0]  ;;  %v3381_v6 = vor.u32 %v3884_v24, %v3378_v43  ;;  %v3677_v61 = vor.u32 %v3958_v52, %v3674_v53  ;;  %v3922_v43 = vld [vmem:[%s5745_s1 + $0x6c4] sm:$0xf]  ;;  %v3916_v60 = vld [vmem:[%s5745_s1 + $0x694] sm:$0xf] }
  0xdb   : > { %2261 = vmatpush.bf16.msra.mxu0 %v3213_v8  ;;  %v2017_v7 = vpop.f32.mrf.mxu2  ;;  %v3306_v8 = vld [vmem:[%s5745_s1 + $0x508] sm:$0xf0]  ;;  %v3181_v17 = vor.u32 %v3834_v0, %v3178_v47  ;;  %v3938_v0 = vld [vmem:[%s5745_s1 + $0x744] sm:$0xf]  ;;  %v3506_v14 = vld [vmem:[%s5745_s1 + $0x698] sm:$0xf0] }
  0xdc   : > { %2275 = vmatpush.bf16.msra.mxu1 %v3277_v10  ;;  %v3370_v10 = vld [vmem:[%s5745_s1 + $0x588] sm:$0xf0]  ;;  %v2031_v12 = vpop.f32.mrf.mxu3 }
  0xdd   : > { %2289 = vmatpush.bf16.msra.mxu2 %v3341_v11  ;;  %v2018_v11 = vadd.f32 %v2017_v7, %v2004_v62  ;;  %v3373_v29 = vor.u32 %v3882_v9, %v3370_v10  ;;  %v3602_v62 = vld [vmem:[%s5745_s1 + $0x758] sm:$0xf0]  ;;  %v3594_v47 = vld [vmem:[%s5745_s1 + $0x748] sm:$0xf0]  ;;  %v3904_v9 = vld [vmem:[%s5745_s1 + $0x634] sm:$0xf] }
  0xde   : > { %2303 = vmatpush.bf16.msra.mxu3 %v3405_v16  ;;  %v3928_v16 = vld [vmem:[%s5745_s1 + $0x6f4] sm:$0xf]  ;;  %v3458_v10 = vld [vmem:[%s5745_s1 + $0x638] sm:$0xf0]  ;;  %v3578_v37 = vld [vmem:[%s5745_s1 + $0x728] sm:$0xf0] }
  0xdf   : > { %2262 = vmatpush.bf16.msra.mxu0 %v3205_v26  ;;  %v5526_v23 = vadd.f32 %v2031_v12, %v2018_v11  ;;  %v3309_v26 = vor.u32 %v3866_v5, %v3306_v8  ;;  %v3557_v33 = vor.u32 %v3928_v16, %v3554_v18  ;;  %v3597_v8 = vor.u32 %v3938_v0, %v3594_v47  ;;  %v3920_v11 = vld [vmem:[%s5745_s1 + $0x6b4] sm:$0xf]  ;;  %v3586_v16 = vld [vmem:[%s5745_s1 + $0x738] sm:$0xf0]  ;;  %v3642_v50 = vld [vmem:[%s5745_s1 + $0x7a8] sm:$0xf0] }
  0xe0   : > { %2276 = vmatpush.bf16.msra.mxu1 %v3269_v27  ;;  %v3960_v27 = vld [vmem:[%s5745_s1 + $0x7f4] sm:$0xf]  ;;  %v3650_v18 = vld [vmem:[%s5745_s1 + $0x7b8] sm:$0xf0]  ;;  %v3498_v0 = vld [vmem:[%s5745_s1 + $0x688] sm:$0xf0] }
  0xe1   : > { %2290 = vmatpush.bf16.msra.mxu2 %v3333_v28  ;;  %v3682_v28 = vld [vmem:[%s5745_s1 + $0x7f8] sm:$0xf0]  ;;  %v3930_v47 = vld [vmem:[%s5745_s1 + $0x704] sm:$0xf] }
  0xe2   : > { %2304 = vmatpush.bf16.msra.mxu3 %v3397_v34  ;;  %v3621_v34 = vor.u32 %v3944_v21, %v3618_v22  ;;  %v3685_v48 = vor.u32 %v3960_v27, %v3682_v28  ;;  %v3461_v21 = vor.u32 %v3904_v9, %v3458_v10  ;;  %v3525_v22 = vor.u32 %v3920_v11, %v3522_v13  ;;  %v3450_v27 = vld [vmem:[%s5745_s1 + $0x628] sm:$0xf0]  ;;  %v3918_v28 = vld [vmem:[%s5745_s1 + $0x6a4] sm:$0xf] }
  0xe3   : > { %2263 = vmatpush.bf16.msra.mxu0 %v3197_v55  ;;  %v3549_v55 = vor.u32 %v3926_v45, %v3546_v49  ;;  %v3950_v49 = vld [vmem:[%s5745_s1 + $0x7a4] sm:$0xf] }
  0xe4   : > { %2277 = vmatpush.bf16.msra.mxu1 %v3261_v58  ;;  %v3908_v58 = vld [vmem:[%s5745_s1 + $0x654] sm:$0xf] }
  0xe5   : > { %2291 = vmatpush.bf16.msra.mxu2 %v3325_v59  ;;  %v3474_v59 = vld [vmem:[%s5745_s1 + $0x658] sm:$0xf0] }
  0xe6   : > { %2305 = vmatpush.bf16.msra.mxu3 %v3389_v39  ;;  %v3940_v39 = vld [vmem:[%s5745_s1 + $0x754] sm:$0xf]  ;;  %v3477_v19 = vor.u32 %v3908_v58, %v3474_v59  ;;  %v3442_v59 = vld [vmem:[%s5745_s1 + $0x618] sm:$0xf0] }
  0xe7   : > { %2264 = vmatpush.bf16.msra.mxu0 %v3189_v44  ;;  %v3605_v24 = vor.u32 %v3940_v39, %v3602_v62  ;;  %v3530_v44 = vld [vmem:[%s5745_s1 + $0x6c8] sm:$0xf0]  ;;  %v3900_v58 = vld [vmem:[%s5745_s1 + $0x614] sm:$0xf]  ;;  %v3570_v62 = vld [vmem:[%s5745_s1 + $0x718] sm:$0xf0] }
  0xe8   : > { %2278 = vmatpush.bf16.msra.mxu1 %v3253_v1  ;;  %v3533_v7 = vor.u32 %v3922_v43, %v3530_v44  ;;  %v3932_v39 = vld [vmem:[%s5745_s1 + $0x714] sm:$0xf]  ;;  %v3914_v43 = vld [vmem:[%s5745_s1 + $0x684] sm:$0xf] }
  0xe9   : > { %2292 = vmatpush.bf16.msra.mxu2 %v3317_v2  ;;  %v3954_v2 = vld [vmem:[%s5745_s1 + $0x7c4] sm:$0xf] }
  0xea   : > { %2306 = vmatpush.bf16.msra.mxu3 %v3381_v6 }
  0xeb   : > { %2265 = vmatpush.bf16.msra.mxu0 %v3181_v17  ;;  %v2043_v1 = vpop.f32.mrf.mxu0  ;;  %v3952_v17 = vld [vmem:[%s5745_s1 + $0x7b4] sm:$0xf] }
  0xec   : > { %2279 = vmatpush.bf16.msra.mxu1 %v3245_v25  ;;  %v2044_v4 = vadd.f32 %v2043_v1, %v5458_v57  ;;  %v2057_v6 = vpop.f32.mrf.mxu1  ;;  %v3661_v57 = vor.u32 %v3954_v2, %v3658_v3  ;;  %v3589_v25 = vor.u32 %v3936_v15, %v3586_v16  ;;  %v3562_v1 = vld [vmem:[%s5745_s1 + $0x708] sm:$0xf0] }
  0xed   : > { %2293 = vmatpush.bf16.msra.mxu2 %v3309_v26  ;;  %v3902_v26 = vld [vmem:[%s5745_s1 + $0x624] sm:$0xf]  ;;  %v3565_v9 = vor.u32 %v3930_v47, %v3562_v1 }
  0xee   : > { %2307 = vmatpush.bf16.msra.mxu3 %v3373_v29  ;;  %2266 = vmatmul.bf16.vlgmr.msra.gmra.mxu0 %v4731_v31  ;;  %v3956_v31 = vld [vmem:[%s5745_s1 + $0x7d4] sm:$0xf]  ;;  %v2058_v12 = vadd.f32 %v2057_v6, %v2044_v4  ;;  %v3653_v29 = vor.u32 %v3952_v17, %v3650_v18  ;;  %v3453_v52 = vor.u32 %v3902_v26, %v3450_v27  ;;  %v3946_v4 = vld [vmem:[%s5745_s1 + $0x784] sm:$0xf] }
  0xef   : > { %2314 = vmatpush.bf16.msrb.mxu0 %v3493_v30  ;;  %2280 = vmatmul.bf16.vlgmr.msra.gmra.mxu1 %v4744_v36  ;;  %v3466_v36 = vld [vmem:[%s5745_s1 + $0x648] sm:$0xf0] }
  0xf0   : > { %2328 = vmatpush.bf16.msrb.mxu1 %v3557_v33  ;;  %2294 = vmatmul.bf16.vlgmr.msra.gmra.mxu2 %v4742_v35  ;;  %v3906_v35 = vld [vmem:[%s5745_s1 + $0x644] sm:$0xf]  ;;  %v3514_v33 = vld [vmem:[%s5745_s1 + $0x6a8] sm:$0xf0] }
  0xf1   : > { %2342 = vmatpush.bf16.msrb.mxu2 %v3621_v34  ;;  %2308 = vmatmul.bf16.vlgmr.msra.gmra.mxu3 %v4752_v40  ;;  %v3669_v40 = vor.u32 %v3956_v31, %v3666_v63  ;;  %v3469_v5 = vor.u32 %v3906_v35, %v3466_v36  ;;  %v3934_v34 = vld [vmem:[%s5745_s1 + $0x724] sm:$0xf]  ;;  %v3948_v31 = vld [vmem:[%s5745_s1 + $0x794] sm:$0xf]  ;;  %v3634_v63 = vld [vmem:[%s5745_s1 + $0x798] sm:$0xf0] }
  0xf2   : > { %2356 = vmatpush.bf16.msrb.mxu3 %v3685_v48  ;;  %v3898_v35 = vld [vmem:[%s5745_s1 + $0x604] sm:$0xf]  ;;  %v3434_v36 = vld [vmem:[%s5745_s1 + $0x608] sm:$0xf0] }
  0xf3   : > { %2315 = vmatpush.bf16.msrb.mxu0 %v3485_v54  ;;  %v2071_v30 = vpop.f32.mrf.mxu2  ;;  %v2045_v45 = vpop.f32.mrf.mxu0  ;;  %v3437_v6 = vor.u32 %v3898_v35, %v3434_v36 }
  0xf4   : > { %2329 = vmatpush.bf16.msrb.mxu1 %v3549_v55  ;;  %v2072_v42 = vadd.f32 %v2071_v30, %v2058_v12  ;;  %v2085_v48 = vpop.f32.mrf.mxu3  ;;  %v2046_v51 = vadd.f32 %v2045_v45, %v5526_v23  ;;  %v2059_v53 = vpop.f32.mrf.mxu1  ;;  %v3517_v55 = vor.u32 %v3918_v28, %v3514_v33  ;;  %v3645_v23 = vor.u32 %v3950_v49, %v3642_v50 }
  0xf5   : > { %2343 = vmatpush.bf16.msrb.mxu2 %v3613_v56  ;;  %v3581_v56 = vor.u32 %v3934_v34, %v3578_v37 }
  0xf6   : > { %2357 = vmatpush.bf16.msrb.mxu3 %v3677_v61  ;;  %v2086_v54 = vadd.f32 %v2085_v48, %v2072_v42  ;;  %v2060_v61 = vadd.f32 %v2059_v53, %v2046_v51 }
  0xf7   : > { %2316 = vmatpush.bf16.msrb.mxu0 %v3477_v19  ;;  %v3445_v19 = vor.u32 %v3900_v58, %v3442_v59 }
  0xf8   : > { %2330 = vmatpush.bf16.msrb.mxu1 %v3541_v20  ;;  %v3509_v20 = vor.u32 %v3916_v60, %v3506_v14 }
  0xf9   : > { %2344 = vmatpush.bf16.msrb.mxu2 %v3605_v24  ;;  %v3573_v24 = vor.u32 %v3932_v39, %v3570_v62 }
  0xfa   : > { %2358 = vmatpush.bf16.msrb.mxu3 %v3669_v40  ;;  %v3637_v40 = vor.u32 %v3948_v31, %v3634_v63 }
  0xfb   : > { %2317 = vmatpush.bf16.msrb.mxu0 %v3469_v5  ;;  %v2073_v44 = vpop.f32.mrf.mxu2  ;;  %v3626_v5 = vld [vmem:[%s5745_s1 + $0x788] sm:$0xf0] }
  0xfc   : > { %2331 = vmatpush.bf16.msrb.mxu1 %v3533_v7  ;;  %v2074_v2 = vadd.f32 %v2073_v44, %v2060_v61  ;;  %v2087_v3 = vpop.f32.mrf.mxu3  ;;  %v3629_v10 = vor.u32 %v3946_v4, %v3626_v5 }
  0xfd   : > { %2345 = vmatpush.bf16.msrb.mxu2 %v3597_v8  ;;  %v3501_v8 = vor.u32 %v3914_v43, %v3498_v0 }
  0xfe   : > { %2359 = vmatpush.bf16.msrb.mxu3 %v3661_v57  ;;  %v2088_v7 = vadd.f32 %v2087_v3, %v2074_v2 }
  0xff   : > { %2318 = vmatpush.bf16.msrb.mxu0 %v3461_v21 }
 0x100   : > { %2332 = vmatpush.bf16.msrb.mxu1 %v3525_v22 }
 0x101   : > { %2346 = vmatpush.bf16.msrb.mxu2 %v3589_v25 }
 0x102   : > { %2360 = vmatpush.bf16.msrb.mxu3 %v3653_v29 }
 0x103   : > { %2319 = vmatpush.bf16.msrb.mxu0 %v3453_v52 }
 0x104   : > { %2333 = vmatpush.bf16.msrb.mxu1 %v3517_v55 }
 0x105   : > { %2347 = vmatpush.bf16.msrb.mxu2 %v3581_v56 }
 0x106   : > { %2361 = vmatpush.bf16.msrb.mxu3 %v3645_v23 }
 0x107   : > { %2320 = vmatpush.bf16.msrb.mxu0 %v3445_v19 }
 0x108   : > { %2334 = vmatpush.bf16.msrb.mxu1 %v3509_v20 }
 0x109   : > { %2348 = vmatpush.bf16.msrb.mxu2 %v3573_v24 }
 0x10a   : > { %2362 = vmatpush.bf16.msrb.mxu3 %v3637_v40 }
 0x10b   : > { %2321 = vmatpush.bf16.msrb.mxu0 %v3437_v6  ;;  %v2099_v11 = vpop.f32.mrf.mxu0 }
 0x10c   : > { %2335 = vmatpush.bf16.msrb.mxu1 %v3501_v8  ;;  %v2100_v57 = vadd.f32 %v2099_v11, %v2086_v54  ;;  %v2113_v12 = vpop.f32.mrf.mxu1 }
 0x10d   : > { %2349 = vmatpush.bf16.msrb.mxu2 %v3565_v9 }
 0x10e   : > { %2363 = vmatpush.bf16.msrb.mxu3 %v3629_v10  ;;  %2322 = vmatmul.bf16.vlgmr.msrb.gmra.mxu0 %v4943_v32  ;;  %v2114_v13 = vadd.f32 %v2113_v12, %v2100_v57  ;;  %v5715_v32 = vld [vmem:[%s5746_s2] sm:$0x3] }
 0x10f   : > { %2336 = vmatmul.bf16.vlgmr.msrb.gmra.mxu1 %v4956_v41 }
 0x110   : > { %2350 = vmatmul.bf16.vlgmr.msrb.gmra.mxu2 %v4954_v38  ;;  %v2387_v38 = vperm.slane %v5715_v32, 0 }
 0x111   : > { %2364 = vmatmul.bf16.vlgmr.msrb.gmra.mxu3 %v4964_v46 }
 0x113   : > { %v2127_v15 = vpop.f32.mrf.mxu2  ;;  %v2101_v17 = vpop.f32.mrf.mxu0 }
 0x114   : > { %v2128_v16 = vadd.f32 %v2127_v15, %v2114_v13  ;;  %v2141_v18 = vpop.f32.mrf.mxu3  ;;  %v2102_v21 = vadd.f32 %v2101_v17, %v2088_v7  ;;  %v2115_v22 = vpop.f32.mrf.mxu1 }
 0x116   : > { %v2142_v25 = vadd.f32 %v2141_v18, %v2128_v16  ;;  %v2116_v41 = vadd.f32 %v2115_v22, %v2102_v21 }
 0x118   : > { %v2391_v28 = vadd.f32 %v2387_v38, %v2142_v25 }
 0x11a   : > { %v2409_v33 = vmul.f32 %v2391_v28, %v2391_v28 }
 0x11b   : > { %v2129_v46 = vpop.f32.mrf.mxu2 }
 0x11c   : > { %v2130_v26 = vadd.f32 %v2129_v46, %v2116_v41  ;;  %v2143_v27 = vpop.f32.mrf.mxu3 }
 0x11e   : > { %v2144_v29 = vadd.f32 %v2143_v27, %v2130_v26 }
 0x120   : > { %v2393_v30 = vadd.f32 %v2387_v38, %v2144_v29 }
 0x122   : > { %v2395_v34 = vadd.f32 %v2393_v30, %v2391_v28  ;;  %v2411_v37 = vmul.f32 %v2393_v30, %v2393_v30 }
 0x124   : > { %v2396_v42 = vrot.slane %v2395_v34, 4  ;;  %v2413_v45 = vadd.f32 %v2411_v37, %v2409_v33 }
 0x126   : > { %v2397_v48 = vadd.f32 %v2396_v42, %v2395_v34  ;;  %v2414_v49 = vrot.slane %v2413_v45, 4 }
 0x128   : > { %v2398_v50 = vrot.slane %v2397_v48, 2  ;;  %v2415_v51 = vadd.f32 %v2414_v49, %v2413_v45 }
 0x12a   : > { %v2399_v52 = vadd.f32 %v2398_v50, %v2397_v48  ;;  %v2416_v53 = vrot.slane %v2415_v51, 2 }
 0x12b   : > { %v2155_v44 = vpop.f32.mrf.mxu0 }
 0x12c   : > { %v2400_v54 = vrot.slane %v2399_v52, 1  ;;  %v2417_v55 = vadd.f32 %v2416_v53, %v2415_v51  ;;  %v2169_v1 = vpop.f32.mrf.mxu1 }
 0x12d   : > { %v2170_v9 = vadd.f32 %v2169_v1, %v2155_v44 }
 0x12e   : > { %v2401_v56 = vadd.f32 %v2400_v54, %v2399_v52  ;;  %v2418_v58 = vrot.slane %v2417_v55, 1 }
 0x130   : > { %v2419_v59 = vadd.f32 %v2418_v58, %v2417_v55  ;;  %v2427_v60 = vmul.f32 0.0625, %v2401_v56 }
 0x132   : > { %v2429_v23 = vmul.f32 0.0625, %v2419_v59  ;;  %v2431_v61 = vmul.f32 %v2427_v60, %v2427_v60  ;;  %v2437_v14 = vsub.f32 %v2391_v28, %v2427_v60  ;;  %v2439_v39 = vsub.f32 %v2393_v30, %v2427_v60 }
 0x133   : > { %v2183_v2 = vpop.f32.mrf.mxu2  ;;  %v2157_v4 = vpop.f32.mrf.mxu0 }
 0x134   : > { %v2433_v62 = vsub.f32 %v2429_v23, %v2431_v61  ;;  %v2197_v3 = vpop.f32.mrf.mxu3  ;;  %v2171_v5 = vpop.f32.mrf.mxu1  ;;  %v2184_v11 = vadd.f32 %v2183_v2, %v2170_v9 }
 0x135   : > { %v2172_v16 = vadd.f32 %v2171_v5, %v2157_v4 }
 0x136   : > { %v2435_v31 = vmax.f32 %v2433_v62, 0.0  ;;  %v2198_v13 = vadd.f32 %v2197_v3, %v2184_v11 }
 0x138   : > { %v2441_v63 = vadd.f32 1e-05, %v2435_v31 }
 0x13a   : > { %3986 = vrsqrt.f32 %v2441_v63  ;;  %vm2449_vm1 = vweird.f32 %v2441_v63 }
 0x13b   : > { %v2185_v6 = vpop.f32.mrf.mxu2 }
 0x13c   : > { %v2199_v7 = vpop.f32.mrf.mxu3  ;;  %v2186_v21 = vadd.f32 %v2185_v6, %v2172_v16 }
 0x13e   : > { %v2200_v46 = vadd.f32 %v2199_v7, %v2186_v21 }
 0x140   : > { %v3987_v19 = vpop.eup %3986 }
 0x141   : > { %v2444_v20 = vmul.f32 %v3987_v19, %v2441_v63  ;;  %vm2450_vm0 = vweird.f32 %v3987_v19 }
 0x142   : > { %vm2451_vm2 = vmor %vm2449_vm1, %vm2450_vm0 }
 0x143   : > { %v2445_v24 = vmul.f32 %v3987_v19, %v2444_v20 }
 0x145   : > { %v2446_v35 = vmul.f32 0.5, %v2445_v24 }
 0x147   : > { %v2447_v36 = vsub.f32 1.5, %v2446_v35  ;;  %v2388_v35 = vperm.slane %v5715_v32, 1 }
 0x149   : > { %v2448_v43 = vmul.f32 %v3987_v19, %v2447_v36 }
 0x14b   : > { %v2452_v40 = vsel %vm2451_vm2, %v3987_v19, %v2448_v43  ;;  %v2211_v8 = vpop.f32.mrf.mxu0 }
 0x14c   : > { %v5718_v0 = vmul.f32 %v2452_v40, %v2437_v14  ;;  %v5720_v47 = vmul.f32 %v2452_v40, %v2439_v39  ;;  %v2225_v10 = vpop.f32.mrf.mxu1  ;;  %v2212_v18 = vadd.f32 %v2211_v8, %v2198_v13 }
 0x14e   : > { %v2226_v25 = vadd.f32 %v2225_v10, %v2212_v18 }
 0x153   : > { %v2239_v57 = vpop.f32.mrf.mxu2  ;;  %v2213_v15 = vpop.f32.mrf.mxu0 }
 0x154   : > { %v2253_v12 = vpop.f32.mrf.mxu3  ;;  %v2227_v17 = vpop.f32.mrf.mxu1  ;;  %v2240_v27 = vadd.f32 %v2239_v57, %v2226_v25  ;;  %v2214_v28 = vadd.f32 %v2213_v15, %v2200_v46 }
 0x156   : > { %v2254_v30 = vadd.f32 %v2253_v12, %v2240_v27  ;;  %v2228_v33 = vadd.f32 %v2227_v17, %v2214_v28  ;;  %v2467_v27 = vld [vmem:[%s5747_s3] sm:$0x3] }
 0x15b   : > { %v2241_v22 = vpop.f32.mrf.mxu2 }
 0x15c   : > { %v2255_v41 = vpop.f32.mrf.mxu3  ;;  %v2242_v37 = vadd.f32 %v2241_v22, %v2228_v33  ;;  %v2477_v33 = vld [vmem:[%s5748_s4] sm:$0x3] }
 0x15e   : > { %v2256_v49 = vadd.f32 %v2255_v41, %v2242_v37 }
 0x16b   : > { %v2267_v38 = vpop.f32.mrf.mxu0 }
 0x16c   : > { %v2281_v26 = vpop.f32.mrf.mxu1  ;;  %v2268_v42 = vadd.f32 %v2267_v38, %v2254_v30 }
 0x16e   : > { %v2282_v50 = vadd.f32 %v2281_v26, %v2268_v42  ;;  %v2479_v42 = vperm.slane %v2477_v33, 0 }
 0x173   : > { %v2295_v29 = vpop.f32.mrf.mxu2  ;;  %v2269_v45 = vpop.f32.mrf.mxu0 }
 0x174   : > { %v2309_v34 = vpop.f32.mrf.mxu3  ;;  %v2283_v48 = vpop.f32.mrf.mxu1  ;;  %v2296_v51 = vadd.f32 %v2295_v29, %v2282_v50  ;;  %v2270_v52 = vadd.f32 %v2269_v45, %v2256_v49  ;;  %v2469_v29 = vperm.slane %v2467_v27, 0 }
 0x176   : > { %v2310_v56 = vadd.f32 %v2309_v34, %v2296_v51  ;;  %v2284_v58 = vadd.f32 %v2283_v48, %v2270_v52  ;;  %v2473_v37 = vmul.f32 %v2469_v29, %v5718_v0  ;;  %v2475_v48 = vmul.f32 %v2469_v29, %v5720_v47 }
 0x177   : > { %v2470_v52 = vperm.slane %v2467_v27, 1 }
 0x17b   : > { %v2297_v53 = vpop.f32.mrf.mxu2 }
 0x17c   : > { %v2311_v54 = vpop.f32.mrf.mxu3  ;;  %v2298_v60 = vadd.f32 %v2297_v53, %v2284_v58  ;;  %v2483_v53 = vadd.f32 %v2479_v42, %v2473_v37 }
 0x17e   : > { %v2312_v14 = vadd.f32 %v2311_v54, %v2298_v60  ;;  %vm2487_vm6 = vcmp.gt.f32.partialorder %v2483_v53, 0.0 }
 0x18b   : > { %v2323_v55 = vpop.f32.mrf.mxu0 }
 0x18c   : > { %v2337_v59 = vpop.f32.mrf.mxu1  ;;  %v2324_v23 = vadd.f32 %v2323_v55, %v2310_v56  ;;  %v2485_v55 = vadd.f32 %v2479_v42, %v2475_v48 }
 0x18e   : > { %v2338_v39 = vadd.f32 %v2337_v59, %v2324_v23  ;;  %v2480_v59 = vperm.slane %v2477_v33, 1  ;;  %v2491_v23 = vmul.f32 0.2, %v2483_v53  ;;  %vm2489_vm7 = vcmp.gt.f32.partialorder %v2485_v55, 0.0 }
 0x193   : > { %v2351_v61 = vpop.f32.mrf.mxu2  ;;  %v2325_v31 = vpop.f32.mrf.mxu0 }
 0x194   : > { %v2365_v62 = vpop.f32.mrf.mxu3  ;;  %v2352_v63 = vadd.f32 %v2351_v61, %v2338_v39  ;;  %v2326_v19 = vadd.f32 %v2325_v31, %v2312_v14  ;;  %v2339_v20 = vpop.f32.mrf.mxu1  ;;  %v2493_v61 = vmul.f32 0.2, %v2485_v55  ;;  %v2495_v31 = vsel %vm2487_vm6, %v2483_v53, %v2491_v23 }
 0x196   : > { %v2366_v24 = vadd.f32 %v2365_v62, %v2352_v63  ;;  %v2340_v36 = vadd.f32 %v2339_v20, %v2326_v19  ;;  %v2497_v63 = vsel %vm2489_vm7, %v2485_v55, %v2493_v61 }
 0x198   : > { %v2392_v1 = vadd.f32 %v2388_v35, %v2366_v24 }
 0x19a   : > { %v2410_v4 = vmul.f32 %v2392_v1, %v2392_v1 }
 0x19b   : > { %v2353_v43 = vpop.f32.mrf.mxu2 }
 0x19c   : > { %v2354_v40 = vadd.f32 %v2353_v43, %v2340_v36  ;;  %v2367_v44 = vpop.f32.mrf.mxu3 }
 0x19e   : > { %v2368_v2 = vadd.f32 %v2367_v44, %v2354_v40 }
 0x1a0   : > { %v2394_v3 = vadd.f32 %v2388_v35, %v2368_v2 }
 0x1a2   : > { %v2402_v5 = vadd.f32 %v2394_v3, %v2392_v1  ;;  %v2412_v6 = vmul.f32 %v2394_v3, %v2394_v3 }
 0x1a4   : > { %v2403_v7 = vrot.slane %v2402_v5, 4  ;;  %v2420_v8 = vadd.f32 %v2412_v6, %v2410_v4 }
 0x1a6   : > { %v2404_v9 = vadd.f32 %v2403_v7, %v2402_v5  ;;  %v2421_v10 = vrot.slane %v2420_v8, 4 }
 0x1a8   : > { %v2405_v11 = vrot.slane %v2404_v9, 2  ;;  %v2422_v57 = vadd.f32 %v2421_v10, %v2420_v8 }
 0x1aa   : > { %v2406_v12 = vadd.f32 %v2405_v11, %v2404_v9  ;;  %v2423_v13 = vrot.slane %v2422_v57, 2 }
 0x1ac   : > { %v2407_v15 = vrot.slane %v2406_v12, 1  ;;  %v2424_v32 = vadd.f32 %v2423_v13, %v2422_v57 }
 0x1ae   : > { %v2408_v16 = vadd.f32 %v2407_v15, %v2406_v12  ;;  %v2425_v17 = vrot.slane %v2424_v32, 1 }
 0x1b0   : > { %v2426_v18 = vadd.f32 %v2425_v17, %v2424_v32  ;;  %v2428_v21 = vmul.f32 0.0625, %v2408_v16 }
 0x1b2   : > { %v2430_v22 = vmul.f32 0.0625, %v2426_v18  ;;  %v2432_v25 = vmul.f32 %v2428_v21, %v2428_v21  ;;  %v2438_v50 = vsub.f32 %v2392_v1, %v2428_v21  ;;  %v2440_v51 = vsub.f32 %v2394_v3, %v2428_v21 }
 0x1b4   : > { %v2434_v41 = vsub.f32 %v2430_v22, %v2432_v25 }
 0x1b6   : > { %v2436_v38 = vmax.f32 %v2434_v41, 0.0 }
 0x1b8   : > { %v2442_v46 = vadd.f32 1e-05, %v2436_v38 }
 0x1ba   : > { %3988 = vrsqrt.f32 %v2442_v46  ;;  %vm2459_vm4 = vweird.f32 %v2442_v46 }
 0x1c0   : > { %v3989_v26 = vpop.eup %3988 }
 0x1c1   : > { %v2454_v28 = vmul.f32 %v3989_v26, %v2442_v46  ;;  %vm2460_vm3 = vweird.f32 %v3989_v26 }
 0x1c2   : > { %vm2461_vm5 = vmor %vm2459_vm4, %vm2460_vm3 }
 0x1c3   : > { %v2455_v30 = vmul.f32 %v3989_v26, %v2454_v28 }
 0x1c5   : > { %v2456_v34 = vmul.f32 0.5, %v2455_v30 }
 0x1c7   : > { %v2457_v45 = vsub.f32 1.5, %v2456_v34 }
 0x1c9   : > { %v2458_v49 = vmul.f32 %v3989_v26, %v2457_v45 }
 0x1cb   : > { %v2462_v54 = vsel %vm2461_vm5, %v3989_v26, %v2458_v49 }
 0x1cc   : > { %v2464_v56 = vmul.f32 %v2462_v54, %v2438_v50  ;;  %v2466_v58 = vmul.f32 %v2462_v54, %v2440_v51 }
 0x1ce   : > { %v2474_v60 = vmul.f32 %v2470_v52, %v2464_v56  ;;  %v2476_v0 = vmul.f32 %v2470_v52, %v2466_v58 }
 0x1d0   : > { %v2484_v14 = vadd.f32 %v2480_v59, %v2474_v60  ;;  %v2486_v39 = vadd.f32 %v2480_v59, %v2476_v0 }
 0x1d2   : > { %vm2488_vm8 = vcmp.gt.f32.partialorder %v2484_v14, 0.0  ;;  %vm2490_vm9 = vcmp.gt.f32.partialorder %v2486_v39, 0.0  ;;  %v2492_v47 = vmul.f32 0.2, %v2484_v14  ;;  %v2494_v62 = vmul.f32 0.2, %v2486_v39 }
 0x1d4   : > { %v2496_v19 = vsel %vm2488_vm8, %v2484_v14, %v2492_v47  ;;  %v2498_v20 = vsel %vm2490_vm9, %v2486_v39, %v2494_v62 }
 0x1d5   : > { %v2499_v24 = vpack.c.bf16 %v2496_v19, %v2495_v31  ;;  %v2500_v35 = vpack.c.bf16 %v2498_v20, %v2497_v63 }
 0x1d7   : > { %2501 = vst [vmem:[%s277_s26] sm:$0xff] %v2499_v24 }
 0x1d8   : > { %2502 = vst [vmem:[%s277_s26 + $0x8] sm:$0xff] %v2500_v35 }
 0x1d9 PF: > { %s15_s20 = sadd.s32 1, %s4012_s20   ;;  %s5750_s18 = smov %s4008_s19 }
 0x1da   : > { %p12_p5 = scmp.ge.s32.totalorder %s15_s20, 4   ;;  %s5751_s19 = smov %s5753_s21 }
 0x1dc   :  { %14 = sbr.rel (!%p12_p5) target bundleno = 2 (0x2), region = 81 }

// kernel: discriminator_forward_pallas.9
= control target key start
LH: loop header
LB: loop body
LE: loop exit
PB: predicated region body
PF: predicated region fallthrough
CT: control target
= control target key end

     0   :  { %s2335_s12 = smov 0   ;;  %s2337_s13 = smov 0   ;;  %s2520_s0 = inlined_call_operand.vmem [shape: bf16[8,8192], index: 0, kind: input, shape index: {}]   ;;  %s2521_s1 = inlined_call_operand.vmem [shape: bf16[8192,128], index: 1, kind: input, shape index: {}]   ;;  %s2522_s2 = inlined_call_operand.vmem [shape: f32[1,128], index: 2, kind: input, shape index: {}]   ;;  %s2523_s3 = inlined_call_operand.vmem [shape: f32[8,128], index: 3, kind: output, shape index: {}]  }
   0x1   :  { %s2339_s14 = smov 0  }
   0x2 LB: > { %s22_s15 = sadd.s32 1, %s2308_s13  ;;  %p1614_p0 = scmp.ge.s32.totalorder %s2312_s14, 1  ;;  %s2312_s14 = sphi %s2339_s14, %s13_s14   ;;  %s2308_s13 = sphi %s2337_s13, %s2525_s13   ;;  %s2304_s12 = sphi %s2335_s12, %s2524_s12  }
   0x3   : > { %p23_p1 = scmp.ge.s32.totalorder %s22_s15, 4  ;;  %p167_p2 = scmp.lt.s32.totalorder %s2312_s14, 5 }
   0x5   : > { %s2527_s15 = smov (%p23_p1, %s22_s15), 0  ;;  %p168_p3 = pnand %p1614_p0, %p167_p2 }
   0x6   : > { %s1615_s16 = sshll.u32 (!%p168_p3), %s2304_s12, 4  ;;  %s1617_s17 = sshll.u32 (!%p168_p3), %s2304_s12, 8 }
   0x7   : > { %171 = sbr.rel (%p168_p3) target bundleno = 301 (0x12d), region = 32  ;;  %p202_p4 = scmp.lt.s32.totalorder (!%p168_p3), %s1615_s16, 63 }
   0x8   : > { %p210_p5 = scmp.lt.s32.totalorder (!%p168_p3), %s1617_s17, 1023  ;;  %p1619_p6 = scmp.ne.s32.totalorder (!%p168_p3), %s2304_s12, 0 }
   0xc   : > { %s2529_s16 = smov (!%p202_p4, %s1615_s16), 63  ;;  %s2531_s17 = smov (!%p210_p5, %s1617_s17), 1023 }
   0xd   : > { %s1616_s18 = sshll.u32 %s2529_s16, 2  ;;  %s1618_s22 = sshll.u32 %s2531_s17, 2 }
   0xe   : > { %s2360_s21 = scalar_lea.vmem %s2520_s0, %s1616_s18  ;;  %s2365_s25 = scalar_lea.vmem %s2521_s1, %s1618_s22 }
   0xf   : > { %222 = sbr.rel (%p1619_p6) target bundleno = 22 (0x16), region = 36 }
  0x14   : > { %v2314_v0 = vmov 0.0  }
  0x15   : > { %223 = vst [vmem:[#allocation2] sm:$0xff] %v2314_v0 }
  0x16 PF: > { %v2143_v1 = vld [vmem:[%s2365_s25 + $0x38] sm:$0xff]  ;;  %v2142_v5 = vld [vmem:[%s2365_s25 + $0x30] sm:$0xff]  ;;  %v2141_v9 = vld [vmem:[%s2365_s25 + $0x28] sm:$0xff]  ;;  %p2132_p7 = scmp.ne.s32.totalorder %s2304_s12, 3 }
  0x17   : > { %v2151_v2 = vld [vmem:[%s2365_s25 + $0x78] sm:$0xff]  ;;  %1313 = vmatpush.bf16.msra.mxu0 %v2143_v1  ;;  %v2150_v6 = vld [vmem:[%s2365_s25 + $0x70] sm:$0xff]  ;;  %v2149_v10 = vld [vmem:[%s2365_s25 + $0x68] sm:$0xff] }
  0x18   : > { %v2159_v3 = vld [vmem:[%s2365_s25 + $0xb8] sm:$0xff]  ;;  %1326 = vmatpush.bf16.msra.mxu1 %v2151_v2  ;;  %v2158_v7 = vld [vmem:[%s2365_s25 + $0xb0] sm:$0xff]  ;;  %v2157_v11 = vld [vmem:[%s2365_s25 + $0xa8] sm:$0xff] }
  0x19   : > { %v2167_v4 = vld [vmem:[%s2365_s25 + $0xf8] sm:$0xff]  ;;  %1339 = vmatpush.bf16.msra.mxu2 %v2159_v3  ;;  %v2166_v8 = vld [vmem:[%s2365_s25 + $0xf0] sm:$0xff]  ;;  %v2165_v12 = vld [vmem:[%s2365_s25 + $0xe8] sm:$0xff] }
  0x1a   : > { %1352 = vmatpush.bf16.msra.mxu3 %v2167_v4  ;;  %v2140_v13 = vld [vmem:[%s2365_s25 + $0x20] sm:$0xff]  ;;  %v2139_v17 = vld [vmem:[%s2365_s25 + $0x18] sm:$0xff]  ;;  %v2138_v21 = vld [vmem:[%s2365_s25 + $0x10] sm:$0xff] }
  0x1b   : > { %1314 = vmatpush.bf16.msra.mxu0 %v2142_v5  ;;  %v2148_v14 = vld [vmem:[%s2365_s25 + $0x60] sm:$0xff]  ;;  %v2147_v18 = vld [vmem:[%s2365_s25 + $0x58] sm:$0xff]  ;;  %v2146_v22 = vld [vmem:[%s2365_s25 + $0x50] sm:$0xff] }
  0x1c   : > { %1327 = vmatpush.bf16.msra.mxu1 %v2150_v6  ;;  %v2156_v15 = vld [vmem:[%s2365_s25 + $0xa0] sm:$0xff]  ;;  %v2155_v19 = vld [vmem:[%s2365_s25 + $0x98] sm:$0xff]  ;;  %v2154_v23 = vld [vmem:[%s2365_s25 + $0x90] sm:$0xff] }
  0x1d   : > { %1340 = vmatpush.bf16.msra.mxu2 %v2158_v7  ;;  %v2164_v16 = vld [vmem:[%s2365_s25 + $0xe0] sm:$0xff]  ;;  %v2163_v20 = vld [vmem:[%s2365_s25 + $0xd8] sm:$0xff]  ;;  %v2162_v24 = vld [vmem:[%s2365_s25 + $0xd0] sm:$0xff] }
  0x1e   : > { %1353 = vmatpush.bf16.msra.mxu3 %v2166_v8  ;;  %v2137_v25 = vld [vmem:[%s2365_s25 + $0x8] sm:$0xff]  ;;  %v225_v30 = vld [vmem:[%s2360_s21] sm:$0xff]  ;;  %v2175_v39 = vld [vmem:[%s2365_s25 + $0x138] sm:$0xff] }
  0x1f   : > { %1315 = vmatpush.bf16.msra.mxu0 %v2141_v9  ;;  %v2145_v26 = vld [vmem:[%s2365_s25 + $0x48] sm:$0xff]  ;;  %v2136_v31 = vld [vmem:[%s2365_s25] sm:$0xff]  ;;  %v497_v34 = vunpack.c.l.b16 %v225_v30  ;;  %v498_v38 = vunpack.c.h.b16 %v225_v30  ;;  %v2183_v40 = vld [vmem:[%s2365_s25 + $0x178] sm:$0xff] }
  0x20   : > { %1328 = vmatpush.bf16.msra.mxu1 %v2149_v10  ;;  %v2153_v27 = vld [vmem:[%s2365_s25 + $0x88] sm:$0xff]  ;;  %v2144_v32 = vld [vmem:[%s2365_s25 + $0x40] sm:$0xff]  ;;  %v2191_v41 = vld [vmem:[%s2365_s25 + $0x1b8] sm:$0xff] }
  0x21   : > { %1341 = vmatpush.bf16.msra.mxu2 %v2157_v11  ;;  %v2161_v28 = vld [vmem:[%s2365_s25 + $0xc8] sm:$0xff]  ;;  %v2152_v35 = vld [vmem:[%s2365_s25 + $0x80] sm:$0xff]  ;;  %v2199_v42 = vld [vmem:[%s2365_s25 + $0x1f8] sm:$0xff]  ;;  %v513_v44 = vpack.c.b16 %v497_v34, %v497_v34  ;;  %v514_v46 = vpack.c.b16 %v498_v38, %v498_v38 }
  0x22   : > { %1354 = vmatpush.bf16.msra.mxu3 %v2165_v12  ;;  %v226_v29 = vld [vmem:[%s2360_s21 + $0x8] sm:$0xff]  ;;  %v2160_v36 = vld [vmem:[%s2365_s25 + $0xc0] sm:$0xff]  ;;  %v2174_v47 = vld [vmem:[%s2365_s25 + $0x130] sm:$0xff] }
  0x23   : > { %1316 = vmatpush.bf16.msra.mxu0 %v2140_v13  ;;  %v499_v33 = vunpack.c.l.b16 %v226_v29  ;;  %v500_v37 = vunpack.c.h.b16 %v226_v29  ;;  %v2182_v48 = vld [vmem:[%s2365_s25 + $0x170] sm:$0xff]  ;;  %v2173_v51 = vld [vmem:[%s2365_s25 + $0x128] sm:$0xff]  ;;  %v2172_v55 = vld [vmem:[%s2365_s25 + $0x120] sm:$0xff] }
  0x24   : > { %1329 = vmatpush.bf16.msra.mxu1 %v2148_v14  ;;  %v2190_v49 = vld [vmem:[%s2365_s25 + $0x1b0] sm:$0xff]  ;;  %v2181_v52 = vld [vmem:[%s2365_s25 + $0x168] sm:$0xff]  ;;  %v2180_v56 = vld [vmem:[%s2365_s25 + $0x160] sm:$0xff] }
  0x25   : > { %1342 = vmatpush.bf16.msra.mxu2 %v2156_v15  ;;  %v515_v43 = vpack.c.b16 %v499_v33, %v499_v33  ;;  %v516_v45 = vpack.c.b16 %v500_v37, %v500_v37  ;;  %v2198_v50 = vld [vmem:[%s2365_s25 + $0x1f0] sm:$0xff]  ;;  %v2189_v53 = vld [vmem:[%s2365_s25 + $0x1a8] sm:$0xff]  ;;  %v2188_v57 = vld [vmem:[%s2365_s25 + $0x1a0] sm:$0xff] }
  0x26   : > { %1355 = vmatpush.bf16.msra.mxu3 %v2164_v16  ;;  %v2197_v54 = vld [vmem:[%s2365_s25 + $0x1e8] sm:$0xff]  ;;  %v2196_v58 = vld [vmem:[%s2365_s25 + $0x1e0] sm:$0xff]  ;;  %v2171_v59 = vld [vmem:[%s2365_s25 + $0x118] sm:$0xff] }
  0x27   : > { %1317 = vmatpush.bf16.msra.mxu0 %v2139_v17  ;;  %v2179_v60 = vld [vmem:[%s2365_s25 + $0x158] sm:$0xff]  ;;  %v2170_v63 = vld [vmem:[%s2365_s25 + $0x110] sm:$0xff]  ;;  %v2169_v3 = vld [vmem:[%s2365_s25 + $0x108] sm:$0xff] }
  0x28   : > { %1330 = vmatpush.bf16.msra.mxu1 %v2147_v18  ;;  %v2187_v61 = vld [vmem:[%s2365_s25 + $0x198] sm:$0xff]  ;;  %v2178_v0 = vld [vmem:[%s2365_s25 + $0x150] sm:$0xff]  ;;  %v2177_v4 = vld [vmem:[%s2365_s25 + $0x148] sm:$0xff] }
  0x29   : > { %1343 = vmatpush.bf16.msra.mxu2 %v2155_v19  ;;  %v2195_v62 = vld [vmem:[%s2365_s25 + $0x1d8] sm:$0xff]  ;;  %v2186_v1 = vld [vmem:[%s2365_s25 + $0x190] sm:$0xff]  ;;  %v2185_v5 = vld [vmem:[%s2365_s25 + $0x188] sm:$0xff] }
  0x2a   : > { %1356 = vmatpush.bf16.msra.mxu3 %v2163_v20  ;;  %v2194_v2 = vld [vmem:[%s2365_s25 + $0x1d0] sm:$0xff]  ;;  %v2193_v6 = vld [vmem:[%s2365_s25 + $0x1c8] sm:$0xff]  ;;  %v228_v7 = vld [vmem:[%s2360_s21 + $0x18] sm:$0xff] }
  0x2b   : > { %1318 = vmatpush.bf16.msra.mxu0 %v2138_v21  ;;  %v227_v8 = vld [vmem:[%s2360_s21 + $0x10] sm:$0xff]  ;;  %v2168_v9 = vld [vmem:[%s2365_s25 + $0x100] sm:$0xff]  ;;  %v503_v11 = vunpack.c.l.b16 %v228_v7  ;;  %v504_v15 = vunpack.c.h.b16 %v228_v7  ;;  %v2207_v17 = vld [vmem:[%s2365_s25 + $0x238] sm:$0xff] }
  0x2c   : > { %1331 = vmatpush.bf16.msra.mxu1 %v2146_v22  ;;  %v2176_v10 = vld [vmem:[%s2365_s25 + $0x140] sm:$0xff]  ;;  %v501_v12 = vunpack.c.l.b16 %v227_v8  ;;  %v502_v16 = vunpack.c.h.b16 %v227_v8  ;;  %v2215_v18 = vld [vmem:[%s2365_s25 + $0x278] sm:$0xff]  ;;  %v2205_v29 = vld [vmem:[%s2365_s25 + $0x228] sm:$0xff] }
  0x2d   : > { %1344 = vmatpush.bf16.msra.mxu2 %v2154_v23  ;;  %v2184_v13 = vld [vmem:[%s2365_s25 + $0x180] sm:$0xff]  ;;  %v2223_v19 = vld [vmem:[%s2365_s25 + $0x2b8] sm:$0xff]  ;;  %v519_v21 = vpack.c.b16 %v503_v11, %v503_v11  ;;  %v520_v23 = vpack.c.b16 %v504_v15, %v504_v15  ;;  %v2213_v30 = vld [vmem:[%s2365_s25 + $0x268] sm:$0xff] }
  0x2e   : > { %1357 = vmatpush.bf16.msra.mxu3 %v2162_v24  ;;  %v2192_v14 = vld [vmem:[%s2365_s25 + $0x1c0] sm:$0xff]  ;;  %v2231_v20 = vld [vmem:[%s2365_s25 + $0x2f8] sm:$0xff]  ;;  %v517_v22 = vpack.c.b16 %v501_v12, %v501_v12  ;;  %v518_v24 = vpack.c.b16 %v502_v16, %v502_v16  ;;  %v2237_v7 = vld [vmem:[%s2365_s25 + $0x328] sm:$0xff] }
  0x2f   : > { %1319 = vmatpush.bf16.msra.mxu0 %v2137_v25  ;;  %v2206_v25 = vld [vmem:[%s2365_s25 + $0x230] sm:$0xff]  ;;  %v2204_v33 = vld [vmem:[%s2365_s25 + $0x220] sm:$0xff]  ;;  %v2203_v37 = vld [vmem:[%s2365_s25 + $0x218] sm:$0xff] }
  0x30   : > { %1332 = vmatpush.bf16.msra.mxu1 %v2145_v26  ;;  %v2214_v26 = vld [vmem:[%s2365_s25 + $0x270] sm:$0xff]  ;;  %v2212_v34 = vld [vmem:[%s2365_s25 + $0x260] sm:$0xff]  ;;  %v2211_v38 = vld [vmem:[%s2365_s25 + $0x258] sm:$0xff] }
  0x31   : > { %1345 = vmatpush.bf16.msra.mxu2 %v2153_v27  ;;  %v2222_v27 = vld [vmem:[%s2365_s25 + $0x2b0] sm:$0xff]  ;;  %v2245_v8 = vld [vmem:[%s2365_s25 + $0x368] sm:$0xff]  ;;  %v2236_v11 = vld [vmem:[%s2365_s25 + $0x320] sm:$0xff] }
  0x32   : > { %1358 = vmatpush.bf16.msra.mxu3 %v2161_v28  ;;  %v2230_v28 = vld [vmem:[%s2365_s25 + $0x2f0] sm:$0xff]  ;;  %v2244_v12 = vld [vmem:[%s2365_s25 + $0x360] sm:$0xff]  ;;  %v2235_v15 = vld [vmem:[%s2365_s25 + $0x318] sm:$0xff] }
  0x33   : > { %1320 = vmatpush.bf16.msra.mxu0 %v2136_v31  ;;  %v2221_v31 = vld [vmem:[%s2365_s25 + $0x2a8] sm:$0xff]  ;;  %v2243_v16 = vld [vmem:[%s2365_s25 + $0x358] sm:$0xff] }
  0x34   : > { %1333 = vmatpush.bf16.msra.mxu1 %v2144_v32  ;;  %v2229_v32 = vld [vmem:[%s2365_s25 + $0x2e8] sm:$0xff] }
  0x35   : > { %1346 = vmatpush.bf16.msra.mxu2 %v2152_v35  ;;  %v2220_v35 = vld [vmem:[%s2365_s25 + $0x2a0] sm:$0xff] }
  0x36   : > { %1359 = vmatpush.bf16.msra.mxu3 %v2160_v36  ;;  %1321 = vmatmul.bf16.vlgmr.msra.gmra.mxu0 %v513_v44  ;;  %v2228_v36 = vld [vmem:[%s2365_s25 + $0x2e0] sm:$0xff]  ;;  %v2226_v44 = vld [vmem:[%s2365_s25 + $0x2d0] sm:$0xff] }
  0x37   : > { %1365 = vmatpush.bf16.msrb.mxu0 %v2175_v39  ;;  %1334 = vmatmul.bf16.vlgmr.msra.gmra.mxu1 %v514_v46  ;;  %v2219_v39 = vld [vmem:[%s2365_s25 + $0x298] sm:$0xff]  ;;  %v2209_v46 = vld [vmem:[%s2365_s25 + $0x248] sm:$0xff] }
  0x38   : > { %1378 = vmatpush.bf16.msrb.mxu1 %v2183_v40  ;;  %1347 = vmatmul.bf16.vlgmr.msra.gmra.mxu2 %v515_v43  ;;  %v2227_v40 = vld [vmem:[%s2365_s25 + $0x2d8] sm:$0xff]  ;;  %v2218_v43 = vld [vmem:[%s2365_s25 + $0x290] sm:$0xff] }
  0x39   : > { %1391 = vmatpush.bf16.msrb.mxu2 %v2191_v41  ;;  %1360 = vmatmul.bf16.vlgmr.msra.gmra.mxu3 %v516_v45  ;;  %v2202_v41 = vld [vmem:[%s2365_s25 + $0x210] sm:$0xff]  ;;  %v2201_v45 = vld [vmem:[%s2365_s25 + $0x208] sm:$0xff] }
  0x3a   : > { %1404 = vmatpush.bf16.msrb.mxu3 %v2199_v42  ;;  %v2210_v42 = vld [vmem:[%s2365_s25 + $0x250] sm:$0xff] }
  0x3b   : > { %1366 = vmatpush.bf16.msrb.mxu0 %v2174_v47  ;;  %v2217_v47 = vld [vmem:[%s2365_s25 + $0x288] sm:$0xff] }
  0x3c   : > { %1379 = vmatpush.bf16.msrb.mxu1 %v2182_v48  ;;  %v2225_v48 = vld [vmem:[%s2365_s25 + $0x2c8] sm:$0xff] }
  0x3d   : > { %1392 = vmatpush.bf16.msrb.mxu2 %v2190_v49  ;;  %v229_v49 = vld [vmem:[%s2360_s21 + $0x20] sm:$0xff] }
  0x3e   : > { %1405 = vmatpush.bf16.msrb.mxu3 %v2198_v50  ;;  %v230_v50 = vld [vmem:[%s2360_s21 + $0x28] sm:$0xff] }
  0x3f   : > { %1367 = vmatpush.bf16.msrb.mxu0 %v2173_v51  ;;  %v2200_v51 = vld [vmem:[%s2365_s25 + $0x200] sm:$0xff] }
  0x40   : > { %1380 = vmatpush.bf16.msrb.mxu1 %v2181_v52  ;;  %v2208_v52 = vld [vmem:[%s2365_s25 + $0x240] sm:$0xff] }
  0x41   : > { %1393 = vmatpush.bf16.msrb.mxu2 %v2189_v53  ;;  %v505_v53 = vunpack.c.l.b16 %v229_v49 }
  0x42   : > { %1406 = vmatpush.bf16.msrb.mxu3 %v2197_v54  ;;  %v507_v54 = vunpack.c.l.b16 %v230_v50 }
  0x43   : > { %1368 = vmatpush.bf16.msrb.mxu0 %v2172_v55  ;;  %v2216_v55 = vld [vmem:[%s2365_s25 + $0x280] sm:$0xff] }
  0x44   : > { %1381 = vmatpush.bf16.msrb.mxu1 %v2180_v56  ;;  %v2224_v56 = vld [vmem:[%s2365_s25 + $0x2c0] sm:$0xff] }
  0x45   : > { %1394 = vmatpush.bf16.msrb.mxu2 %v2188_v57  ;;  %v506_v57 = vunpack.c.h.b16 %v229_v49 }
  0x46   : > { %1407 = vmatpush.bf16.msrb.mxu3 %v2196_v58  ;;  %v508_v58 = vunpack.c.h.b16 %v230_v50 }
  0x47   : > { %1369 = vmatpush.bf16.msrb.mxu0 %v2171_v59  ;;  %v2239_v59 = vld [vmem:[%s2365_s25 + $0x338] sm:$0xff] }
  0x48   : > { %1382 = vmatpush.bf16.msrb.mxu1 %v2179_v60  ;;  %v2247_v60 = vld [vmem:[%s2365_s25 + $0x378] sm:$0xff] }
  0x49   : > { %1395 = vmatpush.bf16.msrb.mxu2 %v2187_v61  ;;  %v2255_v61 = vld [vmem:[%s2365_s25 + $0x3b8] sm:$0xff] }
  0x4a   : > { %1408 = vmatpush.bf16.msrb.mxu3 %v2195_v62  ;;  %v2263_v62 = vld [vmem:[%s2365_s25 + $0x3f8] sm:$0xff] }
  0x4b   : > { %1370 = vmatpush.bf16.msrb.mxu0 %v2170_v63  ;;  %v521_v63 = vpack.c.b16 %v505_v53, %v505_v53 }
  0x4c   : > { %1383 = vmatpush.bf16.msrb.mxu1 %v2178_v0  ;;  %v523_v0 = vpack.c.b16 %v507_v54, %v507_v54 }
  0x4d   : > { %1396 = vmatpush.bf16.msrb.mxu2 %v2186_v1  ;;  %v522_v1 = vpack.c.b16 %v506_v57, %v506_v57 }
  0x4e   : > { %1409 = vmatpush.bf16.msrb.mxu3 %v2194_v2  ;;  %v524_v2 = vpack.c.b16 %v508_v58, %v508_v58 }
  0x4f   : > { %1371 = vmatpush.bf16.msrb.mxu0 %v2169_v3  ;;  %v2238_v3 = vld [vmem:[%s2365_s25 + $0x330] sm:$0xff] }
  0x50   : > { %1384 = vmatpush.bf16.msrb.mxu1 %v2177_v4  ;;  %v2246_v4 = vld [vmem:[%s2365_s25 + $0x370] sm:$0xff] }
  0x51   : > { %1397 = vmatpush.bf16.msrb.mxu2 %v2185_v5  ;;  %v2254_v5 = vld [vmem:[%s2365_s25 + $0x3b0] sm:$0xff] }
  0x52   : > { %1410 = vmatpush.bf16.msrb.mxu3 %v2193_v6  ;;  %v2262_v6 = vld [vmem:[%s2365_s25 + $0x3f0] sm:$0xff] }
  0x53   : > { %1372 = vmatpush.bf16.msrb.mxu0 %v2168_v9  ;;  %v2253_v9 = vld [vmem:[%s2365_s25 + $0x3a8] sm:$0xff] }
  0x54   : > { %1385 = vmatpush.bf16.msrb.mxu1 %v2176_v10  ;;  %v2261_v10 = vld [vmem:[%s2365_s25 + $0x3e8] sm:$0xff] }
  0x55   : > { %1398 = vmatpush.bf16.msrb.mxu2 %v2184_v13  ;;  %v2252_v13 = vld [vmem:[%s2365_s25 + $0x3a0] sm:$0xff] }
  0x56   : > { %1411 = vmatpush.bf16.msrb.mxu3 %v2192_v14  ;;  %1373 = vmatmul.bf16.vlgmr.msrb.gmra.mxu0 %v517_v22  ;;  %v2260_v14 = vld [vmem:[%s2365_s25 + $0x3e0] sm:$0xff]  ;;  %v2258_v22 = vld [vmem:[%s2365_s25 + $0x3d0] sm:$0xff] }
  0x57   : > { %1417 = vmatpush.bf16.msra.mxu0 %v2207_v17  ;;  %1386 = vmatmul.bf16.vlgmr.msrb.gmra.mxu1 %v518_v24  ;;  %v2251_v17 = vld [vmem:[%s2365_s25 + $0x398] sm:$0xff]  ;;  %v2241_v24 = vld [vmem:[%s2365_s25 + $0x348] sm:$0xff] }
  0x58   : > { %1430 = vmatpush.bf16.msra.mxu1 %v2215_v18  ;;  %1399 = vmatmul.bf16.vlgmr.msrb.gmra.mxu2 %v519_v21  ;;  %v2259_v18 = vld [vmem:[%s2365_s25 + $0x3d8] sm:$0xff]  ;;  %v2250_v21 = vld [vmem:[%s2365_s25 + $0x390] sm:$0xff] }
  0x59   : > { %1443 = vmatpush.bf16.msra.mxu2 %v2223_v19  ;;  %1412 = vmatmul.bf16.vlgmr.msrb.gmra.mxu3 %v520_v23  ;;  %v2234_v19 = vld [vmem:[%s2365_s25 + $0x310] sm:$0xff]  ;;  %v2233_v23 = vld [vmem:[%s2365_s25 + $0x308] sm:$0xff] }
  0x5a   : > { %1456 = vmatpush.bf16.msra.mxu3 %v2231_v20  ;;  %v2242_v20 = vld [vmem:[%s2365_s25 + $0x350] sm:$0xff] }
  0x5b   : > { %1418 = vmatpush.bf16.msra.mxu0 %v2206_v25  ;;  %v231_v25 = vld [vmem:[%s2360_s21 + $0x30] sm:$0xff] }
  0x5c   : > { %1431 = vmatpush.bf16.msra.mxu1 %v2214_v26  ;;  %v2249_v26 = vld [vmem:[%s2365_s25 + $0x388] sm:$0xff] }
  0x5d   : > { %1444 = vmatpush.bf16.msra.mxu2 %v2222_v27  ;;  %v2257_v27 = vld [vmem:[%s2365_s25 + $0x3c8] sm:$0xff] }
  0x5e   : > { %1457 = vmatpush.bf16.msra.mxu3 %v2230_v28  ;;  %v232_v28 = vld [vmem:[%s2360_s21 + $0x38] sm:$0xff] }
  0x5f   : > { %1419 = vmatpush.bf16.msra.mxu0 %v2205_v29  ;;  %v509_v29 = vunpack.c.l.b16 %v231_v25 }
  0x60   : > { %1432 = vmatpush.bf16.msra.mxu1 %v2213_v30  ;;  %v510_v30 = vunpack.c.h.b16 %v231_v25 }
  0x61   : > { %1445 = vmatpush.bf16.msra.mxu2 %v2221_v31  ;;  %v2232_v31 = vld [vmem:[%s2365_s25 + $0x300] sm:$0xff] }
  0x62   : > { %1458 = vmatpush.bf16.msra.mxu3 %v2229_v32  ;;  %v2240_v32 = vld [vmem:[%s2365_s25 + $0x340] sm:$0xff] }
  0x63   : > { %1420 = vmatpush.bf16.msra.mxu0 %v2204_v33  ;;  %v511_v33 = vunpack.c.l.b16 %v232_v28 }
  0x64   : > { %1433 = vmatpush.bf16.msra.mxu1 %v2212_v34  ;;  %v512_v34 = vunpack.c.h.b16 %v232_v28 }
  0x65   : > { %1446 = vmatpush.bf16.msra.mxu2 %v2220_v35  ;;  %v2248_v35 = vld [vmem:[%s2365_s25 + $0x380] sm:$0xff] }
  0x66   : > { %1459 = vmatpush.bf16.msra.mxu3 %v2228_v36  ;;  %v2256_v36 = vld [vmem:[%s2365_s25 + $0x3c0] sm:$0xff] }
  0x67   : > { %1421 = vmatpush.bf16.msra.mxu0 %v2203_v37  ;;  %v525_v37 = vpack.c.b16 %v509_v29, %v509_v29 }
  0x68   : > { %1434 = vmatpush.bf16.msra.mxu1 %v2211_v38  ;;  %v526_v38 = vpack.c.b16 %v510_v30, %v510_v30 }
  0x69   : > { %1447 = vmatpush.bf16.msra.mxu2 %v2219_v39  ;;  %v527_v39 = vpack.c.b16 %v511_v33, %v511_v33 }
  0x6a   : > { %1460 = vmatpush.bf16.msra.mxu3 %v2227_v40  ;;  %v528_v40 = vpack.c.b16 %v512_v34, %v512_v34 }
  0x6b   : > { %1422 = vmatpush.bf16.msra.mxu0 %v2202_v41 }
  0x6c   : > { %1435 = vmatpush.bf16.msra.mxu1 %v2210_v42 }
  0x6d   : > { %1448 = vmatpush.bf16.msra.mxu2 %v2218_v43 }
  0x6e   : > { %1461 = vmatpush.bf16.msra.mxu3 %v2226_v44 }
  0x6f   : > { %1423 = vmatpush.bf16.msra.mxu0 %v2201_v45 }
  0x70   : > { %1436 = vmatpush.bf16.msra.mxu1 %v2209_v46 }
  0x71   : > { %1449 = vmatpush.bf16.msra.mxu2 %v2217_v47 }
  0x72   : > { %1462 = vmatpush.bf16.msra.mxu3 %v2225_v48 }
  0x73   : > { %1424 = vmatpush.bf16.msra.mxu0 %v2200_v51 }
  0x74   : > { %1437 = vmatpush.bf16.msra.mxu1 %v2208_v52 }
  0x75   : > { %1450 = vmatpush.bf16.msra.mxu2 %v2216_v55 }
  0x76   : > { %1463 = vmatpush.bf16.msra.mxu3 %v2224_v56  ;;  %1425 = vmatmul.bf16.vlgmr.msra.gmra.mxu0 %v521_v63 }
  0x77   : > { %1469 = vmatpush.bf16.msrb.mxu0 %v2239_v59  ;;  %1438 = vmatmul.bf16.vlgmr.msra.gmra.mxu1 %v522_v1 }
  0x78   : > { %1482 = vmatpush.bf16.msrb.mxu1 %v2247_v60  ;;  %1451 = vmatmul.bf16.vlgmr.msra.gmra.mxu2 %v523_v0 }
  0x79   : > { %1495 = vmatpush.bf16.msrb.mxu2 %v2255_v61  ;;  %1464 = vmatmul.bf16.vlgmr.msra.gmra.mxu3 %v524_v2 }
  0x7a   : > { %1508 = vmatpush.bf16.msrb.mxu3 %v2263_v62 }
  0x7b   : > { %1470 = vmatpush.bf16.msrb.mxu0 %v2238_v3 }
  0x7c   : > { %1483 = vmatpush.bf16.msrb.mxu1 %v2246_v4 }
  0x7d   : > { %1496 = vmatpush.bf16.msrb.mxu2 %v2254_v5 }
  0x7e   : > { %1509 = vmatpush.bf16.msrb.mxu3 %v2262_v6 }
  0x7f   : > { %1471 = vmatpush.bf16.msrb.mxu0 %v2237_v7 }
  0x80   : > { %1484 = vmatpush.bf16.msrb.mxu1 %v2245_v8 }
  0x81   : > { %1497 = vmatpush.bf16.msrb.mxu2 %v2253_v9 }
  0x82   : > { %1510 = vmatpush.bf16.msrb.mxu3 %v2261_v10 }
  0x83   : > { %1472 = vmatpush.bf16.msrb.mxu0 %v2236_v11 }
  0x84   : > { %1485 = vmatpush.bf16.msrb.mxu1 %v2244_v12 }
  0x85   : > { %1498 = vmatpush.bf16.msrb.mxu2 %v2252_v13 }
  0x86   : > { %1511 = vmatpush.bf16.msrb.mxu3 %v2260_v14 }
  0x87   : > { %1473 = vmatpush.bf16.msrb.mxu0 %v2235_v15 }
  0x88   : > { %1486 = vmatpush.bf16.msrb.mxu1 %v2243_v16 }
  0x89   : > { %1499 = vmatpush.bf16.msrb.mxu2 %v2251_v17 }
  0x8a   : > { %1512 = vmatpush.bf16.msrb.mxu3 %v2259_v18 }
  0x8b   : > { %1474 = vmatpush.bf16.msrb.mxu0 %v2234_v19 }
  0x8c   : > { %1487 = vmatpush.bf16.msrb.mxu1 %v2242_v20 }
  0x8d   : > { %1500 = vmatpush.bf16.msrb.mxu2 %v2250_v21  ;;  %v224_v21 = vld [vmem:[#allocation2] sm:$0xff] }
  0x8e   : > { %1513 = vmatpush.bf16.msrb.mxu3 %v2258_v22 }
  0x8f   : > { %1475 = vmatpush.bf16.msrb.mxu0 %v2233_v23 }
  0x90   : > { %1488 = vmatpush.bf16.msrb.mxu1 %v2241_v24 }
  0x91   : > { %1501 = vmatpush.bf16.msrb.mxu2 %v2249_v26 }
  0x92   : > { %1514 = vmatpush.bf16.msrb.mxu3 %v2257_v27 }
  0x93   : > { %1476 = vmatpush.bf16.msrb.mxu0 %v2232_v31 }
  0x94   : > { %1489 = vmatpush.bf16.msrb.mxu1 %v2240_v32 }
  0x95   : > { %1502 = vmatpush.bf16.msrb.mxu2 %v2248_v35 }
  0x96   : > { %1515 = vmatpush.bf16.msrb.mxu3 %v2256_v36  ;;  %1477 = vmatmul.bf16.vlgmr.msrb.gmra.mxu0 %v525_v37 }
  0x97   : > { %1490 = vmatmul.bf16.vlgmr.msrb.gmra.mxu1 %v526_v38 }
  0x98   : > { %1503 = vmatmul.bf16.vlgmr.msrb.gmra.mxu2 %v527_v39 }
  0x99   : > { %1516 = vmatmul.bf16.vlgmr.msrb.gmra.mxu3 %v528_v40 }
  0xb3   : > { %v1322_v41 = vpop.f32.mrf.mxu0 }
  0xb4   : > { %v1335_v42 = vpop.f32.mrf.mxu1 }
  0xb5   : > { %v1336_v43 = vadd.f32 %v1335_v42, %v1322_v41 }
  0xbb   : > { %v1348_v44 = vpop.f32.mrf.mxu2  ;;  %v1324_v47 = vpop.f32.mrf.mxu0 }
  0xbc   : > { %v1349_v45 = vadd.f32 %v1348_v44, %v1336_v43  ;;  %v1361_v46 = vpop.f32.mrf.mxu3  ;;  %v1337_v49 = vpop.f32.mrf.mxu1 }
  0xbe   : > { %v1362_v48 = vadd.f32 %v1361_v46, %v1349_v45 }
  0xc3   : > { %v1350_v50 = vpop.f32.mrf.mxu2 }
  0xc4   : > { %v1363_v51 = vpop.f32.mrf.mxu3 }
  0xd3   : > { %v1374_v52 = vpop.f32.mrf.mxu0 }
  0xd4   : > { %v1387_v53 = vpop.f32.mrf.mxu1  ;;  %v1375_v62 = vadd.f32 %v1374_v52, %v1362_v48 }
  0xd6   : > { %v1388_v2 = vadd.f32 %v1387_v53, %v1375_v62 }
  0xdb   : > { %v1400_v54 = vpop.f32.mrf.mxu2  ;;  %v1376_v56 = vpop.f32.mrf.mxu0 }
  0xdc   : > { %v1413_v55 = vpop.f32.mrf.mxu3  ;;  %v1389_v57 = vpop.f32.mrf.mxu1  ;;  %v1401_v4 = vadd.f32 %v1400_v54, %v1388_v2 }
  0xde   : > { %v1414_v7 = vadd.f32 %v1413_v55, %v1401_v4 }
  0xe3   : > { %v1402_v58 = vpop.f32.mrf.mxu2 }
  0xe4   : > { %v1415_v59 = vpop.f32.mrf.mxu3 }
  0xf3   : > { %v1426_v60 = vpop.f32.mrf.mxu0 }
  0xf4   : > { %v1439_v61 = vpop.f32.mrf.mxu1  ;;  %v1427_v8 = vadd.f32 %v1426_v60, %v1414_v7 }
  0xf6   : > { %v1440_v9 = vadd.f32 %v1439_v61, %v1427_v8 }
  0xfb   : > { %v1452_v63 = vpop.f32.mrf.mxu2  ;;  %v1428_v1 = vpop.f32.mrf.mxu0 }
  0xfc   : > { %v1465_v0 = vpop.f32.mrf.mxu3  ;;  %v1441_v3 = vpop.f32.mrf.mxu1  ;;  %v1453_v10 = vadd.f32 %v1452_v63, %v1440_v9 }
  0xfe   : > { %v1466_v11 = vadd.f32 %v1465_v0, %v1453_v10 }
 0x103   : > { %v1454_v5 = vpop.f32.mrf.mxu2 }
 0x104   : > { %v1467_v6 = vpop.f32.mrf.mxu3 }
 0x113   : > { %v1478_v12 = vpop.f32.mrf.mxu0 }
 0x114   : > { %v1491_v13 = vpop.f32.mrf.mxu1  ;;  %v1479_v14 = vadd.f32 %v1478_v12, %v1466_v11 }
 0x116   : > { %v1492_v15 = vadd.f32 %v1491_v13, %v1479_v14 }
 0x11b   : > { %v1504_v16 = vpop.f32.mrf.mxu2  ;;  %v1480_v19 = vpop.f32.mrf.mxu0 }
 0x11c   : > { %v1517_v17 = vpop.f32.mrf.mxu3  ;;  %v1505_v18 = vadd.f32 %v1504_v16, %v1492_v15  ;;  %v1493_v20 = vpop.f32.mrf.mxu1 }
 0x11e   : > { %v1518_v22 = vadd.f32 %v1517_v17, %v1505_v18 }
 0x120   : > { %v1521_v23 = vadd.f32 %v1518_v22, %v224_v21  ;;  %1526 = sbr.rel (%p2132_p7) target bundleno = 301 (0x12d), region = 40 }
 0x122   : > { %1522 = vst [vmem:[#allocation2] sm:$0xff] %v1521_v23 }
 0x123   : > { %v1506_v24 = vpop.f32.mrf.mxu2 }
 0x124   : > { %v1519_v25 = vpop.f32.mrf.mxu3 }
 0x125   : > { %v2289_v27 = vld [vmem:[%s2522_s2] ss:$0 sm:$0xff] }
 0x129   : > { %v1527_v26 = vld [vmem:[#allocation2] sm:$0xff] }
 0x12a   : > { %v1532_v28 = vadd.f32 %v2289_v27, %v1527_v26 }
 0x12c   : > { %1533 = vst [vmem:[%s2523_s3] sm:$0xff] %v1532_v28 }
 0x12d PF: > { %s13_s14 = sadd.s32 1, %s2312_s14   ;;  %s2524_s12 = smov %s2308_s13 }
 0x12e   : > { %p10_p8 = scmp.ge.s32.totalorder %s13_s14, 6   ;;  %s2525_s13 = smov %s2527_s15 }
 0x130   :  { %12 = sbr.rel (!%p10_p8) target bundleno = 2 (0x2), region = 73 }

// kernel: discriminator_forward_pallas.8
= control target key start
LH: loop header
LB: loop body
LE: loop exit
PB: predicated region body
PF: predicated region fallthrough
CT: control target
= control target key end

     0   :  { %s7314_s18 = smov 0   ;;  %s7316_s19 = smov 0   ;;  %s8549_s0 = inlined_call_operand.vmem [shape: bf16[2,4,4096], index: 0, kind: input, shape index: {}]   ;;  %s8550_s1 = inlined_call_operand.vmem [shape: bf16[4096,512], index: 1, kind: input, shape index: {}]   ;;  %s8551_s2 = inlined_call_operand.vmem [shape: f32[1,512], index: 2, kind: input, shape index: {}]   ;;  %s8552_s3 = inlined_call_operand.vmem [shape: f32[1,512], index: 3, kind: input, shape index: {}]   ;;  %s8553_s4 = inlined_call_operand.vmem [shape: f32[1,512], index: 4, kind: input, shape index: {}]   ;;  %s8554_s5 = inlined_call_operand.vmem [shape: bf16[2,4,512], index: 5, kind: output, shape index: {}]  }
   0x1   :  { %s7318_s20 = smov 0   ;;  %s7320_s21 = smov 0  }
   0x2   :  { %s7322_s22 = smov 0  }
   0x3 LB: > { %s24_s23 = sadd.s32 1, %s7273_s20  ;;  %s27_s24 = sadd.s32 1, %s7277_s21  ;;  %s7281_s22 = sphi %s7322_s22, %s15_s22   ;;  %s7277_s21 = sphi %s7320_s21, %s8558_s21   ;;  %s7273_s20 = sphi %s7318_s20, %s8557_s20   ;;  %s7269_s19 = sphi %s7316_s19, %s8556_s19   ;;  %s7265_s18 = sphi %s7314_s18, %s8555_s18  }
   0x4   : > { %p25_p0 = scmp.ge.s32.totalorder %s24_s23, 2  ;;  %p4595_p1 = scmp.ge.s32.totalorder %s7281_s22, 1 }
   0x5   : > { %p218_p2 = scmp.lt.s32.totalorder %s7281_s22, 5 }
   0x6   : > { %s8560_s23 = smov (%p25_p0, %s24_s23), 0  ;;  %s8562_s24 = smov (!%p25_p0, %s27_s24), %s7277_s21 }
   0x7   : > { %p219_p3 = pnand %p4595_p1, %p218_p2  ;;  %p29_p4 = scmp.ge.s32.totalorder %s8562_s24, 2 }
   0x8   : > { %s4596_s25 = sshll.u32 (!%p219_p3), %s7265_s18, 4  ;;  %p257_p5 = scmp.lt.s32.totalorder (!%p219_p3), %s7269_s19, 1 }
   0x9   : > { %s8564_s24 = smov (%p29_p4, %s8562_s24), 0  ;;  %222 = sbr.rel (%p219_p3) target bundleno = 786 (0x312), region = 40 }
   0xa   : > { %p259_p6 = scmp.lt.s32.totalorder (!%p219_p3), %s4596_s25, 31  ;;  %s4599_s26 = sshll.u32 (!%p219_p3), %s7265_s18, 8 }
   0xb   : > { %p267_p7 = scmp.lt.s32.totalorder (!%p219_p3), %s4599_s26, 511  ;;  %p4604_p8 = scmp.ne.s32.totalorder (!%p219_p3), %s7265_s18, 0 }
   0xe   : > { %s8566_s19 = smov (!%p257_p5, %s7269_s19), 1  ;;  %s8568_s25 = smov (!%p259_p6, %s4596_s25), 31 }
   0xf   : > { %s4597_s27 = sshll.u32 %s8566_s19, 5  ;;  %s6657_s29 = sshll.u32 %s8566_s19, 3 }
  0x10   : > { %s262_s28 = sadd.s32 %s4597_s27, %s8568_s25  ;;  %s7351_s8 = scalar_lea.vmem %s8554_s5, %s6657_s29 }
  0x11   : > { %s4598_s30 = sshll.u32 %s262_s28, 1  ;;  %s8570_s26 = smov (!%p267_p7, %s4599_s26), 511 }
  0x12   : > { %s7356_s11 = scalar_lea.vmem %s8549_s0, %s4598_s30  ;;  %s6656_s12 = sshll.u32 %s8570_s26, 4 }
  0x13   : > { %s7361_s15 = scalar_lea.vmem %s8550_s1, %s6656_s12  ;;  %281 = sbr.rel (%p4604_p8) target bundleno = 27 (0x1b), region = 44 }
  0x18   : > { %v7283_v0 = vmov 0.0  }
  0x19   : > { %282 = vst [vmem:[#allocation2] sm:$0xff] %v7283_v0 }
  0x1a   : > { %283 = vst [vmem:[#allocation2 + $0x8] sm:$0xff] %v7283_v0 }
  0x1b PF: > { %v4719_v1 = vld [vmem:[%s7361_s15 + $0xe0] sm:$0xf]  ;;  %v6688_v2 = vld [vmem:[%s7361_s15 + $0xec] sm:$0xf0]  ;;  %vm4241_vm0 = vcmask 1043456   ;;  %p6653_p9 = scmp.ne.s32.totalorder %s7265_s18, 1 }
  0x1c   : > { %v4847_v3 = vld [vmem:[%s7361_s15 + $0x1e0] sm:$0xf]  ;;  %v4720_v4 = vor.u32 %v6688_v2, %v4719_v1  ;;  %v6720_v5 = vld [vmem:[%s7361_s15 + $0x1ec] sm:$0xf0] }
  0x1d   : > { %v4975_v6 = vld [vmem:[%s7361_s15 + $0x2e0] sm:$0xf]  ;;  %v6752_v7 = vld [vmem:[%s7361_s15 + $0x2ec] sm:$0xf0]  ;;  %v4848_v8 = vor.u32 %v6720_v5, %v4847_v3 }
  0x1e   : > { %v4976_v9 = vor.u32 %v6752_v7, %v4975_v6  ;;  %v5103_v10 = vld [vmem:[%s7361_s15 + $0x3e0] sm:$0xf]  ;;  %v6784_v11 = vld [vmem:[%s7361_s15 + $0x3ec] sm:$0xf0]  ;;  %3403 = vmatpush.bf16.msra.mxu0 %v4720_v4 }
  0x1f   : > { %v4703_v12 = vld [vmem:[%s7361_s15 + $0xc0] sm:$0xf]  ;;  %v5104_v13 = vor.u32 %v6784_v11, %v5103_v10  ;;  %v6684_v14 = vld [vmem:[%s7361_s15 + $0xcc] sm:$0xf0]  ;;  %3416 = vmatpush.bf16.msra.mxu1 %v4848_v8 }
  0x20   : > { %v4831_v15 = vld [vmem:[%s7361_s15 + $0x1c0] sm:$0xf]  ;;  %v6716_v16 = vld [vmem:[%s7361_s15 + $0x1cc] sm:$0xf0]  ;;  %3429 = vmatpush.bf16.msra.mxu2 %v4976_v9  ;;  %v4704_v17 = vor.u32 %v6684_v14, %v4703_v12 }
  0x21   : > { %v4832_v18 = vor.u32 %v6716_v16, %v4831_v15  ;;  %v4959_v19 = vld [vmem:[%s7361_s15 + $0x2c0] sm:$0xf]  ;;  %v6748_v20 = vld [vmem:[%s7361_s15 + $0x2cc] sm:$0xf0]  ;;  %3442 = vmatpush.bf16.msra.mxu3 %v5104_v13 }
  0x22   : > { %v5087_v21 = vld [vmem:[%s7361_s15 + $0x3c0] sm:$0xf]  ;;  %v4960_v22 = vor.u32 %v6748_v20, %v4959_v19  ;;  %v6780_v23 = vld [vmem:[%s7361_s15 + $0x3cc] sm:$0xf0]  ;;  %3404 = vmatpush.bf16.msra.mxu0 %v4704_v17 }
  0x23   : > { %v4687_v24 = vld [vmem:[%s7361_s15 + $0xa0] sm:$0xf]  ;;  %v6680_v25 = vld [vmem:[%s7361_s15 + $0xac] sm:$0xf0]  ;;  %v5088_v26 = vor.u32 %v6780_v23, %v5087_v21  ;;  %3417 = vmatpush.bf16.msra.mxu1 %v4832_v18 }
  0x24   : > { %v4815_v27 = vld [vmem:[%s7361_s15 + $0x1a0] sm:$0xf]  ;;  %v6712_v28 = vld [vmem:[%s7361_s15 + $0x1ac] sm:$0xf0]  ;;  %v4688_v30 = vor.u32 %v6680_v25, %v4687_v24  ;;  %3430 = vmatpush.bf16.msra.mxu2 %v4960_v22 }
  0x25   : > { %v4943_v29 = vld [vmem:[%s7361_s15 + $0x2a0] sm:$0xf]  ;;  %v6744_v31 = vld [vmem:[%s7361_s15 + $0x2ac] sm:$0xf0]  ;;  %v4816_v34 = vor.u32 %v6712_v28, %v4815_v27  ;;  %3443 = vmatpush.bf16.msra.mxu3 %v5088_v26 }
  0x26   : > { %v5071_v32 = vld [vmem:[%s7361_s15 + $0x3a0] sm:$0xf]  ;;  %v6776_v33 = vld [vmem:[%s7361_s15 + $0x3ac] sm:$0xf0]  ;;  %v4944_v35 = vor.u32 %v6744_v31, %v4943_v29  ;;  %3405 = vmatpush.bf16.msra.mxu0 %v4688_v30 }
  0x27   : > { %v4671_v36 = vld [vmem:[%s7361_s15 + $0x80] sm:$0xf]  ;;  %v6676_v37 = vld [vmem:[%s7361_s15 + $0x8c] sm:$0xf0]  ;;  %v5072_v39 = vor.u32 %v6776_v33, %v5071_v32  ;;  %3418 = vmatpush.bf16.msra.mxu1 %v4816_v34 }
  0x28   : > { %v4799_v38 = vld [vmem:[%s7361_s15 + $0x180] sm:$0xf]  ;;  %v6708_v40 = vld [vmem:[%s7361_s15 + $0x18c] sm:$0xf0]  ;;  %v4672_v45 = vor.u32 %v6676_v37, %v4671_v36  ;;  %3431 = vmatpush.bf16.msra.mxu2 %v4944_v35 }
  0x29   : > { %v4927_v41 = vld [vmem:[%s7361_s15 + $0x280] sm:$0xf]  ;;  %v6740_v42 = vld [vmem:[%s7361_s15 + $0x28c] sm:$0xf0]  ;;  %v4800_v46 = vor.u32 %v6708_v40, %v4799_v38  ;;  %3444 = vmatpush.bf16.msra.mxu3 %v5072_v39 }
  0x2a   : > { %v5055_v43 = vld [vmem:[%s7361_s15 + $0x380] sm:$0xf]  ;;  %v6772_v44 = vld [vmem:[%s7361_s15 + $0x38c] sm:$0xf0]  ;;  %v4928_v47 = vor.u32 %v6740_v42, %v4927_v41  ;;  %3406 = vmatpush.bf16.msra.mxu0 %v4672_v45 }
  0x2b   : > { %v4655_v48 = vld [vmem:[%s7361_s15 + $0x60] sm:$0xf]  ;;  %v6672_v49 = vld [vmem:[%s7361_s15 + $0x6c] sm:$0xf0]  ;;  %v5056_v51 = vor.u32 %v6772_v44, %v5055_v43  ;;  %3419 = vmatpush.bf16.msra.mxu1 %v4800_v46 }
  0x2c   : > { %v4783_v50 = vld [vmem:[%s7361_s15 + $0x160] sm:$0xf]  ;;  %v6704_v52 = vld [vmem:[%s7361_s15 + $0x16c] sm:$0xf0]  ;;  %v4656_v57 = vor.u32 %v6672_v49, %v4655_v48  ;;  %3432 = vmatpush.bf16.msra.mxu2 %v4928_v47 }
  0x2d   : > { %v4911_v53 = vld [vmem:[%s7361_s15 + $0x260] sm:$0xf]  ;;  %v6736_v54 = vld [vmem:[%s7361_s15 + $0x26c] sm:$0xf0]  ;;  %v4784_v58 = vor.u32 %v6704_v52, %v4783_v50  ;;  %3445 = vmatpush.bf16.msra.mxu3 %v5056_v51 }
  0x2e   : > { %v5039_v55 = vld [vmem:[%s7361_s15 + $0x360] sm:$0xf]  ;;  %v6768_v56 = vld [vmem:[%s7361_s15 + $0x36c] sm:$0xf0]  ;;  %v4912_v59 = vor.u32 %v6736_v54, %v4911_v53  ;;  %3407 = vmatpush.bf16.msra.mxu0 %v4656_v57 }
  0x2f   : > { %v4639_v60 = vld [vmem:[%s7361_s15 + $0x40] sm:$0xf]  ;;  %v6668_v61 = vld [vmem:[%s7361_s15 + $0x4c] sm:$0xf0]  ;;  %v5040_v63 = vor.u32 %v6768_v56, %v5039_v55  ;;  %3420 = vmatpush.bf16.msra.mxu1 %v4784_v58 }
  0x30   : > { %v4767_v62 = vld [vmem:[%s7361_s15 + $0x140] sm:$0xf]  ;;  %v6700_v0 = vld [vmem:[%s7361_s15 + $0x14c] sm:$0xf0]  ;;  %v4640_v5 = vor.u32 %v6668_v61, %v4639_v60  ;;  %3433 = vmatpush.bf16.msra.mxu2 %v4912_v59 }
  0x31   : > { %v4895_v1 = vld [vmem:[%s7361_s15 + $0x240] sm:$0xf]  ;;  %v6732_v2 = vld [vmem:[%s7361_s15 + $0x24c] sm:$0xf0]  ;;  %v4768_v6 = vor.u32 %v6700_v0, %v4767_v62  ;;  %3446 = vmatpush.bf16.msra.mxu3 %v5040_v63 }
  0x32   : > { %v5023_v3 = vld [vmem:[%s7361_s15 + $0x340] sm:$0xf]  ;;  %v6764_v4 = vld [vmem:[%s7361_s15 + $0x34c] sm:$0xf0]  ;;  %v4896_v7 = vor.u32 %v6732_v2, %v4895_v1  ;;  %3408 = vmatpush.bf16.msra.mxu0 %v4640_v5 }
  0x33   : > { %v4623_v8 = vld [vmem:[%s7361_s15 + $0x20] sm:$0xf]  ;;  %v6664_v9 = vld [vmem:[%s7361_s15 + $0x2c] sm:$0xf0]  ;;  %v5024_v11 = vor.u32 %v6764_v4, %v5023_v3  ;;  %3421 = vmatpush.bf16.msra.mxu1 %v4768_v6 }
  0x34   : > { %v4751_v10 = vld [vmem:[%s7361_s15 + $0x120] sm:$0xf]  ;;  %v6696_v12 = vld [vmem:[%s7361_s15 + $0x12c] sm:$0xf0]  ;;  %v4624_v17 = vor.u32 %v6664_v9, %v4623_v8  ;;  %3434 = vmatpush.bf16.msra.mxu2 %v4896_v7 }
  0x35   : > { %v4879_v13 = vld [vmem:[%s7361_s15 + $0x220] sm:$0xf]  ;;  %v6728_v14 = vld [vmem:[%s7361_s15 + $0x22c] sm:$0xf0]  ;;  %v4752_v20 = vor.u32 %v6696_v12, %v4751_v10  ;;  %3447 = vmatpush.bf16.msra.mxu3 %v5024_v11 }
  0x36   : > { %v5007_v15 = vld [vmem:[%s7361_s15 + $0x320] sm:$0xf]  ;;  %v6760_v16 = vld [vmem:[%s7361_s15 + $0x32c] sm:$0xf0]  ;;  %v4880_v21 = vor.u32 %v6728_v14, %v4879_v13  ;;  %3409 = vmatpush.bf16.msra.mxu0 %v4624_v17 }
  0x37   : > { %v4607_v18 = vld [vmem:[%s7361_s15] sm:$0xf]  ;;  %v6660_v19 = vld [vmem:[%s7361_s15 + $0xc] sm:$0xf0]  ;;  %v5008_v25 = vor.u32 %v6760_v16, %v5007_v15  ;;  %3422 = vmatpush.bf16.msra.mxu1 %v4752_v20 }
  0x38   : > { %v4735_v22 = vld [vmem:[%s7361_s15 + $0x100] sm:$0xf]  ;;  %v6692_v23 = vld [vmem:[%s7361_s15 + $0x10c] sm:$0xf0]  ;;  %v4608_v32 = vor.u32 %v6660_v19, %v4607_v18  ;;  %3435 = vmatpush.bf16.msra.mxu2 %v4880_v21 }
  0x39   : > { %v4863_v24 = vld [vmem:[%s7361_s15 + $0x200] sm:$0xf]  ;;  %v6724_v26 = vld [vmem:[%s7361_s15 + $0x20c] sm:$0xf0]  ;;  %v4736_v36 = vor.u32 %v6692_v23, %v4735_v22  ;;  %3448 = vmatpush.bf16.msra.mxu3 %v5008_v25 }
  0x3a   : > { %v4991_v27 = vld [vmem:[%s7361_s15 + $0x300] sm:$0xf]  ;;  %v6756_v28 = vld [vmem:[%s7361_s15 + $0x30c] sm:$0xf0]  ;;  %v4864_v37 = vor.u32 %v6724_v26, %v4863_v24  ;;  %3410 = vmatpush.bf16.msra.mxu0 %v4608_v32 }
  0x3b   : > { %v5231_v29 = vld [vmem:[%s7361_s15 + $0x4e0] sm:$0xf]  ;;  %v6816_v30 = vld [vmem:[%s7361_s15 + $0x4ec] sm:$0xf0]  ;;  %v4992_v40 = vor.u32 %v6756_v28, %v4991_v27  ;;  %3423 = vmatpush.bf16.msra.mxu1 %v4736_v36 }
  0x3c   : > { %v5359_v31 = vld [vmem:[%s7361_s15 + $0x5e0] sm:$0xf]  ;;  %v6848_v33 = vld [vmem:[%s7361_s15 + $0x5ec] sm:$0xf0]  ;;  %v5232_v41 = vor.u32 %v6816_v30, %v5231_v29  ;;  %3436 = vmatpush.bf16.msra.mxu2 %v4864_v37 }
  0x3d   : > { %v5487_v34 = vld [vmem:[%s7361_s15 + $0x6e0] sm:$0xf]  ;;  %v6880_v35 = vld [vmem:[%s7361_s15 + $0x6ec] sm:$0xf0]  ;;  %v5360_v42 = vor.u32 %v6848_v33, %v5359_v31  ;;  %3449 = vmatpush.bf16.msra.mxu3 %v4992_v40 }
  0x3e   : > { %v5615_v38 = vld [vmem:[%s7361_s15 + $0x7e0] sm:$0xf]  ;;  %v6912_v39 = vld [vmem:[%s7361_s15 + $0x7ec] sm:$0xf0]  ;;  %v5488_v43 = vor.u32 %v6880_v35, %v5487_v34  ;;  %3455 = vmatpush.bf16.msrb.mxu0 %v5232_v41 }
  0x3f   : > { %v5215_v44 = vld [vmem:[%s7361_s15 + $0x4c0] sm:$0xf]  ;;  %v6812_v45 = vld [vmem:[%s7361_s15 + $0x4cc] sm:$0xf0]  ;;  %v5616_v47 = vor.u32 %v6912_v39, %v5615_v38  ;;  %3468 = vmatpush.bf16.msrb.mxu1 %v5360_v42 }
  0x40   : > { %v5343_v46 = vld [vmem:[%s7361_s15 + $0x5c0] sm:$0xf]  ;;  %v6844_v48 = vld [vmem:[%s7361_s15 + $0x5cc] sm:$0xf0]  ;;  %v5216_v53 = vor.u32 %v6812_v45, %v5215_v44  ;;  %3481 = vmatpush.bf16.msrb.mxu2 %v5488_v43 }
  0x41   : > { %v5471_v49 = vld [vmem:[%s7361_s15 + $0x6c0] sm:$0xf]  ;;  %v6876_v50 = vld [vmem:[%s7361_s15 + $0x6cc] sm:$0xf0]  ;;  %v5344_v56 = vor.u32 %v6844_v48, %v5343_v46  ;;  %3494 = vmatpush.bf16.msrb.mxu3 %v5616_v47 }
  0x42   : > { %v5599_v51 = vld [vmem:[%s7361_s15 + $0x7c0] sm:$0xf]  ;;  %v6908_v52 = vld [vmem:[%s7361_s15 + $0x7cc] sm:$0xf0]  ;;  %v5472_v57 = vor.u32 %v6876_v50, %v5471_v49  ;;  %3456 = vmatpush.bf16.msrb.mxu0 %v5216_v53 }
  0x43   : > { %v5199_v54 = vld [vmem:[%s7361_s15 + $0x4a0] sm:$0xf]  ;;  %v6808_v55 = vld [vmem:[%s7361_s15 + $0x4ac] sm:$0xf0]  ;;  %v5600_v61 = vor.u32 %v6908_v52, %v5599_v51  ;;  %3469 = vmatpush.bf16.msrb.mxu1 %v5344_v56 }
  0x44   : > { %v5327_v58 = vld [vmem:[%s7361_s15 + $0x5a0] sm:$0xf]  ;;  %v6840_v59 = vld [vmem:[%s7361_s15 + $0x5ac] sm:$0xf0]  ;;  %v5200_v2 = vor.u32 %v6808_v55, %v5199_v54  ;;  %3482 = vmatpush.bf16.msrb.mxu2 %v5472_v57  ;;  %v287_v54 = vld [vmem:[%s7356_s11 + $0x8] sm:$0xff] }
  0x45   : > { %v286_v60 = vld [vmem:[%s7356_s11] sm:$0xff]  ;;  %v6872_v63 = vld [vmem:[%s7361_s15 + $0x6ac] sm:$0xf0]  ;;  %v5328_v4 = vor.u32 %v6840_v59, %v5327_v58  ;;  %3495 = vmatpush.bf16.msrb.mxu3 %v5600_v61  ;;  %806 = vst [vmem:[#allocation1 + $0x20] ss:$4 sm:$0xff] %v287_v54 }
  0x46   : > { %v5455_v62 = vld [vmem:[%s7361_s15 + $0x6a0] sm:$0xf]  ;;  %803 = vst [vmem:[#allocation1] ss:$4 sm:$0xff] %v286_v60  ;;  %v6904_v1 = vld [vmem:[%s7361_s15 + $0x7ac] sm:$0xf0]  ;;  %3457 = vmatpush.bf16.msrb.mxu0 %v5200_v2 }
  0x47   : > { %v5583_v0 = vld [vmem:[%s7361_s15 + $0x7a0] sm:$0xf]  ;;  %v5456_v5 = vor.u32 %v6872_v63, %v5455_v62  ;;  %v6804_v6 = vld [vmem:[%s7361_s15 + $0x48c] sm:$0xf0]  ;;  %3470 = vmatpush.bf16.msrb.mxu1 %v5328_v4 }
  0x48   : > { %v5183_v3 = vld [vmem:[%s7361_s15 + $0x480] sm:$0xf]  ;;  %v6836_v8 = vld [vmem:[%s7361_s15 + $0x58c] sm:$0xf0]  ;;  %v5584_v9 = vor.u32 %v6904_v1, %v5583_v0 }
  0x49   : > { %v5311_v7 = vld [vmem:[%s7361_s15 + $0x580] sm:$0xf]  ;;  %v6868_v11 = vld [vmem:[%s7361_s15 + $0x68c] sm:$0xf0]  ;;  %v5184_v16 = vor.u32 %v6804_v6, %v5183_v3  ;;  %3483 = vmatpush.bf16.msrb.mxu2 %v5456_v5 }
  0x4a   : > { %v5439_v10 = vld [vmem:[%s7361_s15 + $0x680] sm:$0xf]  ;;  %v6900_v13 = vld [vmem:[%s7361_s15 + $0x78c] sm:$0xf0]  ;;  %v5312_v22 = vor.u32 %v6836_v8, %v5311_v7  ;;  %3496 = vmatpush.bf16.msrb.mxu3 %v5584_v9 }
  0x4b   : > { %v5567_v12 = vld [vmem:[%s7361_s15 + $0x780] sm:$0xf]  ;;  %v6800_v15 = vld [vmem:[%s7361_s15 + $0x46c] sm:$0xf0]  ;;  %v5440_v23 = vor.u32 %v6868_v11, %v5439_v10  ;;  %3458 = vmatpush.bf16.msrb.mxu0 %v5184_v16 }
  0x4c   : > { %v5167_v14 = vld [vmem:[%s7361_s15 + $0x460] sm:$0xf]  ;;  %v6832_v18 = vld [vmem:[%s7361_s15 + $0x56c] sm:$0xf0]  ;;  %v5568_v26 = vor.u32 %v6900_v13, %v5567_v12  ;;  %3471 = vmatpush.bf16.msrb.mxu1 %v5312_v22 }
  0x4d   : > { %v5295_v17 = vld [vmem:[%s7361_s15 + $0x560] sm:$0xf]  ;;  %v6864_v20 = vld [vmem:[%s7361_s15 + $0x66c] sm:$0xf0]  ;;  %v5168_v31 = vor.u32 %v6800_v15, %v5167_v14  ;;  %3484 = vmatpush.bf16.msrb.mxu2 %v5440_v23 }
  0x4e   : > { %v5423_v19 = vld [vmem:[%s7361_s15 + $0x660] sm:$0xf]  ;;  %v288_v21 = vld [vmem:[%s7356_s11 + $0x10] sm:$0xff]  ;;  %v7473_v27 = vld.sshfl [vmem:[#allocation1 + $0x18] sm:$0xff pattern:$0x73625140]  ;;  %v5296_v32 = vor.u32 %v6832_v18, %v5295_v17  ;;  %3497 = vmatpush.bf16.msrb.mxu3 %v5568_v26 }
  0x4f   : > { %v7468_v24 = vld.sshfl [vmem:[#allocation1 + $0x10] sm:$0xff pattern:$0x73625140]  ;;  %v7470_v25 = vld.sshfl [vmem:[#allocation1] sm:$0xff pattern:$0x73625140]  ;;  %3450 = vmatmul.bf16.vlgmr.msra.gmra.mxu3 %v7473_v27  ;;  %v5424_v33 = vor.u32 %v6864_v20, %v5423_v19  ;;  %3459 = vmatpush.bf16.msrb.mxu0 %v5168_v31 }
  0x50   : > { %3437 = vmatmul.bf16.vlgmr.msra.gmra.mxu2 %v7468_v24  ;;  %v7475_v28 = vld.sshfl [vmem:[#allocation1 + $0x8] sm:$0xff pattern:$0x73625140]  ;;  %v5551_v29 = vld [vmem:[%s7361_s15 + $0x760] sm:$0xf]  ;;  %3411 = vmatmul.bf16.vlgmr.msra.gmra.mxu0 %v7470_v25  ;;  %v289_v17 = vld [vmem:[%s7356_s11 + $0x18] sm:$0xff] }
  0x51   : > { %v6896_v30 = vld [vmem:[%s7361_s15 + $0x76c] sm:$0xf0]  ;;  %816 = vst [vmem:[#allocation1] ss:$4 sm:$0xff] %v288_v21  ;;  %3424 = vmatmul.bf16.vlgmr.msra.gmra.mxu1 %v7475_v28  ;;  %v5151_v34 = vld [vmem:[%s7361_s15 + $0x440] sm:$0xf]  ;;  %3485 = vmatpush.bf16.msrb.mxu2 %v5424_v33 }
  0x52   : > { %v6796_v35 = vld [vmem:[%s7361_s15 + $0x44c] sm:$0xf0]  ;;  %v5279_v36 = vld [vmem:[%s7361_s15 + $0x540] sm:$0xf]  ;;  %v5552_v37 = vor.u32 %v6896_v30, %v5551_v29  ;;  %3472 = vmatpush.bf16.msrb.mxu1 %v5296_v32 }
  0x53   : > { %v6828_v38 = vld [vmem:[%s7361_s15 + $0x54c] sm:$0xf0]  ;;  %v5407_v39 = vld [vmem:[%s7361_s15 + $0x640] sm:$0xf]  ;;  %v5152_v43 = vor.u32 %v6796_v35, %v5151_v34 }
  0x54   : > { %v6860_v40 = vld [vmem:[%s7361_s15 + $0x64c] sm:$0xf0]  ;;  %v5535_v41 = vld [vmem:[%s7361_s15 + $0x740] sm:$0xf]  ;;  %v5280_v46 = vor.u32 %v6828_v38, %v5279_v36  ;;  %3498 = vmatpush.bf16.msrb.mxu3 %v5552_v37 }
  0x55   : > { %v6892_v42 = vld [vmem:[%s7361_s15 + $0x74c] sm:$0xf0]  ;;  %v5135_v44 = vld [vmem:[%s7361_s15 + $0x420] sm:$0xf]  ;;  %v5408_v47 = vor.u32 %v6860_v40, %v5407_v39  ;;  %3460 = vmatpush.bf16.msrb.mxu0 %v5152_v43 }
  0x56   : > { %v6792_v45 = vld [vmem:[%s7361_s15 + $0x42c] sm:$0xf0]  ;;  %v5263_v48 = vld [vmem:[%s7361_s15 + $0x520] sm:$0xf]  ;;  %v5536_v51 = vor.u32 %v6892_v42, %v5535_v41  ;;  %3473 = vmatpush.bf16.msrb.mxu1 %v5280_v46 }
  0x57   : > { %v6824_v49 = vld [vmem:[%s7361_s15 + $0x52c] sm:$0xf0]  ;;  %v5391_v50 = vld [vmem:[%s7361_s15 + $0x620] sm:$0xf]  ;;  %v5136_v57 = vor.u32 %v6792_v45, %v5135_v44  ;;  %3486 = vmatpush.bf16.msrb.mxu2 %v5408_v47 }
  0x58   : > { %v6856_v52 = vld [vmem:[%s7361_s15 + $0x62c] sm:$0xf0]  ;;  %v5519_v53 = vld [vmem:[%s7361_s15 + $0x720] sm:$0xf]  ;;  %v5264_v61 = vor.u32 %v6824_v49, %v5263_v48  ;;  %3499 = vmatpush.bf16.msrb.mxu3 %v5536_v51 }
  0x59   : > { %v6888_v55 = vld [vmem:[%s7361_s15 + $0x72c] sm:$0xf0]  ;;  %v5119_v56 = vld [vmem:[%s7361_s15 + $0x400] sm:$0xf]  ;;  %v5392_v62 = vor.u32 %v6856_v52, %v5391_v50  ;;  %3461 = vmatpush.bf16.msrb.mxu0 %v5136_v57 }
  0x5a   : > { %v6788_v58 = vld [vmem:[%s7361_s15 + $0x40c] sm:$0xf0]  ;;  %v5247_v59 = vld [vmem:[%s7361_s15 + $0x500] sm:$0xf]  ;;  %v5520_v2 = vor.u32 %v6888_v55, %v5519_v53  ;;  %3474 = vmatpush.bf16.msrb.mxu1 %v5264_v61 }
  0x5b   : > { %v6820_v60 = vld [vmem:[%s7361_s15 + $0x50c] sm:$0xf0]  ;;  %v5375_v63 = vld [vmem:[%s7361_s15 + $0x600] sm:$0xf]  ;;  %v5120_v9 = vor.u32 %v6788_v58, %v5119_v56  ;;  %3487 = vmatpush.bf16.msrb.mxu2 %v5392_v62 }
  0x5c   : > { %v6852_v0 = vld [vmem:[%s7361_s15 + $0x60c] sm:$0xf0]  ;;  %v5503_v1 = vld [vmem:[%s7361_s15 + $0x700] sm:$0xf]  ;;  %v5248_v13 = vor.u32 %v6820_v60, %v5247_v59  ;;  %3500 = vmatpush.bf16.msrb.mxu3 %v5520_v2 }
  0x5d   : > { %v6884_v3 = vld [vmem:[%s7361_s15 + $0x70c] sm:$0xf0]  ;;  %v5743_v4 = vld [vmem:[%s7361_s15 + $0x8e0] sm:$0xf]  ;;  %v5376_v14 = vor.u32 %v6852_v0, %v5375_v63  ;;  %3462 = vmatpush.bf16.msrb.mxu0 %v5120_v9 }
  0x5e   : > { %v6944_v5 = vld [vmem:[%s7361_s15 + $0x8ec] sm:$0xf0]  ;;  %v5871_v6 = vld [vmem:[%s7361_s15 + $0x9e0] sm:$0xf]  ;;  %v5504_v18 = vor.u32 %v6884_v3, %v5503_v1  ;;  %3475 = vmatpush.bf16.msrb.mxu1 %v5248_v13 }
  0x5f   : > { %v6976_v7 = vld [vmem:[%s7361_s15 + $0x9ec] sm:$0xf0]  ;;  %v5999_v8 = vld [vmem:[%s7361_s15 + $0xae0] sm:$0xf]  ;;  %v5744_v19 = vor.u32 %v6944_v5, %v5743_v4  ;;  %3488 = vmatpush.bf16.msrb.mxu2 %v5376_v14 }
  0x60   : > { %v7008_v10 = vld [vmem:[%s7361_s15 + $0xaec] sm:$0xf0]  ;;  %v6127_v11 = vld [vmem:[%s7361_s15 + $0xbe0] sm:$0xf]  ;;  %v5872_v26 = vor.u32 %v6976_v7, %v5871_v6  ;;  %3501 = vmatpush.bf16.msrb.mxu3 %v5504_v18 }
  0x61   : > { %v7040_v12 = vld [vmem:[%s7361_s15 + $0xbec] sm:$0xf0]  ;;  %v5727_v15 = vld [vmem:[%s7361_s15 + $0x8c0] sm:$0xf]  ;;  %v6000_v29 = vor.u32 %v7008_v10, %v5999_v8  ;;  %3507 = vmatpush.bf16.msra.mxu0 %v5744_v19 }
  0x62   : > { %v6940_v16 = vld [vmem:[%s7361_s15 + $0x8cc] sm:$0xf0]  ;;  %v5855_v20 = vld [vmem:[%s7361_s15 + $0x9c0] sm:$0xf]  ;;  %v6128_v32 = vor.u32 %v7040_v12, %v6127_v11  ;;  %3520 = vmatpush.bf16.msra.mxu1 %v5872_v26 }
  0x63   : > { %v6972_v21 = vld [vmem:[%s7361_s15 + $0x9cc] sm:$0xf0]  ;;  %v7522_v23 = vld.sshfl [vmem:[#allocation1 + $0x20] sm:$0xff pattern:$0x73625140]  ;;  %v5728_v37 = vor.u32 %v6940_v16, %v5727_v15  ;;  %3533 = vmatpush.bf16.msra.mxu2 %v6000_v29 }
  0x64   : > { %v7520_v22 = vld.sshfl [vmem:[#allocation1 + $0x30] sm:$0xff pattern:$0x73625140]  ;;  %v7524_v30 = vld.sshfl [vmem:[#allocation1 + $0x38] sm:$0xff pattern:$0x73625140]  ;;  %v5856_v38 = vor.u32 %v6972_v21, %v5855_v20  ;;  %3546 = vmatpush.bf16.msra.mxu3 %v6128_v32  ;;  %3463 = vmatmul.bf16.vlgmr.msrb.gmra.mxu0 %v7522_v23 }
  0x65   : > { %v7526_v31 = vld.sshfl [vmem:[#allocation1 + $0x28] sm:$0xff pattern:$0x73625140]  ;;  %v5983_v33 = vld [vmem:[%s7361_s15 + $0xac0] sm:$0xf]  ;;  %3489 = vmatmul.bf16.vlgmr.msrb.gmra.mxu2 %v7520_v22  ;;  %3502 = vmatmul.bf16.vlgmr.msrb.gmra.mxu3 %v7524_v30 }
  0x66   : > { %v7004_v34 = vld [vmem:[%s7361_s15 + $0xacc] sm:$0xf0]  ;;  %818 = vst [vmem:[#allocation1 + $0x20] ss:$4 sm:$0xff] %v289_v17  ;;  %v6111_v35 = vld [vmem:[%s7361_s15 + $0xbc0] sm:$0xf]  ;;  %3508 = vmatpush.bf16.msra.mxu0 %v5728_v37  ;;  %3476 = vmatmul.bf16.vlgmr.msrb.gmra.mxu1 %v7526_v31 }
  0x67   : > { %v7036_v36 = vld [vmem:[%s7361_s15 + $0xbcc] sm:$0xf0]  ;;  %v5984_v39 = vor.u32 %v7004_v34, %v5983_v33  ;;  %v5711_v40 = vld [vmem:[%s7361_s15 + $0x8a0] sm:$0xf]  ;;  %3521 = vmatpush.bf16.msra.mxu1 %v5856_v38 }
  0x68   : > { %v6936_v41 = vld [vmem:[%s7361_s15 + $0x8ac] sm:$0xf0]  ;;  %v5839_v42 = vld [vmem:[%s7361_s15 + $0x9a0] sm:$0xf]  ;;  %v6112_v43 = vor.u32 %v7036_v36, %v6111_v35 }
  0x69   : > { %v6968_v44 = vld [vmem:[%s7361_s15 + $0x9ac] sm:$0xf0]  ;;  %v5967_v45 = vld [vmem:[%s7361_s15 + $0xaa0] sm:$0xf]  ;;  %v5712_v49 = vor.u32 %v6936_v41, %v5711_v40  ;;  %3534 = vmatpush.bf16.msra.mxu2 %v5984_v39 }
  0x6a   : > { %v7000_v46 = vld [vmem:[%s7361_s15 + $0xaac] sm:$0xf0]  ;;  %v6095_v47 = vld [vmem:[%s7361_s15 + $0xba0] sm:$0xf]  ;;  %v5840_v50 = vor.u32 %v6968_v44, %v5839_v42  ;;  %3547 = vmatpush.bf16.msra.mxu3 %v6112_v43 }
  0x6b   : > { %v7032_v48 = vld [vmem:[%s7361_s15 + $0xbac] sm:$0xf0]  ;;  %v5968_v51 = vor.u32 %v7000_v46, %v5967_v45  ;;  %v5695_v52 = vld [vmem:[%s7361_s15 + $0x880] sm:$0xf]  ;;  %3509 = vmatpush.bf16.msra.mxu0 %v5712_v49 }
  0x6c   : > { %v6932_v53 = vld [vmem:[%s7361_s15 + $0x88c] sm:$0xf0]  ;;  %v5823_v54 = vld [vmem:[%s7361_s15 + $0x980] sm:$0xf]  ;;  %v6096_v55 = vor.u32 %v7032_v48, %v6095_v47  ;;  %3522 = vmatpush.bf16.msra.mxu1 %v5840_v50 }
  0x6d   : > { %v6964_v56 = vld [vmem:[%s7361_s15 + $0x98c] sm:$0xf0]  ;;  %v5951_v57 = vld [vmem:[%s7361_s15 + $0xa80] sm:$0xf]  ;;  %v5696_v61 = vor.u32 %v6932_v53, %v5695_v52  ;;  %3535 = vmatpush.bf16.msra.mxu2 %v5968_v51 }
  0x6e   : > { %v6996_v58 = vld [vmem:[%s7361_s15 + $0xa8c] sm:$0xf0]  ;;  %v6079_v59 = vld [vmem:[%s7361_s15 + $0xb80] sm:$0xf]  ;;  %v5824_v62 = vor.u32 %v6964_v56, %v5823_v54  ;;  %3548 = vmatpush.bf16.msra.mxu3 %v6096_v55 }
  0x6f   : > { %v7028_v60 = vld [vmem:[%s7361_s15 + $0xb8c] sm:$0xf0]  ;;  %v5952_v63 = vor.u32 %v6996_v58, %v5951_v57  ;;  %v5679_v0 = vld [vmem:[%s7361_s15 + $0x860] sm:$0xf]  ;;  %3510 = vmatpush.bf16.msra.mxu0 %v5696_v61 }
  0x70   : > { %v6928_v1 = vld [vmem:[%s7361_s15 + $0x86c] sm:$0xf0]  ;;  %v5807_v2 = vld [vmem:[%s7361_s15 + $0x960] sm:$0xf]  ;;  %v6080_v3 = vor.u32 %v7028_v60, %v6079_v59  ;;  %3523 = vmatpush.bf16.msra.mxu1 %v5824_v62 }
  0x71   : > { %v6960_v4 = vld [vmem:[%s7361_s15 + $0x96c] sm:$0xf0]  ;;  %v5935_v5 = vld [vmem:[%s7361_s15 + $0xa60] sm:$0xf]  ;;  %v5680_v9 = vor.u32 %v6928_v1, %v5679_v0  ;;  %3536 = vmatpush.bf16.msra.mxu2 %v5952_v63 }
  0x72   : > { %v6992_v6 = vld [vmem:[%s7361_s15 + $0xa6c] sm:$0xf0]  ;;  %v6063_v7 = vld [vmem:[%s7361_s15 + $0xb60] sm:$0xf]  ;;  %v5808_v10 = vor.u32 %v6960_v4, %v5807_v2  ;;  %3549 = vmatpush.bf16.msra.mxu3 %v6080_v3 }
  0x73   : > { %v7024_v8 = vld [vmem:[%s7361_s15 + $0xb6c] sm:$0xf0]  ;;  %v5936_v11 = vor.u32 %v6992_v6, %v5935_v5  ;;  %v5663_v12 = vld [vmem:[%s7361_s15 + $0x840] sm:$0xf]  ;;  %3511 = vmatpush.bf16.msra.mxu0 %v5680_v9 }
  0x74   : > { %v6924_v13 = vld [vmem:[%s7361_s15 + $0x84c] sm:$0xf0]  ;;  %v5791_v14 = vld [vmem:[%s7361_s15 + $0x940] sm:$0xf]  ;;  %v6064_v15 = vor.u32 %v7024_v8, %v6063_v7  ;;  %3524 = vmatpush.bf16.msra.mxu1 %v5808_v10 }
  0x75   : > { %v6956_v16 = vld [vmem:[%s7361_s15 + $0x94c] sm:$0xf0]  ;;  %v5919_v17 = vld [vmem:[%s7361_s15 + $0xa40] sm:$0xf]  ;;  %v5664_v21 = vor.u32 %v6924_v13, %v5663_v12  ;;  %3537 = vmatpush.bf16.msra.mxu2 %v5936_v11 }
  0x76   : > { %v6988_v18 = vld [vmem:[%s7361_s15 + $0xa4c] sm:$0xf0]  ;;  %v6047_v19 = vld [vmem:[%s7361_s15 + $0xb40] sm:$0xf]  ;;  %v5792_v26 = vor.u32 %v6956_v16, %v5791_v14  ;;  %3550 = vmatpush.bf16.msra.mxu3 %v6064_v15 }
  0x77   : > { %v7020_v20 = vld [vmem:[%s7361_s15 + $0xb4c] sm:$0xf0]  ;;  %v5920_v29 = vor.u32 %v6988_v18, %v5919_v17  ;;  %v5647_v32 = vld [vmem:[%s7361_s15 + $0x820] sm:$0xf]  ;;  %3512 = vmatpush.bf16.msra.mxu0 %v5664_v21 }
  0x78   : > { %v6920_v33 = vld [vmem:[%s7361_s15 + $0x82c] sm:$0xf0]  ;;  %v5775_v34 = vld [vmem:[%s7361_s15 + $0x920] sm:$0xf]  ;;  %v6048_v35 = vor.u32 %v7020_v20, %v6047_v19  ;;  %3525 = vmatpush.bf16.msra.mxu1 %v5792_v26 }
  0x79   : > { %v6952_v36 = vld [vmem:[%s7361_s15 + $0x92c] sm:$0xf0]  ;;  %v5903_v37 = vld [vmem:[%s7361_s15 + $0xa20] sm:$0xf]  ;;  %v5648_v41 = vor.u32 %v6920_v33, %v5647_v32  ;;  %3538 = vmatpush.bf16.msra.mxu2 %v5920_v29 }
  0x7a   : > { %v6984_v38 = vld [vmem:[%s7361_s15 + $0xa2c] sm:$0xf0]  ;;  %v6031_v39 = vld [vmem:[%s7361_s15 + $0xb20] sm:$0xf]  ;;  %v5776_v44 = vor.u32 %v6952_v36, %v5775_v34  ;;  %3551 = vmatpush.bf16.msra.mxu3 %v6048_v35 }
  0x7b   : > { %v7016_v40 = vld [vmem:[%s7361_s15 + $0xb2c] sm:$0xf0]  ;;  %v5631_v42 = vld [vmem:[%s7361_s15 + $0x800] sm:$0xf]  ;;  %v5904_v45 = vor.u32 %v6984_v38, %v5903_v37  ;;  %3513 = vmatpush.bf16.msra.mxu0 %v5648_v41 }
  0x7c   : > { %v6916_v43 = vld [vmem:[%s7361_s15 + $0x80c] sm:$0xf0]  ;;  %v5759_v46 = vld [vmem:[%s7361_s15 + $0x900] sm:$0xf]  ;;  %v6032_v49 = vor.u32 %v7016_v40, %v6031_v39  ;;  %3526 = vmatpush.bf16.msra.mxu1 %v5776_v44 }
  0x7d   : > { %v6948_v47 = vld [vmem:[%s7361_s15 + $0x90c] sm:$0xf0]  ;;  %v5887_v48 = vld [vmem:[%s7361_s15 + $0xa00] sm:$0xf]  ;;  %v5632_v56 = vor.u32 %v6916_v43, %v5631_v42  ;;  %3539 = vmatpush.bf16.msra.mxu2 %v5904_v45 }
  0x7e   : > { %v6980_v50 = vld [vmem:[%s7361_s15 + $0xa0c] sm:$0xf0]  ;;  %v6015_v51 = vld [vmem:[%s7361_s15 + $0xb00] sm:$0xf]  ;;  %v5760_v60 = vor.u32 %v6948_v47, %v5759_v46  ;;  %3552 = vmatpush.bf16.msra.mxu3 %v6032_v49 }
  0x7f   : > { %v7012_v52 = vld [vmem:[%s7361_s15 + $0xb0c] sm:$0xf0]  ;;  %v6255_v53 = vld [vmem:[%s7361_s15 + $0xce0] sm:$0xf]  ;;  %v5888_v61 = vor.u32 %v6980_v50, %v5887_v48  ;;  %3514 = vmatpush.bf16.msra.mxu0 %v5632_v56 }
  0x80   : > { %v7072_v54 = vld [vmem:[%s7361_s15 + $0xcec] sm:$0xf0]  ;;  %v6383_v55 = vld [vmem:[%s7361_s15 + $0xde0] sm:$0xf]  ;;  %v6016_v0 = vor.u32 %v7012_v52, %v6015_v51  ;;  %3527 = vmatpush.bf16.msra.mxu1 %v5760_v60 }
  0x81   : > { %v7104_v57 = vld [vmem:[%s7361_s15 + $0xdec] sm:$0xf0]  ;;  %v6511_v58 = vld [vmem:[%s7361_s15 + $0xee0] sm:$0xf]  ;;  %v6256_v1 = vor.u32 %v7072_v54, %v6255_v53  ;;  %3540 = vmatpush.bf16.msra.mxu2 %v5888_v61 }
  0x82   : > { %v7136_v59 = vld [vmem:[%s7361_s15 + $0xeec] sm:$0xf0]  ;;  %v6639_v62 = vld [vmem:[%s7361_s15 + $0xfe0] sm:$0xf]  ;;  %v6384_v2 = vor.u32 %v7104_v57, %v6383_v55  ;;  %3553 = vmatpush.bf16.msra.mxu3 %v6016_v0 }
  0x83   : > { %v7168_v63 = vld [vmem:[%s7361_s15 + $0xfec] sm:$0xf0]  ;;  %v6512_v3 = vor.u32 %v7136_v59, %v6511_v58  ;;  %v819_v4 = vld.sshfl [vmem:[#allocation1] sm:$0xff pattern:$0x73625140]  ;;  %3559 = vmatpush.bf16.msrb.mxu0 %v6256_v1 }
  0x84   : > { %v6239_v5 = vld [vmem:[%s7361_s15 + $0xcc0] sm:$0xf]  ;;  %v7068_v6 = vld [vmem:[%s7361_s15 + $0xccc] sm:$0xf0]  ;;  %v6640_v8 = vor.u32 %v7168_v63, %v6639_v62  ;;  %3572 = vmatpush.bf16.msrb.mxu1 %v6384_v2  ;;  %3515 = vmatmul.bf16.vlgmr.msra.gmra.mxu0 %v819_v4 }
  0x85   : > { %v6367_v7 = vld [vmem:[%s7361_s15 + $0xdc0] sm:$0xf]  ;;  %v821_v9 = vld.sshfl [vmem:[#allocation1 + $0x10] sm:$0xff pattern:$0x73625140]  ;;  %v6240_v17 = vor.u32 %v7068_v6, %v6239_v5  ;;  %3585 = vmatpush.bf16.msrb.mxu2 %v6512_v3 }
  0x86   : > { %v7100_v10 = vld [vmem:[%s7361_s15 + $0xdcc] sm:$0xf0]  ;;  %v6495_v11 = vld [vmem:[%s7361_s15 + $0xec0] sm:$0xf]  ;;  %3598 = vmatpush.bf16.msrb.mxu3 %v6640_v8  ;;  %3541 = vmatmul.bf16.vlgmr.msra.gmra.mxu2 %v821_v9 }
  0x87   : > { %v7132_v12 = vld [vmem:[%s7361_s15 + $0xecc] sm:$0xf0]  ;;  %v6623_v13 = vld [vmem:[%s7361_s15 + $0xfc0] sm:$0xf]  ;;  %v6368_v18 = vor.u32 %v7100_v10, %v6367_v7  ;;  %3560 = vmatpush.bf16.msrb.mxu0 %v6240_v17 }
  0x88   : > { %v7164_v14 = vld [vmem:[%s7361_s15 + $0xfcc] sm:$0xf0]  ;;  %v820_v15 = vld.sshfl [vmem:[#allocation1 + $0x8] sm:$0xff pattern:$0x73625140]  ;;  %v6496_v19 = vor.u32 %v7132_v12, %v6495_v11 }
  0x89   : > { %v822_v16 = vld.sshfl [vmem:[#allocation1 + $0x18] sm:$0xff pattern:$0x73625140]  ;;  %v6223_v20 = vld [vmem:[%s7361_s15 + $0xca0] sm:$0xf]  ;;  %v6624_v29 = vor.u32 %v7164_v14, %v6623_v13  ;;  %3528 = vmatmul.bf16.vlgmr.msra.gmra.mxu1 %v820_v15 }
  0x8a   : > { %v7064_v21 = vld [vmem:[%s7361_s15 + $0xcac] sm:$0xf0]  ;;  %v6351_v26 = vld [vmem:[%s7361_s15 + $0xda0] sm:$0xf]  ;;  %3554 = vmatmul.bf16.vlgmr.msra.gmra.mxu3 %v822_v16  ;;  %3573 = vmatpush.bf16.msrb.mxu1 %v6368_v18 }
  0x8b   : > { %v7096_v32 = vld [vmem:[%s7361_s15 + $0xdac] sm:$0xf0]  ;;  %v6479_v33 = vld [vmem:[%s7361_s15 + $0xea0] sm:$0xf]  ;;  %v6224_v37 = vor.u32 %v7064_v21, %v6223_v20  ;;  %3586 = vmatpush.bf16.msrb.mxu2 %v6496_v19  ;;  %3599 = vmatpush.bf16.msrb.mxu3 %v6624_v29 }
  0x8c   : > { %v7128_v34 = vld [vmem:[%s7361_s15 + $0xeac] sm:$0xf0]  ;;  %v6607_v35 = vld [vmem:[%s7361_s15 + $0xfa0] sm:$0xf]  ;;  %v6352_v38 = vor.u32 %v7096_v32, %v6351_v26 }
  0x8d   : > { %v7160_v36 = vld [vmem:[%s7361_s15 + $0xfac] sm:$0xf0]  ;;  %v6480_v39 = vor.u32 %v7128_v34, %v6479_v33  ;;  %v6207_v40 = vld [vmem:[%s7361_s15 + $0xc80] sm:$0xf]  ;;  %3561 = vmatpush.bf16.msrb.mxu0 %v6224_v37 }
  0x8e   : > { %v7060_v41 = vld [vmem:[%s7361_s15 + $0xc8c] sm:$0xf0]  ;;  %v6335_v42 = vld [vmem:[%s7361_s15 + $0xd80] sm:$0xf]  ;;  %v6608_v43 = vor.u32 %v7160_v36, %v6607_v35  ;;  %3574 = vmatpush.bf16.msrb.mxu1 %v6352_v38 }
  0x8f   : > { %v7092_v44 = vld [vmem:[%s7361_s15 + $0xd8c] sm:$0xf0]  ;;  %v6463_v45 = vld [vmem:[%s7361_s15 + $0xe80] sm:$0xf]  ;;  %v6208_v49 = vor.u32 %v7060_v41, %v6207_v40  ;;  %3587 = vmatpush.bf16.msrb.mxu2 %v6480_v39  ;;  %v6686_v41 = vld [vmem:[%s7361_s15 + $0xe4] sm:$0xf] }
  0x90   : > { %v7124_v46 = vld [vmem:[%s7361_s15 + $0xe8c] sm:$0xf0]  ;;  %v6591_v47 = vld [vmem:[%s7361_s15 + $0xf80] sm:$0xf]  ;;  %v6336_v50 = vor.u32 %v7092_v44, %v6335_v42  ;;  %3600 = vmatpush.bf16.msrb.mxu3 %v6608_v43  ;;  %v4721_v42 = vld [vmem:[%s7361_s15 + $0xf0] sm:$0xf0] }
  0x91   : > { %v7156_v48 = vld [vmem:[%s7361_s15 + $0xf8c] sm:$0xf0]  ;;  %v6464_v51 = vor.u32 %v7124_v46, %v6463_v45  ;;  %v6191_v52 = vld [vmem:[%s7361_s15 + $0xc60] sm:$0xf]  ;;  %3562 = vmatpush.bf16.msrb.mxu0 %v6208_v49  ;;  %v6718_v43 = vld [vmem:[%s7361_s15 + $0x1e4] sm:$0xf] }
  0x92   : > { %v7056_v53 = vld [vmem:[%s7361_s15 + $0xc6c] sm:$0xf0]  ;;  %v6319_v54 = vld [vmem:[%s7361_s15 + $0xd60] sm:$0xf]  ;;  %v6592_v55 = vor.u32 %v7156_v48, %v6591_v47  ;;  %3575 = vmatpush.bf16.msrb.mxu1 %v6336_v50  ;;  %v4849_v45 = vld [vmem:[%s7361_s15 + $0x1f0] sm:$0xf0] }
  0x93   : > { %v7088_v56 = vld [vmem:[%s7361_s15 + $0xd6c] sm:$0xf0]  ;;  %v6447_v57 = vld [vmem:[%s7361_s15 + $0xe60] sm:$0xf]  ;;  %v6192_v61 = vor.u32 %v7056_v53, %v6191_v52  ;;  %3588 = vmatpush.bf16.msrb.mxu2 %v6464_v51  ;;  %v6750_v46 = vld [vmem:[%s7361_s15 + $0x2e4] sm:$0xf]  ;;  %v4724_v53 = vor.u32 %v6686_v41, %v4721_v42 }
  0x94   : > { %v7120_v58 = vld [vmem:[%s7361_s15 + $0xe6c] sm:$0xf0]  ;;  %v6575_v59 = vld [vmem:[%s7361_s15 + $0xf60] sm:$0xf]  ;;  %v6320_v62 = vor.u32 %v7088_v56, %v6319_v54  ;;  %3601 = vmatpush.bf16.msrb.mxu3 %v6592_v55  ;;  %v4977_v47 = vld [vmem:[%s7361_s15 + $0x2f0] sm:$0xf0]  ;;  %v4852_v54 = vor.u32 %v6718_v43, %v4849_v45 }
  0x95   : > { %v7152_v60 = vld [vmem:[%s7361_s15 + $0xf6c] sm:$0xf0]  ;;  %v6448_v63 = vor.u32 %v7120_v58, %v6447_v57  ;;  %v6175_v0 = vld [vmem:[%s7361_s15 + $0xc40] sm:$0xf]  ;;  %3563 = vmatpush.bf16.msrb.mxu0 %v6192_v61  ;;  %v6782_v50 = vld [vmem:[%s7361_s15 + $0x3e4] sm:$0xf]  ;;  %v4980_v55 = vor.u32 %v6750_v46, %v4977_v47 }
  0x96   : > { %v7052_v1 = vld [vmem:[%s7361_s15 + $0xc4c] sm:$0xf0]  ;;  %v6303_v2 = vld [vmem:[%s7361_s15 + $0xd40] sm:$0xf]  ;;  %v6576_v3 = vor.u32 %v7152_v60, %v6575_v59  ;;  %3576 = vmatpush.bf16.msrb.mxu1 %v6320_v62  ;;  %v5105_v51 = vld [vmem:[%s7361_s15 + $0x3f0] sm:$0xf0] }
  0x97   : > { %v7084_v4 = vld [vmem:[%s7361_s15 + $0xd4c] sm:$0xf0]  ;;  %v6431_v5 = vld [vmem:[%s7361_s15 + $0xe40] sm:$0xf]  ;;  %v6176_v9 = vor.u32 %v7052_v1, %v6175_v0  ;;  %3589 = vmatpush.bf16.msrb.mxu2 %v6448_v63  ;;  %v6682_v57 = vld [vmem:[%s7361_s15 + $0xc4] sm:$0xf]  ;;  %v5108_v60 = vor.u32 %v6782_v50, %v5105_v51 }
  0x98   : > { %v7116_v6 = vld [vmem:[%s7361_s15 + $0xe4c] sm:$0xf0]  ;;  %v6559_v7 = vld [vmem:[%s7361_s15 + $0xf40] sm:$0xf]  ;;  %v6304_v10 = vor.u32 %v7084_v4, %v6303_v2  ;;  %3602 = vmatpush.bf16.msrb.mxu3 %v6576_v3  ;;  %v4705_v58 = vld [vmem:[%s7361_s15 + $0xd0] sm:$0xf0] }
  0x99   : > { %v7148_v8 = vld [vmem:[%s7361_s15 + $0xf4c] sm:$0xf0]  ;;  %v6432_v11 = vor.u32 %v7116_v6, %v6431_v5  ;;  %v6159_v12 = vld [vmem:[%s7361_s15 + $0xc20] sm:$0xf]  ;;  %3564 = vmatpush.bf16.msrb.mxu0 %v6176_v9  ;;  %v6714_v59 = vld [vmem:[%s7361_s15 + $0x1c4] sm:$0xf]  ;;  %v4708_v5 = vor.u32 %v6682_v57, %v4705_v58 }
  0x9a   : > { %v7048_v13 = vld [vmem:[%s7361_s15 + $0xc2c] sm:$0xf0]  ;;  %v6287_v14 = vld [vmem:[%s7361_s15 + $0xd20] sm:$0xf]  ;;  %v6560_v15 = vor.u32 %v7148_v8, %v6559_v7  ;;  %3577 = vmatpush.bf16.msrb.mxu1 %v6304_v10  ;;  %v4833_v62 = vld [vmem:[%s7361_s15 + $0x1d0] sm:$0xf0] }
  0x9b   : > { %v7080_v16 = vld [vmem:[%s7361_s15 + $0xd2c] sm:$0xf0]  ;;  %v6415_v17 = vld [vmem:[%s7361_s15 + $0xe20] sm:$0xf]  ;;  %v6160_v21 = vor.u32 %v7048_v13, %v6159_v12  ;;  %3590 = vmatpush.bf16.msrb.mxu2 %v6432_v11  ;;  %v6746_v63 = vld [vmem:[%s7361_s15 + $0x2c4] sm:$0xf]  ;;  %v4836_v6 = vor.u32 %v6714_v59, %v4833_v62 }
  0x9c   : > { %v7112_v18 = vld [vmem:[%s7361_s15 + $0xe2c] sm:$0xf0]  ;;  %v6543_v19 = vld [vmem:[%s7361_s15 + $0xf20] sm:$0xf]  ;;  %v6288_v32 = vor.u32 %v7080_v16, %v6287_v14  ;;  %3603 = vmatpush.bf16.msrb.mxu3 %v6560_v15  ;;  %v4961_v0 = vld [vmem:[%s7361_s15 + $0x2d0] sm:$0xf0] }
  0x9d   : > { %v7144_v20 = vld [vmem:[%s7361_s15 + $0xf2c] sm:$0xf0]  ;;  %v6143_v26 = vld [vmem:[%s7361_s15 + $0xc00] sm:$0xf]  ;;  %v6416_v33 = vor.u32 %v7112_v18, %v6415_v17  ;;  %3565 = vmatpush.bf16.msrb.mxu0 %v6160_v21  ;;  %v6778_v1 = vld [vmem:[%s7361_s15 + $0x3c4] sm:$0xf]  ;;  %v4964_v7 = vor.u32 %v6746_v63, %v4961_v0 }
  0x9e   : > { %v7044_v29 = vld [vmem:[%s7361_s15 + $0xc0c] sm:$0xf0]  ;;  %v6271_v34 = vld [vmem:[%s7361_s15 + $0xd00] sm:$0xf]  ;;  %v6544_v37 = vor.u32 %v7144_v20, %v6543_v19  ;;  %3578 = vmatpush.bf16.msrb.mxu1 %v6288_v32  ;;  %v5089_v2 = vld [vmem:[%s7361_s15 + $0x3d0] sm:$0xf0] }
  0x9f   : > { %v7076_v35 = vld [vmem:[%s7361_s15 + $0xd0c] sm:$0xf0]  ;;  %v6399_v36 = vld [vmem:[%s7361_s15 + $0xe00] sm:$0xf]  ;;  %v6144_v44 = vor.u32 %v7044_v29, %v6143_v26  ;;  %3591 = vmatpush.bf16.msrb.mxu2 %v6416_v33  ;;  %v6678_v8 = vld [vmem:[%s7361_s15 + $0xa4] sm:$0xf]  ;;  %v5092_v11 = vor.u32 %v6778_v1, %v5089_v2 }
  0xa0   : > { %v7108_v38 = vld [vmem:[%s7361_s15 + $0xe0c] sm:$0xf0]  ;;  %v6527_v39 = vld [vmem:[%s7361_s15 + $0xf00] sm:$0xf]  ;;  %v6272_v48 = vor.u32 %v7076_v35, %v6271_v34  ;;  %3604 = vmatpush.bf16.msrb.mxu3 %v6544_v37  ;;  %v4689_v9 = vld [vmem:[%s7361_s15 + $0xb0] sm:$0xf0] }
  0xa1   : > { %v7140_v40 = vld [vmem:[%s7361_s15 + $0xf0c] sm:$0xf0]  ;;  %v6400_v49 = vor.u32 %v7108_v38, %v6399_v36  ;;  %v823_v56 = vld.sshfl [vmem:[#allocation1 + $0x20] sm:$0xff pattern:$0x73625140]  ;;  %3566 = vmatpush.bf16.msrb.mxu0 %v6144_v44  ;;  %v4692_v17 = vor.u32 %v6678_v8, %v4689_v9 }
  0xa2   : > { %v6528_v52 = vor.u32 %v7140_v40, %v6527_v39  ;;  %v825_v61 = vld.sshfl [vmem:[#allocation1 + $0x30] sm:$0xff pattern:$0x73625140]  ;;  %3579 = vmatpush.bf16.msrb.mxu1 %v6272_v48  ;;  %v824_v3 = vld.sshfl [vmem:[#allocation1 + $0x28] sm:$0xff pattern:$0x73625140] }
  0xa3   : > { %3592 = vmatpush.bf16.msrb.mxu2 %v6400_v49  ;;  %v826_v4 = vld.sshfl [vmem:[#allocation1 + $0x38] sm:$0xff pattern:$0x73625140]  ;;  %v6710_v10 = vld [vmem:[%s7361_s15 + $0x1a4] sm:$0xf] }
  0xa4   : > { %3605 = vmatpush.bf16.msrb.mxu3 %v6528_v52  ;;  %3567 = vmatmul.bf16.vlgmr.msrb.gmra.mxu0 %v823_v56  ;;  %v4817_v12 = vld [vmem:[%s7361_s15 + $0x1b0] sm:$0xf0]  ;;  %v6742_v13 = vld [vmem:[%s7361_s15 + $0x2a4] sm:$0xf] }
  0xa5   : > { %3611 = vmatpush.bf16.msra.mxu0 %v4724_v53  ;;  %v4945_v14 = vld [vmem:[%s7361_s15 + $0x2b0] sm:$0xf0]  ;;  %3580 = vmatmul.bf16.vlgmr.msrb.gmra.mxu1 %v824_v3  ;;  %v6774_v15 = vld [vmem:[%s7361_s15 + $0x3a4] sm:$0xf]  ;;  %v4820_v18 = vor.u32 %v6710_v10, %v4817_v12 }
  0xa6   : > { %3624 = vmatpush.bf16.msra.mxu1 %v4852_v54  ;;  %3593 = vmatmul.bf16.vlgmr.msrb.gmra.mxu2 %v825_v61  ;;  %v5073_v16 = vld [vmem:[%s7361_s15 + $0x3b0] sm:$0xf0]  ;;  %v4948_v19 = vor.u32 %v6742_v13, %v4945_v14  ;;  %v6674_v20 = vld [vmem:[%s7361_s15 + $0x84] sm:$0xf] }
  0xa7   : > { %3637 = vmatpush.bf16.msra.mxu2 %v4980_v55  ;;  %3606 = vmatmul.bf16.vlgmr.msrb.gmra.mxu3 %v826_v4  ;;  %v4673_v21 = vld [vmem:[%s7361_s15 + $0x90] sm:$0xf0]  ;;  %v6706_v26 = vld [vmem:[%s7361_s15 + $0x184] sm:$0xf]  ;;  %v5076_v29 = vor.u32 %v6774_v15, %v5073_v16 }
  0xa8   : > { %3650 = vmatpush.bf16.msra.mxu3 %v5108_v60  ;;  %v4801_v32 = vld [vmem:[%s7361_s15 + $0x190] sm:$0xf0]  ;;  %v6738_v33 = vld [vmem:[%s7361_s15 + $0x284] sm:$0xf]  ;;  %v4676_v37 = vor.u32 %v6674_v20, %v4673_v21 }
  0xa9   : > { %3612 = vmatpush.bf16.msra.mxu0 %v4708_v5  ;;  %v4929_v34 = vld [vmem:[%s7361_s15 + $0x290] sm:$0xf0]  ;;  %v6770_v35 = vld [vmem:[%s7361_s15 + $0x384] sm:$0xf]  ;;  %v4804_v38 = vor.u32 %v6706_v26, %v4801_v32 }
  0xaa   : > { %3625 = vmatpush.bf16.msra.mxu1 %v4836_v6  ;;  %v5057_v36 = vld [vmem:[%s7361_s15 + $0x390] sm:$0xf0]  ;;  %v4932_v39 = vor.u32 %v6738_v33, %v4929_v34  ;;  %v6670_v40 = vld [vmem:[%s7361_s15 + $0x64] sm:$0xf] }
  0xab   : > { %3638 = vmatpush.bf16.msra.mxu2 %v4964_v7  ;;  %v4657_v41 = vld [vmem:[%s7361_s15 + $0x70] sm:$0xf0]  ;;  %v6702_v42 = vld [vmem:[%s7361_s15 + $0x164] sm:$0xf]  ;;  %v5060_v43 = vor.u32 %v6770_v35, %v5057_v36 }
  0xac   : > { %3651 = vmatpush.bf16.msra.mxu3 %v5092_v11  ;;  %v4785_v44 = vld [vmem:[%s7361_s15 + $0x170] sm:$0xf0]  ;;  %v6734_v45 = vld [vmem:[%s7361_s15 + $0x264] sm:$0xf]  ;;  %v4660_v49 = vor.u32 %v6670_v40, %v4657_v41 }
  0xad   : > { %3613 = vmatpush.bf16.msra.mxu0 %v4692_v17  ;;  %v4913_v46 = vld [vmem:[%s7361_s15 + $0x270] sm:$0xf0]  ;;  %v6766_v47 = vld [vmem:[%s7361_s15 + $0x364] sm:$0xf]  ;;  %v4788_v50 = vor.u32 %v6702_v42, %v4785_v44 }
  0xae   : > { %3626 = vmatpush.bf16.msra.mxu1 %v4820_v18  ;;  %v5041_v48 = vld [vmem:[%s7361_s15 + $0x370] sm:$0xf0]  ;;  %v4916_v51 = vor.u32 %v6734_v45, %v4913_v46  ;;  %v6666_v52 = vld [vmem:[%s7361_s15 + $0x44] sm:$0xf] }
  0xaf   : > { %3639 = vmatpush.bf16.msra.mxu2 %v4948_v19  ;;  %v4641_v53 = vld [vmem:[%s7361_s15 + $0x50] sm:$0xf0]  ;;  %v6698_v54 = vld [vmem:[%s7361_s15 + $0x144] sm:$0xf]  ;;  %v5044_v55 = vor.u32 %v6766_v47, %v5041_v48 }
  0xb0   : > { %3652 = vmatpush.bf16.msra.mxu3 %v5076_v29  ;;  %v4769_v56 = vld [vmem:[%s7361_s15 + $0x150] sm:$0xf0]  ;;  %v6730_v57 = vld [vmem:[%s7361_s15 + $0x244] sm:$0xf]  ;;  %v4644_v61 = vor.u32 %v6666_v52, %v4641_v53 }
  0xb1   : > { %3614 = vmatpush.bf16.msra.mxu0 %v4676_v37  ;;  %v4897_v58 = vld [vmem:[%s7361_s15 + $0x250] sm:$0xf0]  ;;  %v6762_v59 = vld [vmem:[%s7361_s15 + $0x344] sm:$0xf]  ;;  %v4772_v62 = vor.u32 %v6698_v54, %v4769_v56 }
  0xb2   : > { %3627 = vmatpush.bf16.msra.mxu1 %v4804_v38  ;;  %v5025_v60 = vld [vmem:[%s7361_s15 + $0x350] sm:$0xf0]  ;;  %v4900_v63 = vor.u32 %v6730_v57, %v4897_v58  ;;  %v6662_v0 = vld [vmem:[%s7361_s15 + $0x24] sm:$0xf] }
  0xb3   : > { %3640 = vmatpush.bf16.msra.mxu2 %v4932_v39  ;;  %v4625_v1 = vld [vmem:[%s7361_s15 + $0x30] sm:$0xf0]  ;;  %v6694_v2 = vld [vmem:[%s7361_s15 + $0x124] sm:$0xf]  ;;  %v5028_v3 = vor.u32 %v6762_v59, %v5025_v60 }
  0xb4   : > { %3653 = vmatpush.bf16.msra.mxu3 %v5060_v43  ;;  %v4753_v4 = vld [vmem:[%s7361_s15 + $0x130] sm:$0xf0]  ;;  %v6726_v5 = vld [vmem:[%s7361_s15 + $0x224] sm:$0xf]  ;;  %v4628_v9 = vor.u32 %v6662_v0, %v4625_v1 }
  0xb5   : > { %3615 = vmatpush.bf16.msra.mxu0 %v4660_v49  ;;  %v4881_v6 = vld [vmem:[%s7361_s15 + $0x230] sm:$0xf0]  ;;  %v6758_v7 = vld [vmem:[%s7361_s15 + $0x324] sm:$0xf]  ;;  %v4756_v12 = vor.u32 %v6694_v2, %v4753_v4 }
  0xb6   : > { %3628 = vmatpush.bf16.msra.mxu1 %v4788_v50  ;;  %v5009_v8 = vld [vmem:[%s7361_s15 + $0x330] sm:$0xf0]  ;;  %v6658_v10 = vld [vmem:[%s7361_s15 + $0x4] sm:$0xf]  ;;  %v4884_v13 = vor.u32 %v6726_v5, %v4881_v6 }
  0xb7   : > { %3641 = vmatpush.bf16.msra.mxu2 %v4916_v51  ;;  %v4609_v11 = vld [vmem:[%s7361_s15 + $0x10] sm:$0xf0]  ;;  %v6690_v14 = vld [vmem:[%s7361_s15 + $0x104] sm:$0xf]  ;;  %v5012_v17 = vor.u32 %v6758_v7, %v5009_v8 }
  0xb8   : > { %3654 = vmatpush.bf16.msra.mxu3 %v5044_v55  ;;  %v4737_v15 = vld [vmem:[%s7361_s15 + $0x110] sm:$0xf0]  ;;  %v6722_v16 = vld [vmem:[%s7361_s15 + $0x204] sm:$0xf]  ;;  %v4612_v32 = vor.u32 %v6658_v10, %v4609_v11 }
  0xb9   : > { %3616 = vmatpush.bf16.msra.mxu0 %v4644_v61  ;;  %v4865_v18 = vld [vmem:[%s7361_s15 + $0x210] sm:$0xf0]  ;;  %v6754_v19 = vld [vmem:[%s7361_s15 + $0x304] sm:$0xf]  ;;  %v4740_v36 = vor.u32 %v6690_v14, %v4737_v15 }
  0xba   : > { %3629 = vmatpush.bf16.msra.mxu1 %v4772_v62  ;;  %v4993_v20 = vld [vmem:[%s7361_s15 + $0x310] sm:$0xf0]  ;;  %v6814_v21 = vld [vmem:[%s7361_s15 + $0x4e4] sm:$0xf]  ;;  %v4868_v37 = vor.u32 %v6722_v16, %v4865_v18 }
  0xbb   : > { %3642 = vmatpush.bf16.msra.mxu2 %v4900_v63  ;;  %v5233_v26 = vld [vmem:[%s7361_s15 + $0x4f0] sm:$0xf0]  ;;  %v6846_v29 = vld [vmem:[%s7361_s15 + $0x5e4] sm:$0xf]  ;;  %v4996_v40 = vor.u32 %v6754_v19, %v4993_v20 }
  0xbc   : > { %3655 = vmatpush.bf16.msra.mxu3 %v5028_v3  ;;  %v5361_v33 = vld [vmem:[%s7361_s15 + $0x5f0] sm:$0xf0]  ;;  %v6878_v34 = vld [vmem:[%s7361_s15 + $0x6e4] sm:$0xf]  ;;  %v5236_v41 = vor.u32 %v6814_v21, %v5233_v26 }
  0xbd   : > { %3617 = vmatpush.bf16.msra.mxu0 %v4628_v9  ;;  %v5489_v35 = vld [vmem:[%s7361_s15 + $0x6f0] sm:$0xf0]  ;;  %v6910_v38 = vld [vmem:[%s7361_s15 + $0x7e4] sm:$0xf]  ;;  %v5364_v42 = vor.u32 %v6846_v29, %v5361_v33 }
  0xbe   : > { %3630 = vmatpush.bf16.msra.mxu1 %v4756_v12  ;;  %v5617_v39 = vld [vmem:[%s7361_s15 + $0x7f0] sm:$0xf0]  ;;  %v5492_v43 = vor.u32 %v6878_v34, %v5489_v35  ;;  %v6810_v44 = vld [vmem:[%s7361_s15 + $0x4c4] sm:$0xf] }
  0xbf   : > { %3643 = vmatpush.bf16.msra.mxu2 %v4884_v13  ;;  %v5217_v45 = vld [vmem:[%s7361_s15 + $0x4d0] sm:$0xf0]  ;;  %v6842_v46 = vld [vmem:[%s7361_s15 + $0x5c4] sm:$0xf]  ;;  %v5620_v47 = vor.u32 %v6910_v38, %v5617_v39 }
  0xc0   : > { %3656 = vmatpush.bf16.msra.mxu3 %v5012_v17  ;;  %v5345_v48 = vld [vmem:[%s7361_s15 + $0x5d0] sm:$0xf0]  ;;  %v6874_v49 = vld [vmem:[%s7361_s15 + $0x6c4] sm:$0xf]  ;;  %v5220_v53 = vor.u32 %v6810_v44, %v5217_v45 }
  0xc1   : > { %3618 = vmatpush.bf16.msra.mxu0 %v4612_v32  ;;  %v5473_v50 = vld [vmem:[%s7361_s15 + $0x6d0] sm:$0xf0]  ;;  %v6906_v51 = vld [vmem:[%s7361_s15 + $0x7c4] sm:$0xf]  ;;  %v5348_v54 = vor.u32 %v6842_v46, %v5345_v48 }
  0xc2   : > { %3631 = vmatpush.bf16.msra.mxu1 %v4740_v36  ;;  %v5601_v52 = vld [vmem:[%s7361_s15 + $0x7d0] sm:$0xf0]  ;;  %v5476_v55 = vor.u32 %v6874_v49, %v5473_v50  ;;  %v6806_v56 = vld [vmem:[%s7361_s15 + $0x4a4] sm:$0xf] }
  0xc3   : > { %3644 = vmatpush.bf16.msra.mxu2 %v4868_v37  ;;  %v5201_v57 = vld [vmem:[%s7361_s15 + $0x4b0] sm:$0xf0]  ;;  %v6838_v58 = vld [vmem:[%s7361_s15 + $0x5a4] sm:$0xf]  ;;  %v5604_v59 = vor.u32 %v6906_v51, %v5601_v52 }
  0xc4   : > { %3657 = vmatpush.bf16.msra.mxu3 %v4996_v40  ;;  %v5329_v60 = vld [vmem:[%s7361_s15 + $0x5b0] sm:$0xf0]  ;;  %v6870_v61 = vld [vmem:[%s7361_s15 + $0x6a4] sm:$0xf]  ;;  %3619 = vmatmul.bf16.vlgmr.msra.gmra.mxu0 %v7470_v25  ;;  %v5204_v1 = vor.u32 %v6806_v56, %v5201_v57 }
  0xc5   : > { %3663 = vmatpush.bf16.msrb.mxu0 %v5236_v41  ;;  %v5457_v62 = vld [vmem:[%s7361_s15 + $0x6b0] sm:$0xf0]  ;;  %v6902_v63 = vld [vmem:[%s7361_s15 + $0x7a4] sm:$0xf]  ;;  %3632 = vmatmul.bf16.vlgmr.msra.gmra.mxu1 %v7475_v28  ;;  %v5332_v2 = vor.u32 %v6838_v58, %v5329_v60 }
  0xc6   : > { %3676 = vmatpush.bf16.msrb.mxu1 %v5364_v42  ;;  %3645 = vmatmul.bf16.vlgmr.msra.gmra.mxu2 %v7468_v24  ;;  %v5585_v0 = vld [vmem:[%s7361_s15 + $0x7b0] sm:$0xf0]  ;;  %v5460_v3 = vor.u32 %v6870_v61, %v5457_v62  ;;  %v6802_v4 = vld [vmem:[%s7361_s15 + $0x484] sm:$0xf] }
  0xc7   : > { %3689 = vmatpush.bf16.msrb.mxu2 %v5492_v43  ;;  %3658 = vmatmul.bf16.vlgmr.msra.gmra.mxu3 %v7473_v27  ;;  %v5185_v5 = vld [vmem:[%s7361_s15 + $0x490] sm:$0xf0]  ;;  %v6834_v6 = vld [vmem:[%s7361_s15 + $0x584] sm:$0xf]  ;;  %v5588_v7 = vor.u32 %v6902_v63, %v5585_v0 }
  0xc8   : > { %3702 = vmatpush.bf16.msrb.mxu3 %v5620_v47  ;;  %v5313_v8 = vld [vmem:[%s7361_s15 + $0x590] sm:$0xf0]  ;;  %v6866_v9 = vld [vmem:[%s7361_s15 + $0x684] sm:$0xf]  ;;  %v5188_v13 = vor.u32 %v6802_v4, %v5185_v5 }
  0xc9   : > { %3664 = vmatpush.bf16.msrb.mxu0 %v5220_v53  ;;  %v5441_v10 = vld [vmem:[%s7361_s15 + $0x690] sm:$0xf0]  ;;  %v6898_v11 = vld [vmem:[%s7361_s15 + $0x784] sm:$0xf]  ;;  %v5316_v14 = vor.u32 %v6834_v6, %v5313_v8 }
  0xca   : > { %3677 = vmatpush.bf16.msrb.mxu1 %v5348_v54  ;;  %v5569_v12 = vld [vmem:[%s7361_s15 + $0x790] sm:$0xf0]  ;;  %v5444_v15 = vor.u32 %v6866_v9, %v5441_v10  ;;  %v6798_v16 = vld [vmem:[%s7361_s15 + $0x464] sm:$0xf] }
  0xcb   : > { %3690 = vmatpush.bf16.msrb.mxu2 %v5476_v55  ;;  %v5169_v17 = vld [vmem:[%s7361_s15 + $0x470] sm:$0xf0]  ;;  %v6830_v18 = vld [vmem:[%s7361_s15 + $0x564] sm:$0xf]  ;;  %v5572_v19 = vor.u32 %v6898_v11, %v5569_v12 }
  0xcc   : > { %3703 = vmatpush.bf16.msrb.mxu3 %v5604_v59  ;;  %v5297_v20 = vld [vmem:[%s7361_s15 + $0x570] sm:$0xf0]  ;;  %v6862_v21 = vld [vmem:[%s7361_s15 + $0x664] sm:$0xf]  ;;  %v5172_v33 = vor.u32 %v6798_v16, %v5169_v17 }
  0xcd   : > { %3665 = vmatpush.bf16.msrb.mxu0 %v5204_v1  ;;  %v5425_v26 = vld [vmem:[%s7361_s15 + $0x670] sm:$0xf0]  ;;  %v6894_v29 = vld [vmem:[%s7361_s15 + $0x764] sm:$0xf]  ;;  %v5300_v34 = vor.u32 %v6830_v18, %v5297_v20  ;;  %v3412_v46 = vpop.f32.mrf.mxu0 }
  0xce   : > { %3678 = vmatpush.bf16.msrb.mxu1 %v5332_v2  ;;  %v5553_v32 = vld [vmem:[%s7361_s15 + $0x770] sm:$0xf0]  ;;  %v5428_v35 = vor.u32 %v6862_v21, %v5425_v26  ;;  %v6794_v36 = vld [vmem:[%s7361_s15 + $0x444] sm:$0xf]  ;;  %v3425_v52 = vpop.f32.mrf.mxu1 }
  0xcf   : > { %3691 = vmatpush.bf16.msrb.mxu2 %v5460_v3  ;;  %v5153_v37 = vld [vmem:[%s7361_s15 + $0x450] sm:$0xf0]  ;;  %v6826_v38 = vld [vmem:[%s7361_s15 + $0x544] sm:$0xf]  ;;  %v5556_v39 = vor.u32 %v6894_v29, %v5553_v32  ;;  %v3426_v57 = vadd.f32 %v3425_v52, %v3412_v46 }
  0xd0   : > { %3704 = vmatpush.bf16.msrb.mxu3 %v5588_v7  ;;  %v5281_v40 = vld [vmem:[%s7361_s15 + $0x550] sm:$0xf0]  ;;  %v6858_v41 = vld [vmem:[%s7361_s15 + $0x644] sm:$0xf]  ;;  %v5156_v45 = vor.u32 %v6794_v36, %v5153_v37 }
  0xd1   : > { %3666 = vmatpush.bf16.msrb.mxu0 %v5188_v13  ;;  %v5409_v42 = vld [vmem:[%s7361_s15 + $0x650] sm:$0xf0]  ;;  %v6890_v43 = vld [vmem:[%s7361_s15 + $0x744] sm:$0xf]  ;;  %v5284_v47 = vor.u32 %v6826_v38, %v5281_v40 }
  0xd2   : > { %3679 = vmatpush.bf16.msrb.mxu1 %v5316_v14  ;;  %v5537_v44 = vld [vmem:[%s7361_s15 + $0x750] sm:$0xf0]  ;;  %v5412_v48 = vor.u32 %v6858_v41, %v5409_v42  ;;  %v6790_v49 = vld [vmem:[%s7361_s15 + $0x424] sm:$0xf]  ;;  %v3451_v10 = vpop.f32.mrf.mxu3 }
  0xd3   : > { %3692 = vmatpush.bf16.msrb.mxu2 %v5444_v15  ;;  %v5137_v50 = vld [vmem:[%s7361_s15 + $0x430] sm:$0xf0]  ;;  %v6822_v51 = vld [vmem:[%s7361_s15 + $0x524] sm:$0xf]  ;;  %v5540_v53 = vor.u32 %v6890_v43, %v5537_v44  ;;  %v3438_v4 = vpop.f32.mrf.mxu2 }
  0xd4   : > { %3705 = vmatpush.bf16.msrb.mxu3 %v5572_v19  ;;  %v5265_v54 = vld [vmem:[%s7361_s15 + $0x530] sm:$0xf0]  ;;  %v6854_v55 = vld [vmem:[%s7361_s15 + $0x624] sm:$0xf]  ;;  %v5140_v60 = vor.u32 %v6790_v49, %v5137_v50  ;;  %v3439_v9 = vadd.f32 %v3438_v4, %v3426_v57 }
  0xd5   : > { %3667 = vmatpush.bf16.msrb.mxu0 %v5172_v33  ;;  %v5393_v56 = vld [vmem:[%s7361_s15 + $0x630] sm:$0xf0]  ;;  %v6886_v58 = vld [vmem:[%s7361_s15 + $0x724] sm:$0xf]  ;;  %v5268_v63 = vor.u32 %v6822_v51, %v5265_v54  ;;  %v3414_v19 = vpop.f32.mrf.mxu0 }
  0xd6   : > { %3680 = vmatpush.bf16.msrb.mxu1 %v5300_v34  ;;  %v5521_v59 = vld [vmem:[%s7361_s15 + $0x730] sm:$0xf0]  ;;  %v6786_v61 = vld [vmem:[%s7361_s15 + $0x404] sm:$0xf]  ;;  %v5396_v0 = vor.u32 %v6854_v55, %v5393_v56  ;;  %v7786_v18 = vadd.f32 %v3451_v10, %v3439_v9  ;;  %v3427_v32 = vpop.f32.mrf.mxu1 }
  0xd7   : > { %3693 = vmatpush.bf16.msrb.mxu2 %v5428_v35  ;;  %v5121_v62 = vld [vmem:[%s7361_s15 + $0x410] sm:$0xf0]  ;;  %v6818_v1 = vld [vmem:[%s7361_s15 + $0x504] sm:$0xf]  ;;  %v5524_v5 = vor.u32 %v6886_v58, %v5521_v59 }
  0xd8   : > { %3706 = vmatpush.bf16.msrb.mxu3 %v5556_v39  ;;  %v5249_v2 = vld [vmem:[%s7361_s15 + $0x510] sm:$0xf0]  ;;  %v6850_v3 = vld [vmem:[%s7361_s15 + $0x604] sm:$0xf]  ;;  %v5124_v14 = vor.u32 %v6786_v61, %v5121_v62 }
  0xd9   : > { %3668 = vmatpush.bf16.msrb.mxu0 %v5156_v45  ;;  %v5377_v6 = vld [vmem:[%s7361_s15 + $0x610] sm:$0xf0]  ;;  %v6882_v7 = vld [vmem:[%s7361_s15 + $0x704] sm:$0xf]  ;;  %v5252_v20 = vor.u32 %v6818_v1, %v5249_v2 }
  0xda   : > { %3681 = vmatpush.bf16.msrb.mxu1 %v5284_v47  ;;  %v5505_v8 = vld [vmem:[%s7361_s15 + $0x710] sm:$0xf0]  ;;  %v6942_v11 = vld [vmem:[%s7361_s15 + $0x8e4] sm:$0xf]  ;;  %v5380_v21 = vor.u32 %v6850_v3, %v5377_v6 }
  0xdb   : > { %3694 = vmatpush.bf16.msrb.mxu2 %v5412_v48  ;;  %v5745_v12 = vld [vmem:[%s7361_s15 + $0x8f0] sm:$0xf0]  ;;  %v6974_v13 = vld [vmem:[%s7361_s15 + $0x9e4] sm:$0xf]  ;;  %v5508_v33 = vor.u32 %v6882_v7, %v5505_v8  ;;  %v3440_v46 = vpop.f32.mrf.mxu2  ;;  %v3453_v48 = vpop.f32.mrf.mxu3 }
  0xdc   : > { %3707 = vmatpush.bf16.msrb.mxu3 %v5540_v53  ;;  %v5873_v15 = vld [vmem:[%s7361_s15 + $0x9f0] sm:$0xf0]  ;;  %v7006_v16 = vld [vmem:[%s7361_s15 + $0xae4] sm:$0xf]  ;;  %v5748_v34 = vor.u32 %v6942_v11, %v5745_v12 }
  0xdd   : > { %3669 = vmatpush.bf16.msrb.mxu0 %v5140_v60  ;;  %v6001_v17 = vld [vmem:[%s7361_s15 + $0xaf0] sm:$0xf0]  ;;  %v7038_v26 = vld [vmem:[%s7361_s15 + $0xbe4] sm:$0xf]  ;;  %v5876_v35 = vor.u32 %v6974_v13, %v5873_v15 }
  0xde   : > { %3682 = vmatpush.bf16.msrb.mxu1 %v5268_v63  ;;  %v6129_v29 = vld [vmem:[%s7361_s15 + $0xbf0] sm:$0xf0]  ;;  %v6004_v36 = vor.u32 %v7006_v16, %v6001_v17  ;;  %v6938_v37 = vld [vmem:[%s7361_s15 + $0x8c4] sm:$0xf] }
  0xdf   : > { %3695 = vmatpush.bf16.msrb.mxu2 %v5396_v0  ;;  %v5729_v38 = vld [vmem:[%s7361_s15 + $0x8d0] sm:$0xf0]  ;;  %v6970_v39 = vld [vmem:[%s7361_s15 + $0x9c4] sm:$0xf]  ;;  %v6132_v40 = vor.u32 %v7038_v26, %v6129_v29 }
  0xe0   : > { %3708 = vmatpush.bf16.msrb.mxu3 %v5524_v5  ;;  %v5857_v41 = vld [vmem:[%s7361_s15 + $0x9d0] sm:$0xf0]  ;;  %v7002_v42 = vld [vmem:[%s7361_s15 + $0xac4] sm:$0xf]  ;;  %v5732_v47 = vor.u32 %v6938_v37, %v5729_v38 }
  0xe1   : > { %3670 = vmatpush.bf16.msrb.mxu0 %v5124_v14  ;;  %v5985_v43 = vld [vmem:[%s7361_s15 + $0xad0] sm:$0xf0]  ;;  %v7034_v44 = vld [vmem:[%s7361_s15 + $0xbc4] sm:$0xf]  ;;  %v5860_v49 = vor.u32 %v6970_v39, %v5857_v41  ;;  %v3464_v9 = vpop.f32.mrf.mxu0 }
  0xe2   : > { %3683 = vmatpush.bf16.msrb.mxu1 %v5252_v20  ;;  %v6113_v45 = vld [vmem:[%s7361_s15 + $0xbd0] sm:$0xf0]  ;;  %v5988_v50 = vor.u32 %v7002_v42, %v5985_v43  ;;  %v6934_v51 = vld [vmem:[%s7361_s15 + $0x8a4] sm:$0xf]  ;;  %v3465_v15 = vadd.f32 %v3464_v9, %v7786_v18 }
  0xe3   : > { %3696 = vmatpush.bf16.msrb.mxu2 %v5380_v21  ;;  %v5713_v52 = vld [vmem:[%s7361_s15 + $0x8b0] sm:$0xf0]  ;;  %v6966_v53 = vld [vmem:[%s7361_s15 + $0x9a4] sm:$0xf]  ;;  %v6116_v54 = vor.u32 %v7034_v44, %v6113_v45  ;;  %v3477_v16 = vpop.f32.mrf.mxu1 }
  0xe4   : > { %3709 = vmatpush.bf16.msrb.mxu3 %v5508_v33  ;;  %v5841_v55 = vld [vmem:[%s7361_s15 + $0x9b0] sm:$0xf0]  ;;  %v6998_v56 = vld [vmem:[%s7361_s15 + $0xaa4] sm:$0xf]  ;;  %3671 = vmatmul.bf16.vlgmr.msrb.gmra.mxu0 %v7522_v23  ;;  %v5716_v60 = vor.u32 %v6934_v51, %v5713_v52  ;;  %v3478_v32 = vadd.f32 %v3477_v16, %v3465_v15 }
  0xe5   : > { %3715 = vmatpush.bf16.msra.mxu0 %v5748_v34  ;;  %v5969_v57 = vld [vmem:[%s7361_s15 + $0xab0] sm:$0xf0]  ;;  %v7030_v58 = vld [vmem:[%s7361_s15 + $0xba4] sm:$0xf]  ;;  %3684 = vmatmul.bf16.vlgmr.msrb.gmra.mxu1 %v7526_v31  ;;  %v5844_v61 = vor.u32 %v6966_v53, %v5841_v55 }
  0xe6   : > { %3728 = vmatpush.bf16.msra.mxu1 %v5876_v35  ;;  %3697 = vmatmul.bf16.vlgmr.msrb.gmra.mxu2 %v7520_v22  ;;  %v6097_v59 = vld [vmem:[%s7361_s15 + $0xbb0] sm:$0xf0]  ;;  %v5972_v62 = vor.u32 %v6998_v56, %v5969_v57  ;;  %v6930_v63 = vld [vmem:[%s7361_s15 + $0x884] sm:$0xf] }
  0xe7   : > { %3741 = vmatpush.bf16.msra.mxu2 %v6004_v36  ;;  %3710 = vmatmul.bf16.vlgmr.msrb.gmra.mxu3 %v7524_v30  ;;  %v5697_v0 = vld [vmem:[%s7361_s15 + $0x890] sm:$0xf0]  ;;  %v6962_v1 = vld [vmem:[%s7361_s15 + $0x984] sm:$0xf]  ;;  %v6100_v2 = vor.u32 %v7030_v58, %v6097_v59 }
  0xe8   : > { %3754 = vmatpush.bf16.msra.mxu3 %v6132_v40  ;;  %v5825_v3 = vld [vmem:[%s7361_s15 + $0x990] sm:$0xf0]  ;;  %v6994_v4 = vld [vmem:[%s7361_s15 + $0xa84] sm:$0xf]  ;;  %v5700_v8 = vor.u32 %v6930_v63, %v5697_v0  ;;  %v3490_v38 = vpop.f32.mrf.mxu2  ;;  %v3503_v44 = vpop.f32.mrf.mxu3 }
  0xe9   : > { %3716 = vmatpush.bf16.msra.mxu0 %v5732_v47  ;;  %v5953_v5 = vld [vmem:[%s7361_s15 + $0xa90] sm:$0xf0]  ;;  %v7026_v6 = vld [vmem:[%s7361_s15 + $0xb84] sm:$0xf]  ;;  %v5828_v10 = vor.u32 %v6962_v1, %v5825_v3  ;;  %v3491_v43 = vadd.f32 %v3490_v38, %v3478_v32 }
  0xea   : > { %3729 = vmatpush.bf16.msra.mxu1 %v5860_v49  ;;  %v6081_v7 = vld [vmem:[%s7361_s15 + $0xb90] sm:$0xf0]  ;;  %v5956_v11 = vor.u32 %v6994_v4, %v5953_v5  ;;  %v6926_v12 = vld [vmem:[%s7361_s15 + $0x864] sm:$0xf]  ;;  %v3466_v49 = vpop.f32.mrf.mxu0 }
  0xeb   : > { %3742 = vmatpush.bf16.msra.mxu2 %v5988_v50  ;;  %v5681_v13 = vld [vmem:[%s7361_s15 + $0x870] sm:$0xf0]  ;;  %v6958_v14 = vld [vmem:[%s7361_s15 + $0x964] sm:$0xf]  ;;  %v6084_v17 = vor.u32 %v7026_v6, %v6081_v7  ;;  %v7835_v48 = vadd.f32 %v3503_v44, %v3491_v43  ;;  %v3479_v55 = vpop.f32.mrf.mxu1 }
  0xec   : > { %3755 = vmatpush.bf16.msra.mxu3 %v6116_v54  ;;  %v5809_v19 = vld [vmem:[%s7361_s15 + $0x970] sm:$0xf0]  ;;  %v6990_v20 = vld [vmem:[%s7361_s15 + $0xa64] sm:$0xf]  ;;  %v5684_v33 = vor.u32 %v6926_v12, %v5681_v13 }
  0xed   : > { %3717 = vmatpush.bf16.msra.mxu0 %v5716_v60  ;;  %v5937_v21 = vld [vmem:[%s7361_s15 + $0xa70] sm:$0xf0]  ;;  %v7022_v26 = vld [vmem:[%s7361_s15 + $0xb64] sm:$0xf]  ;;  %v5812_v18 = vor.u32 %v6958_v14, %v5809_v19 }
  0xee   : > { %3730 = vmatpush.bf16.msra.mxu1 %v5844_v61  ;;  %v6065_v29 = vld [vmem:[%s7361_s15 + $0xb70] sm:$0xf0]  ;;  %v5940_v34 = vor.u32 %v6990_v20, %v5937_v21  ;;  %v6922_v35 = vld [vmem:[%s7361_s15 + $0x844] sm:$0xf] }
  0xef   : > { %3743 = vmatpush.bf16.msra.mxu2 %v5972_v62  ;;  %v5665_v36 = vld [vmem:[%s7361_s15 + $0x850] sm:$0xf0]  ;;  %v6954_v37 = vld [vmem:[%s7361_s15 + $0x944] sm:$0xf]  ;;  %v6068_v39 = vor.u32 %v7022_v26, %v6065_v29 }
  0xf0   : > { %3756 = vmatpush.bf16.msra.mxu3 %v6100_v2  ;;  %v5793_v40 = vld [vmem:[%s7361_s15 + $0x950] sm:$0xf0]  ;;  %v6986_v41 = vld [vmem:[%s7361_s15 + $0xa44] sm:$0xf]  ;;  %v5668_v47 = vor.u32 %v6922_v35, %v5665_v36  ;;  %v3492_v6 = vpop.f32.mrf.mxu2 }
  0xf1   : > { %3718 = vmatpush.bf16.msra.mxu0 %v5700_v8  ;;  %v5921_v42 = vld [vmem:[%s7361_s15 + $0xa50] sm:$0xf0]  ;;  %v7018_v45 = vld [vmem:[%s7361_s15 + $0xb44] sm:$0xf]  ;;  %v5796_v50 = vor.u32 %v6954_v37, %v5793_v40 }
  0xf2   : > { %3731 = vmatpush.bf16.msra.mxu1 %v5828_v10  ;;  %v6049_v46 = vld [vmem:[%s7361_s15 + $0xb50] sm:$0xf0]  ;;  %v5924_v51 = vor.u32 %v6986_v41, %v5921_v42  ;;  %v6918_v52 = vld [vmem:[%s7361_s15 + $0x824] sm:$0xf] }
  0xf3   : > { %3744 = vmatpush.bf16.msra.mxu2 %v5956_v11  ;;  %v5649_v53 = vld [vmem:[%s7361_s15 + $0x830] sm:$0xf0]  ;;  %v6950_v54 = vld [vmem:[%s7361_s15 + $0x924] sm:$0xf]  ;;  %v6052_v56 = vor.u32 %v7018_v45, %v6049_v46  ;;  %v3505_v11 = vpop.f32.mrf.mxu3 }
  0xf4   : > { %3757 = vmatpush.bf16.msra.mxu3 %v6084_v17  ;;  %v5777_v57 = vld [vmem:[%s7361_s15 + $0x930] sm:$0xf0]  ;;  %v6982_v58 = vld [vmem:[%s7361_s15 + $0xa24] sm:$0xf]  ;;  %v5652_v62 = vor.u32 %v6918_v52, %v5649_v53 }
  0xf5   : > { %3719 = vmatpush.bf16.msra.mxu0 %v5684_v33  ;;  %v5905_v59 = vld [vmem:[%s7361_s15 + $0xa30] sm:$0xf0]  ;;  %v7014_v60 = vld [vmem:[%s7361_s15 + $0xb24] sm:$0xf]  ;;  %v5780_v1 = vor.u32 %v6950_v54, %v5777_v57 }
  0xf6   : > { %3732 = vmatpush.bf16.msra.mxu1 %v5812_v18  ;;  %v6033_v61 = vld [vmem:[%s7361_s15 + $0xb30] sm:$0xf0]  ;;  %v6914_v63 = vld [vmem:[%s7361_s15 + $0x804] sm:$0xf]  ;;  %v5908_v2 = vor.u32 %v6982_v58, %v5905_v59 }
  0xf7   : > { %3745 = vmatpush.bf16.msra.mxu2 %v5940_v34  ;;  %v5633_v0 = vld [vmem:[%s7361_s15 + $0x810] sm:$0xf0]  ;;  %v6946_v3 = vld [vmem:[%s7361_s15 + $0x904] sm:$0xf]  ;;  %v6036_v7 = vor.u32 %v7014_v60, %v6033_v61 }
  0xf8   : > { %3758 = vmatpush.bf16.msra.mxu3 %v6068_v39  ;;  %v5761_v4 = vld [vmem:[%s7361_s15 + $0x910] sm:$0xf0]  ;;  %v6978_v5 = vld [vmem:[%s7361_s15 + $0xa04] sm:$0xf]  ;;  %v5636_v15 = vor.u32 %v6914_v63, %v5633_v0 }
  0xf9   : > { %3720 = vmatpush.bf16.msra.mxu0 %v5668_v47  ;;  %v5889_v8 = vld [vmem:[%s7361_s15 + $0xa10] sm:$0xf0]  ;;  %v7010_v9 = vld [vmem:[%s7361_s15 + $0xb04] sm:$0xf]  ;;  %v5764_v20 = vor.u32 %v6946_v3, %v5761_v4 }
  0xfa   : > { %3733 = vmatpush.bf16.msra.mxu1 %v5796_v50  ;;  %v6017_v10 = vld [vmem:[%s7361_s15 + $0xb10] sm:$0xf0]  ;;  %v7070_v12 = vld [vmem:[%s7361_s15 + $0xce4] sm:$0xf]  ;;  %v5892_v21 = vor.u32 %v6978_v5, %v5889_v8 }
  0xfb   : > { %3746 = vmatpush.bf16.msra.mxu2 %v5924_v51  ;;  %v6257_v13 = vld [vmem:[%s7361_s15 + $0xcf0] sm:$0xf0]  ;;  %v7102_v14 = vld [vmem:[%s7361_s15 + $0xde4] sm:$0xf]  ;;  %v6020_v32 = vor.u32 %v7010_v9, %v6017_v10 }
  0xfc   : > { %3759 = vmatpush.bf16.msra.mxu3 %v6052_v56  ;;  %v6385_v16 = vld [vmem:[%s7361_s15 + $0xdf0] sm:$0xf0]  ;;  %v7134_v17 = vld [vmem:[%s7361_s15 + $0xee4] sm:$0xf]  ;;  %v6260_v33 = vor.u32 %v7070_v12, %v6257_v13 }
  0xfd   : > { %3721 = vmatpush.bf16.msra.mxu0 %v5652_v62  ;;  %v6513_v19 = vld [vmem:[%s7361_s15 + $0xef0] sm:$0xf0]  ;;  %v7166_v26 = vld [vmem:[%s7361_s15 + $0xfe4] sm:$0xf]  ;;  %v6388_v18 = vor.u32 %v7102_v14, %v6385_v16 }
  0xfe   : > { %3734 = vmatpush.bf16.msra.mxu1 %v5780_v1  ;;  %v6641_v29 = vld [vmem:[%s7361_s15 + $0xff0] sm:$0xf0]  ;;  %v6516_v34 = vor.u32 %v7134_v17, %v6513_v19  ;;  %v7066_v35 = vld [vmem:[%s7361_s15 + $0xcc4] sm:$0xf] }
  0xff   : > { %3747 = vmatpush.bf16.msra.mxu2 %v5908_v2  ;;  %v6241_v36 = vld [vmem:[%s7361_s15 + $0xcd0] sm:$0xf0]  ;;  %v7098_v37 = vld [vmem:[%s7361_s15 + $0xdc4] sm:$0xf]  ;;  %v6644_v38 = vor.u32 %v7166_v26, %v6641_v29 }
 0x100   : > { %3760 = vmatpush.bf16.msra.mxu3 %v6036_v7  ;;  %v6369_v39 = vld [vmem:[%s7361_s15 + $0xdd0] sm:$0xf0]  ;;  %v7130_v40 = vld [vmem:[%s7361_s15 + $0xec4] sm:$0xf]  ;;  %v6244_v44 = vor.u32 %v7066_v35, %v6241_v36 }
 0x101   : > { %3722 = vmatpush.bf16.msra.mxu0 %v5636_v15  ;;  %v6497_v41 = vld [vmem:[%s7361_s15 + $0xed0] sm:$0xf0]  ;;  %v7162_v42 = vld [vmem:[%s7361_s15 + $0xfc4] sm:$0xf]  ;;  %v6372_v45 = vor.u32 %v7098_v37, %v6369_v39  ;;  %v3516_v7 = vpop.f32.mrf.mxu0 }
 0x102   : > { %3735 = vmatpush.bf16.msra.mxu1 %v5764_v20  ;;  %v6625_v43 = vld [vmem:[%s7361_s15 + $0xfd0] sm:$0xf0]  ;;  %v6500_v46 = vor.u32 %v7130_v40, %v6497_v41  ;;  %v7062_v47 = vld [vmem:[%s7361_s15 + $0xca4] sm:$0xf]  ;;  %v3517_v10 = vadd.f32 %v3516_v7, %v7835_v48 }
 0x103   : > { %3748 = vmatpush.bf16.msra.mxu2 %v5892_v21  ;;  %v6225_v49 = vld [vmem:[%s7361_s15 + $0xcb0] sm:$0xf0]  ;;  %v7094_v50 = vld [vmem:[%s7361_s15 + $0xda4] sm:$0xf]  ;;  %v6628_v52 = vor.u32 %v7162_v42, %v6625_v43 }
 0x104   : > { %3761 = vmatpush.bf16.msra.mxu3 %v6020_v32  ;;  %v7211_v51 = vld.sshfl [vmem:[#allocation1] sm:$0xff pattern:$0x73625140]  ;;  %v6353_v53 = vld [vmem:[%s7361_s15 + $0xdb0] sm:$0xf0]  ;;  %v6228_v61 = vor.u32 %v7062_v47, %v6225_v49 }
 0x105   : > { %3767 = vmatpush.bf16.msrb.mxu0 %v6260_v33  ;;  %v7126_v54 = vld [vmem:[%s7361_s15 + $0xea4] sm:$0xf]  ;;  %v6481_v55 = vld [vmem:[%s7361_s15 + $0xeb0] sm:$0xf0]  ;;  %v6356_v62 = vor.u32 %v7094_v50, %v6353_v53 }
 0x106   : > { %3780 = vmatpush.bf16.msrb.mxu1 %v6388_v18  ;;  %3723 = vmatmul.bf16.vlgmr.msra.gmra.mxu0 %v7211_v51  ;;  %v7212_v56 = vld.sshfl [vmem:[#allocation1 + $0x10] sm:$0xff pattern:$0x73625140]  ;;  %v7213_v57 = vld.sshfl [vmem:[#allocation1 + $0x8] sm:$0xff pattern:$0x73625140]  ;;  %v6484_v63 = vor.u32 %v7126_v54, %v6481_v55  ;;  %v3529_v12 = vpop.f32.mrf.mxu1 }
 0x107   : > { %3793 = vmatpush.bf16.msrb.mxu2 %v6516_v34  ;;  %3736 = vmatmul.bf16.vlgmr.msra.gmra.mxu1 %v7213_v57  ;;  %v7158_v58 = vld [vmem:[%s7361_s15 + $0xfa4] sm:$0xf]  ;;  %v6609_v59 = vld [vmem:[%s7361_s15 + $0xfb0] sm:$0xf0]  ;;  %v3530_v20 = vadd.f32 %v3529_v12, %v3517_v10  ;;  %v4727_v12 = vld [vmem:[%s7361_s15 + $0xe8] sm:$0xf] }
 0x108   : > { %3806 = vmatpush.bf16.msrb.mxu3 %v6644_v38  ;;  %3749 = vmatmul.bf16.vlgmr.msra.gmra.mxu2 %v7212_v56  ;;  %v7214_v60 = vld.sshfl [vmem:[#allocation1 + $0x18] sm:$0xff pattern:$0x73625140]  ;;  %v7058_v0 = vld [vmem:[%s7361_s15 + $0xc84] sm:$0xf]  ;;  %v6612_v3 = vor.u32 %v7158_v58, %v6609_v59 }
 0x109   : > { %3762 = vmatmul.bf16.vlgmr.msra.gmra.mxu3 %v7214_v60  ;;  %3768 = vmatpush.bf16.msrb.mxu0 %v6244_v44  ;;  %v6209_v1 = vld [vmem:[%s7361_s15 + $0xc90] sm:$0xf0]  ;;  %v7090_v2 = vld [vmem:[%s7361_s15 + $0xd84] sm:$0xf]  ;;  %v3542_v39 = vpop.f32.mrf.mxu2  ;;  %v3518_v47 = vpop.f32.mrf.mxu0 }
 0x10a   : > { %3781 = vmatpush.bf16.msrb.mxu1 %v6372_v45  ;;  %v6337_v4 = vld [vmem:[%s7361_s15 + $0xd90] sm:$0xf0]  ;;  %v7122_v5 = vld [vmem:[%s7361_s15 + $0xe84] sm:$0xf]  ;;  %v6212_v11 = vor.u32 %v7058_v0, %v6209_v1  ;;  %v3543_v43 = vadd.f32 %v3542_v39, %v3530_v20  ;;  %v6753_v20 = vld [vmem:[%s7361_s15 + $0x2f4] sm:$0xf0] }
 0x10b   : > { %3794 = vmatpush.bf16.msrb.mxu2 %v6500_v46  ;;  %v6465_v6 = vld [vmem:[%s7361_s15 + $0xe90] sm:$0xf0]  ;;  %v7154_v8 = vld [vmem:[%s7361_s15 + $0xf84] sm:$0xf]  ;;  %v6340_v13 = vor.u32 %v7090_v2, %v6337_v4  ;;  %v6717_v39 = vld [vmem:[%s7361_s15 + $0x1d4] sm:$0xf0] }
 0x10c   : > { %3807 = vmatpush.bf16.msrb.mxu3 %v6628_v52  ;;  %v6593_v9 = vld [vmem:[%s7361_s15 + $0xf90] sm:$0xf0]  ;;  %v6468_v14 = vor.u32 %v7122_v5, %v6465_v6  ;;  %v7054_v15 = vld [vmem:[%s7361_s15 + $0xc64] sm:$0xf]  ;;  %v4695_v47 = vld [vmem:[%s7361_s15 + $0xa8] sm:$0xf] }
 0x10d   : > { %3769 = vmatpush.bf16.msrb.mxu0 %v6228_v61  ;;  %v6193_v16 = vld [vmem:[%s7361_s15 + $0xc70] sm:$0xf0]  ;;  %v7086_v17 = vld [vmem:[%s7361_s15 + $0xd64] sm:$0xf]  ;;  %v6596_v19 = vor.u32 %v7154_v8, %v6593_v9  ;;  %v3555_v44 = vpop.f32.mrf.mxu3 }
 0x10e   : > { %3782 = vmatpush.bf16.msrb.mxu1 %v6356_v62  ;;  %v6321_v21 = vld [vmem:[%s7361_s15 + $0xd70] sm:$0xf0]  ;;  %v7118_v26 = vld [vmem:[%s7361_s15 + $0xe64] sm:$0xf]  ;;  %v6196_v33 = vor.u32 %v7054_v15, %v6193_v16  ;;  %v3531_v50 = vpop.f32.mrf.mxu1  ;;  %v7902_v51 = vadd.f32 %v3555_v44, %v3543_v43  ;;  %v6781_v43 = vld [vmem:[%s7361_s15 + $0x3d4] sm:$0xf0] }
 0x10f   : > { %3795 = vmatpush.bf16.msrb.mxu2 %v6484_v63  ;;  %v6449_v48 = vld [vmem:[%s7361_s15 + $0xe70] sm:$0xf0]  ;;  %v7150_v29 = vld [vmem:[%s7361_s15 + $0xf64] sm:$0xf]  ;;  %v6324_v18 = vor.u32 %v7086_v17, %v6321_v21  ;;  %v6721_v17 = vld [vmem:[%s7361_s15 + $0x1f4] sm:$0xf0] }
 0x110   : > { %3808 = vmatpush.bf16.msrb.mxu3 %v6612_v3  ;;  %v6577_v32 = vld [vmem:[%s7361_s15 + $0xf70] sm:$0xf0]  ;;  %v6452_v34 = vor.u32 %v7118_v26, %v6449_v48  ;;  %v7050_v35 = vld [vmem:[%s7361_s15 + $0xc44] sm:$0xf]  ;;  %v5111_v48 = vld [vmem:[%s7361_s15 + $0x3e8] sm:$0xf] }
 0x111   : > { %3770 = vmatpush.bf16.msrb.mxu0 %v6212_v11  ;;  %v6177_v36 = vld [vmem:[%s7361_s15 + $0xc50] sm:$0xf0]  ;;  %v7082_v37 = vld [vmem:[%s7361_s15 + $0xd44] sm:$0xf]  ;;  %v6580_v38 = vor.u32 %v7150_v29, %v6577_v32  ;;  %v3544_v11 = vpop.f32.mrf.mxu2  ;;  %v6785_v29 = vld [vmem:[%s7361_s15 + $0x3f4] sm:$0xf0] }
 0x112   : > { %3783 = vmatpush.bf16.msrb.mxu1 %v6340_v13  ;;  %v6305_v40 = vld [vmem:[%s7361_s15 + $0xd50] sm:$0xf0]  ;;  %v7114_v41 = vld [vmem:[%s7361_s15 + $0xe44] sm:$0xf]  ;;  %v6180_v49 = vor.u32 %v7050_v35, %v6177_v36  ;;  %v6689_v13 = vld [vmem:[%s7361_s15 + $0xf4] sm:$0xf0] }
 0x113   : > { %3796 = vmatpush.bf16.msrb.mxu2 %v6468_v14  ;;  %v6433_v42 = vld [vmem:[%s7361_s15 + $0xe50] sm:$0xf0]  ;;  %v7146_v45 = vld [vmem:[%s7361_s15 + $0xf44] sm:$0xf]  ;;  %v6308_v52 = vor.u32 %v7082_v37, %v6305_v40  ;;  %v4855_v14 = vld [vmem:[%s7361_s15 + $0x1e8] sm:$0xf] }
 0x114   : > { %3809 = vmatpush.bf16.msrb.mxu3 %v6596_v19  ;;  %v6561_v46 = vld [vmem:[%s7361_s15 + $0xf50] sm:$0xf0]  ;;  %v6436_v53 = vor.u32 %v7114_v41, %v6433_v42  ;;  %v7046_v54 = vld [vmem:[%s7361_s15 + $0xc24] sm:$0xf]  ;;  %v4983_v19 = vld [vmem:[%s7361_s15 + $0x2e8] sm:$0xf] }
 0x115   : > { %3771 = vmatpush.bf16.msrb.mxu0 %v6196_v33  ;;  %v6161_v55 = vld [vmem:[%s7361_s15 + $0xc30] sm:$0xf0]  ;;  %v7078_v56 = vld [vmem:[%s7361_s15 + $0xd24] sm:$0xf]  ;;  %v6564_v57 = vor.u32 %v7146_v45, %v6561_v46  ;;  %v3557_v15 = vpop.f32.mrf.mxu3  ;;  %v4728_v33 = vor.u32 %v6689_v13, %v4727_v12  ;;  %v4711_v35 = vld [vmem:[%s7361_s15 + $0xc8] sm:$0xf] }
 0x116   : > { %3784 = vmatpush.bf16.msrb.mxu1 %v6324_v18  ;;  %v6289_v58 = vld [vmem:[%s7361_s15 + $0xd30] sm:$0xf0]  ;;  %v7110_v59 = vld [vmem:[%s7361_s15 + $0xe24] sm:$0xf]  ;;  %v6164_v63 = vor.u32 %v7046_v54, %v6161_v55  ;;  %v4856_v18 = vor.u32 %v6721_v17, %v4855_v14  ;;  %v6685_v36 = vld [vmem:[%s7361_s15 + $0xd4] sm:$0xf0] }
 0x117   : > { %3797 = vmatpush.bf16.msrb.mxu2 %v6452_v34  ;;  %v6417_v60 = vld [vmem:[%s7361_s15 + $0xe30] sm:$0xf0]  ;;  %v7142_v61 = vld [vmem:[%s7361_s15 + $0xf24] sm:$0xf]  ;;  %v6292_v2 = vor.u32 %v7078_v56, %v6289_v58  ;;  %v4984_v34 = vor.u32 %v6753_v20, %v4983_v19  ;;  %v4839_v37 = vld [vmem:[%s7361_s15 + $0x1c8] sm:$0xf]  ;;  %v4712_v44 = vor.u32 %v6685_v36, %v4711_v35 }
 0x118   : > { %3810 = vmatpush.bf16.msrb.mxu3 %v6580_v38  ;;  %v6545_v62 = vld [vmem:[%s7361_s15 + $0xf30] sm:$0xf0]  ;;  %v7042_v0 = vld [vmem:[%s7361_s15 + $0xc04] sm:$0xf]  ;;  %v6420_v3 = vor.u32 %v7110_v59, %v6417_v60  ;;  %v5112_v38 = vor.u32 %v6785_v29, %v5111_v48  ;;  %v4967_v40 = vld [vmem:[%s7361_s15 + $0x2c8] sm:$0xf]  ;;  %v4840_v45 = vor.u32 %v6717_v39, %v4839_v37 }
 0x119   : > { %3772 = vmatpush.bf16.msrb.mxu0 %v6180_v49  ;;  %v6145_v1 = vld [vmem:[%s7361_s15 + $0xc10] sm:$0xf0]  ;;  %v7074_v4 = vld [vmem:[%s7361_s15 + $0xd04] sm:$0xf]  ;;  %v6548_v7 = vor.u32 %v7142_v61, %v6545_v62  ;;  %v6749_v41 = vld [vmem:[%s7361_s15 + $0x2d4] sm:$0xf0] }
 0x11a   : > { %3785 = vmatpush.bf16.msrb.mxu1 %v6308_v52  ;;  %v6273_v5 = vld [vmem:[%s7361_s15 + $0xd10] sm:$0xf0]  ;;  %v7106_v6 = vld [vmem:[%s7361_s15 + $0xe04] sm:$0xf]  ;;  %v6148_v16 = vor.u32 %v7042_v0, %v6145_v1  ;;  %v5095_v42 = vld [vmem:[%s7361_s15 + $0x3c8] sm:$0xf]  ;;  %v4968_v46 = vor.u32 %v6749_v41, %v4967_v40 }
 0x11b   : > { %3798 = vmatpush.bf16.msrb.mxu2 %v6436_v53  ;;  %v6401_v8 = vld [vmem:[%s7361_s15 + $0xe10] sm:$0xf0]  ;;  %v7138_v9 = vld [vmem:[%s7361_s15 + $0xf04] sm:$0xf]  ;;  %v6276_v21 = vor.u32 %v7074_v4, %v6273_v5  ;;  %v6681_v49 = vld [vmem:[%s7361_s15 + $0xb4] sm:$0xf0]  ;;  %v5096_v53 = vor.u32 %v6781_v43, %v5095_v42 }
 0x11c   : > { %3811 = vmatpush.bf16.msrb.mxu3 %v6564_v57  ;;  %v6529_v10 = vld [vmem:[%s7361_s15 + $0xf10] sm:$0xf0]  ;;  %v6404_v26 = vor.u32 %v7106_v6, %v6401_v8  ;;  %v4823_v50 = vld [vmem:[%s7361_s15 + $0x1a8] sm:$0xf]  ;;  %v6713_v54 = vld [vmem:[%s7361_s15 + $0x1b4] sm:$0xf0]  ;;  %v4696_v62 = vor.u32 %v6681_v49, %v4695_v47 }
 0x11d   : > { %3773 = vmatpush.bf16.msrb.mxu0 %v6164_v63  ;;  %v6532_v32 = vor.u32 %v7138_v9, %v6529_v10  ;;  %v7215_v52 = vld.sshfl [vmem:[#allocation1 + $0x20] sm:$0xff pattern:$0x73625140]  ;;  %v4951_v55 = vld [vmem:[%s7361_s15 + $0x2a8] sm:$0xf]  ;;  %v4824_v63 = vor.u32 %v6713_v54, %v4823_v50 }
 0x11e   : > { %3786 = vmatpush.bf16.msrb.mxu1 %v6292_v2  ;;  %v6745_v56 = vld [vmem:[%s7361_s15 + $0x2b4] sm:$0xf0]  ;;  %v7216_v57 = vld.sshfl [vmem:[#allocation1 + $0x30] sm:$0xff pattern:$0x73625140] }
 0x11f   : > { %3799 = vmatpush.bf16.msrb.mxu2 %v6420_v3  ;;  %v7217_v58 = vld.sshfl [vmem:[#allocation1 + $0x28] sm:$0xff pattern:$0x73625140]  ;;  %v6777_v60 = vld [vmem:[%s7361_s15 + $0x3b4] sm:$0xf0]  ;;  %v4952_v0 = vor.u32 %v6745_v56, %v4951_v55 }
 0x120   : > { %3812 = vmatpush.bf16.msrb.mxu3 %v6548_v7  ;;  %v5079_v59 = vld [vmem:[%s7361_s15 + $0x3a8] sm:$0xf]  ;;  %v7218_v61 = vld.sshfl [vmem:[#allocation1 + $0x38] sm:$0xff pattern:$0x73625140] }
 0x121   : > { %3774 = vmatpush.bf16.msrb.mxu0 %v6148_v16  ;;  %v4679_v1 = vld [vmem:[%s7361_s15 + $0x88] sm:$0xf]  ;;  %v6677_v2 = vld [vmem:[%s7361_s15 + $0x94] sm:$0xf0]  ;;  %v5080_v4 = vor.u32 %v6777_v60, %v5079_v59  ;;  %v3568_v8 = vpop.f32.mrf.mxu0 }
 0x122   : > { %3787 = vmatpush.bf16.msrb.mxu1 %v6276_v21  ;;  %v4807_v3 = vld [vmem:[%s7361_s15 + $0x188] sm:$0xf]  ;;  %v6709_v5 = vld [vmem:[%s7361_s15 + $0x194] sm:$0xf0]  ;;  %v3569_v11 = vadd.f32 %v3568_v8, %v7902_v51  ;;  %v4680_v12 = vor.u32 %v6677_v2, %v4679_v1  ;;  %v3581_v13 = vpop.f32.mrf.mxu1 }
 0x123   : > { %3800 = vmatpush.bf16.msrb.mxu2 %v6404_v26  ;;  %v4935_v6 = vld [vmem:[%s7361_s15 + $0x288] sm:$0xf]  ;;  %v6741_v7 = vld [vmem:[%s7361_s15 + $0x294] sm:$0xf0]  ;;  %v4808_v14 = vor.u32 %v6709_v5, %v4807_v3 }
 0x124   : > { %3813 = vmatpush.bf16.msrb.mxu3 %v6532_v32  ;;  %3775 = vmatmul.bf16.vlgmr.msrb.gmra.mxu0 %v7215_v52  ;;  %v5063_v9 = vld [vmem:[%s7361_s15 + $0x388] sm:$0xf]  ;;  %v6773_v10 = vld [vmem:[%s7361_s15 + $0x394] sm:$0xf0]  ;;  %v4936_v15 = vor.u32 %v6741_v7, %v4935_v6  ;;  %v3582_v21 = vadd.f32 %v3581_v13, %v3569_v11 }
 0x125   : > { %3819 = vmatpush.bf16.msra.mxu0 %v4728_v33  ;;  %3788 = vmatmul.bf16.vlgmr.msrb.gmra.mxu1 %v7217_v58  ;;  %v4663_v16 = vld [vmem:[%s7361_s15 + $0x68] sm:$0xf]  ;;  %v6673_v17 = vld [vmem:[%s7361_s15 + $0x74] sm:$0xf0]  ;;  %v5064_v20 = vor.u32 %v6773_v10, %v5063_v9 }
 0x126   : > { %3832 = vmatpush.bf16.msra.mxu1 %v4856_v18  ;;  %3801 = vmatmul.bf16.vlgmr.msrb.gmra.mxu2 %v7216_v57  ;;  %v4791_v19 = vld [vmem:[%s7361_s15 + $0x168] sm:$0xf]  ;;  %v6705_v26 = vld [vmem:[%s7361_s15 + $0x174] sm:$0xf0]  ;;  %v4664_v33 = vor.u32 %v6673_v17, %v4663_v16 }
 0x127   : > { %3845 = vmatpush.bf16.msra.mxu2 %v4984_v34  ;;  %3814 = vmatmul.bf16.vlgmr.msrb.gmra.mxu3 %v7218_v61  ;;  %v4919_v48 = vld [vmem:[%s7361_s15 + $0x268] sm:$0xf]  ;;  %v6737_v51 = vld [vmem:[%s7361_s15 + $0x274] sm:$0xf0]  ;;  %v4792_v18 = vor.u32 %v6705_v26, %v4791_v19 }
 0x128   : > { %3858 = vmatpush.bf16.msra.mxu3 %v5112_v38  ;;  %v5047_v29 = vld [vmem:[%s7361_s15 + $0x368] sm:$0xf]  ;;  %v6769_v32 = vld [vmem:[%s7361_s15 + $0x374] sm:$0xf0]  ;;  %v4920_v34 = vor.u32 %v6737_v51, %v4919_v48 }
 0x129   : > { %3820 = vmatpush.bf16.msra.mxu0 %v4712_v44  ;;  %v4647_v35 = vld [vmem:[%s7361_s15 + $0x48] sm:$0xf]  ;;  %v6669_v36 = vld [vmem:[%s7361_s15 + $0x54] sm:$0xf0]  ;;  %v5048_v38 = vor.u32 %v6769_v32, %v5047_v29  ;;  %v3594_v39 = vpop.f32.mrf.mxu2  ;;  %v3570_v47 = vpop.f32.mrf.mxu0 }
 0x12a   : > { %3833 = vmatpush.bf16.msra.mxu1 %v4840_v45  ;;  %v4775_v37 = vld [vmem:[%s7361_s15 + $0x148] sm:$0xf]  ;;  %v6701_v40 = vld [vmem:[%s7361_s15 + $0x154] sm:$0xf0]  ;;  %v3595_v43 = vadd.f32 %v3594_v39, %v3582_v21  ;;  %v3607_v44 = vpop.f32.mrf.mxu3  ;;  %v4648_v49 = vor.u32 %v6669_v36, %v4647_v35  ;;  %v3583_v50 = vpop.f32.mrf.mxu1 }
 0x12b   : > { %3846 = vmatpush.bf16.msra.mxu2 %v4968_v46  ;;  %v4903_v41 = vld [vmem:[%s7361_s15 + $0x248] sm:$0xf]  ;;  %v6733_v42 = vld [vmem:[%s7361_s15 + $0x254] sm:$0xf0] }
 0x12c   : > { %3859 = vmatpush.bf16.msra.mxu3 %v5096_v53  ;;  %v5031_v45 = vld [vmem:[%s7361_s15 + $0x348] sm:$0xf]  ;;  %v6765_v46 = vld [vmem:[%s7361_s15 + $0x354] sm:$0xf0]  ;;  %v7969_v52 = vadd.f32 %v3607_v44, %v3595_v43  ;;  %v4776_v53 = vor.u32 %v6701_v40, %v4775_v37  ;;  %v4904_v54 = vor.u32 %v6733_v42, %v4903_v41 }
 0x12d   : > { %3821 = vmatpush.bf16.msra.mxu0 %v4696_v62  ;;  %v4631_v55 = vld [vmem:[%s7361_s15 + $0x28] sm:$0xf]  ;;  %v6665_v56 = vld [vmem:[%s7361_s15 + $0x34] sm:$0xf0]  ;;  %v5032_v58 = vor.u32 %v6765_v46, %v5031_v45 }
 0x12e   : > { %3834 = vmatpush.bf16.msra.mxu1 %v4824_v63  ;;  %v4759_v57 = vld [vmem:[%s7361_s15 + $0x128] sm:$0xf]  ;;  %v6697_v59 = vld [vmem:[%s7361_s15 + $0x134] sm:$0xf0] }
 0x12f   : > { %3847 = vmatpush.bf16.msra.mxu2 %v4952_v0  ;;  %v4887_v60 = vld [vmem:[%s7361_s15 + $0x228] sm:$0xf]  ;;  %v6729_v61 = vld [vmem:[%s7361_s15 + $0x234] sm:$0xf0]  ;;  %v4632_v0 = vor.u32 %v6665_v56, %v4631_v55  ;;  %v4760_v3 = vor.u32 %v6697_v59, %v4759_v57 }
 0x130   : > { %3860 = vmatpush.bf16.msra.mxu3 %v5080_v4  ;;  %v5015_v62 = vld [vmem:[%s7361_s15 + $0x328] sm:$0xf]  ;;  %v6761_v63 = vld [vmem:[%s7361_s15 + $0x334] sm:$0xf0]  ;;  %v4888_v4 = vor.u32 %v6729_v61, %v4887_v60 }
 0x131   : > { %3822 = vmatpush.bf16.msra.mxu0 %v4680_v12  ;;  %v4615_v1 = vld [vmem:[%s7361_s15 + $0x8] sm:$0xf]  ;;  %v6661_v2 = vld [vmem:[%s7361_s15 + $0x14] sm:$0xf0]  ;;  %v5016_v8 = vor.u32 %v6761_v63, %v5015_v62  ;;  %v3596_v12 = vpop.f32.mrf.mxu2 }
 0x132   : > { %3835 = vmatpush.bf16.msra.mxu1 %v4808_v14  ;;  %v4743_v5 = vld [vmem:[%s7361_s15 + $0x108] sm:$0xf]  ;;  %v6693_v6 = vld [vmem:[%s7361_s15 + $0x114] sm:$0xf0]  ;;  %v3609_v16 = vpop.f32.mrf.mxu3  ;;  %v4616_v17 = vor.u32 %v6661_v2, %v4615_v1 }
 0x133   : > { %3848 = vmatpush.bf16.msra.mxu2 %v4936_v15  ;;  %v4871_v7 = vld [vmem:[%s7361_s15 + $0x208] sm:$0xf]  ;;  %v6725_v9 = vld [vmem:[%s7361_s15 + $0x214] sm:$0xf0]  ;;  %v4744_v26 = vor.u32 %v6693_v6, %v4743_v5 }
 0x134   : > { %3861 = vmatpush.bf16.msra.mxu3 %v5064_v20  ;;  %v4999_v10 = vld [vmem:[%s7361_s15 + $0x308] sm:$0xf]  ;;  %v6757_v11 = vld [vmem:[%s7361_s15 + $0x314] sm:$0xf0]  ;;  %v4872_v48 = vor.u32 %v6725_v9, %v4871_v7 }
 0x135   : > { %3823 = vmatpush.bf16.msra.mxu0 %v4664_v33  ;;  %v5239_v13 = vld [vmem:[%s7361_s15 + $0x4e8] sm:$0xf]  ;;  %v6817_v14 = vld [vmem:[%s7361_s15 + $0x4f4] sm:$0xf0]  ;;  %v5000_v32 = vor.u32 %v6757_v11, %v4999_v10 }
 0x136   : > { %3836 = vmatpush.bf16.msra.mxu1 %v4792_v18  ;;  %v5367_v15 = vld [vmem:[%s7361_s15 + $0x5e8] sm:$0xf]  ;;  %v6849_v19 = vld [vmem:[%s7361_s15 + $0x5f4] sm:$0xf0]  ;;  %v5240_v33 = vor.u32 %v6817_v14, %v5239_v13 }
 0x137   : > { %3849 = vmatpush.bf16.msra.mxu2 %v4920_v34  ;;  %v5495_v20 = vld [vmem:[%s7361_s15 + $0x6e8] sm:$0xf]  ;;  %v6881_v21 = vld [vmem:[%s7361_s15 + $0x6f4] sm:$0xf0]  ;;  %v5368_v18 = vor.u32 %v6849_v19, %v5367_v15 }
 0x138   : > { %3862 = vmatpush.bf16.msra.mxu3 %v5048_v38  ;;  %v5623_v51 = vld [vmem:[%s7361_s15 + $0x7e8] sm:$0xf]  ;;  %v6913_v29 = vld [vmem:[%s7361_s15 + $0x7f4] sm:$0xf0]  ;;  %v5496_v34 = vor.u32 %v6881_v21, %v5495_v20 }
 0x139   : > { %3824 = vmatpush.bf16.msra.mxu0 %v4648_v49  ;;  %v5223_v35 = vld [vmem:[%s7361_s15 + $0x4c8] sm:$0xf]  ;;  %v6813_v36 = vld [vmem:[%s7361_s15 + $0x4d4] sm:$0xf0]  ;;  %v5624_v38 = vor.u32 %v6913_v29, %v5623_v51 }
 0x13a   : > { %3837 = vmatpush.bf16.msra.mxu1 %v4776_v53  ;;  %v5351_v37 = vld [vmem:[%s7361_s15 + $0x5c8] sm:$0xf]  ;;  %v6845_v39 = vld [vmem:[%s7361_s15 + $0x5d4] sm:$0xf0]  ;;  %v5224_v44 = vor.u32 %v6813_v36, %v5223_v35 }
 0x13b   : > { %3850 = vmatpush.bf16.msra.mxu2 %v4904_v54  ;;  %v5479_v40 = vld [vmem:[%s7361_s15 + $0x6c8] sm:$0xf]  ;;  %v6877_v41 = vld [vmem:[%s7361_s15 + $0x6d4] sm:$0xf0]  ;;  %v5352_v45 = vor.u32 %v6845_v39, %v5351_v37 }
 0x13c   : > { %3863 = vmatpush.bf16.msra.mxu3 %v5032_v58  ;;  %v5607_v42 = vld [vmem:[%s7361_s15 + $0x7c8] sm:$0xf]  ;;  %v6909_v43 = vld [vmem:[%s7361_s15 + $0x7d4] sm:$0xf0]  ;;  %v5480_v46 = vor.u32 %v6877_v41, %v5479_v40 }
 0x13d   : > { %3825 = vmatpush.bf16.msra.mxu0 %v4632_v0  ;;  %v5207_v47 = vld [vmem:[%s7361_s15 + $0x4a8] sm:$0xf]  ;;  %v6809_v49 = vld [vmem:[%s7361_s15 + $0x4b4] sm:$0xf0]  ;;  %v5608_v53 = vor.u32 %v6909_v43, %v5607_v42 }
 0x13e   : > { %3838 = vmatpush.bf16.msra.mxu1 %v4760_v3  ;;  %v5335_v50 = vld [vmem:[%s7361_s15 + $0x5a8] sm:$0xf]  ;;  %v6841_v54 = vld [vmem:[%s7361_s15 + $0x5b4] sm:$0xf0]  ;;  %v5208_v59 = vor.u32 %v6809_v49, %v5207_v47 }
 0x13f   : > { %3851 = vmatpush.bf16.msra.mxu2 %v4888_v4  ;;  %v5463_v55 = vld [vmem:[%s7361_s15 + $0x6a8] sm:$0xf]  ;;  %v6873_v56 = vld [vmem:[%s7361_s15 + $0x6b4] sm:$0xf0]  ;;  %v5336_v60 = vor.u32 %v6841_v54, %v5335_v50 }
 0x140   : > { %3864 = vmatpush.bf16.msra.mxu3 %v5016_v8  ;;  %v5591_v57 = vld [vmem:[%s7361_s15 + $0x7a8] sm:$0xf]  ;;  %v6905_v58 = vld [vmem:[%s7361_s15 + $0x7b4] sm:$0xf0]  ;;  %v5464_v61 = vor.u32 %v6873_v56, %v5463_v55 }
 0x141   : > { %3826 = vmatpush.bf16.msra.mxu0 %v4616_v17  ;;  %v5191_v62 = vld [vmem:[%s7361_s15 + $0x488] sm:$0xf]  ;;  %v6805_v63 = vld [vmem:[%s7361_s15 + $0x494] sm:$0xf0]  ;;  %v5592_v1 = vor.u32 %v6905_v58, %v5591_v57  ;;  %v3620_v8 = vpop.f32.mrf.mxu0 }
 0x142   : > { %3839 = vmatpush.bf16.msra.mxu1 %v4744_v26  ;;  %v5319_v0 = vld [vmem:[%s7361_s15 + $0x588] sm:$0xf]  ;;  %v6837_v2 = vld [vmem:[%s7361_s15 + $0x594] sm:$0xf0]  ;;  %v5192_v7 = vor.u32 %v6805_v63, %v5191_v62  ;;  %v3633_v14 = vpop.f32.mrf.mxu1 }
 0x143   : > { %3852 = vmatpush.bf16.msra.mxu2 %v4872_v48  ;;  %v5447_v3 = vld [vmem:[%s7361_s15 + $0x688] sm:$0xf]  ;;  %v6869_v4 = vld [vmem:[%s7361_s15 + $0x694] sm:$0xf0]  ;;  %v5320_v9 = vor.u32 %v6837_v2, %v5319_v0  ;;  %v3634_v20 = vadd.f32 %v3633_v14, %v3620_v8 }
 0x144   : > { %3865 = vmatpush.bf16.msra.mxu3 %v5000_v32  ;;  %3827 = vmatmul.bf16.vlgmr.msra.gmra.mxu0 %v7470_v25  ;;  %v5575_v5 = vld [vmem:[%s7361_s15 + $0x788] sm:$0xf]  ;;  %v6901_v6 = vld [vmem:[%s7361_s15 + $0x794] sm:$0xf0]  ;;  %v5448_v10 = vor.u32 %v6869_v4, %v5447_v3 }
 0x145   : > { %3871 = vmatpush.bf16.msrb.mxu0 %v5240_v33  ;;  %3840 = vmatmul.bf16.vlgmr.msra.gmra.mxu1 %v7475_v28  ;;  %v5175_v11 = vld [vmem:[%s7361_s15 + $0x468] sm:$0xf]  ;;  %v6801_v12 = vld [vmem:[%s7361_s15 + $0x474] sm:$0xf0]  ;;  %v5576_v15 = vor.u32 %v6901_v6, %v5575_v5 }
 0x146   : > { %3884 = vmatpush.bf16.msrb.mxu1 %v5368_v18  ;;  %3853 = vmatmul.bf16.vlgmr.msra.gmra.mxu2 %v7468_v24  ;;  %v5303_v13 = vld [vmem:[%s7361_s15 + $0x568] sm:$0xf]  ;;  %v6833_v16 = vld [vmem:[%s7361_s15 + $0x574] sm:$0xf0]  ;;  %v5176_v48 = vor.u32 %v6801_v12, %v5175_v11 }
 0x147   : > { %3897 = vmatpush.bf16.msrb.mxu2 %v5496_v34  ;;  %3866 = vmatmul.bf16.vlgmr.msra.gmra.mxu3 %v7473_v27  ;;  %v5431_v17 = vld [vmem:[%s7361_s15 + $0x668] sm:$0xf]  ;;  %v6865_v19 = vld [vmem:[%s7361_s15 + $0x674] sm:$0xf0]  ;;  %v5304_v51 = vor.u32 %v6833_v16, %v5303_v13 }
 0x148   : > { %3910 = vmatpush.bf16.msrb.mxu3 %v5624_v38  ;;  %v5559_v21 = vld [vmem:[%s7361_s15 + $0x768] sm:$0xf]  ;;  %v6897_v26 = vld [vmem:[%s7361_s15 + $0x774] sm:$0xf0]  ;;  %v5432_v29 = vor.u32 %v6865_v19, %v5431_v17 }
 0x149   : > { %3872 = vmatpush.bf16.msrb.mxu0 %v5224_v44  ;;  %v5159_v32 = vld [vmem:[%s7361_s15 + $0x448] sm:$0xf]  ;;  %v6797_v33 = vld [vmem:[%s7361_s15 + $0x454] sm:$0xf0]  ;;  %v3646_v34 = vpop.f32.mrf.mxu2  ;;  %v5560_v35 = vor.u32 %v6897_v26, %v5559_v21 }
 0x14a   : > { %3885 = vmatpush.bf16.msrb.mxu1 %v5352_v45  ;;  %v5287_v18 = vld [vmem:[%s7361_s15 + $0x548] sm:$0xf]  ;;  %v6829_v36 = vld [vmem:[%s7361_s15 + $0x554] sm:$0xf0]  ;;  %v3647_v39 = vadd.f32 %v3646_v34, %v3634_v20  ;;  %v3659_v40 = vpop.f32.mrf.mxu3  ;;  %v5160_v43 = vor.u32 %v6797_v33, %v5159_v32  ;;  %v3622_v45 = vpop.f32.mrf.mxu0 }
 0x14b   : > { %3898 = vmatpush.bf16.msrb.mxu2 %v5480_v46  ;;  %v5415_v37 = vld [vmem:[%s7361_s15 + $0x648] sm:$0xf]  ;;  %v6861_v38 = vld [vmem:[%s7361_s15 + $0x654] sm:$0xf0]  ;;  %v5288_v46 = vor.u32 %v6829_v36, %v5287_v18  ;;  %v3635_v54 = vpop.f32.mrf.mxu1 }
 0x14c   : > { %3911 = vmatpush.bf16.msrb.mxu3 %v5608_v53  ;;  %v5543_v41 = vld [vmem:[%s7361_s15 + $0x748] sm:$0xf]  ;;  %v6893_v42 = vld [vmem:[%s7361_s15 + $0x754] sm:$0xf0]  ;;  %v8039_v44 = vadd.f32 %v3659_v40, %v3647_v39  ;;  %v5416_v47 = vor.u32 %v6861_v38, %v5415_v37 }
 0x14d   : > { %3873 = vmatpush.bf16.msrb.mxu0 %v5208_v59  ;;  %v5143_v49 = vld [vmem:[%s7361_s15 + $0x428] sm:$0xf]  ;;  %v6793_v50 = vld [vmem:[%s7361_s15 + $0x434] sm:$0xf0]  ;;  %v5544_v55 = vor.u32 %v6893_v42, %v5543_v41 }
 0x14e   : > { %3886 = vmatpush.bf16.msrb.mxu1 %v5336_v60  ;;  %v5271_v53 = vld [vmem:[%s7361_s15 + $0x528] sm:$0xf]  ;;  %v6825_v56 = vld [vmem:[%s7361_s15 + $0x534] sm:$0xf0] }
 0x14f   : > { %3899 = vmatpush.bf16.msrb.mxu2 %v5464_v61  ;;  %v5399_v57 = vld [vmem:[%s7361_s15 + $0x628] sm:$0xf]  ;;  %v6857_v58 = vld [vmem:[%s7361_s15 + $0x634] sm:$0xf0]  ;;  %v5144_v61 = vor.u32 %v6793_v50, %v5143_v49  ;;  %v5272_v0 = vor.u32 %v6825_v56, %v5271_v53 }
 0x150   : > { %3912 = vmatpush.bf16.msrb.mxu3 %v5592_v1  ;;  %v5527_v59 = vld [vmem:[%s7361_s15 + $0x728] sm:$0xf]  ;;  %v6889_v60 = vld [vmem:[%s7361_s15 + $0x734] sm:$0xf0]  ;;  %v5400_v1 = vor.u32 %v6857_v58, %v5399_v57 }
 0x151   : > { %3874 = vmatpush.bf16.msrb.mxu0 %v5192_v7  ;;  %v5127_v62 = vld [vmem:[%s7361_s15 + $0x408] sm:$0xf]  ;;  %v6789_v63 = vld [vmem:[%s7361_s15 + $0x414] sm:$0xf0]  ;;  %v3648_v5 = vpop.f32.mrf.mxu2  ;;  %v5528_v6 = vor.u32 %v6889_v60, %v5527_v59 }
 0x152   : > { %3887 = vmatpush.bf16.msrb.mxu1 %v5320_v9  ;;  %v5255_v2 = vld [vmem:[%s7361_s15 + $0x508] sm:$0xf]  ;;  %v6821_v3 = vld [vmem:[%s7361_s15 + $0x514] sm:$0xf0]  ;;  %v5128_v14 = vor.u32 %v6789_v63, %v5127_v62 }
 0x153   : > { %3900 = vmatpush.bf16.msrb.mxu2 %v5448_v10  ;;  %v5383_v4 = vld [vmem:[%s7361_s15 + $0x608] sm:$0xf]  ;;  %v6853_v7 = vld [vmem:[%s7361_s15 + $0x614] sm:$0xf0]  ;;  %v3661_v10 = vpop.f32.mrf.mxu3  ;;  %v5256_v19 = vor.u32 %v6821_v3, %v5255_v2 }
 0x154   : > { %3913 = vmatpush.bf16.msrb.mxu3 %v5576_v15  ;;  %v5511_v8 = vld [vmem:[%s7361_s15 + $0x708] sm:$0xf]  ;;  %v6885_v9 = vld [vmem:[%s7361_s15 + $0x714] sm:$0xf0]  ;;  %v5384_v20 = vor.u32 %v6853_v7, %v5383_v4 }
 0x155   : > { %3875 = vmatpush.bf16.msrb.mxu0 %v5176_v48  ;;  %v5751_v11 = vld [vmem:[%s7361_s15 + $0x8e8] sm:$0xf]  ;;  %v6945_v12 = vld [vmem:[%s7361_s15 + $0x8f4] sm:$0xf0]  ;;  %v5512_v48 = vor.u32 %v6885_v9, %v5511_v8 }
 0x156   : > { %3888 = vmatpush.bf16.msrb.mxu1 %v5304_v51  ;;  %v5879_v13 = vld [vmem:[%s7361_s15 + $0x9e8] sm:$0xf]  ;;  %v6977_v15 = vld [vmem:[%s7361_s15 + $0x9f4] sm:$0xf0]  ;;  %v5752_v51 = vor.u32 %v6945_v12, %v5751_v11 }
 0x157   : > { %3901 = vmatpush.bf16.msrb.mxu2 %v5432_v29  ;;  %v6007_v16 = vld [vmem:[%s7361_s15 + $0xae8] sm:$0xf]  ;;  %v7009_v17 = vld [vmem:[%s7361_s15 + $0xaf4] sm:$0xf0]  ;;  %v5880_v29 = vor.u32 %v6977_v15, %v5879_v13 }
 0x158   : > { %3914 = vmatpush.bf16.msrb.mxu3 %v5560_v35  ;;  %v6135_v21 = vld [vmem:[%s7361_s15 + $0xbe8] sm:$0xf]  ;;  %v7041_v26 = vld [vmem:[%s7361_s15 + $0xbf4] sm:$0xf0]  ;;  %v6008_v32 = vor.u32 %v7009_v17, %v6007_v16 }
 0x159   : > { %3876 = vmatpush.bf16.msrb.mxu0 %v5160_v43  ;;  %v5735_v33 = vld [vmem:[%s7361_s15 + $0x8c8] sm:$0xf]  ;;  %v6941_v18 = vld [vmem:[%s7361_s15 + $0x8d4] sm:$0xf0]  ;;  %v6136_v35 = vor.u32 %v7041_v26, %v6135_v21 }
 0x15a   : > { %3889 = vmatpush.bf16.msrb.mxu1 %v5288_v46  ;;  %v5863_v34 = vld [vmem:[%s7361_s15 + $0x9c8] sm:$0xf]  ;;  %v6973_v36 = vld [vmem:[%s7361_s15 + $0x9d4] sm:$0xf0]  ;;  %v5736_v41 = vor.u32 %v6941_v18, %v5735_v33 }
 0x15b   : > { %3902 = vmatpush.bf16.msrb.mxu2 %v5416_v47  ;;  %v5991_v37 = vld [vmem:[%s7361_s15 + $0xac8] sm:$0xf]  ;;  %v7005_v38 = vld [vmem:[%s7361_s15 + $0xad4] sm:$0xf0]  ;;  %v5864_v42 = vor.u32 %v6973_v36, %v5863_v34 }
 0x15c   : > { %3915 = vmatpush.bf16.msrb.mxu3 %v5544_v55  ;;  %v6119_v39 = vld [vmem:[%s7361_s15 + $0xbc8] sm:$0xf]  ;;  %v7037_v40 = vld [vmem:[%s7361_s15 + $0xbd4] sm:$0xf0]  ;;  %v5992_v43 = vor.u32 %v7005_v38, %v5991_v37 }
 0x15d   : > { %3877 = vmatpush.bf16.msrb.mxu0 %v5144_v61  ;;  %v5719_v45 = vld [vmem:[%s7361_s15 + $0x8a8] sm:$0xf]  ;;  %v6937_v46 = vld [vmem:[%s7361_s15 + $0x8b4] sm:$0xf0]  ;;  %v6120_v49 = vor.u32 %v7037_v40, %v6119_v39 }
 0x15e   : > { %3890 = vmatpush.bf16.msrb.mxu1 %v5272_v0  ;;  %v5847_v47 = vld [vmem:[%s7361_s15 + $0x9a8] sm:$0xf]  ;;  %v6969_v50 = vld [vmem:[%s7361_s15 + $0x9b4] sm:$0xf0]  ;;  %v5720_v57 = vor.u32 %v6937_v46, %v5719_v45 }
 0x15f   : > { %3903 = vmatpush.bf16.msrb.mxu2 %v5400_v1  ;;  %v5975_v53 = vld [vmem:[%s7361_s15 + $0xaa8] sm:$0xf]  ;;  %v7001_v54 = vld [vmem:[%s7361_s15 + $0xab4] sm:$0xf0]  ;;  %v5848_v58 = vor.u32 %v6969_v50, %v5847_v47 }
 0x160   : > { %3916 = vmatpush.bf16.msrb.mxu3 %v5528_v6  ;;  %v6103_v55 = vld [vmem:[%s7361_s15 + $0xba8] sm:$0xf]  ;;  %v7033_v56 = vld [vmem:[%s7361_s15 + $0xbb4] sm:$0xf0]  ;;  %v5976_v59 = vor.u32 %v7001_v54, %v5975_v53 }
 0x161   : > { %3878 = vmatpush.bf16.msrb.mxu0 %v5128_v14  ;;  %v5703_v60 = vld [vmem:[%s7361_s15 + $0x888] sm:$0xf]  ;;  %v6933_v61 = vld [vmem:[%s7361_s15 + $0x894] sm:$0xf0]  ;;  %v6104_v63 = vor.u32 %v7033_v56, %v6103_v55  ;;  %v8093_v6 = vpop.f32.mrf.mxu0 }
 0x162   : > { %3891 = vmatpush.bf16.msrb.mxu1 %v5256_v19  ;;  %v5831_v62 = vld [vmem:[%s7361_s15 + $0x988] sm:$0xf]  ;;  %v6965_v0 = vld [vmem:[%s7361_s15 + $0x994] sm:$0xf0]  ;;  %v5704_v5 = vor.u32 %v6933_v61, %v5703_v60  ;;  %v8098_v12 = vpop.f32.mrf.mxu1 }
 0x163   : > { %3904 = vmatpush.bf16.msrb.mxu2 %v5384_v20  ;;  %v5959_v1 = vld [vmem:[%s7361_s15 + $0xa88] sm:$0xf]  ;;  %v6997_v2 = vld [vmem:[%s7361_s15 + $0xa94] sm:$0xf0]  ;;  %v5832_v7 = vor.u32 %v6965_v0, %v5831_v62 }
 0x164   : > { %3917 = vmatpush.bf16.msrb.mxu3 %v5512_v48  ;;  %3879 = vmatmul.bf16.vlgmr.msrb.gmra.mxu0 %v7522_v23  ;;  %v6087_v3 = vld [vmem:[%s7361_s15 + $0xb88] sm:$0xf]  ;;  %v7029_v4 = vld [vmem:[%s7361_s15 + $0xb94] sm:$0xf0]  ;;  %v5960_v8 = vor.u32 %v6997_v2, %v5959_v1 }
 0x165   : > { %3923 = vmatpush.bf16.msra.mxu0 %v5752_v51  ;;  %3892 = vmatmul.bf16.vlgmr.msrb.gmra.mxu1 %v7526_v31  ;;  %v5687_v9 = vld [vmem:[%s7361_s15 + $0x868] sm:$0xf]  ;;  %v6929_v10 = vld [vmem:[%s7361_s15 + $0x874] sm:$0xf0]  ;;  %v6088_v13 = vor.u32 %v7029_v4, %v6087_v3 }
 0x166   : > { %3936 = vmatpush.bf16.msra.mxu1 %v5880_v29  ;;  %3905 = vmatmul.bf16.vlgmr.msrb.gmra.mxu2 %v7520_v22  ;;  %v5815_v11 = vld [vmem:[%s7361_s15 + $0x968] sm:$0xf]  ;;  %v6961_v14 = vld [vmem:[%s7361_s15 + $0x974] sm:$0xf0]  ;;  %v5688_v20 = vor.u32 %v6929_v10, %v5687_v9 }
 0x167   : > { %3949 = vmatpush.bf16.msra.mxu2 %v6008_v32  ;;  %3918 = vmatmul.bf16.vlgmr.msrb.gmra.mxu3 %v7524_v30  ;;  %v5943_v15 = vld [vmem:[%s7361_s15 + $0xa68] sm:$0xf]  ;;  %v6993_v16 = vld [vmem:[%s7361_s15 + $0xa74] sm:$0xf0]  ;;  %v5816_v21 = vor.u32 %v6961_v14, %v5815_v11 }
 0x168   : > { %3962 = vmatpush.bf16.msra.mxu3 %v6136_v35  ;;  %v6071_v17 = vld [vmem:[%s7361_s15 + $0xb68] sm:$0xf]  ;;  %v7025_v19 = vld [vmem:[%s7361_s15 + $0xb74] sm:$0xf0]  ;;  %v5944_v26 = vor.u32 %v6993_v16, %v5943_v15 }
 0x169   : > { %3924 = vmatpush.bf16.msra.mxu0 %v5736_v41  ;;  %v5671_v48 = vld [vmem:[%s7361_s15 + $0x848] sm:$0xf]  ;;  %v6925_v51 = vld [vmem:[%s7361_s15 + $0x854] sm:$0xf0]  ;;  %v8108_v32 = vpop.f32.mrf.mxu2  ;;  %v6072_v33 = vor.u32 %v7025_v19, %v6071_v17  ;;  %v3674_v40 = vpop.f32.mrf.mxu0 }
 0x16a   : > { %3937 = vmatpush.bf16.msra.mxu1 %v5864_v42  ;;  %v5799_v29 = vld [vmem:[%s7361_s15 + $0x948] sm:$0xf]  ;;  %v6957_v18 = vld [vmem:[%s7361_s15 + $0x954] sm:$0xf0]  ;;  %v8113_v36 = vpop.f32.mrf.mxu3  ;;  %v5672_v39 = vor.u32 %v6925_v51, %v5671_v48  ;;  %v3687_v47 = vpop.f32.mrf.mxu1 }
 0x16b   : > { %3950 = vmatpush.bf16.msra.mxu2 %v5992_v43  ;;  %v5927_v34 = vld [vmem:[%s7361_s15 + $0xa48] sm:$0xf]  ;;  %v6989_v35 = vld [vmem:[%s7361_s15 + $0xa54] sm:$0xf0]  ;;  %v5800_v41 = vor.u32 %v6957_v18, %v5799_v29 }
 0x16c   : > { %3963 = vmatpush.bf16.msra.mxu3 %v6120_v49  ;;  %v6055_v37 = vld [vmem:[%s7361_s15 + $0xb48] sm:$0xf]  ;;  %v7021_v38 = vld [vmem:[%s7361_s15 + $0xb54] sm:$0xf0]  ;;  %v5928_v42 = vor.u32 %v6989_v35, %v5927_v34 }
 0x16d   : > { %3925 = vmatpush.bf16.msra.mxu0 %v5720_v57  ;;  %v5655_v43 = vld [vmem:[%s7361_s15 + $0x828] sm:$0xf]  ;;  %v6921_v45 = vld [vmem:[%s7361_s15 + $0x834] sm:$0xf0]  ;;  %v6056_v49 = vor.u32 %v7021_v38, %v6055_v37 }
 0x16e   : > { %3938 = vmatpush.bf16.msra.mxu1 %v5848_v58  ;;  %v5783_v46 = vld [vmem:[%s7361_s15 + $0x928] sm:$0xf]  ;;  %v6953_v50 = vld [vmem:[%s7361_s15 + $0x934] sm:$0xf0]  ;;  %v5656_v57 = vor.u32 %v6921_v45, %v5655_v43 }
 0x16f   : > { %3951 = vmatpush.bf16.msra.mxu2 %v5976_v59  ;;  %v5911_v53 = vld [vmem:[%s7361_s15 + $0xa28] sm:$0xf]  ;;  %v6985_v54 = vld [vmem:[%s7361_s15 + $0xa34] sm:$0xf0]  ;;  %v5784_v60 = vor.u32 %v6953_v50, %v5783_v46 }
 0x170   : > { %3964 = vmatpush.bf16.msra.mxu3 %v6104_v63  ;;  %v6039_v55 = vld [vmem:[%s7361_s15 + $0xb28] sm:$0xf]  ;;  %v7017_v56 = vld [vmem:[%s7361_s15 + $0xb34] sm:$0xf0]  ;;  %v5912_v61 = vor.u32 %v6985_v54, %v5911_v53 }
 0x171   : > { %3926 = vmatpush.bf16.msra.mxu0 %v5704_v5  ;;  %v5639_v58 = vld [vmem:[%s7361_s15 + $0x808] sm:$0xf]  ;;  %v6917_v59 = vld [vmem:[%s7361_s15 + $0x814] sm:$0xf0]  ;;  %v3700_v1 = vpop.f32.mrf.mxu2  ;;  %v6040_v2 = vor.u32 %v7017_v56, %v6039_v55 }
 0x172   : > { %3939 = vmatpush.bf16.msra.mxu1 %v5832_v7  ;;  %v5767_v62 = vld [vmem:[%s7361_s15 + $0x908] sm:$0xf]  ;;  %v6949_v63 = vld [vmem:[%s7361_s15 + $0x914] sm:$0xf0]  ;;  %v3713_v7 = vpop.f32.mrf.mxu3  ;;  %v5640_v11 = vor.u32 %v6917_v59, %v5639_v58 }
 0x173   : > { %3952 = vmatpush.bf16.msra.mxu2 %v5960_v8  ;;  %v5895_v0 = vld [vmem:[%s7361_s15 + $0xa08] sm:$0xf]  ;;  %v6981_v3 = vld [vmem:[%s7361_s15 + $0xa14] sm:$0xf0]  ;;  %v5768_v16 = vor.u32 %v6949_v63, %v5767_v62 }
 0x174   : > { %3965 = vmatpush.bf16.msra.mxu3 %v6088_v13  ;;  %v6023_v4 = vld [vmem:[%s7361_s15 + $0xb08] sm:$0xf]  ;;  %v7013_v5 = vld [vmem:[%s7361_s15 + $0xb14] sm:$0xf0]  ;;  %v5896_v17 = vor.u32 %v6981_v3, %v5895_v0 }
 0x175   : > { %3927 = vmatpush.bf16.msra.mxu0 %v5688_v20  ;;  %v6263_v8 = vld [vmem:[%s7361_s15 + $0xce8] sm:$0xf]  ;;  %v7073_v9 = vld [vmem:[%s7361_s15 + $0xcf4] sm:$0xf0] }
 0x176   : > { %3940 = vmatpush.bf16.msra.mxu1 %v5816_v21  ;;  %v6391_v10 = vld [vmem:[%s7361_s15 + $0xde8] sm:$0xf]  ;;  %v7105_v13 = vld [vmem:[%s7361_s15 + $0xdf4] sm:$0xf0]  ;;  %v6024_v21 = vor.u32 %v7013_v5, %v6023_v4 }
 0x177   : > { %3953 = vmatpush.bf16.msra.mxu2 %v5944_v26  ;;  %v6519_v14 = vld [vmem:[%s7361_s15 + $0xee8] sm:$0xf]  ;;  %v7137_v15 = vld [vmem:[%s7361_s15 + $0xef4] sm:$0xf0]  ;;  %v6264_v26 = vor.u32 %v7073_v9, %v6263_v8  ;;  %v6392_v48 = vor.u32 %v7105_v13, %v6391_v10 }
 0x178   : > { %3966 = vmatpush.bf16.msra.mxu3 %v6072_v33  ;;  %v6647_v19 = vld [vmem:[%s7361_s15 + $0xfe8] sm:$0xf]  ;;  %v7169_v20 = vld [vmem:[%s7361_s15 + $0xff4] sm:$0xf0]  ;;  %v6520_v51 = vor.u32 %v7137_v15, %v6519_v14 }
 0x179   : > { %3928 = vmatpush.bf16.msra.mxu0 %v5672_v39  ;;  %v6247_v29 = vld [vmem:[%s7361_s15 + $0xcc8] sm:$0xf]  ;;  %v7069_v33 = vld [vmem:[%s7361_s15 + $0xcd4] sm:$0xf0]  ;;  %v6648_v34 = vor.u32 %v7169_v20, %v6647_v19 }
 0x17a   : > { %3941 = vmatpush.bf16.msra.mxu1 %v5800_v41  ;;  %v6375_v18 = vld [vmem:[%s7361_s15 + $0xdc8] sm:$0xf]  ;;  %v7101_v35 = vld [vmem:[%s7361_s15 + $0xdd4] sm:$0xf0]  ;;  %v6248_v41 = vor.u32 %v7069_v33, %v6247_v29 }
 0x17b   : > { %3954 = vmatpush.bf16.msra.mxu2 %v5928_v42  ;;  %v6503_v37 = vld [vmem:[%s7361_s15 + $0xec8] sm:$0xf]  ;;  %v7133_v38 = vld [vmem:[%s7361_s15 + $0xed4] sm:$0xf0]  ;;  %v6376_v42 = vor.u32 %v7101_v35, %v6375_v18  ;;  %v3673_v18 = vadd.f32 %v8093_v6, %v8039_v44 }
 0x17c   : > { %3967 = vmatpush.bf16.msra.mxu3 %v6056_v49  ;;  %v6631_v39 = vld [vmem:[%s7361_s15 + $0xfc8] sm:$0xf]  ;;  %v7165_v40 = vld [vmem:[%s7361_s15 + $0xfd4] sm:$0xf0]  ;;  %v6504_v43 = vor.u32 %v7133_v38, %v6503_v37 }
 0x17d   : > { %3929 = vmatpush.bf16.msra.mxu0 %v5656_v57  ;;  %v6231_v45 = vld [vmem:[%s7361_s15 + $0xca8] sm:$0xf]  ;;  %v7065_v46 = vld [vmem:[%s7361_s15 + $0xcb4] sm:$0xf0]  ;;  %v6632_v50 = vor.u32 %v7165_v40, %v6631_v39 }
 0x17e   : > { %3942 = vmatpush.bf16.msra.mxu1 %v5784_v60  ;;  %v6359_v47 = vld [vmem:[%s7361_s15 + $0xda8] sm:$0xf]  ;;  %v7219_v49 = vld.sshfl [vmem:[#allocation1] sm:$0xff pattern:$0x73625140] }
 0x17f   : > { %3955 = vmatpush.bf16.msra.mxu2 %v5912_v61  ;;  %v7097_v53 = vld [vmem:[%s7361_s15 + $0xdb4] sm:$0xf0]  ;;  %v6487_v54 = vld [vmem:[%s7361_s15 + $0xea8] sm:$0xf]  ;;  %v6232_v61 = vor.u32 %v7065_v46, %v6231_v45 }
 0x180   : > { %3968 = vmatpush.bf16.msra.mxu3 %v6040_v2  ;;  %v7129_v55 = vld [vmem:[%s7361_s15 + $0xeb4] sm:$0xf0]  ;;  %v7220_v56 = vld.sshfl [vmem:[#allocation1 + $0x10] sm:$0xff pattern:$0x73625140]  ;;  %v6360_v62 = vor.u32 %v7097_v53, %v6359_v47  ;;  %v3686_v53 = vadd.f32 %v8098_v12, %v3673_v18 }
 0x181   : > { %3930 = vmatpush.bf16.msra.mxu0 %v5640_v11  ;;  %v7221_v57 = vld.sshfl [vmem:[#allocation1 + $0x8] sm:$0xff pattern:$0x73625140]  ;;  %v7161_v59 = vld [vmem:[%s7361_s15 + $0xfb4] sm:$0xf0]  ;;  %v6488_v63 = vor.u32 %v7129_v55, %v6487_v54 }
 0x182   : > { %3943 = vmatpush.bf16.msra.mxu1 %v5768_v16  ;;  %v6615_v58 = vld [vmem:[%s7361_s15 + $0xfa8] sm:$0xf]  ;;  %v7222_v60 = vld.sshfl [vmem:[#allocation1 + $0x18] sm:$0xff pattern:$0x73625140] }
 0x183   : > { %3956 = vmatpush.bf16.msra.mxu2 %v5896_v17  ;;  %v6215_v0 = vld [vmem:[%s7361_s15 + $0xc88] sm:$0xf]  ;;  %v7061_v1 = vld [vmem:[%s7361_s15 + $0xc94] sm:$0xf0]  ;;  %v6616_v3 = vor.u32 %v7161_v59, %v6615_v58  ;;  %v8163_v8 = vpop.f32.mrf.mxu0 }
 0x184   : > { %3969 = vmatpush.bf16.msra.mxu3 %v6024_v21  ;;  %3931 = vmatmul.bf16.vlgmr.msra.gmra.mxu0 %v7219_v49  ;;  %v6343_v2 = vld [vmem:[%s7361_s15 + $0xd88] sm:$0xf]  ;;  %v7093_v4 = vld [vmem:[%s7361_s15 + $0xd94] sm:$0xf0]  ;;  %v6216_v11 = vor.u32 %v7061_v1, %v6215_v0  ;;  %v8167_v13 = vpop.f32.mrf.mxu1 }
 0x185   : > { %3975 = vmatpush.bf16.msrb.mxu0 %v6264_v26  ;;  %3944 = vmatmul.bf16.vlgmr.msra.gmra.mxu1 %v7221_v57  ;;  %v6471_v5 = vld [vmem:[%s7361_s15 + $0xe88] sm:$0xf]  ;;  %v7125_v7 = vld [vmem:[%s7361_s15 + $0xe94] sm:$0xf0]  ;;  %v6344_v14 = vor.u32 %v7093_v4, %v6343_v2 }
 0x186   : > { %3988 = vmatpush.bf16.msrb.mxu1 %v6392_v48  ;;  %3957 = vmatmul.bf16.vlgmr.msra.gmra.mxu2 %v7220_v56  ;;  %v6599_v9 = vld [vmem:[%s7361_s15 + $0xf88] sm:$0xf]  ;;  %v7157_v10 = vld [vmem:[%s7361_s15 + $0xf94] sm:$0xf0]  ;;  %v6472_v15 = vor.u32 %v7125_v7, %v6471_v5 }
 0x187   : > { %4001 = vmatpush.bf16.msrb.mxu2 %v6520_v51  ;;  %3970 = vmatmul.bf16.vlgmr.msra.gmra.mxu3 %v7222_v60  ;;  %v6199_v16 = vld [vmem:[%s7361_s15 + $0xc68] sm:$0xf]  ;;  %v7057_v17 = vld [vmem:[%s7361_s15 + $0xc74] sm:$0xf0]  ;;  %v6600_v20 = vor.u32 %v7157_v10, %v6599_v9 }
 0x188   : > { %4014 = vmatpush.bf16.msrb.mxu3 %v6648_v34  ;;  %v6327_v19 = vld [vmem:[%s7361_s15 + $0xd68] sm:$0xf]  ;;  %v7089_v21 = vld [vmem:[%s7361_s15 + $0xd74] sm:$0xf0]  ;;  %v6200_v33 = vor.u32 %v7057_v17, %v6199_v16 }
 0x189   : > { %3976 = vmatpush.bf16.msrb.mxu0 %v6248_v41  ;;  %v6455_v26 = vld [vmem:[%s7361_s15 + $0xe68] sm:$0xf]  ;;  %v7121_v48 = vld [vmem:[%s7361_s15 + $0xe74] sm:$0xf0]  ;;  %v6328_v34 = vor.u32 %v7089_v21, %v6327_v19  ;;  %v4729_v19 = vld [vmem:[%s7361_s15 + $0xf8] sm:$0xf0] }
 0x18a   : > { %3989 = vmatpush.bf16.msrb.mxu1 %v6376_v42  ;;  %v6583_v51 = vld [vmem:[%s7361_s15 + $0xf68] sm:$0xf]  ;;  %v7153_v29 = vld [vmem:[%s7361_s15 + $0xf74] sm:$0xf0]  ;;  %v6456_v35 = vor.u32 %v7121_v48, %v6455_v26  ;;  %v4857_v48 = vld [vmem:[%s7361_s15 + $0x1f8] sm:$0xf0] }
 0x18b   : > { %4002 = vmatpush.bf16.msrb.mxu2 %v6504_v43  ;;  %v6183_v37 = vld [vmem:[%s7361_s15 + $0xc48] sm:$0xf]  ;;  %v7053_v38 = vld [vmem:[%s7361_s15 + $0xc54] sm:$0xf0]  ;;  %v6584_v40 = vor.u32 %v7153_v29, %v6583_v51  ;;  %v8182_v41 = vpop.f32.mrf.mxu2  ;;  %v3726_v47 = vpop.f32.mrf.mxu0  ;;  %v6751_v51 = vld [vmem:[%s7361_s15 + $0x2ec] sm:$0xf] }
 0x18c   : > { %4015 = vmatpush.bf16.msrb.mxu3 %v6632_v50  ;;  %v6311_v39 = vld [vmem:[%s7361_s15 + $0xd48] sm:$0xf]  ;;  %v7085_v42 = vld [vmem:[%s7361_s15 + $0xd54] sm:$0xf0]  ;;  %v8187_v46 = vpop.f32.mrf.mxu3  ;;  %v6184_v49 = vor.u32 %v7053_v38, %v6183_v37  ;;  %v3739_v50 = vpop.f32.mrf.mxu1  ;;  %v4985_v29 = vld [vmem:[%s7361_s15 + $0x2f8] sm:$0xf0] }
 0x18d   : > { %3977 = vmatpush.bf16.msrb.mxu0 %v6232_v61  ;;  %v6439_v43 = vld [vmem:[%s7361_s15 + $0xe48] sm:$0xf]  ;;  %v7117_v45 = vld [vmem:[%s7361_s15 + $0xe54] sm:$0xf0]  ;;  %v6312_v54 = vor.u32 %v7085_v42, %v6311_v39  ;;  %v5113_v37 = vld [vmem:[%s7361_s15 + $0x3f8] sm:$0xf0] }
 0x18e   : > { %3990 = vmatpush.bf16.msrb.mxu1 %v6360_v62  ;;  %v6567_v44 = vld [vmem:[%s7361_s15 + $0xf48] sm:$0xf]  ;;  %v7149_v6 = vld [vmem:[%s7361_s15 + $0xf54] sm:$0xf0]  ;;  %v6440_v55 = vor.u32 %v7117_v45, %v6439_v43  ;;  %v4988_v43 = vor.u32 %v6751_v51, %v4985_v29  ;;  %v6683_v45 = vld [vmem:[%s7361_s15 + $0xcc] sm:$0xf] }
 0x18f   : > { %4003 = vmatpush.bf16.msrb.mxu2 %v6488_v63  ;;  %v6167_v56 = vld [vmem:[%s7361_s15 + $0xc28] sm:$0xf]  ;;  %v7049_v57 = vld [vmem:[%s7361_s15 + $0xc34] sm:$0xf0]  ;;  %v6568_v59 = vor.u32 %v7149_v6, %v6567_v44  ;;  %v6715_v44 = vld [vmem:[%s7361_s15 + $0x1cc] sm:$0xf] }
 0x190   : > { %4016 = vmatpush.bf16.msrb.mxu3 %v6616_v3  ;;  %v6295_v58 = vld [vmem:[%s7361_s15 + $0xd28] sm:$0xf]  ;;  %v7081_v60 = vld [vmem:[%s7361_s15 + $0xd34] sm:$0xf0]  ;;  %v6168_v0 = vor.u32 %v7049_v57, %v6167_v56  ;;  %v3699_v3 = vadd.f32 %v8108_v32, %v3686_v53  ;;  %v6687_v32 = vld [vmem:[%s7361_s15 + $0xec] sm:$0xf] }
 0x191   : > { %3978 = vmatpush.bf16.msrb.mxu0 %v6216_v11  ;;  %v6423_v61 = vld [vmem:[%s7361_s15 + $0xe28] sm:$0xf]  ;;  %v7113_v62 = vld [vmem:[%s7361_s15 + $0xe34] sm:$0xf0]  ;;  %v6296_v4 = vor.u32 %v7081_v60, %v6295_v58  ;;  %v4732_v39 = vor.u32 %v6687_v32, %v4729_v19  ;;  %v4841_v47 = vld [vmem:[%s7361_s15 + $0x1d8] sm:$0xf0] }
 0x192   : > { %3991 = vmatpush.bf16.msrb.mxu1 %v6344_v14  ;;  %v6551_v63 = vld [vmem:[%s7361_s15 + $0xf28] sm:$0xf]  ;;  %v7145_v12 = vld [vmem:[%s7361_s15 + $0xf34] sm:$0xf0]  ;;  %v6424_v5 = vor.u32 %v7113_v62, %v6423_v61  ;;  %v4969_v50 = vld [vmem:[%s7361_s15 + $0x2d8] sm:$0xf0]  ;;  %v4844_v56 = vor.u32 %v6715_v44, %v4841_v47 }
 0x193   : > { %4004 = vmatpush.bf16.msrb.mxu2 %v6472_v15  ;;  %v6151_v1 = vld [vmem:[%s7361_s15 + $0xc08] sm:$0xf]  ;;  %v7045_v2 = vld [vmem:[%s7361_s15 + $0xc14] sm:$0xf0]  ;;  %v6552_v11 = vor.u32 %v7145_v12, %v6551_v63  ;;  %v3752_v17 = vpop.f32.mrf.mxu2  ;;  %v6779_v53 = vld [vmem:[%s7361_s15 + $0x3cc] sm:$0xf] }
 0x194   : > { %4017 = vmatpush.bf16.msrb.mxu3 %v6600_v20  ;;  %v6279_v7 = vld [vmem:[%s7361_s15 + $0xd08] sm:$0xf]  ;;  %v7077_v9 = vld [vmem:[%s7361_s15 + $0xd14] sm:$0xf0]  ;;  %v6719_v20 = vld [vmem:[%s7361_s15 + $0x1ec] sm:$0xf]  ;;  %v3765_v21 = vpop.f32.mrf.mxu3  ;;  %v6152_v26 = vor.u32 %v7045_v2, %v6151_v1 }
 0x195   : > { %3979 = vmatpush.bf16.msrb.mxu0 %v6200_v33  ;;  %v6407_v10 = vld [vmem:[%s7361_s15 + $0xe08] sm:$0xf]  ;;  %v7109_v14 = vld [vmem:[%s7361_s15 + $0xe14] sm:$0xf0]  ;;  %v3712_v33 = vadd.f32 %v8113_v36, %v3699_v3  ;;  %v6280_v18 = vor.u32 %v7077_v9, %v6279_v7  ;;  %v4860_v42 = vor.u32 %v6719_v20, %v4857_v48  ;;  %v4713_v36 = vld [vmem:[%s7361_s15 + $0xd8] sm:$0xf0] }
 0x196   : > { %3992 = vmatpush.bf16.msrb.mxu1 %v6328_v34  ;;  %v6535_v15 = vld [vmem:[%s7361_s15 + $0xf08] sm:$0xf]  ;;  %v7141_v16 = vld [vmem:[%s7361_s15 + $0xf14] sm:$0xf0]  ;;  %v6408_v34 = vor.u32 %v7109_v14, %v6407_v10  ;;  %v6679_v58 = vld [vmem:[%s7361_s15 + $0xac] sm:$0xf] }
 0x197   : > { %4005 = vmatpush.bf16.msrb.mxu2 %v6456_v35  ;;  %v6783_v35 = vld [vmem:[%s7361_s15 + $0x3ec] sm:$0xf]  ;;  %v6536_v38 = vor.u32 %v7141_v16, %v6535_v15  ;;  %v7223_v61 = vld.sshfl [vmem:[#allocation1 + $0x20] sm:$0xff pattern:$0x73625140] }
 0x198   : > { %4018 = vmatpush.bf16.msrb.mxu3 %v6584_v40  ;;  %v3725_v40 = vadd.f32 %v8163_v8, %v3712_v33  ;;  %v5116_v6 = vor.u32 %v6783_v35, %v5113_v37  ;;  %v4716_v8 = vor.u32 %v6683_v45, %v4713_v36  ;;  %v6711_v60 = vld [vmem:[%s7361_s15 + $0x1ac] sm:$0xf]  ;;  %v4825_v63 = vld [vmem:[%s7361_s15 + $0x1b8] sm:$0xf0] }
 0x199   : > { %3980 = vmatpush.bf16.msrb.mxu0 %v6184_v49  ;;  %v6747_v49 = vld [vmem:[%s7361_s15 + $0x2cc] sm:$0xf]  ;;  %v4809_v16 = vld [vmem:[%s7361_s15 + $0x198] sm:$0xf0] }
 0x19a   : > { %3993 = vmatpush.bf16.msrb.mxu1 %v6312_v54  ;;  %v5097_v54 = vld [vmem:[%s7361_s15 + $0x3d8] sm:$0xf0]  ;;  %v4972_v57 = vor.u32 %v6747_v49, %v4969_v50  ;;  %v6743_v12 = vld [vmem:[%s7361_s15 + $0x2ac] sm:$0xf] }
 0x19b   : > { %4006 = vmatpush.bf16.msrb.mxu2 %v6440_v55  ;;  %v3738_v55 = vadd.f32 %v8167_v13, %v3725_v40  ;;  %v5100_v62 = vor.u32 %v6779_v53, %v5097_v54  ;;  %v7224_v13 = vld.sshfl [vmem:[#allocation1 + $0x30] sm:$0xff pattern:$0x73625140]  ;;  %v7225_v2 = vld.sshfl [vmem:[#allocation1 + $0x28] sm:$0xff pattern:$0x73625140] }
 0x19c   : > { %4019 = vmatpush.bf16.msrb.mxu3 %v6568_v59  ;;  %v4697_v59 = vld [vmem:[%s7361_s15 + $0xb8] sm:$0xf0]  ;;  %v6775_v3 = vld [vmem:[%s7361_s15 + $0x3ac] sm:$0xf] }
 0x19d   : > { %3981 = vmatpush.bf16.msrb.mxu0 %v6168_v0  ;;  %v4953_v0 = vld [vmem:[%s7361_s15 + $0x2b8] sm:$0xf0]  ;;  %v3751_v1 = vadd.f32 %v8182_v41, %v3738_v55  ;;  %v4700_v7 = vor.u32 %v6679_v58, %v4697_v59  ;;  %v4828_v41 = vor.u32 %v6711_v60, %v4825_v63  ;;  %v6675_v10 = vld [vmem:[%s7361_s15 + $0x8c] sm:$0xf] }
 0x19e   : > { %3994 = vmatpush.bf16.msrb.mxu1 %v6296_v4  ;;  %v5081_v4 = vld [vmem:[%s7361_s15 + $0x3b8] sm:$0xf0]  ;;  %v4956_v9 = vor.u32 %v6743_v12, %v4953_v0  ;;  %v6707_v14 = vld [vmem:[%s7361_s15 + $0x18c] sm:$0xf] }
 0x19f   : > { %4007 = vmatpush.bf16.msrb.mxu2 %v6424_v5  ;;  %v7226_v5 = vld.sshfl [vmem:[#allocation1 + $0x38] sm:$0xff pattern:$0x73625140]  ;;  %v5084_v15 = vor.u32 %v6775_v3, %v5081_v4  ;;  %v6739_v17 = vld [vmem:[%s7361_s15 + $0x28c] sm:$0xf]  ;;  %v3764_v19 = vadd.f32 %v8187_v46, %v3751_v1  ;;  %v4812_v33 = vor.u32 %v6707_v14, %v4809_v16 }
 0x1a0   : > { %4020 = vmatpush.bf16.msrb.mxu3 %v6552_v11  ;;  %v4681_v11 = vld [vmem:[%s7361_s15 + $0x98] sm:$0xf0]  ;;  %v6771_v21 = vld [vmem:[%s7361_s15 + $0x38c] sm:$0xf] }
 0x1a1   : > { %3982 = vmatpush.bf16.msrb.mxu0 %v6152_v26  ;;  %v4937_v32 = vld [vmem:[%s7361_s15 + $0x298] sm:$0xf0]  ;;  %v3776_v20 = vpop.f32.mrf.mxu0  ;;  %v4684_v48 = vor.u32 %v6675_v10, %v4681_v11  ;;  %v6703_v46 = vld [vmem:[%s7361_s15 + $0x16c] sm:$0xf] }
 0x1a2   : > { %3995 = vmatpush.bf16.msrb.mxu1 %v6280_v18  ;;  %v5065_v26 = vld [vmem:[%s7361_s15 + $0x398] sm:$0xf0]  ;;  %v3789_v51 = vpop.f32.mrf.mxu1  ;;  %v3777_v29 = vadd.f32 %v3776_v20, %v3764_v19  ;;  %v4940_v18 = vor.u32 %v6739_v17, %v4937_v32  ;;  %v6667_v47 = vld [vmem:[%s7361_s15 + $0x4c] sm:$0xf] }
 0x1a3   : > { %4008 = vmatpush.bf16.msrb.mxu2 %v6408_v34  ;;  %v6671_v34 = vld [vmem:[%s7361_s15 + $0x6c] sm:$0xf]  ;;  %v4665_v35 = vld [vmem:[%s7361_s15 + $0x78] sm:$0xf0]  ;;  %v5068_v37 = vor.u32 %v6771_v21, %v5065_v26 }
 0x1a4   : > { %4021 = vmatpush.bf16.msrb.mxu3 %v6536_v38  ;;  %3983 = vmatmul.bf16.vlgmr.msrb.gmra.mxu0 %v7223_v61  ;;  %v4793_v38 = vld [vmem:[%s7361_s15 + $0x178] sm:$0xf0]  ;;  %v4668_v45 = vor.u32 %v6671_v34, %v4665_v35  ;;  %v3790_v36 = vadd.f32 %v3789_v51, %v3777_v29  ;;  %v6699_v50 = vld [vmem:[%s7361_s15 + $0x14c] sm:$0xf] }
 0x1a5   : > { %4027 = vmatpush.bf16.msra.mxu0 %v4732_v39  ;;  %3996 = vmatmul.bf16.vlgmr.msrb.gmra.mxu1 %v7225_v2  ;;  %v6735_v39 = vld [vmem:[%s7361_s15 + $0x26c] sm:$0xf]  ;;  %v4921_v40 = vld [vmem:[%s7361_s15 + $0x278] sm:$0xf0]  ;;  %v4796_v44 = vor.u32 %v6703_v46, %v4793_v38 }
 0x1a6   : > { %4040 = vmatpush.bf16.msra.mxu1 %v4860_v42  ;;  %4009 = vmatmul.bf16.vlgmr.msrb.gmra.mxu2 %v7224_v13  ;;  %v6767_v42 = vld [vmem:[%s7361_s15 + $0x36c] sm:$0xf]  ;;  %v4649_v49 = vld [vmem:[%s7361_s15 + $0x58] sm:$0xf0] }
 0x1a7   : > { %4053 = vmatpush.bf16.msra.mxu2 %v4988_v43  ;;  %4022 = vmatmul.bf16.vlgmr.msrb.gmra.mxu3 %v7226_v5  ;;  %v5049_v43 = vld [vmem:[%s7361_s15 + $0x378] sm:$0xf0]  ;;  %v6731_v55 = vld [vmem:[%s7361_s15 + $0x24c] sm:$0xf] }
 0x1a8   : > { %4066 = vmatpush.bf16.msra.mxu3 %v5116_v6  ;;  %v4924_v6 = vor.u32 %v6735_v39, %v4921_v40  ;;  %v5052_v53 = vor.u32 %v6767_v42, %v5049_v43  ;;  %v6763_v59 = vld [vmem:[%s7361_s15 + $0x34c] sm:$0xf]  ;;  %v5033_v60 = vld [vmem:[%s7361_s15 + $0x358] sm:$0xf0] }
 0x1a9   : > { %4028 = vmatpush.bf16.msra.mxu0 %v4716_v8  ;;  %v3802_v54 = vpop.f32.mrf.mxu2  ;;  %v4777_v8 = vld [vmem:[%s7361_s15 + $0x158] sm:$0xf0]  ;;  %v3778_v61 = vpop.f32.mrf.mxu0  ;;  %v6663_v13 = vld [vmem:[%s7361_s15 + $0x2c] sm:$0xf]  ;;  %v5036_v4 = vor.u32 %v6763_v59, %v5033_v60 }
 0x1aa   : > { %4041 = vmatpush.bf16.msra.mxu1 %v4844_v56  ;;  %v4905_v56 = vld [vmem:[%s7361_s15 + $0x258] sm:$0xf0]  ;;  %v3815_v58 = vpop.f32.mrf.mxu3  ;;  %v3791_v63 = vpop.f32.mrf.mxu1  ;;  %v4780_v0 = vor.u32 %v6699_v50, %v4777_v8  ;;  %v6695_v3 = vld [vmem:[%s7361_s15 + $0x12c] sm:$0xf] }
 0x1ab   : > { %4054 = vmatpush.bf16.msra.mxu2 %v4972_v57  ;;  %v3803_v57 = vadd.f32 %v3802_v54, %v3790_v36  ;;  %v4908_v1 = vor.u32 %v6731_v55, %v4905_v56  ;;  %v4633_v2 = vld [vmem:[%s7361_s15 + $0x38] sm:$0xf0]  ;;  %v6759_v11 = vld [vmem:[%s7361_s15 + $0x32c] sm:$0xf] }
 0x1ac   : > { %4067 = vmatpush.bf16.msra.mxu3 %v5100_v62  ;;  %v4652_v62 = vor.u32 %v6667_v47, %v4649_v49  ;;  %v4761_v5 = vld [vmem:[%s7361_s15 + $0x138] sm:$0xf0]  ;;  %v6659_v16 = vld [vmem:[%s7361_s15 + $0xc] sm:$0xf] }
 0x1ad   : > { %4029 = vmatpush.bf16.msra.mxu0 %v4700_v7  ;;  %v3816_v12 = vadd.f32 %v3815_v58, %v3803_v57  ;;  %v6727_v7 = vld [vmem:[%s7361_s15 + $0x22c] sm:$0xf]  ;;  %v5017_v14 = vld [vmem:[%s7361_s15 + $0x338] sm:$0xf0]  ;;  %v4764_v20 = vor.u32 %v6695_v3, %v4761_v5 }
 0x1ae   : > { %4042 = vmatpush.bf16.msra.mxu1 %v4828_v41  ;;  %v4889_v41 = vld [vmem:[%s7361_s15 + $0x238] sm:$0xf0]  ;;  %v6691_v32 = vld [vmem:[%s7361_s15 + $0x10c] sm:$0xf] }
 0x1af   : > { %4055 = vmatpush.bf16.msra.mxu2 %v4956_v9  ;;  %v284_v9 = vld [vmem:[#allocation2] sm:$0xff]  ;;  %v4239_v10 = vrot.slane %v3816_v12, 4  ;;  %v4617_v17 = vld [vmem:[%s7361_s15 + $0x18] sm:$0xf0]  ;;  %v4892_v21 = vor.u32 %v6727_v7, %v4889_v41 }
 0x1b0   : > { %4068 = vmatpush.bf16.msra.mxu3 %v5084_v15  ;;  %v4636_v15 = vor.u32 %v6663_v13, %v4633_v2  ;;  %v4745_v26 = vld [vmem:[%s7361_s15 + $0x118] sm:$0xf0]  ;;  %v6815_v35 = vld [vmem:[%s7361_s15 + $0x4ec] sm:$0xf]  ;;  %v4620_v40 = vor.u32 %v6659_v16, %v4617_v17 }
 0x1b1   : > { %4030 = vmatpush.bf16.msra.mxu0 %v4684_v48  ;;  %v4242_v19 = vsel %vm4241_vm0, %v7969_v52, %v4239_v10  ;;  %v6723_v48 = vld [vmem:[%s7361_s15 + $0x20c] sm:$0xf]  ;;  %v4873_v51 = vld [vmem:[%s7361_s15 + $0x218] sm:$0xf0]  ;;  %v3804_v52 = vpop.f32.mrf.mxu2 }
 0x1b2   : > { %4043 = vmatpush.bf16.msra.mxu1 %v4812_v33  ;;  %v4246_v29 = vadd.f32 %v4242_v19, %v284_v9  ;;  %v5020_v33 = vor.u32 %v6759_v11, %v5017_v14  ;;  %v5001_v34 = vld [vmem:[%s7361_s15 + $0x318] sm:$0xf0]  ;;  %v3817_v39 = vpop.f32.mrf.mxu3  ;;  %v6879_v42 = vld [vmem:[%s7361_s15 + $0x6ec] sm:$0xf]  ;;  %v4876_v36 = vor.u32 %v6723_v48, %v4873_v51 }
 0x1b3   : > { %4056 = vmatpush.bf16.msra.mxu2 %v4940_v18  ;;  %v6755_v18 = vld [vmem:[%s7361_s15 + $0x30c] sm:$0xf]  ;;  %v5241_v46 = vld [vmem:[%s7361_s15 + $0x4f8] sm:$0xf0] }
 0x1b4   : > { %4069 = vmatpush.bf16.msra.mxu3 %v5068_v37  ;;  %v6847_v37 = vld [vmem:[%s7361_s15 + $0x5ec] sm:$0xf]  ;;  %v5369_v38 = vld [vmem:[%s7361_s15 + $0x5f8] sm:$0xf0]  ;;  %4248 = vst [vmem:[#allocation2] sm:$0xff] %v4246_v29  ;;  %v5004_v47 = vor.u32 %v6755_v18, %v5001_v34  ;;  %v5244_v49 = vor.u32 %v6815_v35, %v5241_v46 }
 0x1b5   : > { %4031 = vmatpush.bf16.msra.mxu0 %v4668_v45  ;;  %v5497_v43 = vld [vmem:[%s7361_s15 + $0x6f8] sm:$0xf0]  ;;  %v4748_v45 = vor.u32 %v6691_v32, %v4745_v26  ;;  %v5372_v50 = vor.u32 %v6847_v37, %v5369_v38  ;;  %v6811_v54 = vld [vmem:[%s7361_s15 + $0x4cc] sm:$0xf] }
 0x1b6   : > { %4044 = vmatpush.bf16.msra.mxu1 %v4796_v44  ;;  %v6911_v44 = vld [vmem:[%s7361_s15 + $0x7ec] sm:$0xf]  ;;  %v5225_v8 = vld [vmem:[%s7361_s15 + $0x4d8] sm:$0xf0] }
 0x1b7   : > { %4057 = vmatpush.bf16.msra.mxu2 %v4924_v6  ;;  %v5625_v6 = vld [vmem:[%s7361_s15 + $0x7f8] sm:$0xf0]  ;;  %v6843_v55 = vld [vmem:[%s7361_s15 + $0x5cc] sm:$0xf] }
 0x1b8   : > { %4070 = vmatpush.bf16.msra.mxu3 %v5052_v53  ;;  %v5500_v53 = vor.u32 %v6879_v42, %v5497_v43  ;;  %v5628_v56 = vor.u32 %v6911_v44, %v5625_v6  ;;  %v5353_v57 = vld [vmem:[%s7361_s15 + $0x5d8] sm:$0xf0]  ;;  %v6875_v58 = vld [vmem:[%s7361_s15 + $0x6cc] sm:$0xf] }
 0x1b9   : > { %4032 = vmatpush.bf16.msra.mxu0 %v4652_v62  ;;  %v5481_v59 = vld [vmem:[%s7361_s15 + $0x6d8] sm:$0xf0]  ;;  %v6907_v60 = vld [vmem:[%s7361_s15 + $0x7cc] sm:$0xf]  ;;  %v5228_v62 = vor.u32 %v6811_v54, %v5225_v8  ;;  %v5356_v63 = vor.u32 %v6843_v55, %v5353_v57 }
 0x1ba   : > { %4045 = vmatpush.bf16.msra.mxu1 %v4780_v0  ;;  %v5609_v61 = vld [vmem:[%s7361_s15 + $0x7d8] sm:$0xf0]  ;;  %v5484_v12 = vor.u32 %v6875_v58, %v5481_v59  ;;  %v6807_v0 = vld [vmem:[%s7361_s15 + $0x4ac] sm:$0xf] }
 0x1bb   : > { %4058 = vmatpush.bf16.msra.mxu2 %v4908_v1  ;;  %v5209_v1 = vld [vmem:[%s7361_s15 + $0x4b8] sm:$0xf0]  ;;  %v6839_v13 = vld [vmem:[%s7361_s15 + $0x5ac] sm:$0xf]  ;;  %v5612_v2 = vor.u32 %v6907_v60, %v5609_v61 }
 0x1bc   : > { %4071 = vmatpush.bf16.msra.mxu3 %v5036_v4  ;;  %v5337_v3 = vld [vmem:[%s7361_s15 + $0x5b8] sm:$0xf0]  ;;  %v6871_v4 = vld [vmem:[%s7361_s15 + $0x6ac] sm:$0xf]  ;;  %v5212_v9 = vor.u32 %v6807_v0, %v5209_v1 }
 0x1bd   : > { %4033 = vmatpush.bf16.msra.mxu0 %v4636_v15  ;;  %v5465_v5 = vld [vmem:[%s7361_s15 + $0x6b8] sm:$0xf0]  ;;  %v6903_v7 = vld [vmem:[%s7361_s15 + $0x7ac] sm:$0xf]  ;;  %v5340_v10 = vor.u32 %v6839_v13, %v5337_v3 }
 0x1be   : > { %4046 = vmatpush.bf16.msra.mxu1 %v4764_v20  ;;  %v5593_v41 = vld [vmem:[%s7361_s15 + $0x7b8] sm:$0xf0]  ;;  %v5468_v11 = vor.u32 %v6871_v4, %v5465_v5  ;;  %v6835_v15 = vld [vmem:[%s7361_s15 + $0x58c] sm:$0xf] }
 0x1bf   : > { %4059 = vmatpush.bf16.msra.mxu2 %v4892_v21  ;;  %v5193_v14 = vld [vmem:[%s7361_s15 + $0x498] sm:$0xf0]  ;;  %v6899_v32 = vld [vmem:[%s7361_s15 + $0x78c] sm:$0xf] }
 0x1c0   : > { %4072 = vmatpush.bf16.msra.mxu3 %v5020_v33  ;;  %v5321_v16 = vld [vmem:[%s7361_s15 + $0x598] sm:$0xf0]  ;;  %v6799_v48 = vld [vmem:[%s7361_s15 + $0x46c] sm:$0xf] }
 0x1c1   : > { %4034 = vmatpush.bf16.msra.mxu0 %v4620_v40  ;;  %v5449_v17 = vld [vmem:[%s7361_s15 + $0x698] sm:$0xf0]  ;;  %v3828_v20 = vpop.f32.mrf.mxu0  ;;  %v5324_v21 = vor.u32 %v6835_v15, %v5321_v16  ;;  %v6831_v29 = vld [vmem:[%s7361_s15 + $0x56c] sm:$0xf] }
 0x1c2   : > { %4047 = vmatpush.bf16.msra.mxu1 %v4748_v45  ;;  %v5577_v19 = vld [vmem:[%s7361_s15 + $0x798] sm:$0xf0]  ;;  %v3841_v33 = vpop.f32.mrf.mxu1  ;;  %v6863_v35 = vld [vmem:[%s7361_s15 + $0x66c] sm:$0xf] }
 0x1c3   : > { %4060 = vmatpush.bf16.msra.mxu2 %v4876_v36  ;;  %v5177_v51 = vld [vmem:[%s7361_s15 + $0x478] sm:$0xf0]  ;;  %v5580_v18 = vor.u32 %v6899_v32, %v5577_v19  ;;  %v3842_v46 = vadd.f32 %v3841_v33, %v3828_v20  ;;  %v6895_v37 = vld [vmem:[%s7361_s15 + $0x76c] sm:$0xf] }
 0x1c4   : > { %4073 = vmatpush.bf16.msra.mxu3 %v5004_v47  ;;  %4035 = vmatmul.bf16.vlgmr.msra.gmra.mxu0 %v7470_v25  ;;  %v5596_v25 = vor.u32 %v6903_v7, %v5593_v41  ;;  %v5305_v34 = vld [vmem:[%s7361_s15 + $0x578] sm:$0xf0]  ;;  %v5180_v39 = vor.u32 %v6799_v48, %v5177_v51  ;;  %v6795_v43 = vld [vmem:[%s7361_s15 + $0x44c] sm:$0xf] }
 0x1c5   : > { %4079 = vmatpush.bf16.msrb.mxu0 %v5244_v49  ;;  %4048 = vmatmul.bf16.vlgmr.msra.gmra.mxu1 %v7475_v28  ;;  %v5433_v52 = vld [vmem:[%s7361_s15 + $0x678] sm:$0xf0]  ;;  %v5308_v40 = vor.u32 %v6831_v29, %v5305_v34  ;;  %v6827_v36 = vld [vmem:[%s7361_s15 + $0x54c] sm:$0xf] }
 0x1c6   : > { %4092 = vmatpush.bf16.msrb.mxu1 %v5372_v50  ;;  %4061 = vmatmul.bf16.vlgmr.msra.gmra.mxu2 %v7468_v24  ;;  %v6803_v24 = vld [vmem:[%s7361_s15 + $0x48c] sm:$0xf]  ;;  %v5561_v38 = vld [vmem:[%s7361_s15 + $0x778] sm:$0xf0]  ;;  %v5436_v42 = vor.u32 %v6863_v35, %v5433_v52 }
 0x1c7   : > { %4105 = vmatpush.bf16.msrb.mxu2 %v5500_v53  ;;  %4074 = vmatmul.bf16.vlgmr.msra.gmra.mxu3 %v7473_v27  ;;  %v6867_v27 = vld [vmem:[%s7361_s15 + $0x68c] sm:$0xf]  ;;  %v5196_v28 = vor.u32 %v6803_v24, %v5193_v14  ;;  %v5161_v45 = vld [vmem:[%s7361_s15 + $0x458] sm:$0xf0]  ;;  %v5564_v6 = vor.u32 %v6895_v37, %v5561_v38 }
 0x1c8   : > { %4118 = vmatpush.bf16.msrb.mxu3 %v5628_v56  ;;  %v5452_v26 = vor.u32 %v6867_v27, %v5449_v17  ;;  %v5289_v47 = vld [vmem:[%s7361_s15 + $0x558] sm:$0xf0]  ;;  %v6859_v49 = vld [vmem:[%s7361_s15 + $0x64c] sm:$0xf]  ;;  %v5164_v56 = vor.u32 %v6795_v43, %v5161_v45 }
 0x1c9   : > { %4080 = vmatpush.bf16.msrb.mxu0 %v5228_v62  ;;  %v3854_v44 = vpop.f32.mrf.mxu2  ;;  %v5417_v50 = vld [vmem:[%s7361_s15 + $0x658] sm:$0xf0]  ;;  %v6891_v8 = vld [vmem:[%s7361_s15 + $0x74c] sm:$0xf]  ;;  %v3830_v58 = vpop.f32.mrf.mxu0  ;;  %v5292_v59 = vor.u32 %v6827_v36, %v5289_v47 }
 0x1ca   : > { %4093 = vmatpush.bf16.msrb.mxu1 %v5356_v63  ;;  %v3855_v53 = vadd.f32 %v3854_v44, %v3842_v46  ;;  %v3867_v54 = vpop.f32.mrf.mxu3  ;;  %v5545_v55 = vld [vmem:[%s7361_s15 + $0x758] sm:$0xf0]  ;;  %v5420_v60 = vor.u32 %v6859_v49, %v5417_v50  ;;  %v6791_v61 = vld [vmem:[%s7361_s15 + $0x42c] sm:$0xf] }
 0x1cb   : > { %4106 = vmatpush.bf16.msrb.mxu2 %v5484_v12  ;;  %v5145_v62 = vld [vmem:[%s7361_s15 + $0x438] sm:$0xf0]  ;;  %v6823_v63 = vld [vmem:[%s7361_s15 + $0x52c] sm:$0xf]  ;;  %v3843_v12 = vpop.f32.mrf.mxu1  ;;  %v5548_v0 = vor.u32 %v6891_v8, %v5545_v55 }
 0x1cc   : > { %4119 = vmatpush.bf16.msrb.mxu3 %v5612_v2  ;;  %v8332_v57 = vadd.f32 %v3867_v54, %v3855_v53  ;;  %v5273_v1 = vld [vmem:[%s7361_s15 + $0x538] sm:$0xf0]  ;;  %v6855_v13 = vld [vmem:[%s7361_s15 + $0x62c] sm:$0xf]  ;;  %v5148_v5 = vor.u32 %v6791_v61, %v5145_v62 }
 0x1cd   : > { %4081 = vmatpush.bf16.msrb.mxu0 %v5212_v9  ;;  %v5401_v2 = vld [vmem:[%s7361_s15 + $0x638] sm:$0xf0]  ;;  %v6887_v3 = vld [vmem:[%s7361_s15 + $0x72c] sm:$0xf]  ;;  %v5276_v9 = vor.u32 %v6823_v63, %v5273_v1 }
 0x1ce   : > { %4094 = vmatpush.bf16.msrb.mxu1 %v5340_v10  ;;  %v5529_v4 = vld [vmem:[%s7361_s15 + $0x738] sm:$0xf0]  ;;  %v6787_v7 = vld [vmem:[%s7361_s15 + $0x40c] sm:$0xf]  ;;  %v5404_v10 = vor.u32 %v6855_v13, %v5401_v2 }
 0x1cf   : > { %4107 = vmatpush.bf16.msrb.mxu2 %v5468_v11  ;;  %v5129_v41 = vld [vmem:[%s7361_s15 + $0x418] sm:$0xf0]  ;;  %v6819_v11 = vld [vmem:[%s7361_s15 + $0x50c] sm:$0xf] }
 0x1d0   : > { %4120 = vmatpush.bf16.msrb.mxu3 %v5596_v25  ;;  %v5257_v24 = vld [vmem:[%s7361_s15 + $0x518] sm:$0xf0]  ;;  %v6851_v14 = vld [vmem:[%s7361_s15 + $0x60c] sm:$0xf]  ;;  %v5532_v25 = vor.u32 %v6887_v3, %v5529_v4 }
 0x1d1   : > { %4082 = vmatpush.bf16.msrb.mxu0 %v5196_v28  ;;  %v3856_v15 = vpop.f32.mrf.mxu2  ;;  %v5385_v16 = vld [vmem:[%s7361_s15 + $0x618] sm:$0xf0]  ;;  %v6883_v27 = vld [vmem:[%s7361_s15 + $0x70c] sm:$0xf]  ;;  %v5260_v29 = vor.u32 %v6819_v11, %v5257_v24 }
 0x1d2   : > { %4095 = vmatpush.bf16.msrb.mxu1 %v5324_v21  ;;  %v5513_v17 = vld [vmem:[%s7361_s15 + $0x718] sm:$0xf0]  ;;  %v3869_v32 = vpop.f32.mrf.mxu3  ;;  %v6943_v19 = vld [vmem:[%s7361_s15 + $0x8ec] sm:$0xf]  ;;  %v5132_v21 = vor.u32 %v6787_v7, %v5129_v41  ;;  %v5388_v33 = vor.u32 %v6851_v14, %v5385_v16 }
 0x1d3   : > { %4108 = vmatpush.bf16.msrb.mxu2 %v5452_v26  ;;  %v5753_v28 = vld [vmem:[%s7361_s15 + $0x8f8] sm:$0xf0]  ;;  %v6975_v20 = vld [vmem:[%s7361_s15 + $0x9ec] sm:$0xf]  ;;  %v5516_v35 = vor.u32 %v6883_v27, %v5513_v17 }
 0x1d4   : > { %4121 = vmatpush.bf16.msrb.mxu3 %v5580_v18  ;;  %v5881_v26 = vld [vmem:[%s7361_s15 + $0x9f8] sm:$0xf0]  ;;  %v7007_v48 = vld [vmem:[%s7361_s15 + $0xaec] sm:$0xf]  ;;  %v5756_v52 = vor.u32 %v6943_v19, %v5753_v28 }
 0x1d5   : > { %4083 = vmatpush.bf16.msrb.mxu0 %v5180_v39  ;;  %v6009_v51 = vld [vmem:[%s7361_s15 + $0xaf8] sm:$0xf0]  ;;  %v7039_v18 = vld [vmem:[%s7361_s15 + $0xbec] sm:$0xf]  ;;  %v5884_v46 = vor.u32 %v6975_v20, %v5881_v26 }
 0x1d6   : > { %4096 = vmatpush.bf16.msrb.mxu1 %v5308_v40  ;;  %v6137_v34 = vld [vmem:[%s7361_s15 + $0xbf8] sm:$0xf0]  ;;  %v6012_v37 = vor.u32 %v7007_v48, %v6009_v51  ;;  %v6939_v38 = vld [vmem:[%s7361_s15 + $0x8cc] sm:$0xf] }
 0x1d7   : > { %4109 = vmatpush.bf16.msrb.mxu2 %v5436_v42  ;;  %v5737_v39 = vld [vmem:[%s7361_s15 + $0x8d8] sm:$0xf0]  ;;  %v6971_v40 = vld [vmem:[%s7361_s15 + $0x9cc] sm:$0xf]  ;;  %v6140_v42 = vor.u32 %v7039_v18, %v6137_v34 }
 0x1d8   : > { %4122 = vmatpush.bf16.msrb.mxu3 %v5564_v6  ;;  %v5865_v43 = vld [vmem:[%s7361_s15 + $0x9d8] sm:$0xf0]  ;;  %v7003_v45 = vld [vmem:[%s7361_s15 + $0xacc] sm:$0xf]  ;;  %v5740_v47 = vor.u32 %v6939_v38, %v5737_v39 }
 0x1d9   : > { %4084 = vmatpush.bf16.msrb.mxu0 %v5164_v56  ;;  %v5993_v36 = vld [vmem:[%s7361_s15 + $0xad8] sm:$0xf0]  ;;  %v7035_v44 = vld [vmem:[%s7361_s15 + $0xbcc] sm:$0xf]  ;;  %v5868_v49 = vor.u32 %v6971_v40, %v5865_v43 }
 0x1da   : > { %4097 = vmatpush.bf16.msrb.mxu1 %v5292_v59  ;;  %v6121_v6 = vld [vmem:[%s7361_s15 + $0xbd8] sm:$0xf0]  ;;  %v5996_v50 = vor.u32 %v7003_v45, %v5993_v36  ;;  %v6935_v53 = vld [vmem:[%s7361_s15 + $0x8ac] sm:$0xf] }
 0x1db   : > { %4110 = vmatpush.bf16.msrb.mxu2 %v5420_v60  ;;  %v5721_v54 = vld [vmem:[%s7361_s15 + $0x8b8] sm:$0xf0]  ;;  %v6967_v8 = vld [vmem:[%s7361_s15 + $0x9ac] sm:$0xf]  ;;  %v6124_v55 = vor.u32 %v7035_v44, %v6121_v6 }
 0x1dc   : > { %4123 = vmatpush.bf16.msrb.mxu3 %v5548_v0  ;;  %v5849_v56 = vld [vmem:[%s7361_s15 + $0x9b8] sm:$0xf0]  ;;  %v6999_v58 = vld [vmem:[%s7361_s15 + $0xaac] sm:$0xf]  ;;  %v5724_v62 = vor.u32 %v6935_v53, %v5721_v54 }
 0x1dd   : > { %4085 = vmatpush.bf16.msrb.mxu0 %v5148_v5  ;;  %v5977_v59 = vld [vmem:[%s7361_s15 + $0xab8] sm:$0xf0]  ;;  %v7031_v60 = vld [vmem:[%s7361_s15 + $0xbac] sm:$0xf] }
 0x1de   : > { %4098 = vmatpush.bf16.msrb.mxu1 %v5276_v9  ;;  %v6105_v61 = vld [vmem:[%s7361_s15 + $0xbb8] sm:$0xf0]  ;;  %v5980_v63 = vor.u32 %v6999_v58, %v5977_v59  ;;  %v6931_v12 = vld [vmem:[%s7361_s15 + $0x88c] sm:$0xf] }
 0x1df   : > { %4111 = vmatpush.bf16.msrb.mxu2 %v5404_v10  ;;  %v5705_v0 = vld [vmem:[%s7361_s15 + $0x898] sm:$0xf0]  ;;  %v6995_v13 = vld [vmem:[%s7361_s15 + $0xa8c] sm:$0xf] }
 0x1e0   : > { %4124 = vmatpush.bf16.msrb.mxu3 %v5532_v25  ;;  %v5833_v1 = vld [vmem:[%s7361_s15 + $0x998] sm:$0xf0]  ;;  %v7027_v3 = vld [vmem:[%s7361_s15 + $0xb8c] sm:$0xf] }
 0x1e1   : > { %4086 = vmatpush.bf16.msrb.mxu0 %v5132_v21  ;;  %v5961_v2 = vld [vmem:[%s7361_s15 + $0xa98] sm:$0xf0]  ;;  %v3880_v5 = vpop.f32.mrf.mxu0  ;;  %v6927_v9 = vld [vmem:[%s7361_s15 + $0x86c] sm:$0xf] }
 0x1e2   : > { %4099 = vmatpush.bf16.msrb.mxu1 %v5260_v29  ;;  %v6089_v4 = vld [vmem:[%s7361_s15 + $0xb98] sm:$0xf0]  ;;  %v5964_v41 = vor.u32 %v6995_v13, %v5961_v2  ;;  %v6959_v11 = vld [vmem:[%s7361_s15 + $0x96c] sm:$0xf]  ;;  %v3881_v24 = vadd.f32 %v3880_v5, %v8332_v57  ;;  %v3893_v14 = vpop.f32.mrf.mxu1 }
 0x1e3   : > { %4112 = vmatpush.bf16.msrb.mxu2 %v5388_v33  ;;  %v5689_v10 = vld [vmem:[%s7361_s15 + $0x878] sm:$0xf0]  ;;  %v6092_v15 = vor.u32 %v7027_v3, %v6089_v4  ;;  %v6991_v16 = vld [vmem:[%s7361_s15 + $0xa6c] sm:$0xf] }
 0x1e4   : > { %4125 = vmatpush.bf16.msrb.mxu3 %v5516_v35  ;;  %4087 = vmatmul.bf16.vlgmr.msrb.gmra.mxu0 %v7522_v23  ;;  %v6963_v23 = vld [vmem:[%s7361_s15 + $0x98c] sm:$0xf]  ;;  %v5817_v25 = vld [vmem:[%s7361_s15 + $0x978] sm:$0xf0]  ;;  %v3894_v19 = vadd.f32 %v3893_v14, %v3881_v24  ;;  %v5692_v28 = vor.u32 %v6927_v9, %v5689_v10 }
 0x1e5   : > { %4131 = vmatpush.bf16.msra.mxu0 %v5756_v52  ;;  %4100 = vmatmul.bf16.vlgmr.msrb.gmra.mxu1 %v7526_v31  ;;  %v5708_v31 = vor.u32 %v6931_v12, %v5705_v0  ;;  %v5836_v7 = vor.u32 %v6963_v23, %v5833_v1  ;;  %v5945_v27 = vld [vmem:[%s7361_s15 + $0xa78] sm:$0xf0]  ;;  %v7023_v17 = vld [vmem:[%s7361_s15 + $0xb6c] sm:$0xf]  ;;  %v5820_v57 = vor.u32 %v6959_v11, %v5817_v25 }
 0x1e6   : > { %4144 = vmatpush.bf16.msra.mxu1 %v5884_v46  ;;  %4113 = vmatmul.bf16.vlgmr.msrb.gmra.mxu2 %v7520_v22  ;;  %v5852_v22 = vor.u32 %v6967_v8, %v5849_v56  ;;  %v6073_v32 = vld [vmem:[%s7361_s15 + $0xb78] sm:$0xf0]  ;;  %v5948_v20 = vor.u32 %v6991_v16, %v5945_v27  ;;  %v6923_v21 = vld [vmem:[%s7361_s15 + $0x84c] sm:$0xf] }
 0x1e7   : > { %4157 = vmatpush.bf16.msra.mxu2 %v6012_v37  ;;  %4126 = vmatmul.bf16.vlgmr.msrb.gmra.mxu3 %v7524_v30  ;;  %v6108_v30 = vor.u32 %v7031_v60, %v6105_v61  ;;  %v5673_v26 = vld [vmem:[%s7361_s15 + $0x858] sm:$0xf0]  ;;  %v6955_v48 = vld [vmem:[%s7361_s15 + $0x94c] sm:$0xf]  ;;  %v6076_v29 = vor.u32 %v7023_v17, %v6073_v32 }
 0x1e8   : > { %4170 = vmatpush.bf16.msra.mxu3 %v6140_v42  ;;  %v5801_v33 = vld [vmem:[%s7361_s15 + $0x958] sm:$0xf0]  ;;  %v6987_v18 = vld [vmem:[%s7361_s15 + $0xa4c] sm:$0xf]  ;;  %v5676_v38 = vor.u32 %v6923_v21, %v5673_v26 }
 0x1e9   : > { %4132 = vmatpush.bf16.msra.mxu0 %v5740_v47  ;;  %v3906_v51 = vpop.f32.mrf.mxu2  ;;  %v5929_v34 = vld [vmem:[%s7361_s15 + $0xa58] sm:$0xf0]  ;;  %v7019_v46 = vld [vmem:[%s7361_s15 + $0xb4c] sm:$0xf]  ;;  %v3882_v40 = vpop.f32.mrf.mxu0  ;;  %v5804_v42 = vor.u32 %v6955_v48, %v5801_v33 }
 0x1ea   : > { %4145 = vmatpush.bf16.msra.mxu1 %v5868_v49  ;;  %v3907_v35 = vadd.f32 %v3906_v51, %v3894_v19  ;;  %v3919_v52 = vpop.f32.mrf.mxu3  ;;  %v6057_v37 = vld [vmem:[%s7361_s15 + $0xb58] sm:$0xf0]  ;;  %v5932_v43 = vor.u32 %v6987_v18, %v5929_v34  ;;  %v6919_v45 = vld [vmem:[%s7361_s15 + $0x82c] sm:$0xf]  ;;  %v3895_v6 = vpop.f32.mrf.mxu1 }
 0x1eb   : > { %4158 = vmatpush.bf16.msra.mxu2 %v5996_v50  ;;  %v5657_v36 = vld [vmem:[%s7361_s15 + $0x838] sm:$0xf0]  ;;  %v6951_v44 = vld [vmem:[%s7361_s15 + $0x92c] sm:$0xf]  ;;  %v6060_v47 = vor.u32 %v7019_v46, %v6057_v37 }
 0x1ec   : > { %4171 = vmatpush.bf16.msra.mxu3 %v6124_v55  ;;  %v8403_v39 = vadd.f32 %v3919_v52, %v3907_v35  ;;  %v5785_v49 = vld [vmem:[%s7361_s15 + $0x938] sm:$0xf0]  ;;  %v6983_v50 = vld [vmem:[%s7361_s15 + $0xa2c] sm:$0xf]  ;;  %v5660_v55 = vor.u32 %v6919_v45, %v5657_v36 }
 0x1ed   : > { %4133 = vmatpush.bf16.msra.mxu0 %v5724_v62  ;;  %v5913_v53 = vld [vmem:[%s7361_s15 + $0xa38] sm:$0xf0]  ;;  %v7015_v54 = vld [vmem:[%s7361_s15 + $0xb2c] sm:$0xf]  ;;  %v5788_v59 = vor.u32 %v6951_v44, %v5785_v49 }
 0x1ee   : > { %4146 = vmatpush.bf16.msra.mxu1 %v5852_v22  ;;  %v6041_v8 = vld [vmem:[%s7361_s15 + $0xb38] sm:$0xf0]  ;;  %v6915_v56 = vld [vmem:[%s7361_s15 + $0x80c] sm:$0xf]  ;;  %v5916_v60 = vor.u32 %v6983_v50, %v5913_v53 }
 0x1ef   : > { %4159 = vmatpush.bf16.msra.mxu2 %v5980_v63  ;;  %v5641_v58 = vld [vmem:[%s7361_s15 + $0x818] sm:$0xf0]  ;;  %v6947_v61 = vld [vmem:[%s7361_s15 + $0x90c] sm:$0xf]  ;;  %v6044_v12 = vor.u32 %v7015_v54, %v6041_v8 }
 0x1f0   : > { %4172 = vmatpush.bf16.msra.mxu3 %v6108_v30  ;;  %v5769_v62 = vld [vmem:[%s7361_s15 + $0x918] sm:$0xf0]  ;;  %v6979_v22 = vld [vmem:[%s7361_s15 + $0xa0c] sm:$0xf]  ;;  %v5644_v4 = vor.u32 %v6915_v56, %v5641_v58 }
 0x1f1   : > { %4134 = vmatpush.bf16.msra.mxu0 %v5708_v31  ;;  %v3908_v63 = vpop.f32.mrf.mxu2  ;;  %v5897_v0 = vld [vmem:[%s7361_s15 + $0xa18] sm:$0xf0]  ;;  %v7011_v23 = vld [vmem:[%s7361_s15 + $0xb0c] sm:$0xf] }
 0x1f2   : > { %4147 = vmatpush.bf16.msra.mxu1 %v5836_v7  ;;  %v6025_v30 = vld [vmem:[%s7361_s15 + $0xb18] sm:$0xf0]  ;;  %v3921_v1 = vpop.f32.mrf.mxu3  ;;  %v7071_v13 = vld [vmem:[%s7361_s15 + $0xcec] sm:$0xf]  ;;  %v5900_v9 = vor.u32 %v6979_v22, %v5897_v0 }
 0x1f3   : > { %4160 = vmatpush.bf16.msra.mxu2 %v5964_v41  ;;  %v6265_v2 = vld [vmem:[%s7361_s15 + $0xcf8] sm:$0xf0]  ;;  %v7103_v3 = vld [vmem:[%s7361_s15 + $0xdec] sm:$0xf]  ;;  %v5772_v41 = vor.u32 %v6947_v61, %v5769_v62  ;;  %v6028_v24 = vor.u32 %v7011_v23, %v6025_v30 }
 0x1f4   : > { %4173 = vmatpush.bf16.msra.mxu3 %v6092_v15  ;;  %v6393_v31 = vld [vmem:[%s7361_s15 + $0xdf8] sm:$0xf0]  ;;  %v7135_v5 = vld [vmem:[%s7361_s15 + $0xeec] sm:$0xf]  ;;  %v6268_v14 = vor.u32 %v7071_v13, %v6265_v2 }
 0x1f5   : > { %4135 = vmatpush.bf16.msra.mxu0 %v5692_v28  ;;  %v6521_v7 = vld [vmem:[%s7361_s15 + $0xef8] sm:$0xf0]  ;;  %v7167_v10 = vld [vmem:[%s7361_s15 + $0xfec] sm:$0xf]  ;;  %v6396_v15 = vor.u32 %v7103_v3, %v6393_v31 }
 0x1f6   : > { %4148 = vmatpush.bf16.msra.mxu1 %v5820_v57  ;;  %v6649_v11 = vld [vmem:[%s7361_s15 + $0xff8] sm:$0xf0]  ;;  %v6524_v25 = vor.u32 %v7135_v5, %v6521_v7  ;;  %v7067_v16 = vld [vmem:[%s7361_s15 + $0xccc] sm:$0xf] }
 0x1f7   : > { %4161 = vmatpush.bf16.msra.mxu2 %v5948_v20  ;;  %v6249_v27 = vld [vmem:[%s7361_s15 + $0xcd8] sm:$0xf0]  ;;  %v7099_v17 = vld [vmem:[%s7361_s15 + $0xdcc] sm:$0xf]  ;;  %v6652_v32 = vor.u32 %v7167_v10, %v6649_v11 }
 0x1f8   : > { %4174 = vmatpush.bf16.msra.mxu3 %v6076_v29  ;;  %v6377_v19 = vld [vmem:[%s7361_s15 + $0xdd8] sm:$0xf0]  ;;  %v7131_v28 = vld [vmem:[%s7361_s15 + $0xecc] sm:$0xf]  ;;  %v6252_v26 = vor.u32 %v7067_v16, %v6249_v27 }
 0x1f9   : > { %4136 = vmatpush.bf16.msra.mxu0 %v5676_v38  ;;  %v6505_v57 = vld [vmem:[%s7361_s15 + $0xed8] sm:$0xf0]  ;;  %v7163_v20 = vld [vmem:[%s7361_s15 + $0xfcc] sm:$0xf]  ;;  %v6380_v48 = vor.u32 %v7099_v17, %v6377_v19 }
 0x1fa   : > { %4149 = vmatpush.bf16.msra.mxu1 %v5804_v42  ;;  %v6633_v21 = vld [vmem:[%s7361_s15 + $0xfd8] sm:$0xf0]  ;;  %v6508_v51 = vor.u32 %v7131_v28, %v6505_v57  ;;  %v7063_v29 = vld [vmem:[%s7361_s15 + $0xcac] sm:$0xf] }
 0x1fb   : > { %4162 = vmatpush.bf16.msra.mxu2 %v5932_v43  ;;  %v6233_v33 = vld [vmem:[%s7361_s15 + $0xcb8] sm:$0xf0]  ;;  %v7095_v18 = vld [vmem:[%s7361_s15 + $0xdac] sm:$0xf]  ;;  %v6636_v35 = vor.u32 %v7163_v20, %v6633_v21 }
 0x1fc   : > { %4175 = vmatpush.bf16.msra.mxu3 %v6060_v47  ;;  %v7227_v34 = vld.sshfl [vmem:[#allocation1] sm:$0xff pattern:$0x73625140]  ;;  %v6361_v52 = vld [vmem:[%s7361_s15 + $0xdb8] sm:$0xf0]  ;;  %v6236_v36 = vor.u32 %v7063_v29, %v6233_v33 }
 0x1fd   : > { %4137 = vmatpush.bf16.msra.mxu0 %v5660_v55  ;;  %v7127_v46 = vld [vmem:[%s7361_s15 + $0xeac] sm:$0xf]  ;;  %v6489_v37 = vld [vmem:[%s7361_s15 + $0xeb8] sm:$0xf0]  ;;  %v6364_v44 = vor.u32 %v7095_v18, %v6361_v52 }
 0x1fe   : > { %4150 = vmatpush.bf16.msra.mxu1 %v5788_v59  ;;  %v7228_v38 = vld.sshfl [vmem:[#allocation1 + $0x10] sm:$0xff pattern:$0x73625140]  ;;  %v7229_v40 = vld.sshfl [vmem:[#allocation1 + $0x8] sm:$0xff pattern:$0x73625140]  ;;  %v6492_v6 = vor.u32 %v7127_v46, %v6489_v37 }
 0x1ff   : > { %4163 = vmatpush.bf16.msra.mxu2 %v5916_v60  ;;  %v7159_v42 = vld [vmem:[%s7361_s15 + $0xfac] sm:$0xf]  ;;  %v6617_v43 = vld [vmem:[%s7361_s15 + $0xfb8] sm:$0xf0] }
 0x200   : > { %4176 = vmatpush.bf16.msra.mxu3 %v6044_v12  ;;  %v7230_v45 = vld.sshfl [vmem:[#allocation1 + $0x18] sm:$0xff pattern:$0x73625140]  ;;  %v7059_v47 = vld [vmem:[%s7361_s15 + $0xc8c] sm:$0xf]  ;;  %v6620_v53 = vor.u32 %v7159_v42, %v6617_v43 }
 0x201   : > { %4138 = vmatpush.bf16.msra.mxu0 %v5644_v4  ;;  %v6217_v49 = vld [vmem:[%s7361_s15 + $0xc98] sm:$0xf0]  ;;  %v7091_v50 = vld [vmem:[%s7361_s15 + $0xd8c] sm:$0xf]  ;;  %v3932_v56 = vpop.f32.mrf.mxu0 }
 0x202   : > { %4151 = vmatpush.bf16.msra.mxu1 %v5772_v41  ;;  %v6345_v54 = vld [vmem:[%s7361_s15 + $0xd98] sm:$0xf0]  ;;  %v7123_v8 = vld [vmem:[%s7361_s15 + $0xe8c] sm:$0xf]  ;;  %v3933_v60 = vadd.f32 %v3932_v56, %v8403_v39  ;;  %v6220_v61 = vor.u32 %v7059_v47, %v6217_v49  ;;  %v3945_v62 = vpop.f32.mrf.mxu1 }
 0x203   : > { %4164 = vmatpush.bf16.msra.mxu2 %v5900_v9  ;;  %v6473_v55 = vld [vmem:[%s7361_s15 + $0xe98] sm:$0xf0]  ;;  %v7155_v58 = vld [vmem:[%s7361_s15 + $0xf8c] sm:$0xf]  ;;  %v6348_v22 = vor.u32 %v7091_v50, %v6345_v54 }
 0x204   : > { %4177 = vmatpush.bf16.msra.mxu3 %v6028_v24  ;;  %4139 = vmatmul.bf16.vlgmr.msra.gmra.mxu0 %v7227_v34  ;;  %v6601_v59 = vld [vmem:[%s7361_s15 + $0xf98] sm:$0xf0]  ;;  %v6476_v63 = vor.u32 %v7123_v8, %v6473_v55  ;;  %v7055_v12 = vld [vmem:[%s7361_s15 + $0xc6c] sm:$0xf]  ;;  %v3946_v1 = vadd.f32 %v3945_v62, %v3933_v60 }
 0x205   : > { %4183 = vmatpush.bf16.msrb.mxu0 %v6268_v14  ;;  %4152 = vmatmul.bf16.vlgmr.msra.gmra.mxu1 %v7229_v40  ;;  %v6201_v0 = vld [vmem:[%s7361_s15 + $0xc78] sm:$0xf0]  ;;  %v7087_v23 = vld [vmem:[%s7361_s15 + $0xd6c] sm:$0xf]  ;;  %v6604_v30 = vor.u32 %v7155_v58, %v6601_v59 }
 0x206   : > { %4196 = vmatpush.bf16.msrb.mxu1 %v6396_v15  ;;  %4165 = vmatmul.bf16.vlgmr.msra.gmra.mxu2 %v7228_v38  ;;  %v6329_v13 = vld [vmem:[%s7361_s15 + $0xd78] sm:$0xf0]  ;;  %v7119_v2 = vld [vmem:[%s7361_s15 + $0xe6c] sm:$0xf]  ;;  %v6204_v31 = vor.u32 %v7055_v12, %v6201_v0 }
 0x207   : > { %4209 = vmatpush.bf16.msrb.mxu2 %v6524_v25  ;;  %4178 = vmatmul.bf16.vlgmr.msra.gmra.mxu3 %v7230_v45  ;;  %v6457_v39 = vld [vmem:[%s7361_s15 + $0xe78] sm:$0xf0]  ;;  %v7151_v3 = vld [vmem:[%s7361_s15 + $0xf6c] sm:$0xf]  ;;  %v6332_v5 = vor.u32 %v7087_v23, %v6329_v13 }
 0x208   : > { %4222 = vmatpush.bf16.msrb.mxu3 %v6652_v32  ;;  %v6585_v4 = vld [vmem:[%s7361_s15 + $0xf78] sm:$0xf0]  ;;  %v6460_v7 = vor.u32 %v7119_v2, %v6457_v39  ;;  %v7051_v41 = vld [vmem:[%s7361_s15 + $0xc4c] sm:$0xf] }
 0x209   : > { %4184 = vmatpush.bf16.msrb.mxu0 %v6252_v26  ;;  %v6185_v9 = vld [vmem:[%s7361_s15 + $0xc58] sm:$0xf0]  ;;  %v7083_v10 = vld [vmem:[%s7361_s15 + $0xd4c] sm:$0xf]  ;;  %v6588_v11 = vor.u32 %v7151_v3, %v6585_v4  ;;  %v3958_v24 = vpop.f32.mrf.mxu2  ;;  %v3934_v19 = vpop.f32.mrf.mxu0 }
 0x20a   : > { %4197 = vmatpush.bf16.msrb.mxu1 %v6380_v48  ;;  %v6313_v14 = vld [vmem:[%s7361_s15 + $0xd58] sm:$0xf0]  ;;  %v7115_v15 = vld [vmem:[%s7361_s15 + $0xe4c] sm:$0xf]  ;;  %v3959_v16 = vadd.f32 %v3958_v24, %v3946_v1  ;;  %v3971_v27 = vpop.f32.mrf.mxu3  ;;  %v6188_v28 = vor.u32 %v7051_v41, %v6185_v9  ;;  %v3947_v57 = vpop.f32.mrf.mxu1 }
 0x20b   : > { %4210 = vmatpush.bf16.msrb.mxu2 %v6508_v51  ;;  %v6441_v25 = vld [vmem:[%s7361_s15 + $0xe58] sm:$0xf0]  ;;  %v7147_v17 = vld [vmem:[%s7361_s15 + $0xf4c] sm:$0xf]  ;;  %v6316_v21 = vor.u32 %v7083_v10, %v6313_v14 }
 0x20c   : > { %4223 = vmatpush.bf16.msrb.mxu3 %v6636_v35  ;;  %v6569_v32 = vld [vmem:[%s7361_s15 + $0xf58] sm:$0xf0]  ;;  %v3972_v20 = vadd.f32 %v3971_v27, %v3959_v16  ;;  %v6444_v26 = vor.u32 %v7115_v15, %v6441_v25  ;;  %v7047_v48 = vld [vmem:[%s7361_s15 + $0xc2c] sm:$0xf] }
 0x20d   : > { %4185 = vmatpush.bf16.msrb.mxu0 %v6236_v36  ;;  %v6169_v51 = vld [vmem:[%s7361_s15 + $0xc38] sm:$0xf0]  ;;  %v7079_v29 = vld [vmem:[%s7361_s15 + $0xd2c] sm:$0xf]  ;;  %v6572_v33 = vor.u32 %v7147_v17, %v6569_v32 }
 0x20e   : > { %4198 = vmatpush.bf16.msrb.mxu1 %v6364_v44  ;;  %v6297_v18 = vld [vmem:[%s7361_s15 + $0xd38] sm:$0xf0]  ;;  %v7111_v34 = vld [vmem:[%s7361_s15 + $0xe2c] sm:$0xf]  ;;  %v6172_v37 = vor.u32 %v7047_v48, %v6169_v51 }
 0x20f   : > { %4211 = vmatpush.bf16.msrb.mxu2 %v6492_v6  ;;  %v6425_v35 = vld [vmem:[%s7361_s15 + $0xe38] sm:$0xf0]  ;;  %v7143_v52 = vld [vmem:[%s7361_s15 + $0xf2c] sm:$0xf]  ;;  %v6300_v38 = vor.u32 %v7079_v29, %v6297_v18 }
 0x210   : > { %4224 = vmatpush.bf16.msrb.mxu3 %v6620_v53  ;;  %v6553_v46 = vld [vmem:[%s7361_s15 + $0xf38] sm:$0xf0]  ;;  %v6428_v40 = vor.u32 %v7111_v34, %v6425_v35  ;;  %v7043_v42 = vld [vmem:[%s7361_s15 + $0xc0c] sm:$0xf] }
 0x211   : > { %4186 = vmatpush.bf16.msrb.mxu0 %v6220_v61  ;;  %v6153_v43 = vld [vmem:[%s7361_s15 + $0xc18] sm:$0xf0]  ;;  %v7075_v45 = vld [vmem:[%s7361_s15 + $0xd0c] sm:$0xf]  ;;  %v6556_v36 = vor.u32 %v7143_v52, %v6553_v46  ;;  %v3960_v49 = vpop.f32.mrf.mxu2 }
 0x212   : > { %4199 = vmatpush.bf16.msrb.mxu1 %v6348_v22  ;;  %v6281_v44 = vld [vmem:[%s7361_s15 + $0xd18] sm:$0xf0]  ;;  %v7107_v6 = vld [vmem:[%s7361_s15 + $0xe0c] sm:$0xf]  ;;  %v3973_v54 = vpop.f32.mrf.mxu3  ;;  %v6156_v8 = vor.u32 %v7043_v42, %v6153_v43 }
 0x213   : > { %4212 = vmatpush.bf16.msrb.mxu2 %v6476_v63  ;;  %v6409_v47 = vld [vmem:[%s7361_s15 + $0xe18] sm:$0xf0]  ;;  %v7139_v50 = vld [vmem:[%s7361_s15 + $0xf0c] sm:$0xf]  ;;  %v6284_v55 = vor.u32 %v7075_v45, %v6281_v44 }
 0x214   : > { %4225 = vmatpush.bf16.msrb.mxu3 %v6604_v30  ;;  %v6537_v53 = vld [vmem:[%s7361_s15 + $0xf18] sm:$0xf0]  ;;  %v6412_v56 = vor.u32 %v7107_v6, %v6409_v47  ;;  %v7231_v59 = vld.sshfl [vmem:[#allocation1 + $0x20] sm:$0xff pattern:$0x73625140] }
 0x215   : > { %4187 = vmatpush.bf16.msrb.mxu0 %v6204_v31  ;;  %v6540_v58 = vor.u32 %v7139_v50, %v6537_v53  ;;  %v7232_v60 = vld.sshfl [vmem:[#allocation1 + $0x28] sm:$0xff pattern:$0x73625140]  ;;  %v7233_v61 = vld.sshfl [vmem:[#allocation1 + $0x30] sm:$0xff pattern:$0x73625140] }
 0x216   : > { %4200 = vmatpush.bf16.msrb.mxu1 %v6332_v5  ;;  %v7234_v62 = vld.sshfl [vmem:[#allocation1 + $0x38] sm:$0xff pattern:$0x73625140] }
 0x217   : > { %4213 = vmatpush.bf16.msrb.mxu2 %v6460_v7 }
 0x218   : > { %4226 = vmatpush.bf16.msrb.mxu3 %v6588_v11 }
 0x219   : > { %4188 = vmatpush.bf16.msrb.mxu0 %v6188_v28 }
 0x21a   : > { %4201 = vmatpush.bf16.msrb.mxu1 %v6316_v21 }
 0x21b   : > { %4214 = vmatpush.bf16.msrb.mxu2 %v6444_v26 }
 0x21c   : > { %4227 = vmatpush.bf16.msrb.mxu3 %v6572_v33 }
 0x21d   : > { %4189 = vmatpush.bf16.msrb.mxu0 %v6172_v37 }
 0x21e   : > { %4202 = vmatpush.bf16.msrb.mxu1 %v6300_v38 }
 0x21f   : > { %4215 = vmatpush.bf16.msrb.mxu2 %v6428_v40 }
 0x220   : > { %4228 = vmatpush.bf16.msrb.mxu3 %v6556_v36 }
 0x221   : > { %4190 = vmatpush.bf16.msrb.mxu0 %v6156_v8  ;;  %v3984_v22 = vpop.f32.mrf.mxu0 }
 0x222   : > { %4203 = vmatpush.bf16.msrb.mxu1 %v6284_v55  ;;  %v3985_v63 = vadd.f32 %v3984_v22, %v3972_v20  ;;  %v3997_v12 = vpop.f32.mrf.mxu1  ;;  %v285_v55 = vld [vmem:[#allocation2 + $0x8] sm:$0xff] }
 0x223   : > { %4216 = vmatpush.bf16.msrb.mxu2 %v6412_v56 }
 0x224   : > { %4229 = vmatpush.bf16.msrb.mxu3 %v6540_v58  ;;  %4191 = vmatmul.bf16.vlgmr.msrb.gmra.mxu0 %v7231_v59  ;;  %v3998_v0 = vadd.f32 %v3997_v12, %v3985_v63 }
 0x225   : > { %4204 = vmatmul.bf16.vlgmr.msrb.gmra.mxu1 %v7232_v60 }
 0x226   : > { %4217 = vmatmul.bf16.vlgmr.msrb.gmra.mxu2 %v7233_v61 }
 0x227   : > { %4230 = vmatmul.bf16.vlgmr.msrb.gmra.mxu3 %v7234_v62 }
 0x229   : > { %v4010_v23 = vpop.f32.mrf.mxu2  ;;  %v3986_v13 = vpop.f32.mrf.mxu0 }
 0x22a   : > { %v4011_v30 = vadd.f32 %v4010_v23, %v3998_v0  ;;  %v4023_v1 = vpop.f32.mrf.mxu3  ;;  %v3999_v2 = vpop.f32.mrf.mxu1 }
 0x22c   : > { %v4024_v39 = vadd.f32 %v4023_v1, %v4011_v30 }
 0x231   : > { %v4012_v3 = vpop.f32.mrf.mxu2 }
 0x232   : > { %v4025_v4 = vpop.f32.mrf.mxu3 }
 0x241   : > { %v4036_v31 = vpop.f32.mrf.mxu0 }
 0x242   : > { %v4049_v5 = vpop.f32.mrf.mxu1 }
 0x243   : > { %v4050_v7 = vadd.f32 %v4049_v5, %v4036_v31 }
 0x249   : > { %v4062_v41 = vpop.f32.mrf.mxu2  ;;  %v4038_v24 = vpop.f32.mrf.mxu0 }
 0x24a   : > { %v4063_v9 = vadd.f32 %v4062_v41, %v4050_v7  ;;  %v4075_v10 = vpop.f32.mrf.mxu3  ;;  %v4051_v14 = vpop.f32.mrf.mxu1 }
 0x24c   : > { %v4076_v11 = vadd.f32 %v4075_v10, %v4063_v9 }
 0x251   : > { %v4064_v15 = vpop.f32.mrf.mxu2 }
 0x252   : > { %v4077_v25 = vpop.f32.mrf.mxu3 }
 0x261   : > { %v4088_v16 = vpop.f32.mrf.mxu0 }
 0x262   : > { %v4101_v27 = vpop.f32.mrf.mxu1  ;;  %v4089_v48 = vadd.f32 %v4088_v16, %v4076_v11 }
 0x264   : > { %v4102_v18 = vadd.f32 %v4101_v27, %v4089_v48 }
 0x269   : > { %v4114_v17 = vpop.f32.mrf.mxu2  ;;  %v4090_v19 = vpop.f32.mrf.mxu0 }
 0x26a   : > { %v4127_v32 = vpop.f32.mrf.mxu3  ;;  %v4103_v28 = vpop.f32.mrf.mxu1  ;;  %v4115_v35 = vadd.f32 %v4114_v17, %v4102_v18 }
 0x26c   : > { %v4128_v37 = vadd.f32 %v4127_v32, %v4115_v35 }
 0x271   : > { %v4116_v57 = vpop.f32.mrf.mxu2 }
 0x272   : > { %v4129_v20 = vpop.f32.mrf.mxu3 }
 0x281   : > { %v4140_v21 = vpop.f32.mrf.mxu0 }
 0x282   : > { %v4153_v26 = vpop.f32.mrf.mxu1  ;;  %v4141_v38 = vadd.f32 %v4140_v21, %v4128_v37 }
 0x284   : > { %v4154_v40 = vadd.f32 %v4153_v26, %v4141_v38 }
 0x289   : > { %v4166_v51 = vpop.f32.mrf.mxu2  ;;  %v4142_v33 = vpop.f32.mrf.mxu0 }
 0x28a   : > { %v4179_v29 = vpop.f32.mrf.mxu3  ;;  %v4155_v34 = vpop.f32.mrf.mxu1  ;;  %v4167_v42 = vadd.f32 %v4166_v51, %v4154_v40 }
 0x28c   : > { %v4180_v43 = vadd.f32 %v4179_v29, %v4167_v42 }
 0x291   : > { %v4168_v52 = vpop.f32.mrf.mxu2 }
 0x292   : > { %v4181_v46 = vpop.f32.mrf.mxu3 }
 0x2a1   : > { %v4192_v45 = vpop.f32.mrf.mxu0 }
 0x2a2   : > { %v4205_v36 = vpop.f32.mrf.mxu1  ;;  %v4193_v44 = vadd.f32 %v4192_v45, %v4180_v43 }
 0x2a4   : > { %v4206_v6 = vadd.f32 %v4205_v36, %v4193_v44 }
 0x2a9   : > { %v4218_v47 = vpop.f32.mrf.mxu2  ;;  %v4194_v53 = vpop.f32.mrf.mxu0 }
 0x2aa   : > { %v4219_v49 = vadd.f32 %v4218_v47, %v4206_v6  ;;  %v4231_v50 = vpop.f32.mrf.mxu3  ;;  %v4207_v54 = vpop.f32.mrf.mxu1 }
 0x2ac   : > { %v4232_v8 = vadd.f32 %v4231_v50, %v4219_v49 }
 0x2ae   : > { %v4240_v56 = vrot.slane %v4232_v8, 4 }
 0x2af   : > { %4253 = sbr.rel (%p6653_p9) target bundleno = 786 (0x312), region = 48 }
 0x2b0   : > { %v4243_v58 = vsel %vm4241_vm0, %v4024_v39, %v4240_v56 }
 0x2b1   : > { %v4247_v59 = vadd.f32 %v4243_v58, %v285_v55  ;;  %v4220_v60 = vpop.f32.mrf.mxu2 }
 0x2b2   : > { %v4233_v61 = vpop.f32.mrf.mxu3 }
 0x2b3   : > { %4249 = vst [vmem:[#allocation2 + $0x8] sm:$0xff] %v4247_v59 }
 0x2b4   : > { %v4256_v62 = vld [vmem:[%s8551_s2] sm:$0xf]  ;;  %v4254_v23 = vld [vmem:[#allocation2] sm:$0xff]  ;;  %vm4496_vm15 = vcmask 1041408  }
 0x2b5   : > { %v4258_v22 = vperm.slane %v4256_v62, 0  ;;  %v4259_v63 = vperm.slane %v4256_v62, 1  ;;  %v4260_v12 = vperm.slane %v4256_v62, 2  ;;  %v4261_v0 = vperm.slane %v4256_v62, 3 }
 0x2b7   : > { %v4262_v30 = vrot.slane %v4259_v63, 4  ;;  %v4263_v13 = vrot.slane %v4261_v0, 4 }
 0x2b9   : > { %v4264_v2 = vsel %vm4241_vm0, %v4258_v22, %v4262_v30  ;;  %v4265_v39 = vsel %vm4241_vm0, %v4260_v12, %v4263_v13 }
 0x2ba   : > { %v4255_v1 = vld [vmem:[#allocation2 + $0x8] sm:$0xff]  ;;  %v8493_v3 = vadd.f32 %v4264_v2, %v4254_v23 }
 0x2bb   : > { %v8495_v4 = vadd.f32 %v4265_v39, %v4255_v1 }
 0x2bc   : > { %4272 = vst [vmem:[#allocation1] ss:$2 sm:$0xff] %v8493_v3  ;;  %v4311_v31 = vmul.f32 %v8493_v3, %v8493_v3 }
 0x2bd   : > { %4274 = vst [vmem:[#allocation1 + $0x10] ss:$2 sm:$0xff] %v8495_v4  ;;  %v4312_v41 = vmul.f32 %v8495_v4, %v8495_v4 }
 0x2c3   : > { %v4275_v5 = vld.sshfl [vmem:[#allocation1] sm:$0xff pattern:$0x75316420]  ;;  %v4276_v7 = vld.sshfl [vmem:[#allocation1 + $0x8] sm:$0xff pattern:$0x75316420] }
 0x2c4   : > { %v4283_v9 = vsel %vm4241_vm0, %v4275_v5, 0.0  ;;  %v4290_v10 = vsel %vm4241_vm0, %v4276_v7, 0.0  ;;  %4315 = vst [vmem:[#allocation1] ss:$2 sm:$0xff] %v4311_v31 }
 0x2c5   : > { %v4284_v11 = vrot.slane %v4283_v9, 4  ;;  %v4291_v24 = vrot.slane %v4290_v10, 4  ;;  %v4277_v14 = vld.sshfl [vmem:[#allocation1 + $0x10] sm:$0xff pattern:$0x75316420] }
 0x2c6   : > { %v4278_v15 = vld.sshfl [vmem:[#allocation1 + $0x18] sm:$0xff pattern:$0x75316420]  ;;  %v4297_v25 = vsel %vm4241_vm0, %v4277_v14, 0.0 }
 0x2c7   : > { %v4285_v16 = vadd.f32 %v4284_v11, %v4283_v9  ;;  %v4292_v27 = vadd.f32 %v4291_v24, %v4290_v10  ;;  %v4298_v17 = vrot.slane %v4297_v25, 4  ;;  %v4304_v32 = vsel %vm4241_vm0, %v4278_v15, 0.0  ;;  %4317 = vst [vmem:[#allocation1 + $0x10] ss:$2 sm:$0xff] %v4312_v41 }
 0x2c8   : > { %v4305_v19 = vrot.slane %v4304_v32, 4 }
 0x2c9   : > { %v4286_v28 = vrot.slane %v4285_v16, 2  ;;  %v4293_v57 = vrot.slane %v4292_v27, 2  ;;  %v4299_v20 = vadd.f32 %v4298_v17, %v4297_v25 }
 0x2ca   : > { %v4306_v21 = vadd.f32 %v4305_v19, %v4304_v32 }
 0x2cb   : > { %v4287_v26 = vadd.f32 %v4286_v28, %v4285_v16  ;;  %v4300_v48 = vrot.slane %v4299_v20, 2  ;;  %v4318_v51 = vld.sshfl [vmem:[#allocation1] sm:$0xff pattern:$0x75316420]  ;;  %v4294_v34 = vadd.f32 %v4293_v57, %v4292_v27 }
 0x2cc   : > { %v4307_v29 = vrot.slane %v4306_v21, 2  ;;  %v4319_v33 = vld.sshfl [vmem:[#allocation1 + $0x8] sm:$0xff pattern:$0x75316420]  ;;  %v4326_v18 = vsel %vm4241_vm0, %v4318_v51, 0.0 }
 0x2cd   : > { %v4327_v35 = vrot.slane %v4326_v18, 4  ;;  %v4288_v52 = vrot.slane %v4287_v26, 1  ;;  %v4333_v46 = vsel %vm4241_vm0, %v4319_v33, 0.0  ;;  %v4301_v38 = vadd.f32 %v4300_v48, %v4299_v20 }
 0x2ce   : > { %v4320_v37 = vld.sshfl [vmem:[#allocation1 + $0x10] sm:$0xff pattern:$0x75316420]  ;;  %v4321_v42 = vld.sshfl [vmem:[#allocation1 + $0x18] sm:$0xff pattern:$0x75316420]  ;;  %v4308_v43 = vadd.f32 %v4307_v29, %v4306_v21 }
 0x2cf   : > { %v4328_v40 = vadd.f32 %v4327_v35, %v4326_v18  ;;  %v4334_v45 = vrot.slane %v4333_v46, 4  ;;  %v4340_v36 = vsel %vm4241_vm0, %v4320_v37, 0.0  ;;  %v4347_v44 = vsel %vm4241_vm0, %v4321_v42, 0.0 }
 0x2d0   : > { %v4295_v6 = vrot.slane %v4294_v34, 1  ;;  %v4289_v49 = vadd.f32 %v4288_v52, %v4287_v26  ;;  %v4341_v53 = vrot.slane %v4340_v36, 4  ;;  %v4348_v54 = vrot.slane %v4347_v44, 4 }
 0x2d1   : > { %v4329_v47 = vrot.slane %v4328_v40, 2  ;;  %v4335_v50 = vadd.f32 %v4334_v45, %v4333_v46  ;;  %v4302_v8 = vrot.slane %v4301_v38, 1  ;;  %v4309_v55 = vrot.slane %v4308_v43, 1 }
 0x2d2   : > { %v4342_v59 = vadd.f32 %v4341_v53, %v4340_v36  ;;  %v4296_v60 = vadd.f32 %v4295_v6, %v4294_v34  ;;  %v4349_v61 = vadd.f32 %v4348_v54, %v4347_v44  ;;  %v4354_v62 = vmul.f32 0.25, %v4289_v49 }
 0x2d3   : > { %v4330_v56 = vadd.f32 %v4329_v47, %v4328_v40  ;;  %v4336_v58 = vrot.slane %v4335_v50, 2  ;;  %v4303_v63 = vadd.f32 %v4302_v8, %v4301_v38  ;;  %v4310_v30 = vadd.f32 %v4309_v55, %v4308_v43  ;;  %v4442_v47 = vld [vmem:[%s8552_s3] sm:$0xf] }
 0x2d4   : > { %v4343_v0 = vrot.slane %v4342_v59, 2  ;;  %v4350_v23 = vrot.slane %v4349_v61, 2  ;;  %v4355_v13 = vmul.f32 0.25, %v4296_v60  ;;  %v4362_v39 = vmul.f32 %v4354_v62, %v4354_v62  ;;  %v4456_v8 = vld [vmem:[%s8553_s4] sm:$0xf] }
 0x2d5   : > { %v4331_v22 = vrot.slane %v4330_v56, 1  ;;  %v4337_v12 = vadd.f32 %v4336_v58, %v4335_v50  ;;  %v4356_v41 = vmul.f32 0.25, %v4303_v63  ;;  %v4357_v10 = vmul.f32 0.25, %v4310_v30 }
 0x2d6   : > { %v4344_v5 = vadd.f32 %v4343_v0, %v4342_v59  ;;  %v4351_v7 = vadd.f32 %v4350_v23, %v4349_v61  ;;  %v4363_v15 = vmul.f32 %v4355_v13, %v4355_v13  ;;  %v4378_v37 = vrot.slane %v4355_v13, 4 }
 0x2d7   : > { %v4332_v1 = vadd.f32 %v4331_v22, %v4330_v56  ;;  %v4338_v2 = vrot.slane %v4337_v12, 1  ;;  %v4364_v32 = vmul.f32 %v4356_v41, %v4356_v41  ;;  %v4365_v28 = vmul.f32 %v4357_v10, %v4357_v10 }
 0x2d8   : > { %v4345_v24 = vrot.slane %v4344_v5, 1  ;;  %v4352_v14 = vrot.slane %v4351_v7, 1  ;;  %v4380_v36 = vsel %vm4241_vm0, %v4354_v62, %v4378_v37  ;;  %v4379_v44 = vrot.slane %v4357_v10, 4 }
 0x2d9   : > { %v4358_v31 = vmul.f32 0.25, %v4332_v1  ;;  %v4339_v9 = vadd.f32 %v4338_v2, %v4337_v12  ;;  %v4384_v56 = vsub.f32 %v8493_v3, %v4380_v36  ;;  %v4445_v58 = vperm.slane %v4442_v47, 1 }
 0x2da   : > { %v4346_v27 = vadd.f32 %v4345_v24, %v4344_v5  ;;  %v4353_v17 = vadd.f32 %v4352_v14, %v4351_v7  ;;  %v4381_v60 = vsel %vm4241_vm0, %v4356_v41, %v4379_v44  ;;  %v4444_v22 = vperm.slane %v4442_v47, 0 }
 0x2db   : > { %v4366_v11 = vsub.f32 %v4358_v31, %v4362_v39  ;;  %v4359_v25 = vmul.f32 0.25, %v4339_v9  ;;  %v4459_v63 = vperm.slane %v4456_v8, 1  ;;  %v4448_v1 = vrot.slane %v4445_v58, 4 }
 0x2dc   : > { %v4360_v20 = vmul.f32 0.25, %v4346_v27  ;;  %v4361_v21 = vmul.f32 0.25, %v4353_v17  ;;  %v4458_v13 = vperm.slane %v4456_v8, 0  ;;  %v4447_v3 = vperm.slane %v4442_v47, 3 }
 0x2dd   : > { %v4370_v16 = vmax.f32 %v4366_v11, 0.0  ;;  %v4367_v19 = vsub.f32 %v4359_v25, %v4363_v15  ;;  %v4462_v7 = vrot.slane %v4459_v63, 4  ;;  %v4461_v41 = vperm.slane %v4456_v8, 3 }
 0x2de   : > { %v4368_v48 = vsub.f32 %v4360_v20, %v4364_v32  ;;  %v4369_v51 = vsub.f32 %v4361_v21, %v4365_v28  ;;  %v4450_v14 = vsel %vm4241_vm0, %v4444_v22, %v4448_v1  ;;  %v4446_v15 = vperm.slane %v4442_v47, 2 }
 0x2df   : > { %v4386_v57 = vadd.f32 1e-05, %v4370_v16  ;;  %v4371_v26 = vmax.f32 %v4367_v19, 0.0  ;;  %v4449_v25 = vrot.slane %v4447_v3, 4  ;;  %v4464_v17 = vsel %vm4241_vm0, %v4458_v13, %v4462_v7 }
 0x2e0   : > { %v4372_v33 = vmax.f32 %v4368_v48, 0.0  ;;  %v4373_v18 = vmax.f32 %v4369_v51, 0.0  ;;  %v4460_v19 = vperm.slane %v4456_v8, 2  ;;  %v4463_v28 = vrot.slane %v4461_v41, 4 }
 0x2e1   : > { %7235 = vrsqrt.f32 %v4386_v57  ;;  %v4387_v29 = vadd.f32 1e-05, %v4371_v26  ;;  %vm4396_vm5 = vweird.f32 %v4386_v57  ;;  %v4451_v48 = vsel %vm4241_vm0, %v4446_v15, %v4449_v25 }
 0x2e2   : > { %v8511_v34 = vadd.f32 1e-05, %v4372_v33  ;;  %v4389_v35 = vadd.f32 1e-05, %v4373_v18  ;;  %v4465_v33 = vsel %vm4241_vm0, %v4460_v19, %v4463_v28 }
 0x2e3   : > { %7237 = vrsqrt.f32 %v4387_v29  ;;  %vm4406_vm2 = vweird.f32 %v4387_v29 }
 0x2e4   : > { %7239 = vrsqrt.f32 %v8511_v34  ;;  %vm4426_vm8 = vweird.f32 %v4389_v35  ;;  %vm4416_vm11 = vweird.f32 %v8511_v34 }
 0x2e5   : > { %7241 = vrsqrt.f32 %v4389_v35 }
 0x2e7   : > { %v7236_v52 = vpop.eup %7235 }
 0x2e8   : > { %v4391_v46 = vmul.f32 %v7236_v52, %v4386_v57  ;;  %vm4397_vm3 = vweird.f32 %v7236_v52  ;;  %v4385_v57 = vsub.f32 %v8495_v4, %v4381_v60 }
 0x2e9   : > { %v7238_v38 = vpop.eup %7237  ;;  %vm4398_vm7 = vmor %vm4396_vm5, %vm4397_vm3 }
 0x2ea   : > { %v4392_v40 = vmul.f32 %v7236_v52, %v4391_v46  ;;  %v4401_v42 = vmul.f32 %v7238_v38, %v4387_v29  ;;  %v7240_v45 = vpop.eup %7239  ;;  %vm4407_vm1 = vweird.f32 %v7238_v38 }
 0x2eb   : > { %v7242_v49 = vpop.eup %7241  ;;  %v4411_v50 = vmul.f32 %v7240_v45, %v8511_v34  ;;  %vm4408_vm4 = vmor %vm4406_vm2, %vm4407_vm1  ;;  %vm4417_vm9 = vweird.f32 %v7240_v45  ;;  %vm4500_vm1 = vcmask 1045508  }
 0x2ec   : > { %v4393_v43 = vmul.f32 0.5, %v4392_v40  ;;  %v4402_v6 = vmul.f32 %v7238_v38, %v4401_v42  ;;  %v4421_v55 = vmul.f32 %v7242_v49, %v4389_v35  ;;  %vm4427_vm6 = vweird.f32 %v7242_v49  ;;  %vm4418_vm12 = vmor %vm4416_vm11, %vm4417_vm9 }
 0x2ed   : > { %v4412_v59 = vmul.f32 %v7240_v45, %v4411_v50  ;;  %vm4428_vm10 = vmor %vm4426_vm8, %vm4427_vm6 }
 0x2ee   : > { %v4394_v53 = vsub.f32 1.5, %v4393_v43  ;;  %v4403_v54 = vmul.f32 0.5, %v4402_v6  ;;  %v4422_v62 = vmul.f32 %v7242_v49, %v4421_v55 }
 0x2ef   : > { %v4413_v12 = vmul.f32 0.5, %v4412_v59 }
 0x2f0   : > { %v4404_v61 = vsub.f32 1.5, %v4403_v54  ;;  %v4395_v0 = vmul.f32 %v7236_v52, %v4394_v53  ;;  %v4423_v30 = vmul.f32 0.5, %v4422_v62 }
 0x2f1   : > { %v4414_v2 = vsub.f32 1.5, %v4413_v12 }
 0x2f2   : > { %v4405_v23 = vmul.f32 %v7238_v38, %v4404_v61  ;;  %v4424_v31 = vsub.f32 1.5, %v4423_v30  ;;  %v4399_v9 = vsel %vm4398_vm7, %v7236_v52, %v4395_v0 }
 0x2f3   : > { %v4415_v10 = vmul.f32 %v7240_v45, %v4414_v2 }
 0x2f4   : > { %v4409_v39 = vsel %vm4408_vm4, %v7238_v38, %v4405_v23  ;;  %v4425_v11 = vmul.f32 %v7242_v49, %v4424_v31 }
 0x2f5   : > { %v4434_v5 = vrot.slane %v4409_v39, 4  ;;  %v4419_v21 = vsel %vm4418_vm12, %v7240_v45, %v4415_v10 }
 0x2f6   : > { %v4429_v27 = vsel %vm4428_vm10, %v7242_v49, %v4425_v11 }
 0x2f7   : > { %v4436_v24 = vsel %vm4241_vm0, %v4399_v9, %v4434_v5  ;;  %v4435_v32 = vrot.slane %v4429_v27, 4 }
 0x2f8   : > { %v4440_v16 = vmul.f32 %v4436_v24, %v4384_v56 }
 0x2f9   : > { %v4437_v26 = vsel %vm4241_vm0, %v4419_v21, %v4435_v32 }
 0x2fa   : > { %v4454_v20 = vmul.f32 %v4450_v14, %v4440_v16  ;;  %v4441_v29 = vmul.f32 %v4437_v26, %v4385_v57 }
 0x2fc   : > { %v4468_v51 = vadd.f32 %v4464_v17, %v4454_v20  ;;  %v4455_v34 = vmul.f32 %v4451_v48, %v4441_v29 }
 0x2fe   : > { %vm4470_vm13 = vcmp.gt.f32.partialorder %v4468_v51, 0.0  ;;  %v4472_v18 = vmul.f32 0.2, %v4468_v51  ;;  %v4469_v52 = vadd.f32 %v4465_v33, %v4455_v34 }
 0x300   : > { %v4474_v35 = vsel %vm4470_vm13, %v4468_v51, %v4472_v18  ;;  %vm4471_vm14 = vcmp.gt.f32.partialorder %v4469_v52, 0.0  ;;  %v4473_v46 = vmul.f32 0.2, %v4469_v52 }
 0x301   : > { %4478 = vst [vmem:[#allocation1] ss:$2 sm:$0xff] %v4474_v35 }
 0x302   : > { %v4475_v37 = vsel %vm4471_vm14, %v4469_v52, %v4473_v46 }
 0x303   : > { %4480 = vst [vmem:[#allocation1 + $0x10] ss:$2 sm:$0xff] %v4475_v37 }
 0x308   : > { %v4481_v4 = vld.sshfl [vmem:[#allocation1] sm:$0xff pattern:$0x75316420]  ;;  %v4482_v38 = vld.sshfl [vmem:[#allocation1 + $0x8] sm:$0xff pattern:$0x75316420] }
 0x309   : > { %v4489_v40 = vpack.c.bf16 %v4482_v38, %v4481_v4 }
 0x30a   : > { %v4483_v43 = vld.sshfl [vmem:[#allocation1 + $0x10] sm:$0xff pattern:$0x75316420]  ;;  %v4484_v45 = vld.sshfl [vmem:[#allocation1 + $0x18] sm:$0xff pattern:$0x75316420] }
 0x30b   : > { %v4493_v42 = vrot.slane %v4489_v40, 2  ;;  %v4490_v36 = vpack.c.bf16 %v4484_v45, %v4483_v43 }
 0x30d   : > { %v4494_v44 = vrot.slane %v4490_v36, 4  ;;  %v4495_v6 = vrot.slane %v4490_v36, 6  ;;  %v4499_v47 = vsel %vm4496_vm15, %v4489_v40, %v4493_v42 }
 0x30f   : > { %v4503_v49 = vsel %vm4500_vm1, %v4494_v44, %v4495_v6 }
 0x310   : > { %v4504_v50 = vsel %vm4241_vm0, %v4499_v47, %v4503_v49 }
 0x311   : > { %4506 = vst [vmem:[%s7351_s8] sm:$0xff] %v4504_v50 }
 0x312 PF: > { %s15_s22 = sadd.s32 1, %s7281_s22   ;;  %s8555_s18 = smov %s7273_s20 }
 0x313   : > { %p12_p10 = scmp.ge.s32.totalorder %s15_s22, 6   ;;  %s8556_s19 = smov %s7277_s21 }
 0x314   : > { %s8557_s20 = smov %s8560_s23  ;;  %s8558_s21 = smov %s8564_s24 }
 0x315   :  { %14 = sbr.rel (!%p12_p10) target bundleno = 3 (0x3), region = 85 }

</bundles_post_ra>
